<compile_context>
chip_gen: v6e
topology: v6e:2x2x1
jax: 0.10.0
libtpu: 0.0.40
codegen_flags: <defaults>
</compile_context>

<pallas_src>
import functools
import math

import jax
import jax.numpy as jnp
from jax.experimental import pallas as pl
from jax.experimental.pallas import tpu as pltpu


def _round_up(x, m):
    return (x + m - 1) // m * m


# ----------------------------------------------------------------------------
# In-kernel exact-erf GELU (erf via Abramowitz-Stegun 7.1.26, |err| < 1.5e-7).
# ----------------------------------------------------------------------------
def _gelu_f32(x):
    z = x * 0.7071067811865476
    a = jnp.abs(z)
    t = 1.0 / (1.0 + 0.3275911 * a)
    poly = t * (0.254829592 + t * (-0.284496736 + t * (1.421413741
               + t * (-1.453152027 + t * 1.061405429))))
    erf_a = 1.0 - poly * jnp.exp(-a * a)
    erf_z = jnp.where(z >= 0, erf_a, -erf_a)
    return 0.5 * x * (1.0 + erf_z)


# ----------------------------------------------------------------------------
# Gridded matmul kernel: bf16 MXU operands, f32 VMEM accumulator,
# fused LN/GELU prologue and bias/GELU/residual epilogue.
# ----------------------------------------------------------------------------
def _mm_kernel(x_ref, w_ref, b_ref, *rest, nk, k_true, prologue, act_out,
               has_res):
    idx = 0
    if prologue == "ln":
        g_ref, be_ref = rest[0], rest[1]
        idx = 2
    if has_res:
        r_ref = rest[idx]
        idx += 1
    o_ref, acc_ref = rest[idx], rest[idx + 1]

    @pl.when(pl.program_id(2) == 0)
    def _init():
        acc_ref[...] = jnp.zeros_like(acc_ref)

    a = x_ref[...]
    if prologue == "gelu":
        a = _gelu_f32(a.astype(jnp.float32))
    elif prologue == "ln":
        xf = a.astype(jnp.float32)
        inv_k = 1.0 / float(k_true)
        mu = jnp.sum(xf, axis=-1, keepdims=True) * inv_k
        msq = jnp.sum(xf * xf, axis=-1, keepdims=True) * inv_k
        var = msq - mu * mu
        a = (xf - mu) * jax.lax.rsqrt(var + 1e-5) * g_ref[...] + be_ref[...]
    if a.dtype != jnp.bfloat16:
        a = a.astype(jnp.bfloat16)
    acc_ref[...] += jnp.dot(a, w_ref[...], preferred_element_type=jnp.float32)

    @pl.when(pl.program_id(2) == nk - 1)
    def _flush():
        y = acc_ref[...] + b_ref[...]
        if act_out:
            y = _gelu_f32(y)
        if has_res:
            y = y + r_ref[...].astype(jnp.float32)
        o_ref[...] = y.astype(o_ref.dtype)


def pallas_matmul(x, w, b=None, *, ln_params=None, act_in=False, act_out=False,
                  residual=None, out_dtype=jnp.bfloat16,
                  tm=512, tn=512, tk=512):
    """y = [gelu]( prologue(x) @ w + b ) [+ residual]  (bf16 MXU, f32 accum)."""
    M, K = x.shape
    N = w.shape[1]
    tm = min(tm, _round_up(M, 8))
    tn = min(tn, _round_up(N, 128))
    Kp128 = _round_up(K, 128)
    tk = Kp128 if Kp128 <= 1024 else tk
    Mp, Np, Kp = _round_up(M, tm), _round_up(N, tn), _round_up(K, tk)
    nk = Kp // tk

    # Prologues are only fused when the full K dim sits in one k-tile (so they
    # are not recomputed per k step); otherwise apply them in a separate pass.
    if ln_params is not None and nk > 1:
        x = layernorm2d(x, ln_params[0], ln_params[1], out_dtype=jnp.bfloat16)
        ln_params = None
    if act_in and nk > 1:
        x = gelu_rows(x, out_dtype=jnp.bfloat16)
        act_in = False
    prologue = "ln" if ln_params is not None else ("gelu" if act_in else None)

    xp = jnp.pad(x, ((0, Mp - M), (0, Kp - K)))           # no dtype cast here
    wp = jnp.pad(w, ((0, Kp - K), (0, Np - N)))           # weights pre-bf16
    bvec = jnp.zeros((N,), jnp.float32) if b is None else b.astype(jnp.float32)
    bp = jnp.pad(bvec, (0, Np - N)).reshape(1, Np)

    in_specs = [pl.BlockSpec((tm, tk), lambda i, j, k: (i, k)),
                pl.BlockSpec((tk, tn), lambda i, j, k: (k, j)),
                pl.BlockSpec((1, tn), lambda i, j, k: (0, j))]
    args = [xp, wp, bp]
    if prologue == "ln":
        g = jnp.pad(ln_params[0].astype(jnp.float32), (0, Kp - K)).reshape(1, Kp)
        be = jnp.pad(ln_params[1].astype(jnp.float32), (0, Kp - K)).reshape(1, Kp)
        in_specs += [pl.BlockSpec((1, tk), lambda i, j, k: (0, k)),
                     pl.BlockSpec((1, tk), lambda i, j, k: (0, k))]
        args += [g, be]
    has_res = residual is not None
    if has_res:
        rp = jnp.pad(residual, ((0, Mp - M), (0, Np - N)))
        in_specs.append(pl.BlockSpec((tm, tn), lambda i, j, k: (i, j)))
        args.append(rp)

    kernel = functools.partial(_mm_kernel, nk=nk, k_true=K, prologue=prologue,
                               act_out=act_out, has_res=has_res)
    out = pl.pallas_call(
        kernel,
        out_shape=jax.ShapeDtypeStruct((Mp, Np), out_dtype),
        grid=(Mp // tm, Np // tn, nk),
        in_specs=in_specs,
        out_specs=pl.BlockSpec((tm, tn), lambda i, j, k: (i, j)),
        scratch_shapes=[pltpu.VMEM((tm, tn), jnp.float32)],
        compiler_params=pltpu.CompilerParams(
            dimension_semantics=("parallel", "parallel", "arbitrary")),
    )(*args)
    return out[:M, :N]


# ----------------------------------------------------------------------------
# Row-gridded elementwise kernels (fallbacks + BatchNorm apply).
# ----------------------------------------------------------------------------
def _layernorm_kernel(x_ref, g_ref, b_ref, o_ref):
    x = x_ref[...].astype(jnp.float32)
    mu = jnp.mean(x, axis=-1, keepdims=True)
    xc = x - mu
    var = jnp.mean(xc * xc, axis=-1, keepdims=True)
    o_ref[...] = (xc * jax.lax.rsqrt(var + 1e-5) * g_ref[...]
                  + b_ref[...]).astype(o_ref.dtype)


def layernorm2d(x2, g, b, *, out_dtype=jnp.bfloat16, tm=1024):
    # Fallback only: LN is normally fused into the qkv / fc1 matmul prologue.
    M, C = x2.shape
    tm = min(tm, _round_up(M, 8))
    Mp = _round_up(M, tm)
    xp = jnp.pad(x2, ((0, Mp - M), (0, 0)))
    out = pl.pallas_call(
        _layernorm_kernel,
        out_shape=jax.ShapeDtypeStruct((Mp, C), out_dtype),
        grid=(Mp // tm,),
        in_specs=[pl.BlockSpec((tm, C), lambda i: (i, 0)),
                  pl.BlockSpec((1, C), lambda i: (0, 0)),
                  pl.BlockSpec((1, C), lambda i: (0, 0))],
        out_specs=pl.BlockSpec((tm, C), lambda i: (i, 0)),
        compiler_params=pltpu.CompilerParams(dimension_semantics=("parallel",)),
    )(xp, g.reshape(1, C).astype(jnp.float32), b.reshape(1, C).astype(jnp.float32))
    return out[:M]


def _gelu_kernel(x_ref, o_ref):
    o_ref[...] = _gelu_f32(x_ref[...].astype(jnp.float32)).astype(o_ref.dtype)


def gelu_rows(x2, *, out_dtype=jnp.bfloat16, tm=1024):
    # Fallback only: GELU is normally fused as a matmul prologue/epilogue.
    M, C = x2.shape
    tm = min(tm, _round_up(M, 8))
    Mp = _round_up(M, tm)
    xp = jnp.pad(x2, ((0, Mp - M), (0, 0)))
    out = pl.pallas_call(
        _gelu_kernel,
        out_shape=jax.ShapeDtypeStruct((Mp, C), out_dtype),
        grid=(Mp // tm,),
        in_specs=[pl.BlockSpec((tm, C), lambda i: (i, 0))],
        out_specs=pl.BlockSpec((tm, C), lambda i: (i, 0)),
        compiler_params=pltpu.CompilerParams(dimension_semantics=("parallel",)),
    )(xp)
    return out[:M]


def _affine_kernel(x_ref, s_ref, t_ref, o_ref, *, act_out):
    y = x_ref[...].astype(jnp.float32) * s_ref[...] + t_ref[...]
    if act_out:
        y = _gelu_f32(y)
    o_ref[...] = y.astype(o_ref.dtype)


def affine_rows(x2, scale, shift, *, act_out=False, out_dtype=jnp.bfloat16,
                tm=1024):
    M, C = x2.shape
    tm = min(tm, _round_up(M, 8))
    Mp = _round_up(M, tm)
    xp = jnp.pad(x2, ((0, Mp - M), (0, 0)))
    out = pl.pallas_call(
        functools.partial(_affine_kernel, act_out=act_out),
        out_shape=jax.ShapeDtypeStruct((Mp, C), out_dtype),
        grid=(Mp // tm,),
        in_specs=[pl.BlockSpec((tm, C), lambda i: (i, 0)),
                  pl.BlockSpec((1, C), lambda i: (0, 0)),
                  pl.BlockSpec((1, C), lambda i: (0, 0))],
        out_specs=pl.BlockSpec((tm, C), lambda i: (i, 0)),
        compiler_params=pltpu.CompilerParams(dimension_semantics=("parallel",)),
    )(xp, scale.reshape(1, C).astype(jnp.float32),
      shift.reshape(1, C).astype(jnp.float32))
    return out[:M]


# ----------------------------------------------------------------------------
# BatchNorm (training-mode batch statistics): one Pallas reduction pass for
# sum / sum-of-squares, one fused normalize(+GELU) pass.
# ----------------------------------------------------------------------------
def _bn_stats_kernel(x_ref, s_ref, q_ref):
    @pl.when(pl.program_id(0) == 0)
    def _init():
        s_ref[...] = jnp.zeros_like(s_ref)
        q_ref[...] = jnp.zeros_like(q_ref)

    x = x_ref[...].astype(jnp.float32)
    s_ref[...] += jnp.sum(x, axis=0, keepdims=True)
    q_ref[...] += jnp.sum(x * x, axis=0, keepdims=True)


def bn_stats(x2, tm=1024):
    M, C = x2.shape
    tm = min(tm, _round_up(M, 8))
    Mp = _round_up(M, tm)
    xp = jnp.pad(x2, ((0, Mp - M), (0, 0)))       # zero rows don't affect sums
    s, q = pl.pallas_call(
        _bn_stats_kernel,
        out_shape=(jax.ShapeDtypeStruct((1, C), jnp.float32),
                   jax.ShapeDtypeStruct((1, C), jnp.float32)),
        grid=(Mp // tm,),
        in_specs=[pl.BlockSpec((tm, C), lambda i: (i, 0))],
        out_specs=(pl.BlockSpec((1, C), lambda i: (0, 0)),
                   pl.BlockSpec((1, C), lambda i: (0, 0))),
        compiler_params=pltpu.CompilerParams(dimension_semantics=("arbitrary",)),
    )(xp)
    return s[0], q[0]


def batchnorm_train(x, g, b, *, act_out=False, eps=1e-5,
                    out_dtype=jnp.bfloat16):
    # TODO(synk): batch statistics only (module defaults to training mode);
    # running stats / eval mode are not modeled.
    B, H, W, C = x.shape
    x2 = x.reshape(-1, C)
    M = x2.shape[0]
    s, q = bn_stats(x2)
    mean = s / M
    var = q / M - mean * mean
    scale = g * jax.lax.rsqrt(var + eps)
    shift = b - mean * scale
    return affine_rows(x2, scale, shift, act_out=act_out,
                       out_dtype=out_dtype).reshape(B, H, W, C)


# ----------------------------------------------------------------------------
# Fused multi-head attention: head split done as wrapper-side layout rearrange,
# softmax scale folded into q, bf16 I/O, grid sized for both v7x TensorCores.
# ----------------------------------------------------------------------------
def _attn_kernel(q_ref, k_ref, v_ref, o_ref, *, scale):
    q = (q_ref[...].astype(jnp.float32) * scale).astype(jnp.bfloat16)
    s = jax.lax.dot_general(q, k_ref[...], (((2,), (2,)), ((0,), (0,))),
                            preferred_element_type=jnp.float32)
    s = s - jnp.max(s, axis=-1, keepdims=True)
    p = jnp.exp(s)
    p = p * pl.reciprocal(jnp.sum(p, axis=-1, keepdims=True), approx=False)
    o = jax.lax.dot_general(p.astype(jnp.bfloat16), v_ref[...],
                            (((2,), (1,)), ((0,), (0,))),
                            preferred_element_type=jnp.float32)
    o_ref[...] = o.astype(o_ref.dtype)


def attention_core(qkv, num_heads, hd):
    """qkv: (BB, N, 3C) packed bf16 [q|k|v] -> (BB*N, C) bf16 attention out."""
    # TODO(synk): at production dims, padding N to a sublane multiple (with a
    # key mask) and hd toward 128 would give unmasked stores / fuller MXU.
    BB, N, C3 = qkv.shape
    C = C3 // 3
    scale = float(hd) ** -0.5
    qkv5 = qkv.reshape(BB, N, 3, num_heads, hd)
    qkv5 = jnp.transpose(qkv5, (2, 0, 3, 1, 4)).reshape(3, BB * num_heads, N, hd)
    q, k, v = qkv5[0], qkv5[1], qkv5[2]
    BH = BB * num_heads

    gb = 1
    for cand in range(min(8, BH), 0, -1):      # keep >= 4 grid points
        if BH % cand == 0 and BH // cand >= min(4, BH):
            gb = cand
            break

    out = pl.pallas_call(
        functools.partial(_attn_kernel, scale=scale),
        out_shape=jax.ShapeDtypeStruct((BH, N, hd), jnp.bfloat16),
        grid=(BH // gb,),
        in_specs=[pl.BlockSpec((gb, N, hd), lambda i: (i, 0, 0)),
                  pl.BlockSpec((gb, N, hd), lambda i: (i, 0, 0)),
                  pl.BlockSpec((gb, N, hd), lambda i: (i, 0, 0))],
        out_specs=pl.BlockSpec((gb, N, hd), lambda i: (i, 0, 0)),
        compiler_params=pltpu.CompilerParams(dimension_semantics=("parallel",)),
    )(q, k, v)
    out = out.reshape(BB, num_heads, N, hd)
    return jnp.transpose(out, (0, 2, 1, 3)).reshape(BB * N, C)


# ----------------------------------------------------------------------------
# Depthwise 3x3 conv (groups=dim), gridded over (batch, channel tiles), bf16 IO.
# ----------------------------------------------------------------------------
def _dwconv3x3_kernel(xp_ref, w_ref, b_ref, o_ref):
    _, H, W, _ = o_ref.shape
    x = xp_ref[...].astype(jnp.float32)
    acc = jnp.zeros(o_ref.shape, jnp.float32)
    for di in range(3):
        for dj in range(3):
            acc = acc + x[:, di:di + H, dj:dj + W, :] * w_ref[di * 3 + dj]
    o_ref[...] = (acc + b_ref[...]).astype(o_ref.dtype)


def dwconv3x3(x, w9, b, *, out_dtype=jnp.bfloat16):
    """Depthwise 3x3, stride 1, pad 1. w9 is (9, C) f32 (tap-major)."""
    # TODO(synk): for very large H*W with C < 256 a row-tiled halo-DMA variant
    # would further bound VMEM on v7x; channel tiling suffices at these dims.
    B, H, W, C = x.shape
    xp = jnp.pad(x, ((0, 0), (1, 1), (1, 1), (0, 0)))
    tc = 128 if C % 128 == 0 else C
    return pl.pallas_call(
        _dwconv3x3_kernel,
        out_shape=jax.ShapeDtypeStruct((B, H, W, C), out_dtype),
        grid=(B, C // tc),
        in_specs=[pl.BlockSpec((1, H + 2, W + 2, tc), lambda i, j: (i, 0, 0, j)),
                  pl.BlockSpec((9, tc), lambda i, j: (0, j)),
                  pl.BlockSpec((1, 1, 1, tc), lambda i, j: (0, 0, 0, j))],
        out_specs=pl.BlockSpec((1, H, W, tc), lambda i, j: (i, 0, 0, j)),
        compiler_params=pltpu.CompilerParams(
            dimension_semantics=("parallel", "parallel")),
    )(xp, w9, b.reshape(1, 1, 1, C))


# ----------------------------------------------------------------------------
# Convolutions via bf16 im2col + the gridded Pallas matmul.
# ----------------------------------------------------------------------------
def conv2d_gemm(x, wmat, b, kh, kw, stride, padding, *, act_out=False,
                out_dtype=jnp.bfloat16):
    """NHWC conv (groups=1); wmat is pre-prepared (kh*kw*Cin, O) bf16."""
    # TODO(synk): the im2col patch slab is still materialized by XLA (in bf16);
    # a tap-indexed K-grid over shifted input views would remove it entirely.
    B, H, W, Cin = x.shape
    O = wmat.shape[1]
    if isinstance(padding, int):
        padding = ((padding, padding), (padding, padding))
    (pad_t, pad_b), (pad_l, pad_r) = padding
    xp = jnp.pad(x, ((0, 0), (pad_t, pad_b), (pad_l, pad_r), (0, 0)))
    Hp, Wp = H + pad_t + pad_b, W + pad_l + pad_r
    Hout = (Hp - kh) // stride + 1
    Wout = (Wp - kw) // stride + 1
    patches = []
    for di in range(kh):
        for dj in range(kw):
            patches.append(
                xp[:, di:di + stride * (Hout - 1) + 1:stride,
                      dj:dj + stride * (Wout - 1) + 1:stride, :])
    pmat = jnp.stack(patches, axis=3).reshape(B * Hout * Wout, kh * kw * Cin)
    y = pallas_matmul(pmat, wmat, b, act_out=act_out, out_dtype=out_dtype)
    return y.reshape(B, Hout, Wout, O)


_DECONV_PHASES = ((0, 0), (0, 1), (1, 0), (1, 1))


def _deconv_phase_weights(w_io):
    """ConvTranspose2d(k=4,s=2,p=1) weight (Cin,Cout,4,4) -> 4 phase GEMMs."""
    Cin, Cout = w_io.shape[0], w_io.shape[1]
    mats = []
    for r, c in _DECONV_PHASES:
        row_taps = (3, 1) if r == 0 else (2, 0)
        col_taps = (3, 1) if c == 0 else (2, 0)
        k = jnp.stack([jnp.stack([w_io[:, :, row_taps[dy], col_taps[dx]]
                                  for dx in (0, 1)], axis=0)
                       for dy in (0, 1)], axis=0)          # (2,2,Cin,Cout)
        mats.append(k.reshape(4 * Cin, Cout).astype(jnp.bfloat16))
    return mats


def conv_transpose2d_4s2p1(x, phase_ws, b, *, out_dtype=jnp.bfloat16):
    """Sub-pixel decomposition of ConvTranspose2d(kernel=4, stride=2, pad=1)."""
    B, H, W, _ = x.shape
    Cout = phase_ws[0].shape[1]
    outs = []
    for (r, c), wm in zip(_DECONV_PHASES, phase_ws):
        pad = ((1 - r, r), (1 - c, c))
        outs.append(conv2d_gemm(x, wm, b, 2, 2, 1, pad, out_dtype=out_dtype))
    o00, o01, o10, o11 = outs
    row0 = jnp.stack([o00, o01], axis=3)                   # (B,H,W,2,C)
    row1 = jnp.stack([o10, o11], axis=3)
    y = jnp.stack([row0, row1], axis=2)                    # (B,H,2,W,2,C)
    return y.reshape(B, 2 * H, 2 * W, Cout)


# ----------------------------------------------------------------------------
# Transformer blocks (LN fused into qkv/fc1 prologue, GELU/residual fused).
# ----------------------------------------------------------------------------
def transformer_block(x, blk, num_heads, out_dtype=jnp.float32):
    shape = x.shape
    N, C = shape[-2], shape[-1]
    BB = int(math.prod(shape[:-2]))
    hd = C // num_heads
    x2 = x.reshape(BB * N, C)

    # PreNorm(Attention) + residual: LN fused into the QKV matmul prologue,
    # residual fused into the proj matmul epilogue.
    qkv = pallas_matmul(x2, blk["qkv"]["w"], None,
                        ln_params=(blk["ln1_g"], blk["ln1_b"]),
                        out_dtype=jnp.bfloat16)
    a = attention_core(qkv.reshape(BB, N, 3 * C), num_heads, hd)
    x2 = pallas_matmul(a, blk["proj"]["w"], blk["proj"]["b"],
                       residual=x2, out_dtype=jnp.float32)

    # PreNorm(FeedForward) + residual: LN + GELU fused into fc1, residual into fc2.
    h = pallas_matmul(x2, blk["fc1"]["w"], blk["fc1"]["b"],
                      ln_params=(blk["ln2_g"], blk["ln2_b"]),
                      act_out=True, out_dtype=jnp.bfloat16)
    x2 = pallas_matmul(h, blk["fc2"]["w"], blk["fc2"]["b"],
                       residual=x2, out_dtype=out_dtype)
    return x2.reshape(shape)


def project(x, lin):
    # Project = GELU -> Linear; GELU fused as the matmul prologue.
    shape = x.shape
    out = pallas_matmul(x.reshape(-1, shape[-1]), lin["w"], lin["b"],
                        act_in=True, out_dtype=jnp.bfloat16)
    return out.reshape(shape[:-1] + (lin["w"].shape[1],))


# ----------------------------------------------------------------------------
# Plain-JAX layout / resize glue.
# ----------------------------------------------------------------------------
def bilinear_align_corners(x, oh, ow):
    x = x.astype(jnp.float32)
    B, H, W, C = x.shape

    def grid(out, inp):
        if out == 1 or inp == 1:
            return jnp.zeros((out,), jnp.float32)
        return jnp.arange(out, dtype=jnp.float32) * ((inp - 1) / (out - 1))

    sy, sx = grid(oh, H), grid(ow, W)
    y0 = jnp.clip(jnp.floor(sy).astype(jnp.int32), 0, H - 1)
    x0 = jnp.clip(jnp.floor(sx).astype(jnp.int32), 0, W - 1)
    y1 = jnp.minimum(y0 + 1, H - 1)
    x1 = jnp.minimum(x0 + 1, W - 1)
    wy = (sy - y0.astype(jnp.float32)).reshape(1, oh, 1, 1)
    wx = (sx - x0.astype(jnp.float32)).reshape(1, 1, ow, 1)

    def g(yi, xi):
        return x[:, yi][:, :, xi]

    top = g(y0, x0) * (1 - wx) + g(y0, x1) * wx
    bot = g(y1, x0) * (1 - wx) + g(y1, x1) * wx
    return top * (1 - wy) + bot * wy


def to_windows(x, k1, k2):
    # 'b (h0 h1) (w0 w1) c -> b (h0 w0) (h1 w1) c'  (NHWC version)
    B, Hh, Ww, C = x.shape
    h1, w1 = Hh // k1, Ww // k2
    x = x.reshape(B, k1, h1, k2, w1, C)
    x = jnp.transpose(x, (0, 1, 3, 2, 4, 5))
    return x.reshape(B, k1 * k2, h1 * w1, C)


def from_windows(x, k1, k2, h1, w1):
    B, G, N, C = x.shape
    x = x.reshape(B, k1, k2, h1, w1, C)
    x = jnp.transpose(x, (0, 1, 3, 2, 4, 5))
    return x.reshape(B, k1 * h1, k2 * w1, C)


# ----------------------------------------------------------------------------
# Parameter initialization (deterministic, synthetic, torch-like layouts)
# and one-time kernel-ready preparation (hoisted out of the jitted forward).
# ----------------------------------------------------------------------------
def init_params(key, num_classes, k1, k2, dim, depth, heads, ratio=4):
    gdim = dim // 2
    keys = iter(jax.random.split(key, 256))

    def nrm(shape, s=0.02):
        return s * jax.random.normal(next(keys), shape, dtype=jnp.float32)

    zeros = lambda shape: jnp.zeros(shape, jnp.float32)
    ones = lambda shape: jnp.ones(shape, jnp.float32)

    def linear(cin, cout, bias=True):
        return {"w": nrm((cin, cout)), "b": zeros((cout,)) if bias else None}

    def tblock(d, r):
        return {
            "ln1_g": ones((d,)), "ln1_b": zeros((d,)),
            "qkv": linear(d, 3 * d, bias=False),
            "proj": linear(d, d),
            "ln2_g": ones((d,)), "ln2_b": zeros((d,)),
            "fc1": linear(d, d * r),
            "fc2": linear(d * r, d),
        }

    params = {
        "cls": nrm((1, k1 * k2, gdim), 1.0),
        "embed_conv1_w": nrm((64, 3, 3, 3)), "embed_conv1_b": zeros((64,)),
        "embed_bn_g": ones((64,)), "embed_bn_b": zeros((64,)),
        "embed_conv2_w": nrm((dim, 64, 3, 3)), "embed_conv2_b": zeros((dim,)),
        "layers": [],
    }
    for dp in depth:
        params["layers"].append({
            "down": linear(gdim, dim),
            "local": [tblock(dim, ratio) for _ in range(dp)],
            "dc_w": nrm((dim, 1, 3, 3)), "dc_b": zeros((dim,)),
            "up": linear(dim, gdim),
            "global": [tblock(gdim, ratio) for _ in range(1)],
        })
    D = dim + gdim
    params["head"] = {
        "ct_w": nrm((D, D, 4, 4)), "ct_b": zeros((D,)),
        "bn1_g": ones((D,)), "bn1_b": zeros((D,)),
        "c3_w": nrm((D, D, 3, 3)), "c3_b": zeros((D,)),
        "bn2_g": ones((D,)), "bn2_b": zeros((D,)),
        "c1_w": nrm((num_classes, D, 1, 1)),
    }
    return params


def prepare_params(p):
    """One-time weight prep (transpose / flip / bf16 cast) outside jit."""
    def lin(d):
        return {"w": d["w"].astype(jnp.bfloat16), "b": d["b"]}

    def convw(w):  # torch OIHW -> (kh*kw*I, O) bf16 GEMM weight
        O, I, kh, kw = w.shape
        return jnp.transpose(w, (2, 3, 1, 0)).reshape(kh * kw * I, O).astype(
            jnp.bfloat16)

    def tblock(t):
        return {"ln1_g": t["ln1_g"], "ln1_b": t["ln1_b"],
                "qkv": lin(t["qkv"]), "proj": lin(t["proj"]),
                "ln2_g": t["ln2_g"], "ln2_b": t["ln2_b"],
                "fc1": lin(t["fc1"]), "fc2": lin(t["fc2"])}

    out = {
        "cls": p["cls"],
        "embed_c1_w": convw(p["embed_conv1_w"]), "embed_c1_b": p["embed_conv1_b"],
        "embed_bn_g": p["embed_bn_g"], "embed_bn_b": p["embed_bn_b"],
        "embed_c2_w": convw(p["embed_conv2_w"]), "embed_c2_b": p["embed_conv2_b"],
        "layers": [],
    }
    for layer in p["layers"]:
        out["layers"].append({
            "down": lin(layer["down"]),
            "local": [tblock(t) for t in layer["local"]],
            "dc_w": jnp.transpose(layer["dc_w"][:, 0], (1, 2, 0)).reshape(9, -1),
            "dc_b": layer["dc_b"],
            "up": lin(layer["up"]),
            "global": [tblock(t) for t in layer["global"]],
        })
    hp = p["head"]
    out["head"] = {
        "ct_phase": _deconv_phase_weights(hp["ct_w"]), "ct_b": hp["ct_b"],
        "bn1_g": hp["bn1_g"], "bn1_b": hp["bn1_b"],
        "c3_w": convw(hp["c3_w"]), "c3_b": hp["c3_b"],
        "bn2_g": hp["bn2_g"], "bn2_b": hp["bn2_b"],
        "c1_w": convw(hp["c1_w"]),
    }
    return out


# ----------------------------------------------------------------------------
# Seg_tran forward
# ----------------------------------------------------------------------------
def seg_tran_forward(params, x_nchw, *, k1, k2, dim, heads):
    gdim = dim // 2
    ghead = heads // 2
    B = x_nchw.shape[0]

    x = jnp.transpose(x_nchw, (0, 2, 3, 1)).astype(jnp.bfloat16)   # NCHW->NHWC

    # x_embed: Conv(3->64,s2)+GELU -> BN -> Conv(64->dim,s2)+GELU
    x = conv2d_gemm(x, params["embed_c1_w"], params["embed_c1_b"],
                    3, 3, 2, 1, act_out=True)
    x = batchnorm_train(x, params["embed_bn_g"], params["embed_bn_b"])
    x = conv2d_gemm(x, params["embed_c2_w"], params["embed_c2_b"],
                    3, 3, 2, 1, act_out=True)

    h4, w4 = x.shape[1], x.shape[2]
    h1, w1 = h4 // k1, w4 // k2

    x = to_windows(x, k1, k2)                        # (B, k1*k2, h1*w1, dim)
    cls = jnp.tile(params["cls"], (B, 1, 1))         # (B, k1*k2, gdim)

    for layer in params["layers"]:
        cls_d = project(cls, layer["down"])                          # bf16
        x = jnp.concatenate([cls_d[:, :, None, :],
                             x.astype(jnp.bfloat16)], axis=2)
        nl = len(layer["local"])
        for bi, blk in enumerate(layer["local"]):
            od = jnp.bfloat16 if bi == nl - 1 else jnp.float32
            x = transformer_block(x, blk, heads, out_dtype=od)
        cls2 = x[:, :, 0]
        x = x[:, :, 1:]
        xs = from_windows(x, k1, k2, h1, w1)
        xs = dwconv3x3(xs, layer["dc_w"], layer["dc_b"])
        x = to_windows(xs, k1, k2)
        cls2 = project(cls2, layer["up"])
        ng = len(layer["global"])
        for gi, blk in enumerate(layer["global"]):
            od = jnp.bfloat16 if gi == ng - 1 else jnp.float32
            cls2 = transformer_block(cls2, blk, ghead, out_dtype=od)
        cls = cls2

    xs = from_windows(x, k1, k2, h1, w1)             # (B, h4, w4, dim) bf16
    cls_img = cls.reshape(B, k1, k2, gdim)           # 'b (h w) d -> b h w d'
    cls_up = bilinear_align_corners(cls_img, h4, w4).astype(xs.dtype)
    y = jnp.concatenate([xs, cls_up], axis=-1)       # (B, h4, w4, dim+gdim)

    hp = params["head"]
    y = conv_transpose2d_4s2p1(y, hp["ct_phase"], hp["ct_b"])
    y = batchnorm_train(y, hp["bn1_g"], hp["bn1_b"], act_out=True)
    y = conv2d_gemm(y, hp["c3_w"], hp["c3_b"], 3, 3, 1, 1)
    y = batchnorm_train(y, hp["bn2_g"], hp["bn2_b"], act_out=True)
    y = conv2d_gemm(y, hp["c1_w"], None, 1, 1, 1, 0, out_dtype=jnp.float32)
    return jnp.transpose(y, (0, 3, 1, 2))            # back to NCHW


# ----------------------------------------------------------------------------
if __name__ == "__main__":
    num_classes = 3
    h = w = 16
    k1 = k2 = 2            # with d1=d2=4 fixed -> local window 8x8
    dim, heads = 32, 4     # gdim=16, ghead=2
    depth = [1]

    key = jax.random.PRNGKey(0)
    pkey, xkey = jax.random.split(key)
    raw_params = init_params(pkey, num_classes, k1, k2, dim, depth, heads)
    params = prepare_params(raw_params)   # one-time weight prep, outside jit
    x = jax.random.normal(xkey, (2, 3, h, w), dtype=jnp.float32)

    fwd = jax.jit(functools.partial(seg_tran_forward, k1=k1, k2=k2,
                                    dim=dim, heads=heads))
    out = fwd(params, x)
    jax.block_until_ready(out)
    assert out.shape == (2, num_classes, h // 2, w // 2), out.shape
    assert bool(jnp.all(jnp.isfinite(out)))
    print("KERNEL_OK")
</pallas_src>

<mosaic_0001>
module attributes {stable_mosaic.version = 11 : i64} {
  func.func @_affine_kernel(%arg0: i32, %arg1: memref<128x64xbf16, #tpu.memory_space<vmem>>, %arg2: memref<1x64xf32, #tpu.memory_space<vmem>>, %arg3: memref<1x64xf32, #tpu.memory_space<vmem>>, %arg4: memref<128x64xbf16, #tpu.memory_space<vmem>>) attributes {dimension_semantics = [#tpu.dimension_semantics<parallel>], iteration_bounds = array<i64: 1>, scalar_prefetch = 0 : i64, scratch_operands = 0 : i64, tpu.core_type = #tpu.core_type<tc>, window_params = [{transform_indices = @transform_0, window_bounds = array<i64: 128, 64>}, {pipeline_mode = #tpu.pipeline_mode<synchronous>, transform_indices = @transform_1, window_bounds = array<i64: 1, 64>}, {pipeline_mode = #tpu.pipeline_mode<synchronous>, transform_indices = @transform_2, window_bounds = array<i64: 1, 64>}, {transform_indices = @transform_3, window_bounds = array<i64: 128, 64>}]} {
    %c0 = arith.constant 0 : index
    %c0_0 = arith.constant 0 : index
    %0 = vector.load %arg1[%c0, %c0_0] : memref<128x64xbf16, #tpu.memory_space<vmem>>, vector<128x64xbf16>
    %1 = arith.extf %0 : vector<128x64xbf16> to vector<128x64xf32>
    %c0_1 = arith.constant 0 : index
    %c0_2 = arith.constant 0 : index
    %2 = vector.load %arg2[%c0_1, %c0_2] : memref<1x64xf32, #tpu.memory_space<vmem>>, vector<1x64xf32>
    %3 = vector.broadcast %2 : vector<1x64xf32> to vector<128x64xf32>
    %4 = arith.mulf %1, %3 : vector<128x64xf32>
    %c0_3 = arith.constant 0 : index
    %c0_4 = arith.constant 0 : index
    %5 = vector.load %arg3[%c0_3, %c0_4] : memref<1x64xf32, #tpu.memory_space<vmem>>, vector<1x64xf32>
    %6 = vector.broadcast %5 : vector<1x64xf32> to vector<128x64xf32>
    %7 = arith.addf %4, %6 : vector<128x64xf32>
    %8 = arith.truncf %7 : vector<128x64xf32> to vector<128x64xbf16>
    %c0_5 = arith.constant 0 : index
    %c0_6 = arith.constant 0 : index
    %9 = vector.load %arg4[%c0_5, %c0_6] : memref<128x64xbf16, #tpu.memory_space<vmem>>, vector<128x64xbf16>
    tpu.vector_store %arg4[%c0_5, %c0_6], %8 {strides = array<i32>} : memref<128x64xbf16, #tpu.memory_space<vmem>>, vector<128x64xbf16>,
    return
  }
  func.func @transform_0(%arg0: i32) -> (i32, i32) {
    %c0_i32 = arith.constant 0 : i32
    %c0_i32_0 = arith.constant 0 : i32
    return %arg0, %c0_i32 : i32, i32
  }
  func.func @transform_1(%arg0: i32) -> (i32, i32) {
    %c0_i32 = arith.constant 0 : i32
    %c0_i32_0 = arith.constant 0 : i32
    %c0_i32_1 = arith.constant 0 : i32
    return %c0_i32, %c0_i32_0 : i32, i32
  }
  func.func @transform_2(%arg0: i32) -> (i32, i32) {
    %c0_i32 = arith.constant 0 : i32
    %c0_i32_0 = arith.constant 0 : i32
    %c0_i32_1 = arith.constant 0 : i32
    return %c0_i32, %c0_i32_0 : i32, i32
  }
  func.func @transform_3(%arg0: i32) -> (i32, i32) {
    %c0_i32 = arith.constant 0 : i32
    %c0_i32_0 = arith.constant 0 : i32
    return %arg0, %c0_i32 : i32, i32
  }
}

module attributes {stable_mosaic.version = 11 : i64} {
  func.func @_mm_kernel(%arg0: i32, %arg1: i32, %arg2: i32, %arg3: memref<128x128xbf16, #tpu.memory_space<vmem>>, %arg4: memref<128x128xbf16, #tpu.memory_space<vmem>>, %arg5: memref<1x128xf32, #tpu.memory_space<vmem>>, %arg6: memref<128x128xbf16, #tpu.memory_space<vmem>>, %arg7: memref<128x128xf32, #tpu.memory_space<vmem>>) attributes {dimension_semantics = [#tpu.dimension_semantics<parallel>, #tpu.dimension_semantics<parallel>, #tpu.dimension_semantics<arbitrary>], iteration_bounds = array<i64: 1, 1, 1>, scalar_prefetch = 0 : i64, scratch_operands = 1 : i64, tpu.core_type = #tpu.core_type<tc>, window_params = [{transform_indices = @transform_0, window_bounds = array<i64: 128, 128>}, {transform_indices = @transform_1, window_bounds = array<i64: 128, 128>}, {transform_indices = @transform_2, window_bounds = array<i64: 1, 128>}, {transform_indices = @transform_3, window_bounds = array<i64: 128, 128>}]} {
    %c0_i32 = arith.constant 0 : i32
    %0 = arith.cmpi eq, %arg2, %c0_i32 : i32
    %1 = arith.extui %0 : i1 to i32
    %c0_i32_0 = arith.constant 0 : i32
    %2 = arith.cmpi ne, %1, %c0_i32_0 : i32
    scf.if %2 {
      %cst_10 = arith.constant 0.000000e+00 : f32
      %12 = vector.broadcast %cst_10 : f32 to vector<128x128xf32>
      %c0_11 = arith.constant 0 : index
      %c0_12 = arith.constant 0 : index
      %13 = vector.load %arg7[%c0_11, %c0_12] : memref<128x128xf32, #tpu.memory_space<vmem>>, vector<128x128xf32>
      tpu.vector_store %arg7[%c0_11, %c0_12], %12 {strides = array<i32>} : memref<128x128xf32, #tpu.memory_space<vmem>>, vector<128x128xf32>,
    } else {
    }
    %c0 = arith.constant 0 : index
    %c0_1 = arith.constant 0 : index
    %3 = vector.load %arg3[%c0, %c0_1] : memref<128x128xbf16, #tpu.memory_space<vmem>>, vector<128x128xbf16>
    %c0_2 = arith.constant 0 : index
    %c0_3 = arith.constant 0 : index
    %4 = vector.load %arg7[%c0_2, %c0_3] : memref<128x128xf32, #tpu.memory_space<vmem>>, vector<128x128xf32>
    %c0_4 = arith.constant 0 : index
    %c0_5 = arith.constant 0 : index
    %5 = vector.load %arg4[%c0_4, %c0_5] : memref<128x128xbf16, #tpu.memory_space<vmem>>, vector<128x128xbf16>
    %cst = arith.constant dense<0.000000e+00> : vector<128x128xf32>
    %6 = tpu.matmul %3, %5, %cst {dimension_numbers = #tpu.dot_dimension_numbers<[1], [0], [0], [1], [0, 0, 1, 1], [], []>} : vector<128x128xbf16>, vector<128x128xbf16>, vector<128x128xf32> -> vector<128x128xf32>
    %7 = arith.addf %4, %6 : vector<128x128xf32>
    %c0_6 = arith.constant 0 : index
    %c0_7 = arith.constant 0 : index
    %8 = vector.load %arg7[%c0_6, %c0_7] : memref<128x128xf32, #tpu.memory_space<vmem>>, vector<128x128xf32>
    tpu.vector_store %arg7[%c0_6, %c0_7], %7 {strides = array<i32>} : memref<128x128xf32, #tpu.memory_space<vmem>>, vector<128x128xf32>,
    %c0_i32_8 = arith.constant 0 : i32
    %9 = arith.cmpi eq, %arg2, %c0_i32_8 : i32
    %10 = arith.extui %9 : i1 to i32
    %c0_i32_9 = arith.constant 0 : i32
    %11 = arith.cmpi ne, %10, %c0_i32_9 : i32
    scf.if %11 {
      %c0_10 = arith.constant 0 : index
      %c0_11 = arith.constant 0 : index
      %12 = vector.load %arg7[%c0_10, %c0_11] : memref<128x128xf32, #tpu.memory_space<vmem>>, vector<128x128xf32>
      %c0_12 = arith.constant 0 : index
      %c0_13 = arith.constant 0 : index
      %13 = vector.load %arg5[%c0_12, %c0_13] : memref<1x128xf32, #tpu.memory_space<vmem>>, vector<1x128xf32>
      %14 = vector.broadcast %13 : vector<1x128xf32> to vector<128x128xf32>
      %15 = arith.addf %12, %14 : vector<128x128xf32>
      %cst_14 = arith.constant 0.707106769 : f32
      %16 = vector.broadcast %cst_14 : f32 to vector<128x128xf32>
      %17 = arith.mulf %15, %16 : vector<128x128xf32>
      %18 = math.absf %17 : vector<128x128xf32>
      %cst_15 = arith.constant 0.327591091 : f32
      %19 = vector.broadcast %cst_15 : f32 to vector<128x128xf32>
      %20 = arith.mulf %19, %18 : vector<128x128xf32>
      %cst_16 = arith.constant 1.000000e+00 : f32
      %21 = vector.broadcast %cst_16 : f32 to vector<128x128xf32>
      %22 = arith.addf %21, %20 : vector<128x128xf32>
      %cst_17 = arith.constant 1.000000e+00 : f32
      %23 = vector.broadcast %cst_17 : f32 to vector<128x128xf32>
      %24 = arith.divf %23, %22 : vector<128x128xf32>
      %cst_18 = arith.constant 1.06140542 : f32
      %25 = vector.broadcast %cst_18 : f32 to vector<128x128xf32>
      %26 = arith.mulf %24, %25 : vector<128x128xf32>
      %cst_19 = arith.constant -1.45315206 : f32
      %27 = vector.broadcast %cst_19 : f32 to vector<128x128xf32>
      %28 = arith.addf %27, %26 : vector<128x128xf32>
      %29 = arith.mulf %24, %28 : vector<128x128xf32>
      %cst_20 = arith.constant 1.42141378 : f32
      %30 = vector.broadcast %cst_20 : f32 to vector<128x128xf32>
      %31 = arith.addf %30, %29 : vector<128x128xf32>
      %32 = arith.mulf %24, %31 : vector<128x128xf32>
      %cst_21 = arith.constant -0.284496725 : f32
      %33 = vector.broadcast %cst_21 : f32 to vector<128x128xf32>
      %34 = arith.addf %33, %32 : vector<128x128xf32>
      %35 = arith.mulf %24, %34 : vector<128x128xf32>
      %cst_22 = arith.constant 0.254829586 : f32
      %36 = vector.broadcast %cst_22 : f32 to vector<128x128xf32>
      %37 = arith.addf %36, %35 : vector<128x128xf32>
      %38 = arith.mulf %24, %37 : vector<128x128xf32>
      %cst_23 = arith.constant 0.000000e+00 : f32
      %39 = vector.broadcast %cst_23 : f32 to vector<128x128xf32>
      %40 = arith.subf %39, %18 : vector<128x128xf32>
      %41 = arith.mulf %40, %18 : vector<128x128xf32>
      %42 = math.exp %41 : vector<128x128xf32>
      %43 = arith.mulf %38, %42 : vector<128x128xf32>
      %cst_24 = arith.constant 1.000000e+00 : f32
      %44 = vector.broadcast %cst_24 : f32 to vector<128x128xf32>
      %45 = arith.subf %44, %43 : vector<128x128xf32>
      %cst_25 = arith.constant 0.000000e+00 : f32
      %46 = vector.broadcast %cst_25 : f32 to vector<128x128xf32>
      %47 = arith.cmpf oge, %17, %46 : vector<128x128xf32>
      %cst_26 = arith.constant 0.000000e+00 : f32
      %48 = vector.broadcast %cst_26 : f32 to vector<128x128xf32>
      %49 = arith.subf %48, %45 : vector<128x128xf32>
      %50 = arith.select %47, %45, %49 : vector<128x128xi1>, vector<128x128xf32>
      %cst_27 = arith.constant 5.000000e-01 : f32
      %51 = vector.broadcast %cst_27 : f32 to vector<128x128xf32>
      %52 = arith.mulf %51, %15 : vector<128x128xf32>
      %cst_28 = arith.constant 1.000000e+00 : f32
      %53 = vector.broadcast %cst_28 : f32 to vector<128x128xf32>
      %54 = arith.addf %53, %50 : vector<128x128xf32>
      %55 = arith.mulf %52, %54 : vector<128x128xf32>
      %56 = arith.truncf %55 : vector<128x128xf32> to vector<128x128xbf16>
      %c0_29 = arith.constant 0 : index
      %c0_30 = arith.constant 0 : index
      %57 = vector.load %arg6[%c0_29, %c0_30] : memref<128x128xbf16, #tpu.memory_space<vmem>>, vector<128x128xbf16>
      tpu.vector_store %arg6[%c0_29, %c0_30], %56 {strides = array<i32>} : memref<128x128xbf16, #tpu.memory_space<vmem>>, vector<128x128xbf16>,
    } else {
    }
    return
  }
  func.func @transform_0(%arg0: i32, %arg1: i32, %arg2: i32) -> (i32, i32) {
    %c0_i32 = arith.constant 0 : i32
    return %arg0, %arg2 : i32, i32
  }
  func.func @transform_1(%arg0: i32, %arg1: i32, %arg2: i32) -> (i32, i32) {
    %c0_i32 = arith.constant 0 : i32
    return %arg2, %arg1 : i32, i32
  }
  func.func @transform_2(%arg0: i32, %arg1: i32, %arg2: i32) -> (i32, i32) {
    %c0_i32 = arith.constant 0 : i32
    %c0_i32_0 = arith.constant 0 : i32
    return %c0_i32, %arg1 : i32, i32
  }
  func.func @transform_3(%arg0: i32, %arg1: i32, %arg2: i32) -> (i32, i32) {
    %c0_i32 = arith.constant 0 : i32
    return %arg0, %arg1 : i32, i32
  }
}

module attributes {stable_mosaic.version = 11 : i64} {
  func.func @_bn_stats_kernel(%arg0: i32, %arg1: memref<128x64xbf16, #tpu.memory_space<vmem>>, %arg2: memref<1x64xf32, #tpu.memory_space<vmem>>, %arg3: memref<1x64xf32, #tpu.memory_space<vmem>>) attributes {dimension_semantics = [#tpu.dimension_semantics<arbitrary>], iteration_bounds = array<i64: 1>, scalar_prefetch = 0 : i64, scratch_operands = 0 : i64, tpu.core_type = #tpu.core_type<tc>, window_params = [{transform_indices = @transform_0, window_bounds = array<i64: 128, 64>}, {pipeline_mode = #tpu.pipeline_mode<synchronous>, transform_indices = @transform_1, window_bounds = array<i64: 1, 64>}, {pipeline_mode = #tpu.pipeline_mode<synchronous>, transform_indices = @transform_2, window_bounds = array<i64: 1, 64>}]} {
    %c0_i32 = arith.constant 0 : i32
    %0 = arith.cmpi eq, %arg0, %c0_i32 : i32
    %1 = arith.extui %0 : i1 to i32
    %c0_i32_0 = arith.constant 0 : i32
    %2 = arith.cmpi ne, %1, %c0_i32_0 : i32
    scf.if %2 {
      %cst_11 = arith.constant 0.000000e+00 : f32
      %16 = vector.broadcast %cst_11 : f32 to vector<1x64xf32>
      %c0_12 = arith.constant 0 : index
      %c0_13 = arith.constant 0 : index
      %17 = vector.load %arg2[%c0_12, %c0_13] : memref<1x64xf32, #tpu.memory_space<vmem>>, vector<1x64xf32>
      tpu.vector_store %arg2[%c0_12, %c0_13], %16 {strides = array<i32>} : memref<1x64xf32, #tpu.memory_space<vmem>>, vector<1x64xf32>,
      %cst_14 = arith.constant 0.000000e+00 : f32
      %18 = vector.broadcast %cst_14 : f32 to vector<1x64xf32>
      %c0_15 = arith.constant 0 : index
      %c0_16 = arith.constant 0 : index
      %19 = vector.load %arg3[%c0_15, %c0_16] : memref<1x64xf32, #tpu.memory_space<vmem>>, vector<1x64xf32>
      tpu.vector_store %arg3[%c0_15, %c0_16], %18 {strides = array<i32>} : memref<1x64xf32, #tpu.memory_space<vmem>>, vector<1x64xf32>,
    } else {
    }
    %c0 = arith.constant 0 : index
    %c0_1 = arith.constant 0 : index
    %3 = vector.load %arg1[%c0, %c0_1] : memref<128x64xbf16, #tpu.memory_space<vmem>>, vector<128x64xbf16>
    %4 = arith.extf %3 : vector<128x64xbf16> to vector<128x64xf32>
    %c0_2 = arith.constant 0 : index
    %c0_3 = arith.constant 0 : index
    %5 = vector.load %arg2[%c0_2, %c0_3] : memref<1x64xf32, #tpu.memory_space<vmem>>, vector<1x64xf32>
    %cst = arith.constant dense<0.000000e+00> : vector<64xf32>
    %6 = vector.multi_reduction <add>, %4, %cst [0] : vector<128x64xf32> to vector<64xf32>
    %7 = vector.shape_cast %6 : vector<64xf32> to vector<1x64xf32>
    %8 = arith.addf %5, %7 : vector<1x64xf32>
    %c0_4 = arith.constant 0 : index
    %c0_5 = arith.constant 0 : index
    %9 = vector.load %arg2[%c0_4, %c0_5] : memref<1x64xf32, #tpu.memory_space<vmem>>, vector<1x64xf32>
    tpu.vector_store %arg2[%c0_4, %c0_5], %8 {strides = array<i32>} : memref<1x64xf32, #tpu.memory_space<vmem>>, vector<1x64xf32>,
    %c0_6 = arith.constant 0 : index
    %c0_7 = arith.constant 0 : index
    %10 = vector.load %arg3[%c0_6, %c0_7] : memref<1x64xf32, #tpu.memory_space<vmem>>, vector<1x64xf32>
    %11 = arith.mulf %4, %4 : vector<128x64xf32>
    %cst_8 = arith.constant dense<0.000000e+00> : vector<64xf32>
    %12 = vector.multi_reduction <add>, %11, %cst_8 [0] : vector<128x64xf32> to vector<64xf32>
    %13 = vector.shape_cast %12 : vector<64xf32> to vector<1x64xf32>
    %14 = arith.addf %10, %13 : vector<1x64xf32>
    %c0_9 = arith.constant 0 : index
    %c0_10 = arith.constant 0 : index
    %15 = vector.load %arg3[%c0_9, %c0_10] : memref<1x64xf32, #tpu.memory_space<vmem>>, vector<1x64xf32>
    tpu.vector_store %arg3[%c0_9, %c0_10], %14 {strides = array<i32>} : memref<1x64xf32, #tpu.memory_space<vmem>>, vector<1x64xf32>,
    return
  }
  func.func @transform_0(%arg0: i32) -> (i32, i32) {
    %c0_i32 = arith.constant 0 : i32
    %c0_i32_0 = arith.constant 0 : i32
    return %arg0, %c0_i32 : i32, i32
  }
  func.func @transform_1(%arg0: i32) -> (i32, i32) {
    %c0_i32 = arith.constant 0 : i32
    %c0_i32_0 = arith.constant 0 : i32
    %c0_i32_1 = arith.constant 0 : i32
    return %c0_i32, %c0_i32_0 : i32, i32
  }
  func.func @transform_2(%arg0: i32) -> (i32, i32) {
    %c0_i32 = arith.constant 0 : i32
    %c0_i32_0 = arith.constant 0 : i32
    %c0_i32_1 = arith.constant 0 : i32
    return %c0_i32, %c0_i32_0 : i32, i32
  }
}

module attributes {stable_mosaic.version = 11 : i64} {
  func.func @_mm_kernel(%arg0: i32, %arg1: i32, %arg2: i32, %arg3: memref<32x640xbf16, #tpu.memory_space<vmem>>, %arg4: memref<640x128xbf16, #tpu.memory_space<vmem>>, %arg5: memref<1x128xf32, #tpu.memory_space<vmem>>, %arg6: memref<32x128xbf16, #tpu.memory_space<vmem>>, %arg7: memref<32x128xf32, #tpu.memory_space<vmem>>) attributes {dimension_semantics = [#tpu.dimension_semantics<parallel>, #tpu.dimension_semantics<parallel>, #tpu.dimension_semantics<arbitrary>], iteration_bounds = array<i64: 1, 1, 1>, scalar_prefetch = 0 : i64, scratch_operands = 1 : i64, tpu.core_type = #tpu.core_type<tc>, window_params = [{transform_indices = @transform_0, window_bounds = array<i64: 32, 640>}, {transform_indices = @transform_1, window_bounds = array<i64: 640, 128>}, {transform_indices = @transform_2, window_bounds = array<i64: 1, 128>}, {transform_indices = @transform_3, window_bounds = array<i64: 32, 128>}]} {
    %c0_i32 = arith.constant 0 : i32
    %0 = arith.cmpi eq, %arg2, %c0_i32 : i32
    %1 = arith.extui %0 : i1 to i32
    %c0_i32_0 = arith.constant 0 : i32
    %2 = arith.cmpi ne, %1, %c0_i32_0 : i32
    scf.if %2 {
      %cst_10 = arith.constant 0.000000e+00 : f32
      %12 = vector.broadcast %cst_10 : f32 to vector<32x128xf32>
      %c0_11 = arith.constant 0 : index
      %c0_12 = arith.constant 0 : index
      %13 = vector.load %arg7[%c0_11, %c0_12] : memref<32x128xf32, #tpu.memory_space<vmem>>, vector<32x128xf32>
      tpu.vector_store %arg7[%c0_11, %c0_12], %12 {strides = array<i32>} : memref<32x128xf32, #tpu.memory_space<vmem>>, vector<32x128xf32>,
    } else {
    }
    %c0 = arith.constant 0 : index
    %c0_1 = arith.constant 0 : index
    %3 = vector.load %arg3[%c0, %c0_1] : memref<32x640xbf16, #tpu.memory_space<vmem>>, vector<32x640xbf16>
    %c0_2 = arith.constant 0 : index
    %c0_3 = arith.constant 0 : index
    %4 = vector.load %arg7[%c0_2, %c0_3] : memref<32x128xf32, #tpu.memory_space<vmem>>, vector<32x128xf32>
    %c0_4 = arith.constant 0 : index
    %c0_5 = arith.constant 0 : index
    %5 = vector.load %arg4[%c0_4, %c0_5] : memref<640x128xbf16, #tpu.memory_space<vmem>>, vector<640x128xbf16>
    %cst = arith.constant dense<0.000000e+00> : vector<32x128xf32>
    %6 = tpu.matmul %3, %5, %cst {dimension_numbers = #tpu.dot_dimension_numbers<[1], [0], [0], [1], [0, 0, 1, 1], [], []>} : vector<32x640xbf16>, vector<640x128xbf16>, vector<32x128xf32> -> vector<32x128xf32>
    %7 = arith.addf %4, %6 : vector<32x128xf32>
    %c0_6 = arith.constant 0 : index
    %c0_7 = arith.constant 0 : index
    %8 = vector.load %arg7[%c0_6, %c0_7] : memref<32x128xf32, #tpu.memory_space<vmem>>, vector<32x128xf32>
    tpu.vector_store %arg7[%c0_6, %c0_7], %7 {strides = array<i32>} : memref<32x128xf32, #tpu.memory_space<vmem>>, vector<32x128xf32>,
    %c0_i32_8 = arith.constant 0 : i32
    %9 = arith.cmpi eq, %arg2, %c0_i32_8 : i32
    %10 = arith.extui %9 : i1 to i32
    %c0_i32_9 = arith.constant 0 : i32
    %11 = arith.cmpi ne, %10, %c0_i32_9 : i32
    scf.if %11 {
      %c0_10 = arith.constant 0 : index
      %c0_11 = arith.constant 0 : index
      %12 = vector.load %arg7[%c0_10, %c0_11] : memref<32x128xf32, #tpu.memory_space<vmem>>, vector<32x128xf32>
      %c0_12 = arith.constant 0 : index
      %c0_13 = arith.constant 0 : index
      %13 = vector.load %arg5[%c0_12, %c0_13] : memref<1x128xf32, #tpu.memory_space<vmem>>, vector<1x128xf32>
      %14 = vector.broadcast %13 : vector<1x128xf32> to vector<32x128xf32>
      %15 = arith.addf %12, %14 : vector<32x128xf32>
      %cst_14 = arith.constant 0.707106769 : f32
      %16 = vector.broadcast %cst_14 : f32 to vector<32x128xf32>
      %17 = arith.mulf %15, %16 : vector<32x128xf32>
      %18 = math.absf %17 : vector<32x128xf32>
      %cst_15 = arith.constant 0.327591091 : f32
      %19 = vector.broadcast %cst_15 : f32 to vector<32x128xf32>
      %20 = arith.mulf %19, %18 : vector<32x128xf32>
      %cst_16 = arith.constant 1.000000e+00 : f32
      %21 = vector.broadcast %cst_16 : f32 to vector<32x128xf32>
      %22 = arith.addf %21, %20 : vector<32x128xf32>
      %cst_17 = arith.constant 1.000000e+00 : f32
      %23 = vector.broadcast %cst_17 : f32 to vector<32x128xf32>
      %24 = arith.divf %23, %22 : vector<32x128xf32>
      %cst_18 = arith.constant 1.06140542 : f32
      %25 = vector.broadcast %cst_18 : f32 to vector<32x128xf32>
      %26 = arith.mulf %24, %25 : vector<32x128xf32>
      %cst_19 = arith.constant -1.45315206 : f32
      %27 = vector.broadcast %cst_19 : f32 to vector<32x128xf32>
      %28 = arith.addf %27, %26 : vector<32x128xf32>
      %29 = arith.mulf %24, %28 : vector<32x128xf32>
      %cst_20 = arith.constant 1.42141378 : f32
      %30 = vector.broadcast %cst_20 : f32 to vector<32x128xf32>
      %31 = arith.addf %30, %29 : vector<32x128xf32>
      %32 = arith.mulf %24, %31 : vector<32x128xf32>
      %cst_21 = arith.constant -0.284496725 : f32
      %33 = vector.broadcast %cst_21 : f32 to vector<32x128xf32>
      %34 = arith.addf %33, %32 : vector<32x128xf32>
      %35 = arith.mulf %24, %34 : vector<32x128xf32>
      %cst_22 = arith.constant 0.254829586 : f32
      %36 = vector.broadcast %cst_22 : f32 to vector<32x128xf32>
      %37 = arith.addf %36, %35 : vector<32x128xf32>
      %38 = arith.mulf %24, %37 : vector<32x128xf32>
      %cst_23 = arith.constant 0.000000e+00 : f32
      %39 = vector.broadcast %cst_23 : f32 to vector<32x128xf32>
      %40 = arith.subf %39, %18 : vector<32x128xf32>
      %41 = arith.mulf %40, %18 : vector<32x128xf32>
      %42 = math.exp %41 : vector<32x128xf32>
      %43 = arith.mulf %38, %42 : vector<32x128xf32>
      %cst_24 = arith.constant 1.000000e+00 : f32
      %44 = vector.broadcast %cst_24 : f32 to vector<32x128xf32>
      %45 = arith.subf %44, %43 : vector<32x128xf32>
      %cst_25 = arith.constant 0.000000e+00 : f32
      %46 = vector.broadcast %cst_25 : f32 to vector<32x128xf32>
      %47 = arith.cmpf oge, %17, %46 : vector<32x128xf32>
      %cst_26 = arith.constant 0.000000e+00 : f32
      %48 = vector.broadcast %cst_26 : f32 to vector<32x128xf32>
      %49 = arith.subf %48, %45 : vector<32x128xf32>
      %50 = arith.select %47, %45, %49 : vector<32x128xi1>, vector<32x128xf32>
      %cst_27 = arith.constant 5.000000e-01 : f32
      %51 = vector.broadcast %cst_27 : f32 to vector<32x128xf32>
      %52 = arith.mulf %51, %15 : vector<32x128xf32>
      %cst_28 = arith.constant 1.000000e+00 : f32
      %53 = vector.broadcast %cst_28 : f32 to vector<32x128xf32>
      %54 = arith.addf %53, %50 : vector<32x128xf32>
      %55 = arith.mulf %52, %54 : vector<32x128xf32>
      %56 = arith.truncf %55 : vector<32x128xf32> to vector<32x128xbf16>
      %c0_29 = arith.constant 0 : index
      %c0_30 = arith.constant 0 : index
      %57 = vector.load %arg6[%c0_29, %c0_30] : memref<32x128xbf16, #tpu.memory_space<vmem>>, vector<32x128xbf16>
      tpu.vector_store %arg6[%c0_29, %c0_30], %56 {strides = array<i32>} : memref<32x128xbf16, #tpu.memory_space<vmem>>, vector<32x128xbf16>,
    } else {
    }
    return
  }
  func.func @transform_0(%arg0: i32, %arg1: i32, %arg2: i32) -> (i32, i32) {
    %c0_i32 = arith.constant 0 : i32
    return %arg0, %arg2 : i32, i32
  }
  func.func @transform_1(%arg0: i32, %arg1: i32, %arg2: i32) -> (i32, i32) {
    %c0_i32 = arith.constant 0 : i32
    return %arg2, %arg1 : i32, i32
  }
  func.func @transform_2(%arg0: i32, %arg1: i32, %arg2: i32) -> (i32, i32) {
    %c0_i32 = arith.constant 0 : i32
    %c0_i32_0 = arith.constant 0 : i32
    return %c0_i32, %arg1 : i32, i32
  }
  func.func @transform_3(%arg0: i32, %arg1: i32, %arg2: i32) -> (i32, i32) {
    %c0_i32 = arith.constant 0 : i32
    return %arg0, %arg1 : i32, i32
  }
}

module attributes {stable_mosaic.version = 11 : i64} {
  func.func @_mm_kernel(%arg0: i32, %arg1: i32, %arg2: i32, %arg3: memref<8x128xf32, #tpu.memory_space<vmem>>, %arg4: memref<128x128xbf16, #tpu.memory_space<vmem>>, %arg5: memref<1x128xf32, #tpu.memory_space<vmem>>, %arg6: memref<8x128xbf16, #tpu.memory_space<vmem>>, %arg7: memref<8x128xf32, #tpu.memory_space<vmem>>) attributes {dimension_semantics = [#tpu.dimension_semantics<parallel>, #tpu.dimension_semantics<parallel>, #tpu.dimension_semantics<arbitrary>], iteration_bounds = array<i64: 1, 1, 1>, scalar_prefetch = 0 : i64, scratch_operands = 1 : i64, tpu.core_type = #tpu.core_type<tc>, window_params = [{transform_indices = @transform_0, window_bounds = array<i64: 8, 128>}, {transform_indices = @transform_1, window_bounds = array<i64: 128, 128>}, {transform_indices = @transform_2, window_bounds = array<i64: 1, 128>}, {transform_indices = @transform_3, window_bounds = array<i64: 8, 128>}]} {
    %c0_i32 = arith.constant 0 : i32
    %0 = arith.cmpi eq, %arg2, %c0_i32 : i32
    %1 = arith.extui %0 : i1 to i32
    %c0_i32_0 = arith.constant 0 : i32
    %2 = arith.cmpi ne, %1, %c0_i32_0 : i32
    scf.if %2 {
      %cst_25 = arith.constant 0.000000e+00 : f32
      %53 = vector.broadcast %cst_25 : f32 to vector<8x128xf32>
      %c0_26 = arith.constant 0 : index
      %c0_27 = arith.constant 0 : index
      %54 = vector.load %arg7[%c0_26, %c0_27] : memref<8x128xf32, #tpu.memory_space<vmem>>, vector<8x128xf32>
      tpu.vector_store %arg7[%c0_26, %c0_27], %53 {strides = array<i32>} : memref<8x128xf32, #tpu.memory_space<vmem>>, vector<8x128xf32>,
    } else {
    }
    %c0 = arith.constant 0 : index
    %c0_1 = arith.constant 0 : index
    %3 = vector.load %arg3[%c0, %c0_1] : memref<8x128xf32, #tpu.memory_space<vmem>>, vector<8x128xf32>
    %cst = arith.constant 0.707106769 : f32
    %4 = vector.broadcast %cst : f32 to vector<8x128xf32>
    %5 = arith.mulf %3, %4 : vector<8x128xf32>
    %6 = math.absf %5 : vector<8x128xf32>
    %cst_2 = arith.constant 0.327591091 : f32
    %7 = vector.broadcast %cst_2 : f32 to vector<8x128xf32>
    %8 = arith.mulf %7, %6 : vector<8x128xf32>
    %cst_3 = arith.constant 1.000000e+00 : f32
    %9 = vector.broadcast %cst_3 : f32 to vector<8x128xf32>
    %10 = arith.addf %9, %8 : vector<8x128xf32>
    %cst_4 = arith.constant 1.000000e+00 : f32
    %11 = vector.broadcast %cst_4 : f32 to vector<8x128xf32>
    %12 = arith.divf %11, %10 : vector<8x128xf32>
    %cst_5 = arith.constant 1.06140542 : f32
    %13 = vector.broadcast %cst_5 : f32 to vector<8x128xf32>
    %14 = arith.mulf %12, %13 : vector<8x128xf32>
    %cst_6 = arith.constant -1.45315206 : f32
    %15 = vector.broadcast %cst_6 : f32 to vector<8x128xf32>
    %16 = arith.addf %15, %14 : vector<8x128xf32>
    %17 = arith.mulf %12, %16 : vector<8x128xf32>
    %cst_7 = arith.constant 1.42141378 : f32
    %18 = vector.broadcast %cst_7 : f32 to vector<8x128xf32>
    %19 = arith.addf %18, %17 : vector<8x128xf32>
    %20 = arith.mulf %12, %19 : vector<8x128xf32>
    %cst_8 = arith.constant -0.284496725 : f32
    %21 = vector.broadcast %cst_8 : f32 to vector<8x128xf32>
    %22 = arith.addf %21, %20 : vector<8x128xf32>
    %23 = arith.mulf %12, %22 : vector<8x128xf32>
    %cst_9 = arith.constant 0.254829586 : f32
    %24 = vector.broadcast %cst_9 : f32 to vector<8x128xf32>
    %25 = arith.addf %24, %23 : vector<8x128xf32>
    %26 = arith.mulf %12, %25 : vector<8x128xf32>
    %cst_10 = arith.constant 0.000000e+00 : f32
    %27 = vector.broadcast %cst_10 : f32 to vector<8x128xf32>
    %28 = arith.subf %27, %6 : vector<8x128xf32>
    %29 = arith.mulf %28, %6 : vector<8x128xf32>
    %30 = math.exp %29 : vector<8x128xf32>
    %31 = arith.mulf %26, %30 : vector<8x128xf32>
    %cst_11 = arith.constant 1.000000e+00 : f32
    %32 = vector.broadcast %cst_11 : f32 to vector<8x128xf32>
    %33 = arith.subf %32, %31 : vector<8x128xf32>
    %cst_12 = arith.constant 0.000000e+00 : f32
    %34 = vector.broadcast %cst_12 : f32 to vector<8x128xf32>
    %35 = arith.cmpf oge, %5, %34 : vector<8x128xf32>
    %cst_13 = arith.constant 0.000000e+00 : f32
    %36 = vector.broadcast %cst_13 : f32 to vector<8x128xf32>
    %37 = arith.subf %36, %33 : vector<8x128xf32>
    %38 = arith.select %35, %33, %37 : vector<8x128xi1>, vector<8x128xf32>
    %cst_14 = arith.constant 5.000000e-01 : f32
    %39 = vector.broadcast %cst_14 : f32 to vector<8x128xf32>
    %40 = arith.mulf %39, %3 : vector<8x128xf32>
    %cst_15 = arith.constant 1.000000e+00 : f32
    %41 = vector.broadcast %cst_15 : f32 to vector<8x128xf32>
    %42 = arith.addf %41, %38 : vector<8x128xf32>
    %43 = arith.mulf %40, %42 : vector<8x128xf32>
    %44 = arith.truncf %43 : vector<8x128xf32> to vector<8x128xbf16>
    %c0_16 = arith.constant 0 : index
    %c0_17 = arith.constant 0 : index
    %45 = vector.load %arg7[%c0_16, %c0_17] : memref<8x128xf32, #tpu.memory_space<vmem>>, vector<8x128xf32>
    %c0_18 = arith.constant 0 : index
    %c0_19 = arith.constant 0 : index
    %46 = vector.load %arg4[%c0_18, %c0_19] : memref<128x128xbf16, #tpu.memory_space<vmem>>, vector<128x128xbf16>
    %cst_20 = arith.constant dense<0.000000e+00> : vector<8x128xf32>
    %47 = tpu.matmul %44, %46, %cst_20 {dimension_numbers = #tpu.dot_dimension_numbers<[1], [0], [0], [1], [0, 0, 1, 1], [], []>} : vector<8x128xbf16>, vector<128x128xbf16>, vector<8x128xf32> -> vector<8x128xf32>
    %48 = arith.addf %45, %47 : vector<8x128xf32>
    %c0_21 = arith.constant 0 : index
    %c0_22 = arith.constant 0 : index
    %49 = vector.load %arg7[%c0_21, %c0_22] : memref<8x128xf32, #tpu.memory_space<vmem>>, vector<8x128xf32>
    tpu.vector_store %arg7[%c0_21, %c0_22], %48 {strides = array<i32>} : memref<8x128xf32, #tpu.memory_space<vmem>>, vector<8x128xf32>,
    %c0_i32_23 = arith.constant 0 : i32
    %50 = arith.cmpi eq, %arg2, %c0_i32_23 : i32
    %51 = arith.extui %50 : i1 to i32
    %c0_i32_24 = arith.constant 0 : i32
    %52 = arith.cmpi ne, %51, %c0_i32_24 : i32
    scf.if %52 {
      %c0_25 = arith.constant 0 : index
      %c0_26 = arith.constant 0 : index
      %53 = vector.load %arg7[%c0_25, %c0_26] : memref<8x128xf32, #tpu.memory_space<vmem>>, vector<8x128xf32>
      %c0_27 = arith.constant 0 : index
      %c0_28 = arith.constant 0 : index
      %54 = vector.load %arg5[%c0_27, %c0_28] : memref<1x128xf32, #tpu.memory_space<vmem>>, vector<1x128xf32>
      %55 = vector.broadcast %54 : vector<1x128xf32> to vector<8x128xf32>
      %56 = arith.addf %53, %55 : vector<8x128xf32>
      %57 = arith.truncf %56 : vector<8x128xf32> to vector<8x128xbf16>
      %c0_29 = arith.constant 0 : index
      %c0_30 = arith.constant 0 : index
      %58 = vector.load %arg6[%c0_29, %c0_30] : memref<8x128xbf16, #tpu.memory_space<vmem>>, vector<8x128xbf16>
      tpu.vector_store %arg6[%c0_29, %c0_30], %57 {strides = array<i32>} : memref<8x128xbf16, #tpu.memory_space<vmem>>, vector<8x128xbf16>,
    } else {
    }
    return
  }
  func.func @transform_0(%arg0: i32, %arg1: i32, %arg2: i32) -> (i32, i32) {
    %c0_i32 = arith.constant 0 : i32
    return %arg0, %arg2 : i32, i32
  }
  func.func @transform_1(%arg0: i32, %arg1: i32, %arg2: i32) -> (i32, i32) {
    %c0_i32 = arith.constant 0 : i32
    return %arg2, %arg1 : i32, i32
  }
  func.func @transform_2(%arg0: i32, %arg1: i32, %arg2: i32) -> (i32, i32) {
    %c0_i32 = arith.constant 0 : i32
    %c0_i32_0 = arith.constant 0 : i32
    return %c0_i32, %arg1 : i32, i32
  }
  func.func @transform_3(%arg0: i32, %arg1: i32, %arg2: i32) -> (i32, i32) {
    %c0_i32 = arith.constant 0 : i32
    return %arg0, %arg1 : i32, i32
  }
}

module attributes {stable_mosaic.version = 11 : i64} {
  func.func @_mm_kernel(%arg0: i32, %arg1: i32, %arg2: i32, %arg3: memref<40x128xbf16, #tpu.memory_space<vmem>>, %arg4: memref<128x128xbf16, #tpu.memory_space<vmem>>, %arg5: memref<1x128xf32, #tpu.memory_space<vmem>>, %arg6: memref<1x128xf32, #tpu.memory_space<vmem>>, %arg7: memref<1x128xf32, #tpu.memory_space<vmem>>, %arg8: memref<40x128xbf16, #tpu.memory_space<vmem>>, %arg9: memref<40x128xf32, #tpu.memory_space<vmem>>) attributes {dimension_semantics = [#tpu.dimension_semantics<parallel>, #tpu.dimension_semantics<parallel>, #tpu.dimension_semantics<arbitrary>], iteration_bounds = array<i64: 1, 1, 1>, scalar_prefetch = 0 : i64, scratch_operands = 1 : i64, tpu.core_type = #tpu.core_type<tc>, window_params = [{transform_indices = @transform_0, window_bounds = array<i64: 40, 128>}, {transform_indices = @transform_1, window_bounds = array<i64: 128, 128>}, {transform_indices = @transform_2, window_bounds = array<i64: 1, 128>}, {transform_indices = @transform_3, window_bounds = array<i64: 1, 128>}, {transform_indices = @transform_4, window_bounds = array<i64: 1, 128>}, {transform_indices = @transform_5, window_bounds = array<i64: 40, 128>}]} {
    %c0_i32 = arith.constant 0 : i32
    %0 = arith.cmpi eq, %arg2, %c0_i32 : i32
    %1 = arith.extui %0 : i1 to i32
    %c0_i32_0 = arith.constant 0 : i32
    %2 = arith.cmpi ne, %1, %c0_i32_0 : i32
    scf.if %2 {
      %cst_19 = arith.constant 0.000000e+00 : f32
      %38 = vector.broadcast %cst_19 : f32 to vector<40x128xf32>
      %c0_20 = arith.constant 0 : index
      %c0_21 = arith.constant 0 : index
      %39 = vector.load %arg9[%c0_20, %c0_21] : memref<40x128xf32, #tpu.memory_space<vmem>>, vector<40x128xf32>
      tpu.vector_store %arg9[%c0_20, %c0_21], %38 {strides = array<i32>} : memref<40x128xf32, #tpu.memory_space<vmem>>, vector<40x128xf32>,
    } else {
    }
    %c0 = arith.constant 0 : index
    %c0_1 = arith.constant 0 : index
    %3 = vector.load %arg3[%c0, %c0_1] : memref<40x128xbf16, #tpu.memory_space<vmem>>, vector<40x128xbf16>
    %4 = arith.extf %3 : vector<40x128xbf16> to vector<40x128xf32>
    %cst = arith.constant dense<0.000000e+00> : vector<40xf32>
    %5 = vector.multi_reduction <add>, %4, %cst [1] : vector<40x128xf32> to vector<40xf32>
    %6 = vector.shape_cast %5 : vector<40xf32> to vector<40x1xf32>
    %cst_2 = arith.constant 3.125000e-02 : f32
    %7 = vector.broadcast %cst_2 : f32 to vector<40x1xf32>
    %8 = arith.mulf %6, %7 : vector<40x1xf32>
    %9 = arith.mulf %4, %4 : vector<40x128xf32>
    %cst_3 = arith.constant dense<0.000000e+00> : vector<40xf32>
    %10 = vector.multi_reduction <add>, %9, %cst_3 [1] : vector<40x128xf32> to vector<40xf32>
    %11 = vector.shape_cast %10 : vector<40xf32> to vector<40x1xf32>
    %cst_4 = arith.constant 3.125000e-02 : f32
    %12 = vector.broadcast %cst_4 : f32 to vector<40x1xf32>
    %13 = arith.mulf %11, %12 : vector<40x1xf32>
    %14 = arith.mulf %8, %8 : vector<40x1xf32>
    %15 = arith.subf %13, %14 : vector<40x1xf32>
    %16 = vector.broadcast %8 : vector<40x1xf32> to vector<40x128xf32>
    %17 = arith.subf %4, %16 : vector<40x128xf32>
    %cst_5 = arith.constant 9.99999974E-6 : f32
    %18 = vector.broadcast %cst_5 : f32 to vector<40x1xf32>
    %19 = arith.addf %15, %18 : vector<40x1xf32>
    %20 = math.rsqrt %19 : vector<40x1xf32>
    %21 = vector.broadcast %20 : vector<40x1xf32> to vector<40x128xf32>
    %22 = arith.mulf %17, %21 : vector<40x128xf32>
    %c0_6 = arith.constant 0 : index
    %c0_7 = arith.constant 0 : index
    %23 = vector.load %arg6[%c0_6, %c0_7] : memref<1x128xf32, #tpu.memory_space<vmem>>, vector<1x128xf32>
    %24 = vector.broadcast %23 : vector<1x128xf32> to vector<40x128xf32>
    %25 = arith.mulf %22, %24 : vector<40x128xf32>
    %c0_8 = arith.constant 0 : index
    %c0_9 = arith.constant 0 : index
    %26 = vector.load %arg7[%c0_8, %c0_9] : memref<1x128xf32, #tpu.memory_space<vmem>>, vector<1x128xf32>
    %27 = vector.broadcast %26 : vector<1x128xf32> to vector<40x128xf32>
    %28 = arith.addf %25, %27 : vector<40x128xf32>
    %29 = arith.truncf %28 : vector<40x128xf32> to vector<40x128xbf16>
    %c0_10 = arith.constant 0 : index
    %c0_11 = arith.constant 0 : index
    %30 = vector.load %arg9[%c0_10, %c0_11] : memref<40x128xf32, #tpu.memory_space<vmem>>, vector<40x128xf32>
    %c0_12 = arith.constant 0 : index
    %c0_13 = arith.constant 0 : index
    %31 = vector.load %arg4[%c0_12, %c0_13] : memref<128x128xbf16, #tpu.memory_space<vmem>>, vector<128x128xbf16>
    %cst_14 = arith.constant dense<0.000000e+00> : vector<40x128xf32>
    %32 = tpu.matmul %29, %31, %cst_14 {dimension_numbers = #tpu.dot_dimension_numbers<[1], [0], [0], [1], [0, 0, 1, 1], [], []>} : vector<40x128xbf16>, vector<128x128xbf16>, vector<40x128xf32> -> vector<40x128xf32>
    %33 = arith.addf %30, %32 : vector<40x128xf32>
    %c0_15 = arith.constant 0 : index
    %c0_16 = arith.constant 0 : index
    %34 = vector.load %arg9[%c0_15, %c0_16] : memref<40x128xf32, #tpu.memory_space<vmem>>, vector<40x128xf32>
    tpu.vector_store %arg9[%c0_15, %c0_16], %33 {strides = array<i32>} : memref<40x128xf32, #tpu.memory_space<vmem>>, vector<40x128xf32>,
    %c0_i32_17 = arith.constant 0 : i32
    %35 = arith.cmpi eq, %arg2, %c0_i32_17 : i32
    %36 = arith.extui %35 : i1 to i32
    %c0_i32_18 = arith.constant 0 : i32
    %37 = arith.cmpi ne, %36, %c0_i32_18 : i32
    scf.if %37 {
      %c0_19 = arith.constant 0 : index
      %c0_20 = arith.constant 0 : index
      %38 = vector.load %arg9[%c0_19, %c0_20] : memref<40x128xf32, #tpu.memory_space<vmem>>, vector<40x128xf32>
      %c0_21 = arith.constant 0 : index
      %c0_22 = arith.constant 0 : index
      %39 = vector.load %arg5[%c0_21, %c0_22] : memref<1x128xf32, #tpu.memory_space<vmem>>, vector<1x128xf32>
      %40 = vector.broadcast %39 : vector<1x128xf32> to vector<40x128xf32>
      %41 = arith.addf %38, %40 : vector<40x128xf32>
      %42 = arith.truncf %41 : vector<40x128xf32> to vector<40x128xbf16>
      %c0_23 = arith.constant 0 : index
      %c0_24 = arith.constant 0 : index
      %43 = vector.load %arg8[%c0_23, %c0_24] : memref<40x128xbf16, #tpu.memory_space<vmem>>, vector<40x128xbf16>
      tpu.vector_store %arg8[%c0_23, %c0_24], %42 {strides = array<i32>} : memref<40x128xbf16, #tpu.memory_space<vmem>>, vector<40x128xbf16>,
    } else {
    }
    return
  }
  func.func @transform_0(%arg0: i32, %arg1: i32, %arg2: i32) -> (i32, i32) {
    %c0_i32 = arith.constant 0 : i32
    return %arg0, %arg2 : i32, i32
  }
  func.func @transform_1(%arg0: i32, %arg1: i32, %arg2: i32) -> (i32, i32) {
    %c0_i32 = arith.constant 0 : i32
    return %arg2, %arg1 : i32, i32
  }
  func.func @transform_2(%arg0: i32, %arg1: i32, %arg2: i32) -> (i32, i32) {
    %c0_i32 = arith.constant 0 : i32
    %c0_i32_0 = arith.constant 0 : i32
    return %c0_i32, %arg1 : i32, i32
  }
  func.func @transform_3(%arg0: i32, %arg1: i32, %arg2: i32) -> (i32, i32) {
    %c0_i32 = arith.constant 0 : i32
    %c0_i32_0 = arith.constant 0 : i32
    return %c0_i32, %arg2 : i32, i32
  }
  func.func @transform_4(%arg0: i32, %arg1: i32, %arg2: i32) -> (i32, i32) {
    %c0_i32 = arith.constant 0 : i32
    %c0_i32_0 = arith.constant 0 : i32
    return %c0_i32, %arg2 : i32, i32
  }
  func.func @transform_5(%arg0: i32, %arg1: i32, %arg2: i32) -> (i32, i32) {
    %c0_i32 = arith.constant 0 : i32
    return %arg0, %arg1 : i32, i32
  }
}

module attributes {stable_mosaic.version = 11 : i64} {
  func.func @_attn_kernel(%arg0: i32, %arg1: memref<8x5x8xbf16, #tpu.memory_space<vmem>>, %arg2: memref<8x5x8xbf16, #tpu.memory_space<vmem>>, %arg3: memref<8x5x8xbf16, #tpu.memory_space<vmem>>, %arg4: memref<8x5x8xbf16, #tpu.memory_space<vmem>>) attributes {dimension_semantics = [#tpu.dimension_semantics<parallel>], iteration_bounds = array<i64: 4>, scalar_prefetch = 0 : i64, scratch_operands = 0 : i64, tpu.core_type = #tpu.core_type<tc>, window_params = [{transform_indices = @transform_0, window_bounds = array<i64: 8, 5, 8>}, {transform_indices = @transform_1, window_bounds = array<i64: 8, 5, 8>}, {transform_indices = @transform_2, window_bounds = array<i64: 8, 5, 8>}, {transform_indices = @transform_3, window_bounds = array<i64: 8, 5, 8>}]} {
    %c0 = arith.constant 0 : index
    %c0_0 = arith.constant 0 : index
    %c0_1 = arith.constant 0 : index
    %0 = vector.load %arg1[%c0, %c0_0, %c0_1] : memref<8x5x8xbf16, #tpu.memory_space<vmem>>, vector<8x5x8xbf16>
    %1 = arith.extf %0 : vector<8x5x8xbf16> to vector<8x5x8xf32>
    %cst = arith.constant 0.353553385 : f32
    %2 = vector.broadcast %cst : f32 to vector<8x5x8xf32>
    %3 = arith.mulf %1, %2 : vector<8x5x8xf32>
    %4 = arith.truncf %3 : vector<8x5x8xf32> to vector<8x5x8xbf16>
    %c0_2 = arith.constant 0 : index
    %c0_3 = arith.constant 0 : index
    %c0_4 = arith.constant 0 : index
    %5 = vector.load %arg2[%c0_2, %c0_3, %c0_4] : memref<8x5x8xbf16, #tpu.memory_space<vmem>>, vector<8x5x8xbf16>
    %cst_5 = arith.constant dense<0.000000e+00> : vector<8x5x5xf32>
    %6 = tpu.matmul %4, %5, %cst_5 {dimension_numbers = #tpu.dot_dimension_numbers<[2], [2], [1], [1], [0, 0, 0, 1, 1, 1], [0], [0]>} : vector<8x5x8xbf16>, vector<8x5x8xbf16>, vector<8x5x5xf32> -> vector<8x5x5xf32>
    %cst_6 = arith.constant dense<0xFF800000> : vector<8x5xf32>
    %7 = vector.multi_reduction <maximumf>, %6, %cst_6 [2] : vector<8x5x5xf32> to vector<8x5xf32>
    %8 = vector.shape_cast %7 : vector<8x5xf32> to vector<8x5x1xf32>
    %9 = vector.broadcast %8 : vector<8x5x1xf32> to vector<8x5x5xf32>
    %10 = arith.subf %6, %9 : vector<8x5x5xf32>
    %11 = math.exp %10 : vector<8x5x5xf32>
    %cst_7 = arith.constant dense<0.000000e+00> : vector<8x5xf32>
    %12 = vector.multi_reduction <add>, %11, %cst_7 [2] : vector<8x5x5xf32> to vector<8x5xf32>
    %13 = vector.shape_cast %12 : vector<8x5xf32> to vector<8x5x1xf32>
    %14 = tpu.reciprocal %13 : vector<8x5x1xf32> -> vector<8x5x1xf32>
    %15 = vector.broadcast %14 : vector<8x5x1xf32> to vector<8x5x5xf32>
    %16 = arith.mulf %11, %15 : vector<8x5x5xf32>
    %17 = arith.truncf %16 : vector<8x5x5xf32> to vector<8x5x5xbf16>
    %c0_8 = arith.constant 0 : index
    %c0_9 = arith.constant 0 : index
    %c0_10 = arith.constant 0 : index
    %18 = vector.load %arg3[%c0_8, %c0_9, %c0_10] : memref<8x5x8xbf16, #tpu.memory_space<vmem>>, vector<8x5x8xbf16>
    %cst_11 = arith.constant dense<0.000000e+00> : vector<8x5x8xf32>
    %19 = tpu.matmul %17, %18, %cst_11 {dimension_numbers = #tpu.dot_dimension_numbers<[2], [1], [1], [2], [0, 0, 0, 1, 1, 2], [0], [0]>} : vector<8x5x5xbf16>, vector<8x5x8xbf16>, vector<8x5x8xf32> -> vector<8x5x8xf32>
    %20 = arith.truncf %19 : vector<8x5x8xf32> to vector<8x5x8xbf16>
    %c0_12 = arith.constant 0 : index
    %c0_13 = arith.constant 0 : index
    %c0_14 = arith.constant 0 : index
    %21 = vector.load %arg4[%c0_12, %c0_13, %c0_14] : memref<8x5x8xbf16, #tpu.memory_space<vmem>>, vector<8x5x8xbf16>
    tpu.vector_store %arg4[%c0_12, %c0_13, %c0_14], %20 {strides = array<i32>} : memref<8x5x8xbf16, #tpu.memory_space<vmem>>, vector<8x5x8xbf16>,
    return
  }
  func.func @transform_0(%arg0: i32) -> (i32, i32, i32) {
    %c0_i32 = arith.constant 0 : i32
    %c0_i32_0 = arith.constant 0 : i32
    %c0_i32_1 = arith.constant 0 : i32
    return %arg0, %c0_i32, %c0_i32_0 : i32, i32, i32
  }
  func.func @transform_1(%arg0: i32) -> (i32, i32, i32) {
    %c0_i32 = arith.constant 0 : i32
    %c0_i32_0 = arith.constant 0 : i32
    %c0_i32_1 = arith.constant 0 : i32
    return %arg0, %c0_i32, %c0_i32_0 : i32, i32, i32
  }
  func.func @transform_2(%arg0: i32) -> (i32, i32, i32) {
    %c0_i32 = arith.constant 0 : i32
    %c0_i32_0 = arith.constant 0 : i32
    %c0_i32_1 = arith.constant 0 : i32
    return %arg0, %c0_i32, %c0_i32_0 : i32, i32, i32
  }
  func.func @transform_3(%arg0: i32) -> (i32, i32, i32) {
    %c0_i32 = arith.constant 0 : i32
    %c0_i32_0 = arith.constant 0 : i32
    %c0_i32_1 = arith.constant 0 : i32
    return %arg0, %c0_i32, %c0_i32_0 : i32, i32, i32
  }
}

module attributes {stable_mosaic.version = 11 : i64} {
  func.func @_mm_kernel(%arg0: i32, %arg1: i32, %arg2: i32, %arg3: memref<40x128xbf16, #tpu.memory_space<vmem>>, %arg4: memref<128x128xbf16, #tpu.memory_space<vmem>>, %arg5: memref<1x128xf32, #tpu.memory_space<vmem>>, %arg6: memref<40x128xbf16, #tpu.memory_space<vmem>>, %arg7: memref<40x128xf32, #tpu.memory_space<vmem>>, %arg8: memref<40x128xf32, #tpu.memory_space<vmem>>) attributes {dimension_semantics = [#tpu.dimension_semantics<parallel>, #tpu.dimension_semantics<parallel>, #tpu.dimension_semantics<arbitrary>], iteration_bounds = array<i64: 1, 1, 1>, scalar_prefetch = 0 : i64, scratch_operands = 1 : i64, tpu.core_type = #tpu.core_type<tc>, window_params = [{transform_indices = @transform_0, window_bounds = array<i64: 40, 128>}, {transform_indices = @transform_1, window_bounds = array<i64: 128, 128>}, {transform_indices = @transform_2, window_bounds = array<i64: 1, 128>}, {transform_indices = @transform_3, window_bounds = array<i64: 40, 128>}, {transform_indices = @transform_4, window_bounds = array<i64: 40, 128>}]} {
    %c0_i32 = arith.constant 0 : i32
    %0 = arith.cmpi eq, %arg2, %c0_i32 : i32
    %1 = arith.extui %0 : i1 to i32
    %c0_i32_0 = arith.constant 0 : i32
    %2 = arith.cmpi ne, %1, %c0_i32_0 : i32
    scf.if %2 {
      %cst_10 = arith.constant 0.000000e+00 : f32
      %12 = vector.broadcast %cst_10 : f32 to vector<40x128xf32>
      %c0_11 = arith.constant 0 : index
      %c0_12 = arith.constant 0 : index
      %13 = vector.load %arg8[%c0_11, %c0_12] : memref<40x128xf32, #tpu.memory_space<vmem>>, vector<40x128xf32>
      tpu.vector_store %arg8[%c0_11, %c0_12], %12 {strides = array<i32>} : memref<40x128xf32, #tpu.memory_space<vmem>>, vector<40x128xf32>,
    } else {
    }
    %c0 = arith.constant 0 : index
    %c0_1 = arith.constant 0 : index
    %3 = vector.load %arg3[%c0, %c0_1] : memref<40x128xbf16, #tpu.memory_space<vmem>>, vector<40x128xbf16>
    %c0_2 = arith.constant 0 : index
    %c0_3 = arith.constant 0 : index
    %4 = vector.load %arg8[%c0_2, %c0_3] : memref<40x128xf32, #tpu.memory_space<vmem>>, vector<40x128xf32>
    %c0_4 = arith.constant 0 : index
    %c0_5 = arith.constant 0 : index
    %5 = vector.load %arg4[%c0_4, %c0_5] : memref<128x128xbf16, #tpu.memory_space<vmem>>, vector<128x128xbf16>
    %cst = arith.constant dense<0.000000e+00> : vector<40x128xf32>
    %6 = tpu.matmul %3, %5, %cst {dimension_numbers = #tpu.dot_dimension_numbers<[1], [0], [0], [1], [0, 0, 1, 1], [], []>} : vector<40x128xbf16>, vector<128x128xbf16>, vector<40x128xf32> -> vector<40x128xf32>
    %7 = arith.addf %4, %6 : vector<40x128xf32>
    %c0_6 = arith.constant 0 : index
    %c0_7 = arith.constant 0 : index
    %8 = vector.load %arg8[%c0_6, %c0_7] : memref<40x128xf32, #tpu.memory_space<vmem>>, vector<40x128xf32>
    tpu.vector_store %arg8[%c0_6, %c0_7], %7 {strides = array<i32>} : memref<40x128xf32, #tpu.memory_space<vmem>>, vector<40x128xf32>,
    %c0_i32_8 = arith.constant 0 : i32
    %9 = arith.cmpi eq, %arg2, %c0_i32_8 : i32
    %10 = arith.extui %9 : i1 to i32
    %c0_i32_9 = arith.constant 0 : i32
    %11 = arith.cmpi ne, %10, %c0_i32_9 : i32
    scf.if %11 {
      %c0_10 = arith.constant 0 : index
      %c0_11 = arith.constant 0 : index
      %12 = vector.load %arg8[%c0_10, %c0_11] : memref<40x128xf32, #tpu.memory_space<vmem>>, vector<40x128xf32>
      %c0_12 = arith.constant 0 : index
      %c0_13 = arith.constant 0 : index
      %13 = vector.load %arg5[%c0_12, %c0_13] : memref<1x128xf32, #tpu.memory_space<vmem>>, vector<1x128xf32>
      %14 = vector.broadcast %13 : vector<1x128xf32> to vector<40x128xf32>
      %15 = arith.addf %12, %14 : vector<40x128xf32>
      %c0_14 = arith.constant 0 : index
      %c0_15 = arith.constant 0 : index
      %16 = vector.load %arg6[%c0_14, %c0_15] : memref<40x128xbf16, #tpu.memory_space<vmem>>, vector<40x128xbf16>
      %17 = arith.extf %16 : vector<40x128xbf16> to vector<40x128xf32>
      %18 = arith.addf %15, %17 : vector<40x128xf32>
      %c0_16 = arith.constant 0 : index
      %c0_17 = arith.constant 0 : index
      %19 = vector.load %arg7[%c0_16, %c0_17] : memref<40x128xf32, #tpu.memory_space<vmem>>, vector<40x128xf32>
      tpu.vector_store %arg7[%c0_16, %c0_17], %18 {strides = array<i32>} : memref<40x128xf32, #tpu.memory_space<vmem>>, vector<40x128xf32>,
    } else {
    }
    return
  }
  func.func @transform_0(%arg0: i32, %arg1: i32, %arg2: i32) -> (i32, i32) {
    %c0_i32 = arith.constant 0 : i32
    return %arg0, %arg2 : i32, i32
  }
  func.func @transform_1(%arg0: i32, %arg1: i32, %arg2: i32) -> (i32, i32) {
    %c0_i32 = arith.constant 0 : i32
    return %arg2, %arg1 : i32, i32
  }
  func.func @transform_2(%arg0: i32, %arg1: i32, %arg2: i32) -> (i32, i32) {
    %c0_i32 = arith.constant 0 : i32
    %c0_i32_0 = arith.constant 0 : i32
    return %c0_i32, %arg1 : i32, i32
  }
  func.func @transform_3(%arg0: i32, %arg1: i32, %arg2: i32) -> (i32, i32) {
    %c0_i32 = arith.constant 0 : i32
    return %arg0, %arg1 : i32, i32
  }
  func.func @transform_4(%arg0: i32, %arg1: i32, %arg2: i32) -> (i32, i32) {
    %c0_i32 = arith.constant 0 : i32
    return %arg0, %arg1 : i32, i32
  }
}

module attributes {stable_mosaic.version = 11 : i64} {
  func.func @_mm_kernel(%arg0: i32, %arg1: i32, %arg2: i32, %arg3: memref<40x128xf32, #tpu.memory_space<vmem>>, %arg4: memref<128x128xbf16, #tpu.memory_space<vmem>>, %arg5: memref<1x128xf32, #tpu.memory_space<vmem>>, %arg6: memref<1x128xf32, #tpu.memory_space<vmem>>, %arg7: memref<1x128xf32, #tpu.memory_space<vmem>>, %arg8: memref<40x128xbf16, #tpu.memory_space<vmem>>, %arg9: memref<40x128xf32, #tpu.memory_space<vmem>>) attributes {dimension_semantics = [#tpu.dimension_semantics<parallel>, #tpu.dimension_semantics<parallel>, #tpu.dimension_semantics<arbitrary>], iteration_bounds = array<i64: 1, 1, 1>, scalar_prefetch = 0 : i64, scratch_operands = 1 : i64, tpu.core_type = #tpu.core_type<tc>, window_params = [{transform_indices = @transform_0, window_bounds = array<i64: 40, 128>}, {transform_indices = @transform_1, window_bounds = array<i64: 128, 128>}, {transform_indices = @transform_2, window_bounds = array<i64: 1, 128>}, {transform_indices = @transform_3, window_bounds = array<i64: 1, 128>}, {transform_indices = @transform_4, window_bounds = array<i64: 1, 128>}, {transform_indices = @transform_5, window_bounds = array<i64: 40, 128>}]} {
    %c0_i32 = arith.constant 0 : i32
    %0 = arith.cmpi eq, %arg2, %c0_i32 : i32
    %1 = arith.extui %0 : i1 to i32
    %c0_i32_0 = arith.constant 0 : i32
    %2 = arith.cmpi ne, %1, %c0_i32_0 : i32
    scf.if %2 {
      %cst_19 = arith.constant 0.000000e+00 : f32
      %37 = vector.broadcast %cst_19 : f32 to vector<40x128xf32>
      %c0_20 = arith.constant 0 : index
      %c0_21 = arith.constant 0 : index
      %38 = vector.load %arg9[%c0_20, %c0_21] : memref<40x128xf32, #tpu.memory_space<vmem>>, vector<40x128xf32>
      tpu.vector_store %arg9[%c0_20, %c0_21], %37 {strides = array<i32>} : memref<40x128xf32, #tpu.memory_space<vmem>>, vector<40x128xf32>,
    } else {
    }
    %c0 = arith.constant 0 : index
    %c0_1 = arith.constant 0 : index
    %3 = vector.load %arg3[%c0, %c0_1] : memref<40x128xf32, #tpu.memory_space<vmem>>, vector<40x128xf32>
    %cst = arith.constant dense<0.000000e+00> : vector<40xf32>
    %4 = vector.multi_reduction <add>, %3, %cst [1] : vector<40x128xf32> to vector<40xf32>
    %5 = vector.shape_cast %4 : vector<40xf32> to vector<40x1xf32>
    %cst_2 = arith.constant 3.125000e-02 : f32
    %6 = vector.broadcast %cst_2 : f32 to vector<40x1xf32>
    %7 = arith.mulf %5, %6 : vector<40x1xf32>
    %8 = arith.mulf %3, %3 : vector<40x128xf32>
    %cst_3 = arith.constant dense<0.000000e+00> : vector<40xf32>
    %9 = vector.multi_reduction <add>, %8, %cst_3 [1] : vector<40x128xf32> to vector<40xf32>
    %10 = vector.shape_cast %9 : vector<40xf32> to vector<40x1xf32>
    %cst_4 = arith.constant 3.125000e-02 : f32
    %11 = vector.broadcast %cst_4 : f32 to vector<40x1xf32>
    %12 = arith.mulf %10, %11 : vector<40x1xf32>
    %13 = arith.mulf %7, %7 : vector<40x1xf32>
    %14 = arith.subf %12, %13 : vector<40x1xf32>
    %15 = vector.broadcast %7 : vector<40x1xf32> to vector<40x128xf32>
    %16 = arith.subf %3, %15 : vector<40x128xf32>
    %cst_5 = arith.constant 9.99999974E-6 : f32
    %17 = vector.broadcast %cst_5 : f32 to vector<40x1xf32>
    %18 = arith.addf %14, %17 : vector<40x1xf32>
    %19 = math.rsqrt %18 : vector<40x1xf32>
    %20 = vector.broadcast %19 : vector<40x1xf32> to vector<40x128xf32>
    %21 = arith.mulf %16, %20 : vector<40x128xf32>
    %c0_6 = arith.constant 0 : index
    %c0_7 = arith.constant 0 : index
    %22 = vector.load %arg6[%c0_6, %c0_7] : memref<1x128xf32, #tpu.memory_space<vmem>>, vector<1x128xf32>
    %23 = vector.broadcast %22 : vector<1x128xf32> to vector<40x128xf32>
    %24 = arith.mulf %21, %23 : vector<40x128xf32>
    %c0_8 = arith.constant 0 : index
    %c0_9 = arith.constant 0 : index
    %25 = vector.load %arg7[%c0_8, %c0_9] : memref<1x128xf32, #tpu.memory_space<vmem>>, vector<1x128xf32>
    %26 = vector.broadcast %25 : vector<1x128xf32> to vector<40x128xf32>
    %27 = arith.addf %24, %26 : vector<40x128xf32>
    %28 = arith.truncf %27 : vector<40x128xf32> to vector<40x128xbf16>
    %c0_10 = arith.constant 0 : index
    %c0_11 = arith.constant 0 : index
    %29 = vector.load %arg9[%c0_10, %c0_11] : memref<40x128xf32, #tpu.memory_space<vmem>>, vector<40x128xf32>
    %c0_12 = arith.constant 0 : index
    %c0_13 = arith.constant 0 : index
    %30 = vector.load %arg4[%c0_12, %c0_13] : memref<128x128xbf16, #tpu.memory_space<vmem>>, vector<128x128xbf16>
    %cst_14 = arith.constant dense<0.000000e+00> : vector<40x128xf32>
    %31 = tpu.matmul %28, %30, %cst_14 {dimension_numbers = #tpu.dot_dimension_numbers<[1], [0], [0], [1], [0, 0, 1, 1], [], []>} : vector<40x128xbf16>, vector<128x128xbf16>, vector<40x128xf32> -> vector<40x128xf32>
    %32 = arith.addf %29, %31 : vector<40x128xf32>
    %c0_15 = arith.constant 0 : index
    %c0_16 = arith.constant 0 : index
    %33 = vector.load %arg9[%c0_15, %c0_16] : memref<40x128xf32, #tpu.memory_space<vmem>>, vector<40x128xf32>
    tpu.vector_store %arg9[%c0_15, %c0_16], %32 {strides = array<i32>} : memref<40x128xf32, #tpu.memory_space<vmem>>, vector<40x128xf32>,
    %c0_i32_17 = arith.constant 0 : i32
    %34 = arith.cmpi eq, %arg2, %c0_i32_17 : i32
    %35 = arith.extui %34 : i1 to i32
    %c0_i32_18 = arith.constant 0 : i32
    %36 = arith.cmpi ne, %35, %c0_i32_18 : i32
    scf.if %36 {
      %c0_19 = arith.constant 0 : index
      %c0_20 = arith.constant 0 : index
      %37 = vector.load %arg9[%c0_19, %c0_20] : memref<40x128xf32, #tpu.memory_space<vmem>>, vector<40x128xf32>
      %c0_21 = arith.constant 0 : index
      %c0_22 = arith.constant 0 : index
      %38 = vector.load %arg5[%c0_21, %c0_22] : memref<1x128xf32, #tpu.memory_space<vmem>>, vector<1x128xf32>
      %39 = vector.broadcast %38 : vector<1x128xf32> to vector<40x128xf32>
      %40 = arith.addf %37, %39 : vector<40x128xf32>
      %cst_23 = arith.constant 0.707106769 : f32
      %41 = vector.broadcast %cst_23 : f32 to vector<40x128xf32>
      %42 = arith.mulf %40, %41 : vector<40x128xf32>
      %43 = math.absf %42 : vector<40x128xf32>
      %cst_24 = arith.constant 0.327591091 : f32
      %44 = vector.broadcast %cst_24 : f32 to vector<40x128xf32>
      %45 = arith.mulf %44, %43 : vector<40x128xf32>
      %cst_25 = arith.constant 1.000000e+00 : f32
      %46 = vector.broadcast %cst_25 : f32 to vector<40x128xf32>
      %47 = arith.addf %46, %45 : vector<40x128xf32>
      %cst_26 = arith.constant 1.000000e+00 : f32
      %48 = vector.broadcast %cst_26 : f32 to vector<40x128xf32>
      %49 = arith.divf %48, %47 : vector<40x128xf32>
      %cst_27 = arith.constant 1.06140542 : f32
      %50 = vector.broadcast %cst_27 : f32 to vector<40x128xf32>
      %51 = arith.mulf %49, %50 : vector<40x128xf32>
      %cst_28 = arith.constant -1.45315206 : f32
      %52 = vector.broadcast %cst_28 : f32 to vector<40x128xf32>
      %53 = arith.addf %52, %51 : vector<40x128xf32>
      %54 = arith.mulf %49, %53 : vector<40x128xf32>
      %cst_29 = arith.constant 1.42141378 : f32
      %55 = vector.broadcast %cst_29 : f32 to vector<40x128xf32>
      %56 = arith.addf %55, %54 : vector<40x128xf32>
      %57 = arith.mulf %49, %56 : vector<40x128xf32>
      %cst_30 = arith.constant -0.284496725 : f32
      %58 = vector.broadcast %cst_30 : f32 to vector<40x128xf32>
      %59 = arith.addf %58, %57 : vector<40x128xf32>
      %60 = arith.mulf %49, %59 : vector<40x128xf32>
      %cst_31 = arith.constant 0.254829586 : f32
      %61 = vector.broadcast %cst_31 : f32 to vector<40x128xf32>
      %62 = arith.addf %61, %60 : vector<40x128xf32>
      %63 = arith.mulf %49, %62 : vector<40x128xf32>
      %cst_32 = arith.constant 0.000000e+00 : f32
      %64 = vector.broadcast %cst_32 : f32 to vector<40x128xf32>
      %65 = arith.subf %64, %43 : vector<40x128xf32>
      %66 = arith.mulf %65, %43 : vector<40x128xf32>
      %67 = math.exp %66 : vector<40x128xf32>
      %68 = arith.mulf %63, %67 : vector<40x128xf32>
      %cst_33 = arith.constant 1.000000e+00 : f32
      %69 = vector.broadcast %cst_33 : f32 to vector<40x128xf32>
      %70 = arith.subf %69, %68 : vector<40x128xf32>
      %cst_34 = arith.constant 0.000000e+00 : f32
      %71 = vector.broadcast %cst_34 : f32 to vector<40x128xf32>
      %72 = arith.cmpf oge, %42, %71 : vector<40x128xf32>
      %cst_35 = arith.constant 0.000000e+00 : f32
      %73 = vector.broadcast %cst_35 : f32 to vector<40x128xf32>
      %74 = arith.subf %73, %70 : vector<40x128xf32>
      %75 = arith.select %72, %70, %74 : vector<40x128xi1>, vector<40x128xf32>
      %cst_36 = arith.constant 5.000000e-01 : f32
      %76 = vector.broadcast %cst_36 : f32 to vector<40x128xf32>
      %77 = arith.mulf %76, %40 : vector<40x128xf32>
      %cst_37 = arith.constant 1.000000e+00 : f32
      %78 = vector.broadcast %cst_37 : f32 to vector<40x128xf32>
      %79 = arith.addf %78, %75 : vector<40x128xf32>
      %80 = arith.mulf %77, %79 : vector<40x128xf32>
      %81 = arith.truncf %80 : vector<40x128xf32> to vector<40x128xbf16>
      %c0_38 = arith.constant 0 : index
      %c0_39 = arith.constant 0 : index
      %82 = vector.load %arg8[%c0_38, %c0_39] : memref<40x128xbf16, #tpu.memory_space<vmem>>, vector<40x128xbf16>
      tpu.vector_store %arg8[%c0_38, %c0_39], %81 {strides = array<i32>} : memref<40x128xbf16, #tpu.memory_space<vmem>>, vector<40x128xbf16>,
    } else {
    }
    return
  }
  func.func @transform_0(%arg0: i32, %arg1: i32, %arg2: i32) -> (i32, i32) {
    %c0_i32 = arith.constant 0 : i32
    return %arg0, %arg2 : i32, i32
  }
  func.func @transform_1(%arg0: i32, %arg1: i32, %arg2: i32) -> (i32, i32) {
    %c0_i32 = arith.constant 0 : i32
    return %arg2, %arg1 : i32, i32
  }
  func.func @transform_2(%arg0: i32, %arg1: i32, %arg2: i32) -> (i32, i32) {
    %c0_i32 = arith.constant 0 : i32
    %c0_i32_0 = arith.constant 0 : i32
    return %c0_i32, %arg1 : i32, i32
  }
  func.func @transform_3(%arg0: i32, %arg1: i32, %arg2: i32) -> (i32, i32) {
    %c0_i32 = arith.constant 0 : i32
    %c0_i32_0 = arith.constant 0 : i32
    return %c0_i32, %arg2 : i32, i32
  }
  func.func @transform_4(%arg0: i32, %arg1: i32, %arg2: i32) -> (i32, i32) {
    %c0_i32 = arith.constant 0 : i32
    %c0_i32_0 = arith.constant 0 : i32
    return %c0_i32, %arg2 : i32, i32
  }
  func.func @transform_5(%arg0: i32, %arg1: i32, %arg2: i32) -> (i32, i32) {
    %c0_i32 = arith.constant 0 : i32
    return %arg0, %arg1 : i32, i32
  }
}

module attributes {stable_mosaic.version = 11 : i64} {
  func.func @_mm_kernel(%arg0: i32, %arg1: i32, %arg2: i32, %arg3: memref<40x128xbf16, #tpu.memory_space<vmem>>, %arg4: memref<128x128xbf16, #tpu.memory_space<vmem>>, %arg5: memref<1x128xf32, #tpu.memory_space<vmem>>, %arg6: memref<40x128xf32, #tpu.memory_space<vmem>>, %arg7: memref<40x128xbf16, #tpu.memory_space<vmem>>, %arg8: memref<40x128xf32, #tpu.memory_space<vmem>>) attributes {dimension_semantics = [#tpu.dimension_semantics<parallel>, #tpu.dimension_semantics<parallel>, #tpu.dimension_semantics<arbitrary>], iteration_bounds = array<i64: 1, 1, 1>, scalar_prefetch = 0 : i64, scratch_operands = 1 : i64, tpu.core_type = #tpu.core_type<tc>, window_params = [{transform_indices = @transform_0, window_bounds = array<i64: 40, 128>}, {transform_indices = @transform_1, window_bounds = array<i64: 128, 128>}, {transform_indices = @transform_2, window_bounds = array<i64: 1, 128>}, {transform_indices = @transform_3, window_bounds = array<i64: 40, 128>}, {transform_indices = @transform_4, window_bounds = array<i64: 40, 128>}]} {
    %c0_i32 = arith.constant 0 : i32
    %0 = arith.cmpi eq, %arg2, %c0_i32 : i32
    %1 = arith.extui %0 : i1 to i32
    %c0_i32_0 = arith.constant 0 : i32
    %2 = arith.cmpi ne, %1, %c0_i32_0 : i32
    scf.if %2 {
      %cst_10 = arith.constant 0.000000e+00 : f32
      %12 = vector.broadcast %cst_10 : f32 to vector<40x128xf32>
      %c0_11 = arith.constant 0 : index
      %c0_12 = arith.constant 0 : index
      %13 = vector.load %arg8[%c0_11, %c0_12] : memref<40x128xf32, #tpu.memory_space<vmem>>, vector<40x128xf32>
      tpu.vector_store %arg8[%c0_11, %c0_12], %12 {strides = array<i32>} : memref<40x128xf32, #tpu.memory_space<vmem>>, vector<40x128xf32>,
    } else {
    }
    %c0 = arith.constant 0 : index
    %c0_1 = arith.constant 0 : index
    %3 = vector.load %arg3[%c0, %c0_1] : memref<40x128xbf16, #tpu.memory_space<vmem>>, vector<40x128xbf16>
    %c0_2 = arith.constant 0 : index
    %c0_3 = arith.constant 0 : index
    %4 = vector.load %arg8[%c0_2, %c0_3] : memref<40x128xf32, #tpu.memory_space<vmem>>, vector<40x128xf32>
    %c0_4 = arith.constant 0 : index
    %c0_5 = arith.constant 0 : index
    %5 = vector.load %arg4[%c0_4, %c0_5] : memref<128x128xbf16, #tpu.memory_space<vmem>>, vector<128x128xbf16>
    %cst = arith.constant dense<0.000000e+00> : vector<40x128xf32>
    %6 = tpu.matmul %3, %5, %cst {dimension_numbers = #tpu.dot_dimension_numbers<[1], [0], [0], [1], [0, 0, 1, 1], [], []>} : vector<40x128xbf16>, vector<128x128xbf16>, vector<40x128xf32> -> vector<40x128xf32>
    %7 = arith.addf %4, %6 : vector<40x128xf32>
    %c0_6 = arith.constant 0 : index
    %c0_7 = arith.constant 0 : index
    %8 = vector.load %arg8[%c0_6, %c0_7] : memref<40x128xf32, #tpu.memory_space<vmem>>, vector<40x128xf32>
    tpu.vector_store %arg8[%c0_6, %c0_7], %7 {strides = array<i32>} : memref<40x128xf32, #tpu.memory_space<vmem>>, vector<40x128xf32>,
    %c0_i32_8 = arith.constant 0 : i32
    %9 = arith.cmpi eq, %arg2, %c0_i32_8 : i32
    %10 = arith.extui %9 : i1 to i32
    %c0_i32_9 = arith.constant 0 : i32
    %11 = arith.cmpi ne, %10, %c0_i32_9 : i32
    scf.if %11 {
      %c0_10 = arith.constant 0 : index
      %c0_11 = arith.constant 0 : index
      %12 = vector.load %arg8[%c0_10, %c0_11] : memref<40x128xf32, #tpu.memory_space<vmem>>, vector<40x128xf32>
      %c0_12 = arith.constant 0 : index
      %c0_13 = arith.constant 0 : index
      %13 = vector.load %arg5[%c0_12, %c0_13] : memref<1x128xf32, #tpu.memory_space<vmem>>, vector<1x128xf32>
      %14 = vector.broadcast %13 : vector<1x128xf32> to vector<40x128xf32>
      %15 = arith.addf %12, %14 : vector<40x128xf32>
      %c0_14 = arith.constant 0 : index
      %c0_15 = arith.constant 0 : index
      %16 = vector.load %arg6[%c0_14, %c0_15] : memref<40x128xf32, #tpu.memory_space<vmem>>, vector<40x128xf32>
      %17 = arith.addf %15, %16 : vector<40x128xf32>
      %18 = arith.truncf %17 : vector<40x128xf32> to vector<40x128xbf16>
      %c0_16 = arith.constant 0 : index
      %c0_17 = arith.constant 0 : index
      %19 = vector.load %arg7[%c0_16, %c0_17] : memref<40x128xbf16, #tpu.memory_space<vmem>>, vector<40x128xbf16>
      tpu.vector_store %arg7[%c0_16, %c0_17], %18 {strides = array<i32>} : memref<40x128xbf16, #tpu.memory_space<vmem>>, vector<40x128xbf16>,
    } else {
    }
    return
  }
  func.func @transform_0(%arg0: i32, %arg1: i32, %arg2: i32) -> (i32, i32) {
    %c0_i32 = arith.constant 0 : i32
    return %arg0, %arg2 : i32, i32
  }
  func.func @transform_1(%arg0: i32, %arg1: i32, %arg2: i32) -> (i32, i32) {
    %c0_i32 = arith.constant 0 : i32
    return %arg2, %arg1 : i32, i32
  }
  func.func @transform_2(%arg0: i32, %arg1: i32, %arg2: i32) -> (i32, i32) {
    %c0_i32 = arith.constant 0 : i32
    %c0_i32_0 = arith.constant 0 : i32
    return %c0_i32, %arg1 : i32, i32
  }
  func.func @transform_3(%arg0: i32, %arg1: i32, %arg2: i32) -> (i32, i32) {
    %c0_i32 = arith.constant 0 : i32
    return %arg0, %arg1 : i32, i32
  }
  func.func @transform_4(%arg0: i32, %arg1: i32, %arg2: i32) -> (i32, i32) {
    %c0_i32 = arith.constant 0 : i32
    return %arg0, %arg1 : i32, i32
  }
}

module attributes {stable_mosaic.version = 11 : i64} {
  func.func @_mm_kernel(%arg0: i32, %arg1: i32, %arg2: i32, %arg3: memref<8x128xbf16, #tpu.memory_space<vmem>>, %arg4: memref<128x128xbf16, #tpu.memory_space<vmem>>, %arg5: memref<1x128xf32, #tpu.memory_space<vmem>>, %arg6: memref<8x128xbf16, #tpu.memory_space<vmem>>, %arg7: memref<8x128xf32, #tpu.memory_space<vmem>>) attributes {dimension_semantics = [#tpu.dimension_semantics<parallel>, #tpu.dimension_semantics<parallel>, #tpu.dimension_semantics<arbitrary>], iteration_bounds = array<i64: 1, 1, 1>, scalar_prefetch = 0 : i64, scratch_operands = 1 : i64, tpu.core_type = #tpu.core_type<tc>, window_params = [{transform_indices = @transform_0, window_bounds = array<i64: 8, 128>}, {transform_indices = @transform_1, window_bounds = array<i64: 128, 128>}, {transform_indices = @transform_2, window_bounds = array<i64: 1, 128>}, {transform_indices = @transform_3, window_bounds = array<i64: 8, 128>}]} {
    %c0_i32 = arith.constant 0 : i32
    %0 = arith.cmpi eq, %arg2, %c0_i32 : i32
    %1 = arith.extui %0 : i1 to i32
    %c0_i32_0 = arith.constant 0 : i32
    %2 = arith.cmpi ne, %1, %c0_i32_0 : i32
    scf.if %2 {
      %cst_25 = arith.constant 0.000000e+00 : f32
      %54 = vector.broadcast %cst_25 : f32 to vector<8x128xf32>
      %c0_26 = arith.constant 0 : index
      %c0_27 = arith.constant 0 : index
      %55 = vector.load %arg7[%c0_26, %c0_27] : memref<8x128xf32, #tpu.memory_space<vmem>>, vector<8x128xf32>
      tpu.vector_store %arg7[%c0_26, %c0_27], %54 {strides = array<i32>} : memref<8x128xf32, #tpu.memory_space<vmem>>, vector<8x128xf32>,
    } else {
    }
    %c0 = arith.constant 0 : index
    %c0_1 = arith.constant 0 : index
    %3 = vector.load %arg3[%c0, %c0_1] : memref<8x128xbf16, #tpu.memory_space<vmem>>, vector<8x128xbf16>
    %4 = arith.extf %3 : vector<8x128xbf16> to vector<8x128xf32>
    %cst = arith.constant 0.707106769 : f32
    %5 = vector.broadcast %cst : f32 to vector<8x128xf32>
    %6 = arith.mulf %4, %5 : vector<8x128xf32>
    %7 = math.absf %6 : vector<8x128xf32>
    %cst_2 = arith.constant 0.327591091 : f32
    %8 = vector.broadcast %cst_2 : f32 to vector<8x128xf32>
    %9 = arith.mulf %8, %7 : vector<8x128xf32>
    %cst_3 = arith.constant 1.000000e+00 : f32
    %10 = vector.broadcast %cst_3 : f32 to vector<8x128xf32>
    %11 = arith.addf %10, %9 : vector<8x128xf32>
    %cst_4 = arith.constant 1.000000e+00 : f32
    %12 = vector.broadcast %cst_4 : f32 to vector<8x128xf32>
    %13 = arith.divf %12, %11 : vector<8x128xf32>
    %cst_5 = arith.constant 1.06140542 : f32
    %14 = vector.broadcast %cst_5 : f32 to vector<8x128xf32>
    %15 = arith.mulf %13, %14 : vector<8x128xf32>
    %cst_6 = arith.constant -1.45315206 : f32
    %16 = vector.broadcast %cst_6 : f32 to vector<8x128xf32>
    %17 = arith.addf %16, %15 : vector<8x128xf32>
    %18 = arith.mulf %13, %17 : vector<8x128xf32>
    %cst_7 = arith.constant 1.42141378 : f32
    %19 = vector.broadcast %cst_7 : f32 to vector<8x128xf32>
    %20 = arith.addf %19, %18 : vector<8x128xf32>
    %21 = arith.mulf %13, %20 : vector<8x128xf32>
    %cst_8 = arith.constant -0.284496725 : f32
    %22 = vector.broadcast %cst_8 : f32 to vector<8x128xf32>
    %23 = arith.addf %22, %21 : vector<8x128xf32>
    %24 = arith.mulf %13, %23 : vector<8x128xf32>
    %cst_9 = arith.constant 0.254829586 : f32
    %25 = vector.broadcast %cst_9 : f32 to vector<8x128xf32>
    %26 = arith.addf %25, %24 : vector<8x128xf32>
    %27 = arith.mulf %13, %26 : vector<8x128xf32>
    %cst_10 = arith.constant 0.000000e+00 : f32
    %28 = vector.broadcast %cst_10 : f32 to vector<8x128xf32>
    %29 = arith.subf %28, %7 : vector<8x128xf32>
    %30 = arith.mulf %29, %7 : vector<8x128xf32>
    %31 = math.exp %30 : vector<8x128xf32>
    %32 = arith.mulf %27, %31 : vector<8x128xf32>
    %cst_11 = arith.constant 1.000000e+00 : f32
    %33 = vector.broadcast %cst_11 : f32 to vector<8x128xf32>
    %34 = arith.subf %33, %32 : vector<8x128xf32>
    %cst_12 = arith.constant 0.000000e+00 : f32
    %35 = vector.broadcast %cst_12 : f32 to vector<8x128xf32>
    %36 = arith.cmpf oge, %6, %35 : vector<8x128xf32>
    %cst_13 = arith.constant 0.000000e+00 : f32
    %37 = vector.broadcast %cst_13 : f32 to vector<8x128xf32>
    %38 = arith.subf %37, %34 : vector<8x128xf32>
    %39 = arith.select %36, %34, %38 : vector<8x128xi1>, vector<8x128xf32>
    %cst_14 = arith.constant 5.000000e-01 : f32
    %40 = vector.broadcast %cst_14 : f32 to vector<8x128xf32>
    %41 = arith.mulf %40, %4 : vector<8x128xf32>
    %cst_15 = arith.constant 1.000000e+00 : f32
    %42 = vector.broadcast %cst_15 : f32 to vector<8x128xf32>
    %43 = arith.addf %42, %39 : vector<8x128xf32>
    %44 = arith.mulf %41, %43 : vector<8x128xf32>
    %45 = arith.truncf %44 : vector<8x128xf32> to vector<8x128xbf16>
    %c0_16 = arith.constant 0 : index
    %c0_17 = arith.constant 0 : index
    %46 = vector.load %arg7[%c0_16, %c0_17] : memref<8x128xf32, #tpu.memory_space<vmem>>, vector<8x128xf32>
    %c0_18 = arith.constant 0 : index
    %c0_19 = arith.constant 0 : index
    %47 = vector.load %arg4[%c0_18, %c0_19] : memref<128x128xbf16, #tpu.memory_space<vmem>>, vector<128x128xbf16>
    %cst_20 = arith.constant dense<0.000000e+00> : vector<8x128xf32>
    %48 = tpu.matmul %45, %47, %cst_20 {dimension_numbers = #tpu.dot_dimension_numbers<[1], [0], [0], [1], [0, 0, 1, 1], [], []>} : vector<8x128xbf16>, vector<128x128xbf16>, vector<8x128xf32> -> vector<8x128xf32>
    %49 = arith.addf %46, %48 : vector<8x128xf32>
    %c0_21 = arith.constant 0 : index
    %c0_22 = arith.constant 0 : index
    %50 = vector.load %arg7[%c0_21, %c0_22] : memref<8x128xf32, #tpu.memory_space<vmem>>, vector<8x128xf32>
    tpu.vector_store %arg7[%c0_21, %c0_22], %49 {strides = array<i32>} : memref<8x128xf32, #tpu.memory_space<vmem>>, vector<8x128xf32>,
    %c0_i32_23 = arith.constant 0 : i32
    %51 = arith.cmpi eq, %arg2, %c0_i32_23 : i32
    %52 = arith.extui %51 : i1 to i32
    %c0_i32_24 = arith.constant 0 : i32
    %53 = arith.cmpi ne, %52, %c0_i32_24 : i32
    scf.if %53 {
      %c0_25 = arith.constant 0 : index
      %c0_26 = arith.constant 0 : index
      %54 = vector.load %arg7[%c0_25, %c0_26] : memref<8x128xf32, #tpu.memory_space<vmem>>, vector<8x128xf32>
      %c0_27 = arith.constant 0 : index
      %c0_28 = arith.constant 0 : index
      %55 = vector.load %arg5[%c0_27, %c0_28] : memref<1x128xf32, #tpu.memory_space<vmem>>, vector<1x128xf32>
      %56 = vector.broadcast %55 : vector<1x128xf32> to vector<8x128xf32>
      %57 = arith.addf %54, %56 : vector<8x128xf32>
      %58 = arith.truncf %57 : vector<8x128xf32> to vector<8x128xbf16>
      %c0_29 = arith.constant 0 : index
      %c0_30 = arith.constant 0 : index
      %59 = vector.load %arg6[%c0_29, %c0_30] : memref<8x128xbf16, #tpu.memory_space<vmem>>, vector<8x128xbf16>
      tpu.vector_store %arg6[%c0_29, %c0_30], %58 {strides = array<i32>} : memref<8x128xbf16, #tpu.memory_space<vmem>>, vector<8x128xbf16>,
    } else {
    }
    return
  }
  func.func @transform_0(%arg0: i32, %arg1: i32, %arg2: i32) -> (i32, i32) {
    %c0_i32 = arith.constant 0 : i32
    return %arg0, %arg2 : i32, i32
  }
  func.func @transform_1(%arg0: i32, %arg1: i32, %arg2: i32) -> (i32, i32) {
    %c0_i32 = arith.constant 0 : i32
    return %arg2, %arg1 : i32, i32
  }
  func.func @transform_2(%arg0: i32, %arg1: i32, %arg2: i32) -> (i32, i32) {
    %c0_i32 = arith.constant 0 : i32
    %c0_i32_0 = arith.constant 0 : i32
    return %c0_i32, %arg1 : i32, i32
  }
  func.func @transform_3(%arg0: i32, %arg1: i32, %arg2: i32) -> (i32, i32) {
    %c0_i32 = arith.constant 0 : i32
    return %arg0, %arg1 : i32, i32
  }
}

module attributes {stable_mosaic.version = 11 : i64} {
  func.func @_mm_kernel(%arg0: i32, %arg1: i32, %arg2: i32, %arg3: memref<8x128xbf16, #tpu.memory_space<vmem>>, %arg4: memref<128x128xbf16, #tpu.memory_space<vmem>>, %arg5: memref<1x128xf32, #tpu.memory_space<vmem>>, %arg6: memref<1x128xf32, #tpu.memory_space<vmem>>, %arg7: memref<1x128xf32, #tpu.memory_space<vmem>>, %arg8: memref<8x128xbf16, #tpu.memory_space<vmem>>, %arg9: memref<8x128xf32, #tpu.memory_space<vmem>>) attributes {dimension_semantics = [#tpu.dimension_semantics<parallel>, #tpu.dimension_semantics<parallel>, #tpu.dimension_semantics<arbitrary>], iteration_bounds = array<i64: 1, 1, 1>, scalar_prefetch = 0 : i64, scratch_operands = 1 : i64, tpu.core_type = #tpu.core_type<tc>, window_params = [{transform_indices = @transform_0, window_bounds = array<i64: 8, 128>}, {transform_indices = @transform_1, window_bounds = array<i64: 128, 128>}, {transform_indices = @transform_2, window_bounds = array<i64: 1, 128>}, {transform_indices = @transform_3, window_bounds = array<i64: 1, 128>}, {transform_indices = @transform_4, window_bounds = array<i64: 1, 128>}, {transform_indices = @transform_5, window_bounds = array<i64: 8, 128>}]} {
    %c0_i32 = arith.constant 0 : i32
    %0 = arith.cmpi eq, %arg2, %c0_i32 : i32
    %1 = arith.extui %0 : i1 to i32
    %c0_i32_0 = arith.constant 0 : i32
    %2 = arith.cmpi ne, %1, %c0_i32_0 : i32
    scf.if %2 {
      %cst_19 = arith.constant 0.000000e+00 : f32
      %38 = vector.broadcast %cst_19 : f32 to vector<8x128xf32>
      %c0_20 = arith.constant 0 : index
      %c0_21 = arith.constant 0 : index
      %39 = vector.load %arg9[%c0_20, %c0_21] : memref<8x128xf32, #tpu.memory_space<vmem>>, vector<8x128xf32>
      tpu.vector_store %arg9[%c0_20, %c0_21], %38 {strides = array<i32>} : memref<8x128xf32, #tpu.memory_space<vmem>>, vector<8x128xf32>,
    } else {
    }
    %c0 = arith.constant 0 : index
    %c0_1 = arith.constant 0 : index
    %3 = vector.load %arg3[%c0, %c0_1] : memref<8x128xbf16, #tpu.memory_space<vmem>>, vector<8x128xbf16>
    %4 = arith.extf %3 : vector<8x128xbf16> to vector<8x128xf32>
    %cst = arith.constant dense<0.000000e+00> : vector<8xf32>
    %5 = vector.multi_reduction <add>, %4, %cst [1] : vector<8x128xf32> to vector<8xf32>
    %6 = vector.shape_cast %5 : vector<8xf32> to vector<8x1xf32>
    %cst_2 = arith.constant 6.250000e-02 : f32
    %7 = vector.broadcast %cst_2 : f32 to vector<8x1xf32>
    %8 = arith.mulf %6, %7 : vector<8x1xf32>
    %9 = arith.mulf %4, %4 : vector<8x128xf32>
    %cst_3 = arith.constant dense<0.000000e+00> : vector<8xf32>
    %10 = vector.multi_reduction <add>, %9, %cst_3 [1] : vector<8x128xf32> to vector<8xf32>
    %11 = vector.shape_cast %10 : vector<8xf32> to vector<8x1xf32>
    %cst_4 = arith.constant 6.250000e-02 : f32
    %12 = vector.broadcast %cst_4 : f32 to vector<8x1xf32>
    %13 = arith.mulf %11, %12 : vector<8x1xf32>
    %14 = arith.mulf %8, %8 : vector<8x1xf32>
    %15 = arith.subf %13, %14 : vector<8x1xf32>
    %16 = vector.broadcast %8 : vector<8x1xf32> to vector<8x128xf32>
    %17 = arith.subf %4, %16 : vector<8x128xf32>
    %cst_5 = arith.constant 9.99999974E-6 : f32
    %18 = vector.broadcast %cst_5 : f32 to vector<8x1xf32>
    %19 = arith.addf %15, %18 : vector<8x1xf32>
    %20 = math.rsqrt %19 : vector<8x1xf32>
    %21 = vector.broadcast %20 : vector<8x1xf32> to vector<8x128xf32>
    %22 = arith.mulf %17, %21 : vector<8x128xf32>
    %c0_6 = arith.constant 0 : index
    %c0_7 = arith.constant 0 : index
    %23 = vector.load %arg6[%c0_6, %c0_7] : memref<1x128xf32, #tpu.memory_space<vmem>>, vector<1x128xf32>
    %24 = vector.broadcast %23 : vector<1x128xf32> to vector<8x128xf32>
    %25 = arith.mulf %22, %24 : vector<8x128xf32>
    %c0_8 = arith.constant 0 : index
    %c0_9 = arith.constant 0 : index
    %26 = vector.load %arg7[%c0_8, %c0_9] : memref<1x128xf32, #tpu.memory_space<vmem>>, vector<1x128xf32>
    %27 = vector.broadcast %26 : vector<1x128xf32> to vector<8x128xf32>
    %28 = arith.addf %25, %27 : vector<8x128xf32>
    %29 = arith.truncf %28 : vector<8x128xf32> to vector<8x128xbf16>
    %c0_10 = arith.constant 0 : index
    %c0_11 = arith.constant 0 : index
    %30 = vector.load %arg9[%c0_10, %c0_11] : memref<8x128xf32, #tpu.memory_space<vmem>>, vector<8x128xf32>
    %c0_12 = arith.constant 0 : index
    %c0_13 = arith.constant 0 : index
    %31 = vector.load %arg4[%c0_12, %c0_13] : memref<128x128xbf16, #tpu.memory_space<vmem>>, vector<128x128xbf16>
    %cst_14 = arith.constant dense<0.000000e+00> : vector<8x128xf32>
    %32 = tpu.matmul %29, %31, %cst_14 {dimension_numbers = #tpu.dot_dimension_numbers<[1], [0], [0], [1], [0, 0, 1, 1], [], []>} : vector<8x128xbf16>, vector<128x128xbf16>, vector<8x128xf32> -> vector<8x128xf32>
    %33 = arith.addf %30, %32 : vector<8x128xf32>
    %c0_15 = arith.constant 0 : index
    %c0_16 = arith.constant 0 : index
    %34 = vector.load %arg9[%c0_15, %c0_16] : memref<8x128xf32, #tpu.memory_space<vmem>>, vector<8x128xf32>
    tpu.vector_store %arg9[%c0_15, %c0_16], %33 {strides = array<i32>} : memref<8x128xf32, #tpu.memory_space<vmem>>, vector<8x128xf32>,
    %c0_i32_17 = arith.constant 0 : i32
    %35 = arith.cmpi eq, %arg2, %c0_i32_17 : i32
    %36 = arith.extui %35 : i1 to i32
    %c0_i32_18 = arith.constant 0 : i32
    %37 = arith.cmpi ne, %36, %c0_i32_18 : i32
    scf.if %37 {
      %c0_19 = arith.constant 0 : index
      %c0_20 = arith.constant 0 : index
      %38 = vector.load %arg9[%c0_19, %c0_20] : memref<8x128xf32, #tpu.memory_space<vmem>>, vector<8x128xf32>
      %c0_21 = arith.constant 0 : index
      %c0_22 = arith.constant 0 : index
      %39 = vector.load %arg5[%c0_21, %c0_22] : memref<1x128xf32, #tpu.memory_space<vmem>>, vector<1x128xf32>
      %40 = vector.broadcast %39 : vector<1x128xf32> to vector<8x128xf32>
      %41 = arith.addf %38, %40 : vector<8x128xf32>
      %42 = arith.truncf %41 : vector<8x128xf32> to vector<8x128xbf16>
      %c0_23 = arith.constant 0 : index
      %c0_24 = arith.constant 0 : index
      %43 = vector.load %arg8[%c0_23, %c0_24] : memref<8x128xbf16, #tpu.memory_space<vmem>>, vector<8x128xbf16>
      tpu.vector_store %arg8[%c0_23, %c0_24], %42 {strides = array<i32>} : memref<8x128xbf16, #tpu.memory_space<vmem>>, vector<8x128xbf16>,
    } else {
    }
    return
  }
  func.func @transform_0(%arg0: i32, %arg1: i32, %arg2: i32) -> (i32, i32) {
    %c0_i32 = arith.constant 0 : i32
    return %arg0, %arg2 : i32, i32
  }
  func.func @transform_1(%arg0: i32, %arg1: i32, %arg2: i32) -> (i32, i32) {
    %c0_i32 = arith.constant 0 : i32
    return %arg2, %arg1 : i32, i32
  }
  func.func @transform_2(%arg0: i32, %arg1: i32, %arg2: i32) -> (i32, i32) {
    %c0_i32 = arith.constant 0 : i32
    %c0_i32_0 = arith.constant 0 : i32
    return %c0_i32, %arg1 : i32, i32
  }
  func.func @transform_3(%arg0: i32, %arg1: i32, %arg2: i32) -> (i32, i32) {
    %c0_i32 = arith.constant 0 : i32
    %c0_i32_0 = arith.constant 0 : i32
    return %c0_i32, %arg2 : i32, i32
  }
  func.func @transform_4(%arg0: i32, %arg1: i32, %arg2: i32) -> (i32, i32) {
    %c0_i32 = arith.constant 0 : i32
    %c0_i32_0 = arith.constant 0 : i32
    return %c0_i32, %arg2 : i32, i32
  }
  func.func @transform_5(%arg0: i32, %arg1: i32, %arg2: i32) -> (i32, i32) {
    %c0_i32 = arith.constant 0 : i32
    return %arg0, %arg1 : i32, i32
  }
}

module attributes {stable_mosaic.version = 11 : i64} {
  func.func @_attn_kernel(%arg0: i32, %arg1: memref<1x4x8xbf16, #tpu.memory_space<vmem>>, %arg2: memref<1x4x8xbf16, #tpu.memory_space<vmem>>, %arg3: memref<1x4x8xbf16, #tpu.memory_space<vmem>>, %arg4: memref<1x4x8xbf16, #tpu.memory_space<vmem>>) attributes {dimension_semantics = [#tpu.dimension_semantics<parallel>], iteration_bounds = array<i64: 4>, scalar_prefetch = 0 : i64, scratch_operands = 0 : i64, tpu.core_type = #tpu.core_type<tc>, window_params = [{transform_indices = @transform_0, window_bounds = array<i64: 1, 4, 8>}, {transform_indices = @transform_1, window_bounds = array<i64: 1, 4, 8>}, {transform_indices = @transform_2, window_bounds = array<i64: 1, 4, 8>}, {transform_indices = @transform_3, window_bounds = array<i64: 1, 4, 8>}]} {
    %c0 = arith.constant 0 : index
    %c0_0 = arith.constant 0 : index
    %c0_1 = arith.constant 0 : index
    %0 = vector.load %arg1[%c0, %c0_0, %c0_1] : memref<1x4x8xbf16, #tpu.memory_space<vmem>>, vector<1x4x8xbf16>
    %1 = arith.extf %0 : vector<1x4x8xbf16> to vector<1x4x8xf32>
    %cst = arith.constant 0.353553385 : f32
    %2 = vector.broadcast %cst : f32 to vector<1x4x8xf32>
    %3 = arith.mulf %1, %2 : vector<1x4x8xf32>
    %4 = arith.truncf %3 : vector<1x4x8xf32> to vector<1x4x8xbf16>
    %c0_2 = arith.constant 0 : index
    %c0_3 = arith.constant 0 : index
    %c0_4 = arith.constant 0 : index
    %5 = vector.load %arg2[%c0_2, %c0_3, %c0_4] : memref<1x4x8xbf16, #tpu.memory_space<vmem>>, vector<1x4x8xbf16>
    %cst_5 = arith.constant dense<0.000000e+00> : vector<1x4x4xf32>
    %6 = tpu.matmul %4, %5, %cst_5 {dimension_numbers = #tpu.dot_dimension_numbers<[2], [2], [1], [1], [0, 0, 0, 1, 1, 1], [0], [0]>} : vector<1x4x8xbf16>, vector<1x4x8xbf16>, vector<1x4x4xf32> -> vector<1x4x4xf32>
    %cst_6 = arith.constant dense<0xFF800000> : vector<1x4xf32>
    %7 = vector.multi_reduction <maximumf>, %6, %cst_6 [2] : vector<1x4x4xf32> to vector<1x4xf32>
    %8 = vector.shape_cast %7 : vector<1x4xf32> to vector<1x4x1xf32>
    %9 = vector.broadcast %8 : vector<1x4x1xf32> to vector<1x4x4xf32>
    %10 = arith.subf %6, %9 : vector<1x4x4xf32>
    %11 = math.exp %10 : vector<1x4x4xf32>
    %cst_7 = arith.constant dense<0.000000e+00> : vector<1x4xf32>
    %12 = vector.multi_reduction <add>, %11, %cst_7 [2] : vector<1x4x4xf32> to vector<1x4xf32>
    %13 = vector.shape_cast %12 : vector<1x4xf32> to vector<1x4x1xf32>
    %14 = tpu.reciprocal %13 : vector<1x4x1xf32> -> vector<1x4x1xf32>
    %15 = vector.broadcast %14 : vector<1x4x1xf32> to vector<1x4x4xf32>
    %16 = arith.mulf %11, %15 : vector<1x4x4xf32>
    %17 = arith.truncf %16 : vector<1x4x4xf32> to vector<1x4x4xbf16>
    %c0_8 = arith.constant 0 : index
    %c0_9 = arith.constant 0 : index
    %c0_10 = arith.constant 0 : index
    %18 = vector.load %arg3[%c0_8, %c0_9, %c0_10] : memref<1x4x8xbf16, #tpu.memory_space<vmem>>, vector<1x4x8xbf16>
    %cst_11 = arith.constant dense<0.000000e+00> : vector<1x4x8xf32>
    %19 = tpu.matmul %17, %18, %cst_11 {dimension_numbers = #tpu.dot_dimension_numbers<[2], [1], [1], [2], [0, 0, 0, 1, 1, 2], [0], [0]>} : vector<1x4x4xbf16>, vector<1x4x8xbf16>, vector<1x4x8xf32> -> vector<1x4x8xf32>
    %20 = arith.truncf %19 : vector<1x4x8xf32> to vector<1x4x8xbf16>
    %c0_12 = arith.constant 0 : index
    %c0_13 = arith.constant 0 : index
    %c0_14 = arith.constant 0 : index
    %21 = vector.load %arg4[%c0_12, %c0_13, %c0_14] : memref<1x4x8xbf16, #tpu.memory_space<vmem>>, vector<1x4x8xbf16>
    tpu.vector_store %arg4[%c0_12, %c0_13, %c0_14], %20 {strides = array<i32>} : memref<1x4x8xbf16, #tpu.memory_space<vmem>>, vector<1x4x8xbf16>,
    return
  }
  func.func @transform_0(%arg0: i32) -> (i32, i32, i32) {
    %c0_i32 = arith.constant 0 : i32
    %c0_i32_0 = arith.constant 0 : i32
    %c0_i32_1 = arith.constant 0 : i32
    return %arg0, %c0_i32, %c0_i32_0 : i32, i32, i32
  }
  func.func @transform_1(%arg0: i32) -> (i32, i32, i32) {
    %c0_i32 = arith.constant 0 : i32
    %c0_i32_0 = arith.constant 0 : i32
    %c0_i32_1 = arith.constant 0 : i32
    return %arg0, %c0_i32, %c0_i32_0 : i32, i32, i32
  }
  func.func @transform_2(%arg0: i32) -> (i32, i32, i32) {
    %c0_i32 = arith.constant 0 : i32
    %c0_i32_0 = arith.constant 0 : i32
    %c0_i32_1 = arith.constant 0 : i32
    return %arg0, %c0_i32, %c0_i32_0 : i32, i32, i32
  }
  func.func @transform_3(%arg0: i32) -> (i32, i32, i32) {
    %c0_i32 = arith.constant 0 : i32
    %c0_i32_0 = arith.constant 0 : i32
    %c0_i32_1 = arith.constant 0 : i32
    return %arg0, %c0_i32, %c0_i32_0 : i32, i32, i32
  }
}

module attributes {stable_mosaic.version = 11 : i64} {
  func.func @_mm_kernel(%arg0: i32, %arg1: i32, %arg2: i32, %arg3: memref<8x128xbf16, #tpu.memory_space<vmem>>, %arg4: memref<128x128xbf16, #tpu.memory_space<vmem>>, %arg5: memref<1x128xf32, #tpu.memory_space<vmem>>, %arg6: memref<8x128xbf16, #tpu.memory_space<vmem>>, %arg7: memref<8x128xf32, #tpu.memory_space<vmem>>, %arg8: memref<8x128xf32, #tpu.memory_space<vmem>>) attributes {dimension_semantics = [#tpu.dimension_semantics<parallel>, #tpu.dimension_semantics<parallel>, #tpu.dimension_semantics<arbitrary>], iteration_bounds = array<i64: 1, 1, 1>, scalar_prefetch = 0 : i64, scratch_operands = 1 : i64, tpu.core_type = #tpu.core_type<tc>, window_params = [{transform_indices = @transform_0, window_bounds = array<i64: 8, 128>}, {transform_indices = @transform_1, window_bounds = array<i64: 128, 128>}, {transform_indices = @transform_2, window_bounds = array<i64: 1, 128>}, {transform_indices = @transform_3, window_bounds = array<i64: 8, 128>}, {transform_indices = @transform_4, window_bounds = array<i64: 8, 128>}]} {
    %c0_i32 = arith.constant 0 : i32
    %0 = arith.cmpi eq, %arg2, %c0_i32 : i32
    %1 = arith.extui %0 : i1 to i32
    %c0_i32_0 = arith.constant 0 : i32
    %2 = arith.cmpi ne, %1, %c0_i32_0 : i32
    scf.if %2 {
      %cst_10 = arith.constant 0.000000e+00 : f32
      %12 = vector.broadcast %cst_10 : f32 to vector<8x128xf32>
      %c0_11 = arith.constant 0 : index
      %c0_12 = arith.constant 0 : index
      %13 = vector.load %arg8[%c0_11, %c0_12] : memref<8x128xf32, #tpu.memory_space<vmem>>, vector<8x128xf32>
      tpu.vector_store %arg8[%c0_11, %c0_12], %12 {strides = array<i32>} : memref<8x128xf32, #tpu.memory_space<vmem>>, vector<8x128xf32>,
    } else {
    }
    %c0 = arith.constant 0 : index
    %c0_1 = arith.constant 0 : index
    %3 = vector.load %arg3[%c0, %c0_1] : memref<8x128xbf16, #tpu.memory_space<vmem>>, vector<8x128xbf16>
    %c0_2 = arith.constant 0 : index
    %c0_3 = arith.constant 0 : index
    %4 = vector.load %arg8[%c0_2, %c0_3] : memref<8x128xf32, #tpu.memory_space<vmem>>, vector<8x128xf32>
    %c0_4 = arith.constant 0 : index
    %c0_5 = arith.constant 0 : index
    %5 = vector.load %arg4[%c0_4, %c0_5] : memref<128x128xbf16, #tpu.memory_space<vmem>>, vector<128x128xbf16>
    %cst = arith.constant dense<0.000000e+00> : vector<8x128xf32>
    %6 = tpu.matmul %3, %5, %cst {dimension_numbers = #tpu.dot_dimension_numbers<[1], [0], [0], [1], [0, 0, 1, 1], [], []>} : vector<8x128xbf16>, vector<128x128xbf16>, vector<8x128xf32> -> vector<8x128xf32>
    %7 = arith.addf %4, %6 : vector<8x128xf32>
    %c0_6 = arith.constant 0 : index
    %c0_7 = arith.constant 0 : index
    %8 = vector.load %arg8[%c0_6, %c0_7] : memref<8x128xf32, #tpu.memory_space<vmem>>, vector<8x128xf32>
    tpu.vector_store %arg8[%c0_6, %c0_7], %7 {strides = array<i32>} : memref<8x128xf32, #tpu.memory_space<vmem>>, vector<8x128xf32>,
    %c0_i32_8 = arith.constant 0 : i32
    %9 = arith.cmpi eq, %arg2, %c0_i32_8 : i32
    %10 = arith.extui %9 : i1 to i32
    %c0_i32_9 = arith.constant 0 : i32
    %11 = arith.cmpi ne, %10, %c0_i32_9 : i32
    scf.if %11 {
      %c0_10 = arith.constant 0 : index
      %c0_11 = arith.constant 0 : index
      %12 = vector.load %arg8[%c0_10, %c0_11] : memref<8x128xf32, #tpu.memory_space<vmem>>, vector<8x128xf32>
      %c0_12 = arith.constant 0 : index
      %c0_13 = arith.constant 0 : index
      %13 = vector.load %arg5[%c0_12, %c0_13] : memref<1x128xf32, #tpu.memory_space<vmem>>, vector<1x128xf32>
      %14 = vector.broadcast %13 : vector<1x128xf32> to vector<8x128xf32>
      %15 = arith.addf %12, %14 : vector<8x128xf32>
      %c0_14 = arith.constant 0 : index
      %c0_15 = arith.constant 0 : index
      %16 = vector.load %arg6[%c0_14, %c0_15] : memref<8x128xbf16, #tpu.memory_space<vmem>>, vector<8x128xbf16>
      %17 = arith.extf %16 : vector<8x128xbf16> to vector<8x128xf32>
      %18 = arith.addf %15, %17 : vector<8x128xf32>
      %c0_16 = arith.constant 0 : index
      %c0_17 = arith.constant 0 : index
      %19 = vector.load %arg7[%c0_16, %c0_17] : memref<8x128xf32, #tpu.memory_space<vmem>>, vector<8x128xf32>
      tpu.vector_store %arg7[%c0_16, %c0_17], %18 {strides = array<i32>} : memref<8x128xf32, #tpu.memory_space<vmem>>, vector<8x128xf32>,
    } else {
    }
    return
  }
  func.func @transform_0(%arg0: i32, %arg1: i32, %arg2: i32) -> (i32, i32) {
    %c0_i32 = arith.constant 0 : i32
    return %arg0, %arg2 : i32, i32
  }
  func.func @transform_1(%arg0: i32, %arg1: i32, %arg2: i32) -> (i32, i32) {
    %c0_i32 = arith.constant 0 : i32
    return %arg2, %arg1 : i32, i32
  }
  func.func @transform_2(%arg0: i32, %arg1: i32, %arg2: i32) -> (i32, i32) {
    %c0_i32 = arith.constant 0 : i32
    %c0_i32_0 = arith.constant 0 : i32
    return %c0_i32, %arg1 : i32, i32
  }
  func.func @transform_3(%arg0: i32, %arg1: i32, %arg2: i32) -> (i32, i32) {
    %c0_i32 = arith.constant 0 : i32
    return %arg0, %arg1 : i32, i32
  }
  func.func @transform_4(%arg0: i32, %arg1: i32, %arg2: i32) -> (i32, i32) {
    %c0_i32 = arith.constant 0 : i32
    return %arg0, %arg1 : i32, i32
  }
}

module attributes {stable_mosaic.version = 11 : i64} {
  func.func @_mm_kernel(%arg0: i32, %arg1: i32, %arg2: i32, %arg3: memref<8x128xf32, #tpu.memory_space<vmem>>, %arg4: memref<128x128xbf16, #tpu.memory_space<vmem>>, %arg5: memref<1x128xf32, #tpu.memory_space<vmem>>, %arg6: memref<1x128xf32, #tpu.memory_space<vmem>>, %arg7: memref<1x128xf32, #tpu.memory_space<vmem>>, %arg8: memref<8x128xbf16, #tpu.memory_space<vmem>>, %arg9: memref<8x128xf32, #tpu.memory_space<vmem>>) attributes {dimension_semantics = [#tpu.dimension_semantics<parallel>, #tpu.dimension_semantics<parallel>, #tpu.dimension_semantics<arbitrary>], iteration_bounds = array<i64: 1, 1, 1>, scalar_prefetch = 0 : i64, scratch_operands = 1 : i64, tpu.core_type = #tpu.core_type<tc>, window_params = [{transform_indices = @transform_0, window_bounds = array<i64: 8, 128>}, {transform_indices = @transform_1, window_bounds = array<i64: 128, 128>}, {transform_indices = @transform_2, window_bounds = array<i64: 1, 128>}, {transform_indices = @transform_3, window_bounds = array<i64: 1, 128>}, {transform_indices = @transform_4, window_bounds = array<i64: 1, 128>}, {transform_indices = @transform_5, window_bounds = array<i64: 8, 128>}]} {
    %c0_i32 = arith.constant 0 : i32
    %0 = arith.cmpi eq, %arg2, %c0_i32 : i32
    %1 = arith.extui %0 : i1 to i32
    %c0_i32_0 = arith.constant 0 : i32
    %2 = arith.cmpi ne, %1, %c0_i32_0 : i32
    scf.if %2 {
      %cst_19 = arith.constant 0.000000e+00 : f32
      %37 = vector.broadcast %cst_19 : f32 to vector<8x128xf32>
      %c0_20 = arith.constant 0 : index
      %c0_21 = arith.constant 0 : index
      %38 = vector.load %arg9[%c0_20, %c0_21] : memref<8x128xf32, #tpu.memory_space<vmem>>, vector<8x128xf32>
      tpu.vector_store %arg9[%c0_20, %c0_21], %37 {strides = array<i32>} : memref<8x128xf32, #tpu.memory_space<vmem>>, vector<8x128xf32>,
    } else {
    }
    %c0 = arith.constant 0 : index
    %c0_1 = arith.constant 0 : index
    %3 = vector.load %arg3[%c0, %c0_1] : memref<8x128xf32, #tpu.memory_space<vmem>>, vector<8x128xf32>
    %cst = arith.constant dense<0.000000e+00> : vector<8xf32>
    %4 = vector.multi_reduction <add>, %3, %cst [1] : vector<8x128xf32> to vector<8xf32>
    %5 = vector.shape_cast %4 : vector<8xf32> to vector<8x1xf32>
    %cst_2 = arith.constant 6.250000e-02 : f32
    %6 = vector.broadcast %cst_2 : f32 to vector<8x1xf32>
    %7 = arith.mulf %5, %6 : vector<8x1xf32>
    %8 = arith.mulf %3, %3 : vector<8x128xf32>
    %cst_3 = arith.constant dense<0.000000e+00> : vector<8xf32>
    %9 = vector.multi_reduction <add>, %8, %cst_3 [1] : vector<8x128xf32> to vector<8xf32>
    %10 = vector.shape_cast %9 : vector<8xf32> to vector<8x1xf32>
    %cst_4 = arith.constant 6.250000e-02 : f32
    %11 = vector.broadcast %cst_4 : f32 to vector<8x1xf32>
    %12 = arith.mulf %10, %11 : vector<8x1xf32>
    %13 = arith.mulf %7, %7 : vector<8x1xf32>
    %14 = arith.subf %12, %13 : vector<8x1xf32>
    %15 = vector.broadcast %7 : vector<8x1xf32> to vector<8x128xf32>
    %16 = arith.subf %3, %15 : vector<8x128xf32>
    %cst_5 = arith.constant 9.99999974E-6 : f32
    %17 = vector.broadcast %cst_5 : f32 to vector<8x1xf32>
    %18 = arith.addf %14, %17 : vector<8x1xf32>
    %19 = math.rsqrt %18 : vector<8x1xf32>
    %20 = vector.broadcast %19 : vector<8x1xf32> to vector<8x128xf32>
    %21 = arith.mulf %16, %20 : vector<8x128xf32>
    %c0_6 = arith.constant 0 : index
    %c0_7 = arith.constant 0 : index
    %22 = vector.load %arg6[%c0_6, %c0_7] : memref<1x128xf32, #tpu.memory_space<vmem>>, vector<1x128xf32>
    %23 = vector.broadcast %22 : vector<1x128xf32> to vector<8x128xf32>
    %24 = arith.mulf %21, %23 : vector<8x128xf32>
    %c0_8 = arith.constant 0 : index
    %c0_9 = arith.constant 0 : index
    %25 = vector.load %arg7[%c0_8, %c0_9] : memref<1x128xf32, #tpu.memory_space<vmem>>, vector<1x128xf32>
    %26 = vector.broadcast %25 : vector<1x128xf32> to vector<8x128xf32>
    %27 = arith.addf %24, %26 : vector<8x128xf32>
    %28 = arith.truncf %27 : vector<8x128xf32> to vector<8x128xbf16>
    %c0_10 = arith.constant 0 : index
    %c0_11 = arith.constant 0 : index
    %29 = vector.load %arg9[%c0_10, %c0_11] : memref<8x128xf32, #tpu.memory_space<vmem>>, vector<8x128xf32>
    %c0_12 = arith.constant 0 : index
    %c0_13 = arith.constant 0 : index
    %30 = vector.load %arg4[%c0_12, %c0_13] : memref<128x128xbf16, #tpu.memory_space<vmem>>, vector<128x128xbf16>
    %cst_14 = arith.constant dense<0.000000e+00> : vector<8x128xf32>
    %31 = tpu.matmul %28, %30, %cst_14 {dimension_numbers = #tpu.dot_dimension_numbers<[1], [0], [0], [1], [0, 0, 1, 1], [], []>} : vector<8x128xbf16>, vector<128x128xbf16>, vector<8x128xf32> -> vector<8x128xf32>
    %32 = arith.addf %29, %31 : vector<8x128xf32>
    %c0_15 = arith.constant 0 : index
    %c0_16 = arith.constant 0 : index
    %33 = vector.load %arg9[%c0_15, %c0_16] : memref<8x128xf32, #tpu.memory_space<vmem>>, vector<8x128xf32>
    tpu.vector_store %arg9[%c0_15, %c0_16], %32 {strides = array<i32>} : memref<8x128xf32, #tpu.memory_space<vmem>>, vector<8x128xf32>,
    %c0_i32_17 = arith.constant 0 : i32
    %34 = arith.cmpi eq, %arg2, %c0_i32_17 : i32
    %35 = arith.extui %34 : i1 to i32
    %c0_i32_18 = arith.constant 0 : i32
    %36 = arith.cmpi ne, %35, %c0_i32_18 : i32
    scf.if %36 {
      %c0_19 = arith.constant 0 : index
      %c0_20 = arith.constant 0 : index
      %37 = vector.load %arg9[%c0_19, %c0_20] : memref<8x128xf32, #tpu.memory_space<vmem>>, vector<8x128xf32>
      %c0_21 = arith.constant 0 : index
      %c0_22 = arith.constant 0 : index
      %38 = vector.load %arg5[%c0_21, %c0_22] : memref<1x128xf32, #tpu.memory_space<vmem>>, vector<1x128xf32>
      %39 = vector.broadcast %38 : vector<1x128xf32> to vector<8x128xf32>
      %40 = arith.addf %37, %39 : vector<8x128xf32>
      %cst_23 = arith.constant 0.707106769 : f32
      %41 = vector.broadcast %cst_23 : f32 to vector<8x128xf32>
      %42 = arith.mulf %40, %41 : vector<8x128xf32>
      %43 = math.absf %42 : vector<8x128xf32>
      %cst_24 = arith.constant 0.327591091 : f32
      %44 = vector.broadcast %cst_24 : f32 to vector<8x128xf32>
      %45 = arith.mulf %44, %43 : vector<8x128xf32>
      %cst_25 = arith.constant 1.000000e+00 : f32
      %46 = vector.broadcast %cst_25 : f32 to vector<8x128xf32>
      %47 = arith.addf %46, %45 : vector<8x128xf32>
      %cst_26 = arith.constant 1.000000e+00 : f32
      %48 = vector.broadcast %cst_26 : f32 to vector<8x128xf32>
      %49 = arith.divf %48, %47 : vector<8x128xf32>
      %cst_27 = arith.constant 1.06140542 : f32
      %50 = vector.broadcast %cst_27 : f32 to vector<8x128xf32>
      %51 = arith.mulf %49, %50 : vector<8x128xf32>
      %cst_28 = arith.constant -1.45315206 : f32
      %52 = vector.broadcast %cst_28 : f32 to vector<8x128xf32>
      %53 = arith.addf %52, %51 : vector<8x128xf32>
      %54 = arith.mulf %49, %53 : vector<8x128xf32>
      %cst_29 = arith.constant 1.42141378 : f32
      %55 = vector.broadcast %cst_29 : f32 to vector<8x128xf32>
      %56 = arith.addf %55, %54 : vector<8x128xf32>
      %57 = arith.mulf %49, %56 : vector<8x128xf32>
      %cst_30 = arith.constant -0.284496725 : f32
      %58 = vector.broadcast %cst_30 : f32 to vector<8x128xf32>
      %59 = arith.addf %58, %57 : vector<8x128xf32>
      %60 = arith.mulf %49, %59 : vector<8x128xf32>
      %cst_31 = arith.constant 0.254829586 : f32
      %61 = vector.broadcast %cst_31 : f32 to vector<8x128xf32>
      %62 = arith.addf %61, %60 : vector<8x128xf32>
      %63 = arith.mulf %49, %62 : vector<8x128xf32>
      %cst_32 = arith.constant 0.000000e+00 : f32
      %64 = vector.broadcast %cst_32 : f32 to vector<8x128xf32>
      %65 = arith.subf %64, %43 : vector<8x128xf32>
      %66 = arith.mulf %65, %43 : vector<8x128xf32>
      %67 = math.exp %66 : vector<8x128xf32>
      %68 = arith.mulf %63, %67 : vector<8x128xf32>
      %cst_33 = arith.constant 1.000000e+00 : f32
      %69 = vector.broadcast %cst_33 : f32 to vector<8x128xf32>
      %70 = arith.subf %69, %68 : vector<8x128xf32>
      %cst_34 = arith.constant 0.000000e+00 : f32
      %71 = vector.broadcast %cst_34 : f32 to vector<8x128xf32>
      %72 = arith.cmpf oge, %42, %71 : vector<8x128xf32>
      %cst_35 = arith.constant 0.000000e+00 : f32
      %73 = vector.broadcast %cst_35 : f32 to vector<8x128xf32>
      %74 = arith.subf %73, %70 : vector<8x128xf32>
      %75 = arith.select %72, %70, %74 : vector<8x128xi1>, vector<8x128xf32>
      %cst_36 = arith.constant 5.000000e-01 : f32
      %76 = vector.broadcast %cst_36 : f32 to vector<8x128xf32>
      %77 = arith.mulf %76, %40 : vector<8x128xf32>
      %cst_37 = arith.constant 1.000000e+00 : f32
      %78 = vector.broadcast %cst_37 : f32 to vector<8x128xf32>
      %79 = arith.addf %78, %75 : vector<8x128xf32>
      %80 = arith.mulf %77, %79 : vector<8x128xf32>
      %81 = arith.truncf %80 : vector<8x128xf32> to vector<8x128xbf16>
      %c0_38 = arith.constant 0 : index
      %c0_39 = arith.constant 0 : index
      %82 = vector.load %arg8[%c0_38, %c0_39] : memref<8x128xbf16, #tpu.memory_space<vmem>>, vector<8x128xbf16>
      tpu.vector_store %arg8[%c0_38, %c0_39], %81 {strides = array<i32>} : memref<8x128xbf16, #tpu.memory_space<vmem>>, vector<8x128xbf16>,
    } else {
    }
    return
  }
  func.func @transform_0(%arg0: i32, %arg1: i32, %arg2: i32) -> (i32, i32) {
    %c0_i32 = arith.constant 0 : i32
    return %arg0, %arg2 : i32, i32
  }
  func.func @transform_1(%arg0: i32, %arg1: i32, %arg2: i32) -> (i32, i32) {
    %c0_i32 = arith.constant 0 : i32
    return %arg2, %arg1 : i32, i32
  }
  func.func @transform_2(%arg0: i32, %arg1: i32, %arg2: i32) -> (i32, i32) {
    %c0_i32 = arith.constant 0 : i32
    %c0_i32_0 = arith.constant 0 : i32
    return %c0_i32, %arg1 : i32, i32
  }
  func.func @transform_3(%arg0: i32, %arg1: i32, %arg2: i32) -> (i32, i32) {
    %c0_i32 = arith.constant 0 : i32
    %c0_i32_0 = arith.constant 0 : i32
    return %c0_i32, %arg2 : i32, i32
  }
  func.func @transform_4(%arg0: i32, %arg1: i32, %arg2: i32) -> (i32, i32) {
    %c0_i32 = arith.constant 0 : i32
    %c0_i32_0 = arith.constant 0 : i32
    return %c0_i32, %arg2 : i32, i32
  }
  func.func @transform_5(%arg0: i32, %arg1: i32, %arg2: i32) -> (i32, i32) {
    %c0_i32 = arith.constant 0 : i32
    return %arg0, %arg1 : i32, i32
  }
}

module attributes {stable_mosaic.version = 11 : i64} {
  func.func @_mm_kernel(%arg0: i32, %arg1: i32, %arg2: i32, %arg3: memref<8x128xbf16, #tpu.memory_space<vmem>>, %arg4: memref<128x128xbf16, #tpu.memory_space<vmem>>, %arg5: memref<1x128xf32, #tpu.memory_space<vmem>>, %arg6: memref<8x128xf32, #tpu.memory_space<vmem>>, %arg7: memref<8x128xbf16, #tpu.memory_space<vmem>>, %arg8: memref<8x128xf32, #tpu.memory_space<vmem>>) attributes {dimension_semantics = [#tpu.dimension_semantics<parallel>, #tpu.dimension_semantics<parallel>, #tpu.dimension_semantics<arbitrary>], iteration_bounds = array<i64: 1, 1, 1>, scalar_prefetch = 0 : i64, scratch_operands = 1 : i64, tpu.core_type = #tpu.core_type<tc>, window_params = [{transform_indices = @transform_0, window_bounds = array<i64: 8, 128>}, {transform_indices = @transform_1, window_bounds = array<i64: 128, 128>}, {transform_indices = @transform_2, window_bounds = array<i64: 1, 128>}, {transform_indices = @transform_3, window_bounds = array<i64: 8, 128>}, {transform_indices = @transform_4, window_bounds = array<i64: 8, 128>}]} {
    %c0_i32 = arith.constant 0 : i32
    %0 = arith.cmpi eq, %arg2, %c0_i32 : i32
    %1 = arith.extui %0 : i1 to i32
    %c0_i32_0 = arith.constant 0 : i32
    %2 = arith.cmpi ne, %1, %c0_i32_0 : i32
    scf.if %2 {
      %cst_10 = arith.constant 0.000000e+00 : f32
      %12 = vector.broadcast %cst_10 : f32 to vector<8x128xf32>
      %c0_11 = arith.constant 0 : index
      %c0_12 = arith.constant 0 : index
      %13 = vector.load %arg8[%c0_11, %c0_12] : memref<8x128xf32, #tpu.memory_space<vmem>>, vector<8x128xf32>
      tpu.vector_store %arg8[%c0_11, %c0_12], %12 {strides = array<i32>} : memref<8x128xf32, #tpu.memory_space<vmem>>, vector<8x128xf32>,
    } else {
    }
    %c0 = arith.constant 0 : index
    %c0_1 = arith.constant 0 : index
    %3 = vector.load %arg3[%c0, %c0_1] : memref<8x128xbf16, #tpu.memory_space<vmem>>, vector<8x128xbf16>
    %c0_2 = arith.constant 0 : index
    %c0_3 = arith.constant 0 : index
    %4 = vector.load %arg8[%c0_2, %c0_3] : memref<8x128xf32, #tpu.memory_space<vmem>>, vector<8x128xf32>
    %c0_4 = arith.constant 0 : index
    %c0_5 = arith.constant 0 : index
    %5 = vector.load %arg4[%c0_4, %c0_5] : memref<128x128xbf16, #tpu.memory_space<vmem>>, vector<128x128xbf16>
    %cst = arith.constant dense<0.000000e+00> : vector<8x128xf32>
    %6 = tpu.matmul %3, %5, %cst {dimension_numbers = #tpu.dot_dimension_numbers<[1], [0], [0], [1], [0, 0, 1, 1], [], []>} : vector<8x128xbf16>, vector<128x128xbf16>, vector<8x128xf32> -> vector<8x128xf32>
    %7 = arith.addf %4, %6 : vector<8x128xf32>
    %c0_6 = arith.constant 0 : index
    %c0_7 = arith.constant 0 : index
    %8 = vector.load %arg8[%c0_6, %c0_7] : memref<8x128xf32, #tpu.memory_space<vmem>>, vector<8x128xf32>
    tpu.vector_store %arg8[%c0_6, %c0_7], %7 {strides = array<i32>} : memref<8x128xf32, #tpu.memory_space<vmem>>, vector<8x128xf32>,
    %c0_i32_8 = arith.constant 0 : i32
    %9 = arith.cmpi eq, %arg2, %c0_i32_8 : i32
    %10 = arith.extui %9 : i1 to i32
    %c0_i32_9 = arith.constant 0 : i32
    %11 = arith.cmpi ne, %10, %c0_i32_9 : i32
    scf.if %11 {
      %c0_10 = arith.constant 0 : index
      %c0_11 = arith.constant 0 : index
      %12 = vector.load %arg8[%c0_10, %c0_11] : memref<8x128xf32, #tpu.memory_space<vmem>>, vector<8x128xf32>
      %c0_12 = arith.constant 0 : index
      %c0_13 = arith.constant 0 : index
      %13 = vector.load %arg5[%c0_12, %c0_13] : memref<1x128xf32, #tpu.memory_space<vmem>>, vector<1x128xf32>
      %14 = vector.broadcast %13 : vector<1x128xf32> to vector<8x128xf32>
      %15 = arith.addf %12, %14 : vector<8x128xf32>
      %c0_14 = arith.constant 0 : index
      %c0_15 = arith.constant 0 : index
      %16 = vector.load %arg6[%c0_14, %c0_15] : memref<8x128xf32, #tpu.memory_space<vmem>>, vector<8x128xf32>
      %17 = arith.addf %15, %16 : vector<8x128xf32>
      %18 = arith.truncf %17 : vector<8x128xf32> to vector<8x128xbf16>
      %c0_16 = arith.constant 0 : index
      %c0_17 = arith.constant 0 : index
      %19 = vector.load %arg7[%c0_16, %c0_17] : memref<8x128xbf16, #tpu.memory_space<vmem>>, vector<8x128xbf16>
      tpu.vector_store %arg7[%c0_16, %c0_17], %18 {strides = array<i32>} : memref<8x128xbf16, #tpu.memory_space<vmem>>, vector<8x128xbf16>,
    } else {
    }
    return
  }
  func.func @transform_0(%arg0: i32, %arg1: i32, %arg2: i32) -> (i32, i32) {
    %c0_i32 = arith.constant 0 : i32
    return %arg0, %arg2 : i32, i32
  }
  func.func @transform_1(%arg0: i32, %arg1: i32, %arg2: i32) -> (i32, i32) {
    %c0_i32 = arith.constant 0 : i32
    return %arg2, %arg1 : i32, i32
  }
  func.func @transform_2(%arg0: i32, %arg1: i32, %arg2: i32) -> (i32, i32) {
    %c0_i32 = arith.constant 0 : i32
    %c0_i32_0 = arith.constant 0 : i32
    return %c0_i32, %arg1 : i32, i32
  }
  func.func @transform_3(%arg0: i32, %arg1: i32, %arg2: i32) -> (i32, i32) {
    %c0_i32 = arith.constant 0 : i32
    return %arg0, %arg1 : i32, i32
  }
  func.func @transform_4(%arg0: i32, %arg1: i32, %arg2: i32) -> (i32, i32) {
    %c0_i32 = arith.constant 0 : i32
    return %arg0, %arg1 : i32, i32
  }
}

module attributes {stable_mosaic.version = 11 : i64} {
  func.func @_dwconv3x3_kernel(%arg0: i32, %arg1: i32, %arg2: memref<1x6x6x32xbf16, #tpu.memory_space<vmem>>, %arg3: memref<9x32xf32, #tpu.memory_space<vmem>>, %arg4: memref<1x1x1x32xf32, #tpu.memory_space<vmem>>, %arg5: memref<1x4x4x32xbf16, #tpu.memory_space<vmem>>) attributes {dimension_semantics = [#tpu.dimension_semantics<parallel>, #tpu.dimension_semantics<parallel>], iteration_bounds = array<i64: 2, 1>, scalar_prefetch = 0 : i64, scratch_operands = 0 : i64, tpu.core_type = #tpu.core_type<tc>, window_params = [{transform_indices = @transform_0, window_bounds = array<i64: 1, 6, 6, 32>}, {transform_indices = @transform_1, window_bounds = array<i64: 9, 32>}, {transform_indices = @transform_2, window_bounds = array<i64: 1, 1, 1, 32>}, {transform_indices = @transform_3, window_bounds = array<i64: 1, 4, 4, 32>}]} {
    %c0 = arith.constant 0 : index
    %c0_0 = arith.constant 0 : index
    %c0_1 = arith.constant 0 : index
    %c0_2 = arith.constant 0 : index
    %0 = vector.load %arg2[%c0, %c0_0, %c0_1, %c0_2] : memref<1x6x6x32xbf16, #tpu.memory_space<vmem>>, vector<1x6x6x32xbf16>
    %1 = arith.extf %0 : vector<1x6x6x32xbf16> to vector<1x6x6x32xf32>
    %cst = arith.constant 0.000000e+00 : f32
    %2 = vector.broadcast %cst : f32 to vector<1x4x4x32xf32>
    %3 = vector.extract_strided_slice %1 {offsets = [0, 0, 0, 0], sizes = [1, 4, 4, 32], strides = [1, 1, 1, 1]} : vector<1x6x6x32xf32> to vector<1x4x4x32xf32>
    %c0_3 = arith.constant 0 : index
    %c0_4 = arith.constant 0 : index
    %4 = vector.load %arg3[%c0_3, %c0_4] : memref<9x32xf32, #tpu.memory_space<vmem>>, vector<1x32xf32>
    %5 = vector.shape_cast %4 : vector<1x32xf32> to vector<32xf32>
    %6 = vector.shape_cast %5 : vector<32xf32> to vector<1x1x1x32xf32>
    %7 = vector.broadcast %6 : vector<1x1x1x32xf32> to vector<1x4x4x32xf32>
    %8 = arith.mulf %3, %7 : vector<1x4x4x32xf32>
    %9 = arith.addf %2, %8 : vector<1x4x4x32xf32>
    %10 = vector.extract_strided_slice %1 {offsets = [0, 0, 1, 0], sizes = [1, 4, 4, 32], strides = [1, 1, 1, 1]} : vector<1x6x6x32xf32> to vector<1x4x4x32xf32>
    %c1 = arith.constant 1 : index
    %c0_5 = arith.constant 0 : index
    %11 = vector.load %arg3[%c1, %c0_5] : memref<9x32xf32, #tpu.memory_space<vmem>>, vector<1x32xf32>
    %12 = vector.shape_cast %11 : vector<1x32xf32> to vector<32xf32>
    %13 = vector.shape_cast %12 : vector<32xf32> to vector<1x1x1x32xf32>
    %14 = vector.broadcast %13 : vector<1x1x1x32xf32> to vector<1x4x4x32xf32>
    %15 = arith.mulf %10, %14 : vector<1x4x4x32xf32>
    %16 = arith.addf %9, %15 : vector<1x4x4x32xf32>
    %17 = vector.extract_strided_slice %1 {offsets = [0, 0, 2, 0], sizes = [1, 4, 4, 32], strides = [1, 1, 1, 1]} : vector<1x6x6x32xf32> to vector<1x4x4x32xf32>
    %c2 = arith.constant 2 : index
    %c0_6 = arith.constant 0 : index
    %18 = vector.load %arg3[%c2, %c0_6] : memref<9x32xf32, #tpu.memory_space<vmem>>, vector<1x32xf32>
    %19 = vector.shape_cast %18 : vector<1x32xf32> to vector<32xf32>
    %20 = vector.shape_cast %19 : vector<32xf32> to vector<1x1x1x32xf32>
    %21 = vector.broadcast %20 : vector<1x1x1x32xf32> to vector<1x4x4x32xf32>
    %22 = arith.mulf %17, %21 : vector<1x4x4x32xf32>
    %23 = arith.addf %16, %22 : vector<1x4x4x32xf32>
    %24 = vector.extract_strided_slice %1 {offsets = [0, 1, 0, 0], sizes = [1, 4, 4, 32], strides = [1, 1, 1, 1]} : vector<1x6x6x32xf32> to vector<1x4x4x32xf32>
    %c3 = arith.constant 3 : index
    %c0_7 = arith.constant 0 : index
    %25 = vector.load %arg3[%c3, %c0_7] : memref<9x32xf32, #tpu.memory_space<vmem>>, vector<1x32xf32>
    %26 = vector.shape_cast %25 : vector<1x32xf32> to vector<32xf32>
    %27 = vector.shape_cast %26 : vector<32xf32> to vector<1x1x1x32xf32>
    %28 = vector.broadcast %27 : vector<1x1x1x32xf32> to vector<1x4x4x32xf32>
    %29 = arith.mulf %24, %28 : vector<1x4x4x32xf32>
    %30 = arith.addf %23, %29 : vector<1x4x4x32xf32>
    %31 = vector.extract_strided_slice %1 {offsets = [0, 1, 1, 0], sizes = [1, 4, 4, 32], strides = [1, 1, 1, 1]} : vector<1x6x6x32xf32> to vector<1x4x4x32xf32>
    %c4 = arith.constant 4 : index
    %c0_8 = arith.constant 0 : index
    %32 = vector.load %arg3[%c4, %c0_8] : memref<9x32xf32, #tpu.memory_space<vmem>>, vector<1x32xf32>
    %33 = vector.shape_cast %32 : vector<1x32xf32> to vector<32xf32>
    %34 = vector.shape_cast %33 : vector<32xf32> to vector<1x1x1x32xf32>
    %35 = vector.broadcast %34 : vector<1x1x1x32xf32> to vector<1x4x4x32xf32>
    %36 = arith.mulf %31, %35 : vector<1x4x4x32xf32>
    %37 = arith.addf %30, %36 : vector<1x4x4x32xf32>
    %38 = vector.extract_strided_slice %1 {offsets = [0, 1, 2, 0], sizes = [1, 4, 4, 32], strides = [1, 1, 1, 1]} : vector<1x6x6x32xf32> to vector<1x4x4x32xf32>
    %c5 = arith.constant 5 : index
    %c0_9 = arith.constant 0 : index
    %39 = vector.load %arg3[%c5, %c0_9] : memref<9x32xf32, #tpu.memory_space<vmem>>, vector<1x32xf32>
    %40 = vector.shape_cast %39 : vector<1x32xf32> to vector<32xf32>
    %41 = vector.shape_cast %40 : vector<32xf32> to vector<1x1x1x32xf32>
    %42 = vector.broadcast %41 : vector<1x1x1x32xf32> to vector<1x4x4x32xf32>
    %43 = arith.mulf %38, %42 : vector<1x4x4x32xf32>
    %44 = arith.addf %37, %43 : vector<1x4x4x32xf32>
    %45 = vector.extract_strided_slice %1 {offsets = [0, 2, 0, 0], sizes = [1, 4, 4, 32], strides = [1, 1, 1, 1]} : vector<1x6x6x32xf32> to vector<1x4x4x32xf32>
    %c6 = arith.constant 6 : index
    %c0_10 = arith.constant 0 : index
    %46 = vector.load %arg3[%c6, %c0_10] : memref<9x32xf32, #tpu.memory_space<vmem>>, vector<1x32xf32>
    %47 = vector.shape_cast %46 : vector<1x32xf32> to vector<32xf32>
    %48 = vector.shape_cast %47 : vector<32xf32> to vector<1x1x1x32xf32>
    %49 = vector.broadcast %48 : vector<1x1x1x32xf32> to vector<1x4x4x32xf32>
    %50 = arith.mulf %45, %49 : vector<1x4x4x32xf32>
    %51 = arith.addf %44, %50 : vector<1x4x4x32xf32>
    %52 = vector.extract_strided_slice %1 {offsets = [0, 2, 1, 0], sizes = [1, 4, 4, 32], strides = [1, 1, 1, 1]} : vector<1x6x6x32xf32> to vector<1x4x4x32xf32>
    %c7 = arith.constant 7 : index
    %c0_11 = arith.constant 0 : index
    %53 = vector.load %arg3[%c7, %c0_11] : memref<9x32xf32, #tpu.memory_space<vmem>>, vector<1x32xf32>
    %54 = vector.shape_cast %53 : vector<1x32xf32> to vector<32xf32>
    %55 = vector.shape_cast %54 : vector<32xf32> to vector<1x1x1x32xf32>
    %56 = vector.broadcast %55 : vector<1x1x1x32xf32> to vector<1x4x4x32xf32>
    %57 = arith.mulf %52, %56 : vector<1x4x4x32xf32>
    %58 = arith.addf %51, %57 : vector<1x4x4x32xf32>
    %59 = vector.extract_strided_slice %1 {offsets = [0, 2, 2, 0], sizes = [1, 4, 4, 32], strides = [1, 1, 1, 1]} : vector<1x6x6x32xf32> to vector<1x4x4x32xf32>
    %c8 = arith.constant 8 : index
    %c0_12 = arith.constant 0 : index
    %60 = vector.load %arg3[%c8, %c0_12] : memref<9x32xf32, #tpu.memory_space<vmem>>, vector<1x32xf32>
    %61 = vector.shape_cast %60 : vector<1x32xf32> to vector<32xf32>
    %62 = vector.shape_cast %61 : vector<32xf32> to vector<1x1x1x32xf32>
    %63 = vector.broadcast %62 : vector<1x1x1x32xf32> to vector<1x4x4x32xf32>
    %64 = arith.mulf %59, %63 : vector<1x4x4x32xf32>
    %65 = arith.addf %58, %64 : vector<1x4x4x32xf32>
    %c0_13 = arith.constant 0 : index
    %c0_14 = arith.constant 0 : index
    %c0_15 = arith.constant 0 : index
    %c0_16 = arith.constant 0 : index
    %66 = vector.load %arg4[%c0_13, %c0_14, %c0_15, %c0_16] : memref<1x1x1x32xf32, #tpu.memory_space<vmem>>, vector<1x1x1x32xf32>
    %67 = vector.broadcast %66 : vector<1x1x1x32xf32> to vector<1x4x4x32xf32>
    %68 = arith.addf %65, %67 : vector<1x4x4x32xf32>
    %69 = arith.truncf %68 : vector<1x4x4x32xf32> to vector<1x4x4x32xbf16>
    %c0_17 = arith.constant 0 : index
    %c0_18 = arith.constant 0 : index
    %c0_19 = arith.constant 0 : index
    %c0_20 = arith.constant 0 : index
    %70 = vector.load %arg5[%c0_17, %c0_18, %c0_19, %c0_20] : memref<1x4x4x32xbf16, #tpu.memory_space<vmem>>, vector<1x4x4x32xbf16>
    tpu.vector_store %arg5[%c0_17, %c0_18, %c0_19, %c0_20], %69 {strides = array<i32>} : memref<1x4x4x32xbf16, #tpu.memory_space<vmem>>, vector<1x4x4x32xbf16>,
    return
  }
  func.func @transform_0(%arg0: i32, %arg1: i32) -> (i32, i32, i32, i32) {
    %c0_i32 = arith.constant 0 : i32
    %c0_i32_0 = arith.constant 0 : i32
    %c0_i32_1 = arith.constant 0 : i32
    return %arg0, %c0_i32, %c0_i32_0, %arg1 : i32, i32, i32, i32
  }
  func.func @transform_1(%arg0: i32, %arg1: i32) -> (i32, i32) {
    %c0_i32 = arith.constant 0 : i32
    %c0_i32_0 = arith.constant 0 : i32
    return %c0_i32, %arg1 : i32, i32
  }
  func.func @transform_2(%arg0: i32, %arg1: i32) -> (i32, i32, i32, i32) {
    %c0_i32 = arith.constant 0 : i32
    %c0_i32_0 = arith.constant 0 : i32
    %c0_i32_1 = arith.constant 0 : i32
    %c0_i32_2 = arith.constant 0 : i32
    return %c0_i32, %c0_i32_0, %c0_i32_1, %arg1 : i32, i32, i32, i32
  }
  func.func @transform_3(%arg0: i32, %arg1: i32) -> (i32, i32, i32, i32) {
    %c0_i32 = arith.constant 0 : i32
    %c0_i32_0 = arith.constant 0 : i32
    %c0_i32_1 = arith.constant 0 : i32
    return %arg0, %c0_i32, %c0_i32_0, %arg1 : i32, i32, i32, i32
  }
}

module attributes {stable_mosaic.version = 11 : i64} {
  func.func @_mm_kernel(%arg0: i32, %arg1: i32, %arg2: i32, %arg3: memref<32x256xbf16, #tpu.memory_space<vmem>>, %arg4: memref<256x128xbf16, #tpu.memory_space<vmem>>, %arg5: memref<1x128xf32, #tpu.memory_space<vmem>>, %arg6: memref<32x128xbf16, #tpu.memory_space<vmem>>, %arg7: memref<32x128xf32, #tpu.memory_space<vmem>>) attributes {dimension_semantics = [#tpu.dimension_semantics<parallel>, #tpu.dimension_semantics<parallel>, #tpu.dimension_semantics<arbitrary>], iteration_bounds = array<i64: 1, 1, 1>, scalar_prefetch = 0 : i64, scratch_operands = 1 : i64, tpu.core_type = #tpu.core_type<tc>, window_params = [{transform_indices = @transform_0, window_bounds = array<i64: 32, 256>}, {transform_indices = @transform_1, window_bounds = array<i64: 256, 128>}, {transform_indices = @transform_2, window_bounds = array<i64: 1, 128>}, {transform_indices = @transform_3, window_bounds = array<i64: 32, 128>}]} {
    %c0_i32 = arith.constant 0 : i32
    %0 = arith.cmpi eq, %arg2, %c0_i32 : i32
    %1 = arith.extui %0 : i1 to i32
    %c0_i32_0 = arith.constant 0 : i32
    %2 = arith.cmpi ne, %1, %c0_i32_0 : i32
    scf.if %2 {
      %cst_10 = arith.constant 0.000000e+00 : f32
      %12 = vector.broadcast %cst_10 : f32 to vector<32x128xf32>
      %c0_11 = arith.constant 0 : index
      %c0_12 = arith.constant 0 : index
      %13 = vector.load %arg7[%c0_11, %c0_12] : memref<32x128xf32, #tpu.memory_space<vmem>>, vector<32x128xf32>
      tpu.vector_store %arg7[%c0_11, %c0_12], %12 {strides = array<i32>} : memref<32x128xf32, #tpu.memory_space<vmem>>, vector<32x128xf32>,
    } else {
    }
    %c0 = arith.constant 0 : index
    %c0_1 = arith.constant 0 : index
    %3 = vector.load %arg3[%c0, %c0_1] : memref<32x256xbf16, #tpu.memory_space<vmem>>, vector<32x256xbf16>
    %c0_2 = arith.constant 0 : index
    %c0_3 = arith.constant 0 : index
    %4 = vector.load %arg7[%c0_2, %c0_3] : memref<32x128xf32, #tpu.memory_space<vmem>>, vector<32x128xf32>
    %c0_4 = arith.constant 0 : index
    %c0_5 = arith.constant 0 : index
    %5 = vector.load %arg4[%c0_4, %c0_5] : memref<256x128xbf16, #tpu.memory_space<vmem>>, vector<256x128xbf16>
    %cst = arith.constant dense<0.000000e+00> : vector<32x128xf32>
    %6 = tpu.matmul %3, %5, %cst {dimension_numbers = #tpu.dot_dimension_numbers<[1], [0], [0], [1], [0, 0, 1, 1], [], []>} : vector<32x256xbf16>, vector<256x128xbf16>, vector<32x128xf32> -> vector<32x128xf32>
    %7 = arith.addf %4, %6 : vector<32x128xf32>
    %c0_6 = arith.constant 0 : index
    %c0_7 = arith.constant 0 : index
    %8 = vector.load %arg7[%c0_6, %c0_7] : memref<32x128xf32, #tpu.memory_space<vmem>>, vector<32x128xf32>
    tpu.vector_store %arg7[%c0_6, %c0_7], %7 {strides = array<i32>} : memref<32x128xf32, #tpu.memory_space<vmem>>, vector<32x128xf32>,
    %c0_i32_8 = arith.constant 0 : i32
    %9 = arith.cmpi eq, %arg2, %c0_i32_8 : i32
    %10 = arith.extui %9 : i1 to i32
    %c0_i32_9 = arith.constant 0 : i32
    %11 = arith.cmpi ne, %10, %c0_i32_9 : i32
    scf.if %11 {
      %c0_10 = arith.constant 0 : index
      %c0_11 = arith.constant 0 : index
      %12 = vector.load %arg7[%c0_10, %c0_11] : memref<32x128xf32, #tpu.memory_space<vmem>>, vector<32x128xf32>
      %c0_12 = arith.constant 0 : index
      %c0_13 = arith.constant 0 : index
      %13 = vector.load %arg5[%c0_12, %c0_13] : memref<1x128xf32, #tpu.memory_space<vmem>>, vector<1x128xf32>
      %14 = vector.broadcast %13 : vector<1x128xf32> to vector<32x128xf32>
      %15 = arith.addf %12, %14 : vector<32x128xf32>
      %16 = arith.truncf %15 : vector<32x128xf32> to vector<32x128xbf16>
      %c0_14 = arith.constant 0 : index
      %c0_15 = arith.constant 0 : index
      %17 = vector.load %arg6[%c0_14, %c0_15] : memref<32x128xbf16, #tpu.memory_space<vmem>>, vector<32x128xbf16>
      tpu.vector_store %arg6[%c0_14, %c0_15], %16 {strides = array<i32>} : memref<32x128xbf16, #tpu.memory_space<vmem>>, vector<32x128xbf16>,
    } else {
    }
    return
  }
  func.func @transform_0(%arg0: i32, %arg1: i32, %arg2: i32) -> (i32, i32) {
    %c0_i32 = arith.constant 0 : i32
    return %arg0, %arg2 : i32, i32
  }
  func.func @transform_1(%arg0: i32, %arg1: i32, %arg2: i32) -> (i32, i32) {
    %c0_i32 = arith.constant 0 : i32
    return %arg2, %arg1 : i32, i32
  }
  func.func @transform_2(%arg0: i32, %arg1: i32, %arg2: i32) -> (i32, i32) {
    %c0_i32 = arith.constant 0 : i32
    %c0_i32_0 = arith.constant 0 : i32
    return %c0_i32, %arg1 : i32, i32
  }
  func.func @transform_3(%arg0: i32, %arg1: i32, %arg2: i32) -> (i32, i32) {
    %c0_i32 = arith.constant 0 : i32
    return %arg0, %arg1 : i32, i32
  }
}

module attributes {stable_mosaic.version = 11 : i64} {
  func.func @_bn_stats_kernel(%arg0: i32, %arg1: memref<128x48xbf16, #tpu.memory_space<vmem>>, %arg2: memref<1x48xf32, #tpu.memory_space<vmem>>, %arg3: memref<1x48xf32, #tpu.memory_space<vmem>>) attributes {dimension_semantics = [#tpu.dimension_semantics<arbitrary>], iteration_bounds = array<i64: 1>, scalar_prefetch = 0 : i64, scratch_operands = 0 : i64, tpu.core_type = #tpu.core_type<tc>, window_params = [{transform_indices = @transform_0, window_bounds = array<i64: 128, 48>}, {pipeline_mode = #tpu.pipeline_mode<synchronous>, transform_indices = @transform_1, window_bounds = array<i64: 1, 48>}, {pipeline_mode = #tpu.pipeline_mode<synchronous>, transform_indices = @transform_2, window_bounds = array<i64: 1, 48>}]} {
    %c0_i32 = arith.constant 0 : i32
    %0 = arith.cmpi eq, %arg0, %c0_i32 : i32
    %1 = arith.extui %0 : i1 to i32
    %c0_i32_0 = arith.constant 0 : i32
    %2 = arith.cmpi ne, %1, %c0_i32_0 : i32
    scf.if %2 {
      %cst_11 = arith.constant 0.000000e+00 : f32
      %16 = vector.broadcast %cst_11 : f32 to vector<1x48xf32>
      %c0_12 = arith.constant 0 : index
      %c0_13 = arith.constant 0 : index
      %17 = vector.load %arg2[%c0_12, %c0_13] : memref<1x48xf32, #tpu.memory_space<vmem>>, vector<1x48xf32>
      tpu.vector_store %arg2[%c0_12, %c0_13], %16 {strides = array<i32>} : memref<1x48xf32, #tpu.memory_space<vmem>>, vector<1x48xf32>,
      %cst_14 = arith.constant 0.000000e+00 : f32
      %18 = vector.broadcast %cst_14 : f32 to vector<1x48xf32>
      %c0_15 = arith.constant 0 : index
      %c0_16 = arith.constant 0 : index
      %19 = vector.load %arg3[%c0_15, %c0_16] : memref<1x48xf32, #tpu.memory_space<vmem>>, vector<1x48xf32>
      tpu.vector_store %arg3[%c0_15, %c0_16], %18 {strides = array<i32>} : memref<1x48xf32, #tpu.memory_space<vmem>>, vector<1x48xf32>,
    } else {
    }
    %c0 = arith.constant 0 : index
    %c0_1 = arith.constant 0 : index
    %3 = vector.load %arg1[%c0, %c0_1] : memref<128x48xbf16, #tpu.memory_space<vmem>>, vector<128x48xbf16>
    %4 = arith.extf %3 : vector<128x48xbf16> to vector<128x48xf32>
    %c0_2 = arith.constant 0 : index
    %c0_3 = arith.constant 0 : index
    %5 = vector.load %arg2[%c0_2, %c0_3] : memref<1x48xf32, #tpu.memory_space<vmem>>, vector<1x48xf32>
    %cst = arith.constant dense<0.000000e+00> : vector<48xf32>
    %6 = vector.multi_reduction <add>, %4, %cst [0] : vector<128x48xf32> to vector<48xf32>
    %7 = vector.shape_cast %6 : vector<48xf32> to vector<1x48xf32>
    %8 = arith.addf %5, %7 : vector<1x48xf32>
    %c0_4 = arith.constant 0 : index
    %c0_5 = arith.constant 0 : index
    %9 = vector.load %arg2[%c0_4, %c0_5] : memref<1x48xf32, #tpu.memory_space<vmem>>, vector<1x48xf32>
    tpu.vector_store %arg2[%c0_4, %c0_5], %8 {strides = array<i32>} : memref<1x48xf32, #tpu.memory_space<vmem>>, vector<1x48xf32>,
    %c0_6 = arith.constant 0 : index
    %c0_7 = arith.constant 0 : index
    %10 = vector.load %arg3[%c0_6, %c0_7] : memref<1x48xf32, #tpu.memory_space<vmem>>, vector<1x48xf32>
    %11 = arith.mulf %4, %4 : vector<128x48xf32>
    %cst_8 = arith.constant dense<0.000000e+00> : vector<48xf32>
    %12 = vector.multi_reduction <add>, %11, %cst_8 [0] : vector<128x48xf32> to vector<48xf32>
    %13 = vector.shape_cast %12 : vector<48xf32> to vector<1x48xf32>
    %14 = arith.addf %10, %13 : vector<1x48xf32>
    %c0_9 = arith.constant 0 : index
    %c0_10 = arith.constant 0 : index
    %15 = vector.load %arg3[%c0_9, %c0_10] : memref<1x48xf32, #tpu.memory_space<vmem>>, vector<1x48xf32>
    tpu.vector_store %arg3[%c0_9, %c0_10], %14 {strides = array<i32>} : memref<1x48xf32, #tpu.memory_space<vmem>>, vector<1x48xf32>,
    return
  }
  func.func @transform_0(%arg0: i32) -> (i32, i32) {
    %c0_i32 = arith.constant 0 : i32
    %c0_i32_0 = arith.constant 0 : i32
    return %arg0, %c0_i32 : i32, i32
  }
  func.func @transform_1(%arg0: i32) -> (i32, i32) {
    %c0_i32 = arith.constant 0 : i32
    %c0_i32_0 = arith.constant 0 : i32
    %c0_i32_1 = arith.constant 0 : i32
    return %c0_i32, %c0_i32_0 : i32, i32
  }
  func.func @transform_2(%arg0: i32) -> (i32, i32) {
    %c0_i32 = arith.constant 0 : i32
    %c0_i32_0 = arith.constant 0 : i32
    %c0_i32_1 = arith.constant 0 : i32
    return %c0_i32, %c0_i32_0 : i32, i32
  }
}

module attributes {stable_mosaic.version = 11 : i64} {
  func.func @_affine_kernel(%arg0: i32, %arg1: memref<128x48xbf16, #tpu.memory_space<vmem>>, %arg2: memref<1x48xf32, #tpu.memory_space<vmem>>, %arg3: memref<1x48xf32, #tpu.memory_space<vmem>>, %arg4: memref<128x48xbf16, #tpu.memory_space<vmem>>) attributes {dimension_semantics = [#tpu.dimension_semantics<parallel>], iteration_bounds = array<i64: 1>, scalar_prefetch = 0 : i64, scratch_operands = 0 : i64, tpu.core_type = #tpu.core_type<tc>, window_params = [{transform_indices = @transform_0, window_bounds = array<i64: 128, 48>}, {pipeline_mode = #tpu.pipeline_mode<synchronous>, transform_indices = @transform_1, window_bounds = array<i64: 1, 48>}, {pipeline_mode = #tpu.pipeline_mode<synchronous>, transform_indices = @transform_2, window_bounds = array<i64: 1, 48>}, {transform_indices = @transform_3, window_bounds = array<i64: 128, 48>}]} {
    %c0 = arith.constant 0 : index
    %c0_0 = arith.constant 0 : index
    %0 = vector.load %arg1[%c0, %c0_0] : memref<128x48xbf16, #tpu.memory_space<vmem>>, vector<128x48xbf16>
    %1 = arith.extf %0 : vector<128x48xbf16> to vector<128x48xf32>
    %c0_1 = arith.constant 0 : index
    %c0_2 = arith.constant 0 : index
    %2 = vector.load %arg2[%c0_1, %c0_2] : memref<1x48xf32, #tpu.memory_space<vmem>>, vector<1x48xf32>
    %3 = vector.broadcast %2 : vector<1x48xf32> to vector<128x48xf32>
    %4 = arith.mulf %1, %3 : vector<128x48xf32>
    %c0_3 = arith.constant 0 : index
    %c0_4 = arith.constant 0 : index
    %5 = vector.load %arg3[%c0_3, %c0_4] : memref<1x48xf32, #tpu.memory_space<vmem>>, vector<1x48xf32>
    %6 = vector.broadcast %5 : vector<1x48xf32> to vector<128x48xf32>
    %7 = arith.addf %4, %6 : vector<128x48xf32>
    %cst = arith.constant 0.707106769 : f32
    %8 = vector.broadcast %cst : f32 to vector<128x48xf32>
    %9 = arith.mulf %7, %8 : vector<128x48xf32>
    %10 = math.absf %9 : vector<128x48xf32>
    %cst_5 = arith.constant 0.327591091 : f32
    %11 = vector.broadcast %cst_5 : f32 to vector<128x48xf32>
    %12 = arith.mulf %11, %10 : vector<128x48xf32>
    %cst_6 = arith.constant 1.000000e+00 : f32
    %13 = vector.broadcast %cst_6 : f32 to vector<128x48xf32>
    %14 = arith.addf %13, %12 : vector<128x48xf32>
    %cst_7 = arith.constant 1.000000e+00 : f32
    %15 = vector.broadcast %cst_7 : f32 to vector<128x48xf32>
    %16 = arith.divf %15, %14 : vector<128x48xf32>
    %cst_8 = arith.constant 1.06140542 : f32
    %17 = vector.broadcast %cst_8 : f32 to vector<128x48xf32>
    %18 = arith.mulf %16, %17 : vector<128x48xf32>
    %cst_9 = arith.constant -1.45315206 : f32
    %19 = vector.broadcast %cst_9 : f32 to vector<128x48xf32>
    %20 = arith.addf %19, %18 : vector<128x48xf32>
    %21 = arith.mulf %16, %20 : vector<128x48xf32>
    %cst_10 = arith.constant 1.42141378 : f32
    %22 = vector.broadcast %cst_10 : f32 to vector<128x48xf32>
    %23 = arith.addf %22, %21 : vector<128x48xf32>
    %24 = arith.mulf %16, %23 : vector<128x48xf32>
    %cst_11 = arith.constant -0.284496725 : f32
    %25 = vector.broadcast %cst_11 : f32 to vector<128x48xf32>
    %26 = arith.addf %25, %24 : vector<128x48xf32>
    %27 = arith.mulf %16, %26 : vector<128x48xf32>
    %cst_12 = arith.constant 0.254829586 : f32
    %28 = vector.broadcast %cst_12 : f32 to vector<128x48xf32>
    %29 = arith.addf %28, %27 : vector<128x48xf32>
    %30 = arith.mulf %16, %29 : vector<128x48xf32>
    %cst_13 = arith.constant 0.000000e+00 : f32
    %31 = vector.broadcast %cst_13 : f32 to vector<128x48xf32>
    %32 = arith.subf %31, %10 : vector<128x48xf32>
    %33 = arith.mulf %32, %10 : vector<128x48xf32>
    %34 = math.exp %33 : vector<128x48xf32>
    %35 = arith.mulf %30, %34 : vector<128x48xf32>
    %cst_14 = arith.constant 1.000000e+00 : f32
    %36 = vector.broadcast %cst_14 : f32 to vector<128x48xf32>
    %37 = arith.subf %36, %35 : vector<128x48xf32>
    %cst_15 = arith.constant 0.000000e+00 : f32
    %38 = vector.broadcast %cst_15 : f32 to vector<128x48xf32>
    %39 = arith.cmpf oge, %9, %38 : vector<128x48xf32>
    %cst_16 = arith.constant 0.000000e+00 : f32
    %40 = vector.broadcast %cst_16 : f32 to vector<128x48xf32>
    %41 = arith.subf %40, %37 : vector<128x48xf32>
    %42 = arith.select %39, %37, %41 : vector<128x48xi1>, vector<128x48xf32>
    %cst_17 = arith.constant 5.000000e-01 : f32
    %43 = vector.broadcast %cst_17 : f32 to vector<128x48xf32>
    %44 = arith.mulf %43, %7 : vector<128x48xf32>
    %cst_18 = arith.constant 1.000000e+00 : f32
    %45 = vector.broadcast %cst_18 : f32 to vector<128x48xf32>
    %46 = arith.addf %45, %42 : vector<128x48xf32>
    %47 = arith.mulf %44, %46 : vector<128x48xf32>
    %48 = arith.truncf %47 : vector<128x48xf32> to vector<128x48xbf16>
    %c0_19 = arith.constant 0 : index
    %c0_20 = arith.constant 0 : index
    %49 = vector.load %arg4[%c0_19, %c0_20] : memref<128x48xbf16, #tpu.memory_space<vmem>>, vector<128x48xbf16>
    tpu.vector_store %arg4[%c0_19, %c0_20], %48 {strides = array<i32>} : memref<128x48xbf16, #tpu.memory_space<vmem>>, vector<128x48xbf16>,
    return
  }
  func.func @transform_0(%arg0: i32) -> (i32, i32) {
    %c0_i32 = arith.constant 0 : i32
    %c0_i32_0 = arith.constant 0 : i32
    return %arg0, %c0_i32 : i32, i32
  }
  func.func @transform_1(%arg0: i32) -> (i32, i32) {
    %c0_i32 = arith.constant 0 : i32
    %c0_i32_0 = arith.constant 0 : i32
    %c0_i32_1 = arith.constant 0 : i32
    return %c0_i32, %c0_i32_0 : i32, i32
  }
  func.func @transform_2(%arg0: i32) -> (i32, i32) {
    %c0_i32 = arith.constant 0 : i32
    %c0_i32_0 = arith.constant 0 : i32
    %c0_i32_1 = arith.constant 0 : i32
    return %c0_i32, %c0_i32_0 : i32, i32
  }
  func.func @transform_3(%arg0: i32) -> (i32, i32) {
    %c0_i32 = arith.constant 0 : i32
    %c0_i32_0 = arith.constant 0 : i32
    return %arg0, %c0_i32 : i32, i32
  }
}

module attributes {stable_mosaic.version = 11 : i64} {
  func.func @_mm_kernel(%arg0: i32, %arg1: i32, %arg2: i32, %arg3: memref<128x512xbf16, #tpu.memory_space<vmem>>, %arg4: memref<512x128xbf16, #tpu.memory_space<vmem>>, %arg5: memref<1x128xf32, #tpu.memory_space<vmem>>, %arg6: memref<128x128xbf16, #tpu.memory_space<vmem>>, %arg7: memref<128x128xf32, #tpu.memory_space<vmem>>) attributes {dimension_semantics = [#tpu.dimension_semantics<parallel>, #tpu.dimension_semantics<parallel>, #tpu.dimension_semantics<arbitrary>], iteration_bounds = array<i64: 1, 1, 1>, scalar_prefetch = 0 : i64, scratch_operands = 1 : i64, tpu.core_type = #tpu.core_type<tc>, window_params = [{transform_indices = @transform_0, window_bounds = array<i64: 128, 512>}, {transform_indices = @transform_1, window_bounds = array<i64: 512, 128>}, {transform_indices = @transform_2, window_bounds = array<i64: 1, 128>}, {transform_indices = @transform_3, window_bounds = array<i64: 128, 128>}]} {
    %c0_i32 = arith.constant 0 : i32
    %0 = arith.cmpi eq, %arg2, %c0_i32 : i32
    %1 = arith.extui %0 : i1 to i32
    %c0_i32_0 = arith.constant 0 : i32
    %2 = arith.cmpi ne, %1, %c0_i32_0 : i32
    scf.if %2 {
      %cst_10 = arith.constant 0.000000e+00 : f32
      %12 = vector.broadcast %cst_10 : f32 to vector<128x128xf32>
      %c0_11 = arith.constant 0 : index
      %c0_12 = arith.constant 0 : index
      %13 = vector.load %arg7[%c0_11, %c0_12] : memref<128x128xf32, #tpu.memory_space<vmem>>, vector<128x128xf32>
      tpu.vector_store %arg7[%c0_11, %c0_12], %12 {strides = array<i32>} : memref<128x128xf32, #tpu.memory_space<vmem>>, vector<128x128xf32>,
    } else {
    }
    %c0 = arith.constant 0 : index
    %c0_1 = arith.constant 0 : index
    %3 = vector.load %arg3[%c0, %c0_1] : memref<128x512xbf16, #tpu.memory_space<vmem>>, vector<128x512xbf16>
    %c0_2 = arith.constant 0 : index
    %c0_3 = arith.constant 0 : index
    %4 = vector.load %arg7[%c0_2, %c0_3] : memref<128x128xf32, #tpu.memory_space<vmem>>, vector<128x128xf32>
    %c0_4 = arith.constant 0 : index
    %c0_5 = arith.constant 0 : index
    %5 = vector.load %arg4[%c0_4, %c0_5] : memref<512x128xbf16, #tpu.memory_space<vmem>>, vector<512x128xbf16>
    %cst = arith.constant dense<0.000000e+00> : vector<128x128xf32>
    %6 = tpu.matmul %3, %5, %cst {dimension_numbers = #tpu.dot_dimension_numbers<[1], [0], [0], [1], [0, 0, 1, 1], [], []>} : vector<128x512xbf16>, vector<512x128xbf16>, vector<128x128xf32> -> vector<128x128xf32>
    %7 = arith.addf %4, %6 : vector<128x128xf32>
    %c0_6 = arith.constant 0 : index
    %c0_7 = arith.constant 0 : index
    %8 = vector.load %arg7[%c0_6, %c0_7] : memref<128x128xf32, #tpu.memory_space<vmem>>, vector<128x128xf32>
    tpu.vector_store %arg7[%c0_6, %c0_7], %7 {strides = array<i32>} : memref<128x128xf32, #tpu.memory_space<vmem>>, vector<128x128xf32>,
    %c0_i32_8 = arith.constant 0 : i32
    %9 = arith.cmpi eq, %arg2, %c0_i32_8 : i32
    %10 = arith.extui %9 : i1 to i32
    %c0_i32_9 = arith.constant 0 : i32
    %11 = arith.cmpi ne, %10, %c0_i32_9 : i32
    scf.if %11 {
      %c0_10 = arith.constant 0 : index
      %c0_11 = arith.constant 0 : index
      %12 = vector.load %arg7[%c0_10, %c0_11] : memref<128x128xf32, #tpu.memory_space<vmem>>, vector<128x128xf32>
      %c0_12 = arith.constant 0 : index
      %c0_13 = arith.constant 0 : index
      %13 = vector.load %arg5[%c0_12, %c0_13] : memref<1x128xf32, #tpu.memory_space<vmem>>, vector<1x128xf32>
      %14 = vector.broadcast %13 : vector<1x128xf32> to vector<128x128xf32>
      %15 = arith.addf %12, %14 : vector<128x128xf32>
      %16 = arith.truncf %15 : vector<128x128xf32> to vector<128x128xbf16>
      %c0_14 = arith.constant 0 : index
      %c0_15 = arith.constant 0 : index
      %17 = vector.load %arg6[%c0_14, %c0_15] : memref<128x128xbf16, #tpu.memory_space<vmem>>, vector<128x128xbf16>
      tpu.vector_store %arg6[%c0_14, %c0_15], %16 {strides = array<i32>} : memref<128x128xbf16, #tpu.memory_space<vmem>>, vector<128x128xbf16>,
    } else {
    }
    return
  }
  func.func @transform_0(%arg0: i32, %arg1: i32, %arg2: i32) -> (i32, i32) {
    %c0_i32 = arith.constant 0 : i32
    return %arg0, %arg2 : i32, i32
  }
  func.func @transform_1(%arg0: i32, %arg1: i32, %arg2: i32) -> (i32, i32) {
    %c0_i32 = arith.constant 0 : i32
    return %arg2, %arg1 : i32, i32
  }
  func.func @transform_2(%arg0: i32, %arg1: i32, %arg2: i32) -> (i32, i32) {
    %c0_i32 = arith.constant 0 : i32
    %c0_i32_0 = arith.constant 0 : i32
    return %c0_i32, %arg1 : i32, i32
  }
  func.func @transform_3(%arg0: i32, %arg1: i32, %arg2: i32) -> (i32, i32) {
    %c0_i32 = arith.constant 0 : i32
    return %arg0, %arg1 : i32, i32
  }
}

module attributes {stable_mosaic.version = 11 : i64} {
  func.func @_mm_kernel(%arg0: i32, %arg1: i32, %arg2: i32, %arg3: memref<128x128xbf16, #tpu.memory_space<vmem>>, %arg4: memref<128x128xbf16, #tpu.memory_space<vmem>>, %arg5: memref<1x128xf32, #tpu.memory_space<vmem>>, %arg6: memref<128x128xf32, #tpu.memory_space<vmem>>, %arg7: memref<128x128xf32, #tpu.memory_space<vmem>>) attributes {dimension_semantics = [#tpu.dimension_semantics<parallel>, #tpu.dimension_semantics<parallel>, #tpu.dimension_semantics<arbitrary>], iteration_bounds = array<i64: 1, 1, 1>, scalar_prefetch = 0 : i64, scratch_operands = 1 : i64, tpu.core_type = #tpu.core_type<tc>, window_params = [{transform_indices = @transform_0, window_bounds = array<i64: 128, 128>}, {transform_indices = @transform_1, window_bounds = array<i64: 128, 128>}, {transform_indices = @transform_2, window_bounds = array<i64: 1, 128>}, {transform_indices = @transform_3, window_bounds = array<i64: 128, 128>}]} {
    %c0_i32 = arith.constant 0 : i32
    %0 = arith.cmpi eq, %arg2, %c0_i32 : i32
    %1 = arith.extui %0 : i1 to i32
    %c0_i32_0 = arith.constant 0 : i32
    %2 = arith.cmpi ne, %1, %c0_i32_0 : i32
    scf.if %2 {
      %cst_10 = arith.constant 0.000000e+00 : f32
      %12 = vector.broadcast %cst_10 : f32 to vector<128x128xf32>
      %c0_11 = arith.constant 0 : index
      %c0_12 = arith.constant 0 : index
      %13 = vector.load %arg7[%c0_11, %c0_12] : memref<128x128xf32, #tpu.memory_space<vmem>>, vector<128x128xf32>
      tpu.vector_store %arg7[%c0_11, %c0_12], %12 {strides = array<i32>} : memref<128x128xf32, #tpu.memory_space<vmem>>, vector<128x128xf32>,
    } else {
    }
    %c0 = arith.constant 0 : index
    %c0_1 = arith.constant 0 : index
    %3 = vector.load %arg3[%c0, %c0_1] : memref<128x128xbf16, #tpu.memory_space<vmem>>, vector<128x128xbf16>
    %c0_2 = arith.constant 0 : index
    %c0_3 = arith.constant 0 : index
    %4 = vector.load %arg7[%c0_2, %c0_3] : memref<128x128xf32, #tpu.memory_space<vmem>>, vector<128x128xf32>
    %c0_4 = arith.constant 0 : index
    %c0_5 = arith.constant 0 : index
    %5 = vector.load %arg4[%c0_4, %c0_5] : memref<128x128xbf16, #tpu.memory_space<vmem>>, vector<128x128xbf16>
    %cst = arith.constant dense<0.000000e+00> : vector<128x128xf32>
    %6 = tpu.matmul %3, %5, %cst {dimension_numbers = #tpu.dot_dimension_numbers<[1], [0], [0], [1], [0, 0, 1, 1], [], []>} : vector<128x128xbf16>, vector<128x128xbf16>, vector<128x128xf32> -> vector<128x128xf32>
    %7 = arith.addf %4, %6 : vector<128x128xf32>
    %c0_6 = arith.constant 0 : index
    %c0_7 = arith.constant 0 : index
    %8 = vector.load %arg7[%c0_6, %c0_7] : memref<128x128xf32, #tpu.memory_space<vmem>>, vector<128x128xf32>
    tpu.vector_store %arg7[%c0_6, %c0_7], %7 {strides = array<i32>} : memref<128x128xf32, #tpu.memory_space<vmem>>, vector<128x128xf32>,
    %c0_i32_8 = arith.constant 0 : i32
    %9 = arith.cmpi eq, %arg2, %c0_i32_8 : i32
    %10 = arith.extui %9 : i1 to i32
    %c0_i32_9 = arith.constant 0 : i32
    %11 = arith.cmpi ne, %10, %c0_i32_9 : i32
    scf.if %11 {
      %c0_10 = arith.constant 0 : index
      %c0_11 = arith.constant 0 : index
      %12 = vector.load %arg7[%c0_10, %c0_11] : memref<128x128xf32, #tpu.memory_space<vmem>>, vector<128x128xf32>
      %c0_12 = arith.constant 0 : index
      %c0_13 = arith.constant 0 : index
      %13 = vector.load %arg5[%c0_12, %c0_13] : memref<1x128xf32, #tpu.memory_space<vmem>>, vector<1x128xf32>
      %14 = vector.broadcast %13 : vector<1x128xf32> to vector<128x128xf32>
      %15 = arith.addf %12, %14 : vector<128x128xf32>
      %c0_14 = arith.constant 0 : index
      %c0_15 = arith.constant 0 : index
      %16 = vector.load %arg6[%c0_14, %c0_15] : memref<128x128xf32, #tpu.memory_space<vmem>>, vector<128x128xf32>
      tpu.vector_store %arg6[%c0_14, %c0_15], %15 {strides = array<i32>} : memref<128x128xf32, #tpu.memory_space<vmem>>, vector<128x128xf32>,
    } else {
    }
    return
  }
  func.func @transform_0(%arg0: i32, %arg1: i32, %arg2: i32) -> (i32, i32) {
    %c0_i32 = arith.constant 0 : i32
    return %arg0, %arg2 : i32, i32
  }
  func.func @transform_1(%arg0: i32, %arg1: i32, %arg2: i32) -> (i32, i32) {
    %c0_i32 = arith.constant 0 : i32
    return %arg2, %arg1 : i32, i32
  }
  func.func @transform_2(%arg0: i32, %arg1: i32, %arg2: i32) -> (i32, i32) {
    %c0_i32 = arith.constant 0 : i32
    %c0_i32_0 = arith.constant 0 : i32
    return %c0_i32, %arg1 : i32, i32
  }
  func.func @transform_3(%arg0: i32, %arg1: i32, %arg2: i32) -> (i32, i32) {
    %c0_i32 = arith.constant 0 : i32
    return %arg0, %arg1 : i32, i32
  }
}

</mosaic_0001>

<bundles_post_ra>
// kernel: seg_tran_forward.29
= control target key start
LH: loop header
LB: loop body
LE: loop exit
PB: predicated region body
PF: predicated region fallthrough
CT: control target
= control target key end

     0   :  { %vm156_vm0 = vcmask 519168   ;;  %s400_s0 = inlined_call_operand.vmem [shape: bf16[128,64], index: 0, kind: input, shape index: {}]   ;;  %s401_s1 = inlined_call_operand.vmem [shape: f32[1,64], index: 1, kind: input, shape index: {}]   ;;  %s402_s2 = inlined_call_operand.vmem [shape: f32[1,64], index: 2, kind: input, shape index: {}]   ;;  %s403_s3 = inlined_call_operand.vmem [shape: bf16[128,64], index: 3, kind: output, shape index: {}]  }
   0x1   :  { %v212_v0 = vld [vmem:[%s400_s0] sm:$0xff]   ;;  %v243_v4 = vld [vmem:[%s400_s0 + $0x8] sm:$0xff]   ;;  %v244_v5 = vld [vmem:[%s400_s0 + $0x10] sm:$0xff]  }
   0x2   :  { %v276_v1 = vld [vmem:[%s401_s1] ss:$0 sm:$0xff]  ;;  %v213_v2 = vunpack.c.l.bf16 %v212_v0  ;;  %v214_v3 = vunpack.c.h.bf16 %v212_v0  ;;  %v245_v6 = vld [vmem:[%s400_s0 + $0x18] sm:$0xff]   ;;  %v217_v8 = vunpack.c.l.bf16 %v243_v4  ;;  %v218_v9 = vunpack.c.h.bf16 %v243_v4  ;;  %v247_v33 = vld [vmem:[%s400_s0 + $0x28] sm:$0xff]  }
   0x3   :  { %v290_v7 = vld [vmem:[%s402_s2] ss:$0 sm:$0xff]  ;;  %v221_v10 = vunpack.c.l.bf16 %v244_v5  ;;  %v222_v11 = vunpack.c.h.bf16 %v244_v5  ;;  %v225_v14 = vunpack.c.l.bf16 %v245_v6  ;;  %v226_v15 = vunpack.c.h.bf16 %v245_v6  ;;  %v248_v34 = vld [vmem:[%s400_s0 + $0x30] sm:$0xff]   ;;  %v249_v39 = vld [vmem:[%s400_s0 + $0x38] sm:$0xff]  }
   0x4   :  { %v53_v12 = vmul.f32 %v213_v2, %v276_v1  ;;  %v54_v13 = vmul.f32 %v214_v3, %v276_v1  ;;  %v55_v16 = vmul.f32 %v217_v8, %v276_v1  ;;  %v56_v17 = vmul.f32 %v218_v9, %v276_v1  ;;  %v246_v28 = vld [vmem:[%s400_s0 + $0x20] sm:$0xff]  }
   0x5   :  { %v57_v18 = vmul.f32 %v221_v10, %v276_v1  ;;  %v58_v19 = vmul.f32 %v222_v11, %v276_v1  ;;  %v59_v22 = vmul.f32 %v225_v14, %v276_v1  ;;  %v60_v23 = vmul.f32 %v226_v15, %v276_v1 }
   0x6   :  { %v76_v20 = vadd.f32 %v290_v7, %v53_v12  ;;  %v77_v21 = vadd.f32 %v290_v7, %v54_v13  ;;  %v78_v24 = vadd.f32 %v290_v7, %v55_v16  ;;  %v79_v25 = vadd.f32 %v290_v7, %v56_v17 }
   0x7   :  { %v80_v26 = vadd.f32 %v290_v7, %v57_v18  ;;  %v81_v27 = vadd.f32 %v290_v7, %v58_v19  ;;  %v82_v31 = vadd.f32 %v290_v7, %v59_v22  ;;  %v83_v32 = vadd.f32 %v290_v7, %v60_v23 }
   0x8   :  { %v195_v29 = vpack.c.bf16 %v76_v20, %v76_v20  ;;  %v196_v30 = vpack.c.bf16 %v77_v21, %v77_v21  ;;  %v197_v35 = vpack.c.bf16 %v78_v24, %v78_v24  ;;  %v198_v36 = vpack.c.bf16 %v79_v25, %v79_v25 }
   0x9   :  { %v199_v37 = vpack.c.bf16 %v80_v26, %v80_v26  ;;  %v200_v38 = vpack.c.bf16 %v81_v27, %v81_v27  ;;  %v201_v40 = vpack.c.bf16 %v82_v31, %v82_v31  ;;  %v202_v41 = vpack.c.bf16 %v83_v32, %v83_v32 }
   0xa   :  { %157 = vst.msk [vmem:[%s403_s3] sm:$0xf] %vm156_vm0, %v195_v29  ;;  %158 = vst.msk [vmem:[%s403_s3 + $0x4] sm:$0xf] %vm156_vm0, %v196_v30  ;;  %v229_v42 = vunpack.c.l.bf16 %v246_v28  ;;  %v230_v43 = vunpack.c.h.bf16 %v246_v28  ;;  %v233_v44 = vunpack.c.l.bf16 %v247_v33  ;;  %v234_v45 = vunpack.c.h.bf16 %v247_v33 }
   0xb   :  { %159 = vst.msk [vmem:[%s403_s3 + $0x8] sm:$0xf] %vm156_vm0, %v197_v35  ;;  %160 = vst.msk [vmem:[%s403_s3 + $0xc] sm:$0xf] %vm156_vm0, %v198_v36  ;;  %v237_v46 = vunpack.c.l.bf16 %v248_v34  ;;  %v238_v47 = vunpack.c.h.bf16 %v248_v34  ;;  %v241_v50 = vunpack.c.l.bf16 %v249_v39  ;;  %v242_v51 = vunpack.c.h.bf16 %v249_v39 }
   0xc   :  { %161 = vst.msk [vmem:[%s403_s3 + $0x10] sm:$0xf] %vm156_vm0, %v199_v37  ;;  %162 = vst.msk [vmem:[%s403_s3 + $0x14] sm:$0xf] %vm156_vm0, %v200_v38  ;;  %v61_v48 = vmul.f32 %v229_v42, %v276_v1  ;;  %v62_v49 = vmul.f32 %v230_v43, %v276_v1  ;;  %v63_v52 = vmul.f32 %v233_v44, %v276_v1 }
   0xd   :  { %163 = vst.msk [vmem:[%s403_s3 + $0x18] sm:$0xf] %vm156_vm0, %v201_v40  ;;  %164 = vst.msk [vmem:[%s403_s3 + $0x1c] sm:$0xf] %vm156_vm0, %v202_v41  ;;  %v64_v53 = vmul.f32 %v234_v45, %v276_v1  ;;  %v65_v54 = vmul.f32 %v237_v46, %v276_v1  ;;  %v66_v55 = vmul.f32 %v238_v47, %v276_v1 }
   0xe   :  { %v84_v56 = vadd.f32 %v290_v7, %v61_v48  ;;  %v85_v57 = vadd.f32 %v290_v7, %v62_v49  ;;  %v67_v58 = vmul.f32 %v241_v50, %v276_v1  ;;  %v68_v59 = vmul.f32 %v242_v51, %v276_v1 }
   0xf   :  { %v86_v60 = vadd.f32 %v290_v7, %v63_v52  ;;  %v87_v61 = vadd.f32 %v290_v7, %v64_v53  ;;  %v88_v62 = vadd.f32 %v290_v7, %v65_v54  ;;  %v89_v63 = vadd.f32 %v290_v7, %v66_v55 }
  0x10   :  { %v203_v0 = vpack.c.bf16 %v84_v56, %v84_v56  ;;  %v204_v2 = vpack.c.bf16 %v85_v57, %v85_v57  ;;  %v90_v3 = vadd.f32 %v290_v7, %v67_v58  ;;  %v91_v4 = vadd.f32 %v290_v7, %v68_v59 }
  0x11   :  { %v205_v5 = vpack.c.bf16 %v86_v60, %v86_v60  ;;  %v206_v6 = vpack.c.bf16 %v87_v61, %v87_v61  ;;  %v207_v8 = vpack.c.bf16 %v88_v62, %v88_v62  ;;  %v208_v9 = vpack.c.bf16 %v89_v63, %v89_v63 }
  0x12   :  { %165 = vst.msk [vmem:[%s403_s3 + $0x20] sm:$0xf] %vm156_vm0, %v203_v0  ;;  %166 = vst.msk [vmem:[%s403_s3 + $0x24] sm:$0xf] %vm156_vm0, %v204_v2  ;;  %v209_v1 = vpack.c.bf16 %v90_v3, %v90_v3  ;;  %v210_v10 = vpack.c.bf16 %v91_v4, %v91_v4 }
  0x13   :  { %167 = vst.msk [vmem:[%s403_s3 + $0x28] sm:$0xf] %vm156_vm0, %v205_v5  ;;  %168 = vst.msk [vmem:[%s403_s3 + $0x2c] sm:$0xf] %vm156_vm0, %v206_v6 }
  0x14   :  { %169 = vst.msk [vmem:[%s403_s3 + $0x30] sm:$0xf] %vm156_vm0, %v207_v8  ;;  %170 = vst.msk [vmem:[%s403_s3 + $0x34] sm:$0xf] %vm156_vm0, %v208_v9 }
  0x15   :  { %171 = vst.msk [vmem:[%s403_s3 + $0x38] sm:$0xf] %vm156_vm0, %v209_v1  ;;  %172 = vst.msk [vmem:[%s403_s3 + $0x3c] sm:$0xf] %vm156_vm0, %v210_v10 }

// kernel: seg_tran_forward.28
= control target key start
LH: loop header
LB: loop body
LE: loop exit
PB: predicated region body
PF: predicated region fallthrough
CT: control target
= control target key end

     0   :  { %vm14_vm0 = vcmask 516096   ;;  %v195_v0 = vmov 0.0   ;;  %vm50_vm1 = vcmask 523264   ;;  %s289_s0 = inlined_call_operand.vmem [shape: bf16[128,64], index: 0, kind: input, shape index: {}]   ;;  %s290_s1 = inlined_call_operand.vmem [shape: f32[1,64], index: 1, kind: output, shape index: {0}]   ;;  %s291_s2 = inlined_call_operand.vmem [shape: f32[1,64], index: 2, kind: output, shape index: {1}]  }
   0x1   :  { %15 = vst.msk [vmem:[%s290_s1] sm:$0x1] %vm14_vm0, %v195_v0  ;;  %v156_v1 = vld [vmem:[%s289_s0] sm:$0xff]   ;;  %v187_v2 = vld [vmem:[%s289_s0 + $0x8] sm:$0xff]   ;;  %16 = vst.msk [vmem:[%s291_s2] sm:$0x1] %vm14_vm0, %v195_v0 }
   0x2   :  { %v157_v3 = vunpack.c.l.bf16 %v156_v1  ;;  %v158_v4 = vunpack.c.h.bf16 %v156_v1  ;;  %v161_v5 = vunpack.c.l.bf16 %v187_v2  ;;  %v188_v6 = vld [vmem:[%s289_s0 + $0x10] sm:$0xff]   ;;  %v162_v7 = vunpack.c.h.bf16 %v187_v2  ;;  %v189_v14 = vld [vmem:[%s289_s0 + $0x18] sm:$0xff]   ;;  %v190_v24 = vld [vmem:[%s289_s0 + $0x20] sm:$0xff]  }
   0x3   :  { %v165_v12 = vunpack.c.l.bf16 %v188_v6  ;;  %v166_v16 = vunpack.c.h.bf16 %v188_v6  ;;  %v169_v22 = vunpack.c.l.bf16 %v189_v14  ;;  %v170_v27 = vunpack.c.h.bf16 %v189_v14  ;;  %v191_v37 = vld [vmem:[%s289_s0 + $0x28] sm:$0xff]   ;;  %v192_v50 = vld [vmem:[%s289_s0 + $0x30] sm:$0xff]   ;;  %v193_v63 = vld [vmem:[%s289_s0 + $0x38] sm:$0xff]  }
   0x4   :  { %v51_v8 = vsel %vm50_vm1, %v157_v3, 0.0  ;;  %v52_v9 = vsel %vm50_vm1, %v158_v4, 0.0  ;;  %v54_v10 = vsel %vm50_vm1, %v161_v5, 0.0  ;;  %v56_v13 = vsel %vm50_vm1, %v162_v7, 0.0 }
   0x5   :  { %v53_v11 = vadd.f32 %v52_v9, %v51_v8  ;;  %v58_v17 = vsel %vm50_vm1, %v165_v12, 0.0  ;;  %v92_v19 = vmul.f32 %v157_v3, %v157_v3  ;;  %v93_v20 = vmul.f32 %v158_v4, %v158_v4 }
   0x6   :  { %v94_v21 = vmul.f32 %v161_v5, %v161_v5  ;;  %v60_v23 = vsel %vm50_vm1, %v166_v16, 0.0  ;;  %v95_v26 = vmul.f32 %v162_v7, %v162_v7  ;;  %v62_v28 = vsel %vm50_vm1, %v169_v22, 0.0 }
   0x7   :  { %v55_v15 = vadd.f32 %v54_v10, %v53_v11  ;;  %v96_v29 = vmul.f32 %v165_v12, %v165_v12  ;;  %v108_v31 = vsel %vm50_vm1, %v92_v19, 0.0  ;;  %v109_v32 = vsel %vm50_vm1, %v93_v20, 0.0 }
   0x8   :  { %v111_v33 = vsel %vm50_vm1, %v94_v21, 0.0  ;;  %v173_v34 = vunpack.c.l.bf16 %v190_v24  ;;  %v64_v35 = vsel %vm50_vm1, %v170_v27, 0.0  ;;  %v110_v36 = vadd.f32 %v109_v32, %v108_v31 }
   0x9   :  { %v57_v18 = vadd.f32 %v56_v13, %v55_v15  ;;  %v97_v39 = vmul.f32 %v166_v16, %v166_v16  ;;  %v113_v40 = vsel %vm50_vm1, %v95_v26, 0.0  ;;  %v174_v41 = vunpack.c.h.bf16 %v190_v24 }
   0xa   :  { %v66_v42 = vsel %vm50_vm1, %v173_v34, 0.0  ;;  %v112_v43 = vadd.f32 %v111_v33, %v110_v36  ;;  %v98_v45 = vmul.f32 %v169_v22, %v169_v22  ;;  %v115_v46 = vsel %vm50_vm1, %v96_v29, 0.0 }
   0xb   :  { %v59_v25 = vadd.f32 %v58_v17, %v57_v18  ;;  %v177_v47 = vunpack.c.l.bf16 %v191_v37  ;;  %v68_v48 = vsel %vm50_vm1, %v174_v41, 0.0  ;;  %v99_v52 = vmul.f32 %v170_v27, %v170_v27 }
   0xc   :  { %v114_v49 = vadd.f32 %v113_v40, %v112_v43  ;;  %v117_v53 = vsel %vm50_vm1, %v97_v39, 0.0  ;;  %v178_v54 = vunpack.c.h.bf16 %v191_v37  ;;  %v100_v58 = vmul.f32 %v173_v34, %v173_v34 }
   0xd   :  { %v61_v30 = vadd.f32 %v60_v23, %v59_v25  ;;  %v70_v55 = vsel %vm50_vm1, %v177_v47, 0.0  ;;  %v119_v59 = vsel %vm50_vm1, %v98_v45, 0.0  ;;  %v181_v60 = vunpack.c.l.bf16 %v192_v50 }
   0xe   :  { %v116_v56 = vadd.f32 %v115_v46, %v114_v49  ;;  %v72_v61 = vsel %vm50_vm1, %v178_v54, 0.0  ;;  %v101_v1 = vmul.f32 %v174_v41, %v174_v41  ;;  %v121_v2 = vsel %vm50_vm1, %v99_v52, 0.0  ;;  %v91_v52 = vld [vmem:[%s291_s2] sm:$0x1] }
   0xf   :  { %v63_v38 = vadd.f32 %v62_v28, %v61_v30  ;;  %v182_v3 = vunpack.c.h.bf16 %v192_v50  ;;  %v74_v4 = vsel %vm50_vm1, %v181_v60, 0.0  ;;  %v102_v7 = vmul.f32 %v177_v47, %v177_v47 }
  0x10   :  { %v118_v62 = vadd.f32 %v117_v53, %v116_v56  ;;  %v123_v8 = vsel %vm50_vm1, %v100_v58, 0.0  ;;  %v185_v9 = vunpack.c.l.bf16 %v193_v63  ;;  %v103_v13 = vmul.f32 %v178_v54, %v178_v54 }
  0x11   :  { %v65_v44 = vadd.f32 %v64_v35, %v63_v38  ;;  %v76_v10 = vsel %vm50_vm1, %v182_v3, 0.0  ;;  %v125_v14 = vsel %vm50_vm1, %v101_v1, 0.0  ;;  %v186_v15 = vunpack.c.h.bf16 %v193_v63 }
  0x12   :  { %v120_v5 = vadd.f32 %v119_v59, %v118_v62  ;;  %v78_v16 = vsel %vm50_vm1, %v185_v9, 0.0  ;;  %v104_v19 = vmul.f32 %v181_v60, %v181_v60  ;;  %v127_v20 = vsel %vm50_vm1, %v102_v7, 0.0 }
  0x13   :  { %v67_v51 = vadd.f32 %v66_v42, %v65_v44  ;;  %v80_v21 = vsel %vm50_vm1, %v186_v15, 0.0  ;;  %v105_v24 = vmul.f32 %v182_v3, %v182_v3  ;;  %v129_v25 = vsel %vm50_vm1, %v103_v13, 0.0  ;;  %v49_v44 = vld [vmem:[%s290_s1] sm:$0x1] }
  0x14   :  { %v122_v11 = vadd.f32 %v121_v2, %v120_v5  ;;  %v106_v28 = vmul.f32 %v185_v9, %v185_v9  ;;  %v131_v29 = vsel %vm50_vm1, %v104_v19, 0.0  ;;  %v107_v32 = vmul.f32 %v186_v15, %v186_v15 }
  0x15   :  { %v69_v57 = vadd.f32 %v68_v48, %v67_v51  ;;  %v133_v33 = vsel %vm50_vm1, %v105_v24, 0.0 }
  0x16   :  { %v124_v17 = vadd.f32 %v123_v8, %v122_v11  ;;  %v135_v36 = vsel %vm50_vm1, %v106_v28, 0.0  ;;  %v137_v39 = vsel %vm50_vm1, %v107_v32, 0.0 }
  0x17   :  { %v71_v0 = vadd.f32 %v70_v55, %v69_v57 }
  0x18   :  { %v126_v22 = vadd.f32 %v125_v14, %v124_v17 }
  0x19   :  { %v73_v6 = vadd.f32 %v72_v61, %v71_v0 }
  0x1a   :  { %v128_v26 = vadd.f32 %v127_v20, %v126_v22 }
  0x1b   :  { %v75_v12 = vadd.f32 %v74_v4, %v73_v6 }
  0x1c   :  { %v130_v30 = vadd.f32 %v129_v25, %v128_v26 }
  0x1d   :  { %v77_v18 = vadd.f32 %v76_v10, %v75_v12 }
  0x1e   :  { %v132_v34 = vadd.f32 %v131_v29, %v130_v30 }
  0x1f   :  { %v79_v23 = vadd.f32 %v78_v16, %v77_v18 }
  0x20   :  { %v134_v37 = vadd.f32 %v133_v33, %v132_v34 }
  0x21   :  { %v81_v27 = vadd.f32 %v80_v21, %v79_v23 }
  0x22   :  { %v136_v40 = vadd.f32 %v135_v36, %v134_v37 }
  0x23   :  { %v82_v31 = vrot.slane %v81_v27, 4 }
  0x24   :  { %v138_v42 = vadd.f32 %v137_v39, %v136_v40 }
  0x25   :  { %v83_v35 = vadd.f32 %v82_v31, %v81_v27 }
  0x26   :  { %v139_v45 = vrot.slane %v138_v42, 4 }
  0x27   :  { %v84_v38 = vrot.slane %v83_v35, 2 }
  0x28   :  { %v140_v47 = vadd.f32 %v139_v45, %v138_v42 }
  0x29   :  { %v85_v41 = vadd.f32 %v84_v38, %v83_v35 }
  0x2a   :  { %v141_v49 = vrot.slane %v140_v47, 2 }
  0x2b   :  { %v86_v43 = vrot.slane %v85_v41, 1 }
  0x2c   :  { %v142_v50 = vadd.f32 %v141_v49, %v140_v47 }
  0x2d   :  { %v87_v46 = vadd.f32 %v86_v43, %v85_v41 }
  0x2e   :  { %v143_v51 = vrot.slane %v142_v50, 1 }
  0x2f   :  { %v88_v48 = vadd.f32 %v87_v46, %v49_v44 }
  0x30   :  { %v144_v53 = vadd.f32 %v143_v51, %v142_v50 }
  0x31   :  { %90 = vst.msk [vmem:[%s290_s1] sm:$0x1] %vm14_vm0, %v88_v48 }
  0x32   :  { %v145_v54 = vadd.f32 %v144_v53, %v91_v52 }
  0x34   :  { %146 = vst.msk [vmem:[%s291_s2] sm:$0x1] %vm14_vm0, %v145_v54 }

// kernel: seg_tran_forward.27
= control target key start
LH: loop header
LB: loop body
LE: loop exit
PB: predicated region body
PF: predicated region fallthrough
CT: control target
= control target key end

     0   :  { %s1500_s1 = inlined_call_operand.vmem [shape: bf16[128,128], index: 1, kind: input, shape index: {}]   ;;  %s1501_s0 = inlined_call_operand.vmem [shape: bf16[128,128], index: 0, kind: input, shape index: {}]   ;;  %s1502_s2 = inlined_call_operand.vmem [shape: f32[1,128], index: 2, kind: input, shape index: {}]   ;;  %s1503_s3 = inlined_call_operand.vmem [shape: bf16[128,128], index: 3, kind: output, shape index: {}]  }
   0x1   :  { %v1026_v0 = vld [vmem:[%s1500_s1 + $0x38] sm:$0xff]   ;;  %v1027_v1 = vld [vmem:[%s1500_s1 + $0x30] sm:$0xff]   ;;  %v1028_v2 = vld [vmem:[%s1500_s1 + $0x28] sm:$0xff]  }
   0x2   :  { %978 = vmatprep.subr.bf16.mxu0 %v1026_v0  ;;  %1010 = vmatprep.subr.bf16.mxu1 %v1026_v0  ;;  %v1029_v3 = vld [vmem:[%s1500_s1 + $0x20] sm:$0xff]   ;;  %v1030_v6 = vld [vmem:[%s1500_s1 + $0x18] sm:$0xff]   ;;  %v1031_v7 = vld [vmem:[%s1500_s1 + $0x10] sm:$0xff]  }
   0x3   :  { %979 = vmatpush3.bf16.msra.mxu0 %v1026_v0  ;;  %1018 = vmatpush3.bf16.msra.mxu1 %v1026_v0  ;;  %v1034_v4 = vld [vmem:[%s1501_s0] sm:$0xff]   ;;  %v1032_v8 = vld [vmem:[%s1500_s1 + $0x8] sm:$0xff]   ;;  %v1038_v12 = vld [vmem:[%s1501_s0 + $0x10] sm:$0xff]  }
   0x4   :  { %980 = vmatprep.subr.bf16.mxu0 %v1027_v1  ;;  %1011 = vmatprep.subr.bf16.mxu1 %v1027_v1  ;;  %v1035_v5 = vld [vmem:[%s1501_s0 + $0x20] sm:$0xff]   ;;  %v1036_v10 = vld [vmem:[%s1501_s0 + $0x8] sm:$0xff]   ;;  %v1039_v13 = vld [vmem:[%s1501_s0 + $0x30] sm:$0xff]  }
   0x5   :  { %994 = vmatprep.mubr.bf16.mxu0 %v1034_v4  ;;  %1002 = vmatprep.mubr.bf16.mxu1 %v1035_v5  ;;  %v1033_v9 = vld [vmem:[%s1500_s1] sm:$0xff]   ;;  %v1037_v11 = vld [vmem:[%s1501_s0 + $0x28] sm:$0xff]   ;;  %v1040_v14 = vld [vmem:[%s1501_s0 + $0x18] sm:$0xff]  }
   0x6   :  { %v1041_v15 = vld [vmem:[%s1501_s0 + $0x38] sm:$0xff]   ;;  %v1177_v16 = vld [vmem:[%s1502_s2] ss:$0 sm:$0xff] }
   0x7   :  { %981 = vmatpush3.bf16.msra.mxu0 %v1027_v1  ;;  %1019 = vmatpush3.bf16.msra.mxu1 %v1027_v1 }
   0x8   :  { %982 = vmatprep.subr.bf16.mxu0 %v1028_v2  ;;  %1012 = vmatprep.subr.bf16.mxu1 %v1028_v2 }
   0xb   :  { %983 = vmatpush3.bf16.msra.mxu0 %v1028_v2  ;;  %1020 = vmatpush3.bf16.msra.mxu1 %v1028_v2 }
   0xc   :  { %984 = vmatprep.subr.bf16.mxu0 %v1029_v3  ;;  %1013 = vmatprep.subr.bf16.mxu1 %v1029_v3 }
   0xf   :  { %985 = vmatpush3.bf16.msra.mxu0 %v1029_v3  ;;  %1021 = vmatpush3.bf16.msra.mxu1 %v1029_v3 }
  0x10   :  { %986 = vmatprep.subr.bf16.mxu0 %v1030_v6  ;;  %1014 = vmatprep.subr.bf16.mxu1 %v1030_v6 }
  0x13   :  { %987 = vmatpush3.bf16.msra.mxu0 %v1030_v6  ;;  %1022 = vmatpush3.bf16.msra.mxu1 %v1030_v6 }
  0x14   :  { %988 = vmatprep.subr.bf16.mxu0 %v1031_v7  ;;  %1015 = vmatprep.subr.bf16.mxu1 %v1031_v7 }
  0x17   :  { %989 = vmatpush3.bf16.msra.mxu0 %v1031_v7  ;;  %1023 = vmatpush3.bf16.msra.mxu1 %v1031_v7 }
  0x18   :  { %990 = vmatprep.subr.bf16.mxu0 %v1032_v8  ;;  %1016 = vmatprep.subr.bf16.mxu1 %v1032_v8 }
  0x1b   :  { %991 = vmatpush3.bf16.msra.mxu0 %v1032_v8  ;;  %1024 = vmatpush3.bf16.msra.mxu1 %v1032_v8 }
  0x1c   :  { %992 = vmatprep.subr.bf16.mxu0 %v1033_v9  ;;  %1017 = vmatprep.subr.bf16.mxu1 %v1033_v9 }
  0x1f   :  { %993 = vmatpush3.bf16.msra.mxu0 %v1033_v9  ;;  %1025 = vmatpush3.bf16.msra.mxu1 %v1033_v9 }
  0x22   :  { %995 = vmatmul.mubr.bf16.vlgmr.msra.gmra.mxu0 %v1036_v10  ;;  %1003 = vmatmul.mubr.bf16.vlgmr.msra.gmra.mxu1 %v1037_v11 }
  0x23   :  { %998 = vmatprep.mubr.bf16.mxu0 %v1038_v12  ;;  %1006 = vmatprep.mubr.bf16.mxu1 %v1039_v13 }
  0x2a   :  { %999 = vmatmul.mubr.bf16.gmra.mxu0 %v1040_v14  ;;  %1007 = vmatmul.mubr.bf16.gmra.mxu1 %v1041_v15 }
  0xe2   :  { %v996_v17 = vpop.f32.mrf.mxu0  ;;  %v1004_v18 = vpop.f32.mrf.mxu1 }
  0xe3   :  { %v1180_v19 = vadd.f32 %v996_v17, %v1177_v16  ;;  %v1183_v20 = vadd.f32 %v1004_v18, %v1177_v16 }
  0xe4   :  { %v213_v21 = vpop.f32.mrf.mxu0  ;;  %v245_v22 = vpop.f32.mrf.mxu1 }
  0xe5   :  { %v1186_v23 = vmul.f32 0.70710677, %v1180_v19  ;;  %v1189_v24 = vmul.f32 0.70710677, %v1183_v20  ;;  %v1192_v25 = vadd.f32 %v1177_v16, %v213_v21  ;;  %v1195_v26 = vadd.f32 %v1177_v16, %v245_v22 }
  0xe6   :  { %v997_v33 = vpop.f32.mrf.mxu0  ;;  %v1005_v41 = vpop.f32.mrf.mxu1 }
  0xe7   :  { %v368_v27 = vand.u32 2147483647, %v1186_v23  ;;  %v376_v28 = vand.u32 2147483647, %v1189_v24  ;;  %v1200_v29 = vmul.f32 0.70710677, %v1192_v25  ;;  %v1208_v40 = vadd.f32 %v997_v33, %v1177_v16 }
  0xe8   :  { %v1203_v30 = vmul.f32 0.70710677, %v1195_v26  ;;  %v216_v42 = vpop.f32.mrf.mxu0  ;;  %v1214_v46 = vadd.f32 %v1005_v41, %v1177_v16  ;;  %v248_v53 = vpop.f32.mrf.mxu1  ;;  %vm688_vm0 = vcmp.ge.f32.partialorder %v1186_v23, 0.0  ;;  %vm696_vm1 = vcmp.ge.f32.partialorder %v1189_v24, 0.0 }
  0xe9   :  { %v384_v31 = vmul.f32 0.3275911, %v368_v27  ;;  %v392_v32 = vmul.f32 0.3275911, %v376_v28  ;;  %v366_v34 = vand.u32 2147483647, %v1200_v29  ;;  %v1217_v47 = vadd.f32 %v1177_v16, %v216_v42 }
  0xea   :  { %v374_v35 = vand.u32 2147483647, %v1203_v30  ;;  %v1211_v45 = vmul.f32 0.70710677, %v1208_v40  ;;  %v592_v48 = vsub.f32 0.0, %v368_v27  ;;  %v600_v50 = vsub.f32 0.0, %v376_v28  ;;  %v1000_v9 = vpop.f32.mrf.mxu0  ;;  %v1008_v10 = vpop.f32.mrf.mxu1 }
  0xeb   :  { %v400_v36 = vadd.f32 1.0, %v384_v31  ;;  %v408_v37 = vadd.f32 1.0, %v392_v32  ;;  %v382_v38 = vmul.f32 0.3275911, %v366_v34  ;;  %v1221_v51 = vmul.f32 0.70710677, %v1214_v46 }
  0xec   :  { %v390_v39 = vmul.f32 0.3275911, %v374_v35  ;;  %v369_v49 = vand.u32 2147483647, %v1211_v45  ;;  %v1224_v52 = vmul.f32 0.70710677, %v1217_v47  ;;  %v608_v57 = vmul.f32 %v592_v48, %v368_v27 }
  0xed   :  { %1042 = vrcp.f32 %v400_v36  ;;  %v398_v43 = vadd.f32 1.0, %v382_v38  ;;  %v377_v55 = vand.u32 2147483647, %v1221_v51  ;;  %v590_v58 = vsub.f32 0.0, %v366_v34 }
  0xee   :  { %1044 = vrcp.f32 %v408_v37  ;;  %v406_v44 = vadd.f32 1.0, %v390_v39  ;;  %v385_v54 = vmul.f32 0.3275911, %v369_v49  ;;  %v367_v56 = vand.u32 2147483647, %v1224_v52 }
  0xef   :  { %1046 = vrcp.f32 %v398_v43  ;;  %v1229_v60 = vadd.f32 %v1177_v16, %v248_v53  ;;  %v616_v61 = vmul.f32 %v600_v50, %v376_v28  ;;  %v598_v62 = vsub.f32 0.0, %v374_v35 }
  0xf0   :  { %1048 = vrcp.f32 %v406_v44  ;;  %v401_v59 = vadd.f32 1.0, %v385_v54  ;;  %v393_v63 = vmul.f32 0.3275911, %v377_v55  ;;  %v383_v0 = vmul.f32 0.3275911, %v367_v56 }
  0xf1   :  { %v593_v1 = vsub.f32 0.0, %v369_v49  ;;  %v1232_v2 = vmul.f32 0.70710677, %v1229_v60  ;;  %v601_v4 = vsub.f32 0.0, %v377_v55  ;;  %v626_v6 = vmul.f32 1.442695, %v608_v57 }
  0xf2   :  { %1050 = vrcp.f32 %v401_v59  ;;  %v409_v3 = vadd.f32 1.0, %v393_v63  ;;  %v399_v5 = vadd.f32 1.0, %v383_v0  ;;  %v606_v7 = vmul.f32 %v590_v58, %v366_v34 }
  0xf3   :  { %v1235_v8 = vand.u32 2147483647, %v1232_v2  ;;  %v642_v12 = vmul.f32 1.442695, %v616_v61  ;;  %v614_v13 = vmul.f32 %v598_v62, %v374_v35  ;;  %v591_v14 = vsub.f32 0.0, %v367_v56 }
  0xf4   :  { %1052 = vrcp.f32 %v409_v3  ;;  %v609_v18 = vmul.f32 %v593_v1, %v369_v49  ;;  %v617_v27 = vmul.f32 %v601_v4, %v377_v55  ;;  %v1245_v28 = vadd.f32 %v1000_v9, %v1177_v16 }
  0xf5   :  { %1054 = vrcp.f32 %v399_v5  ;;  %v391_v21 = vmul.f32 0.3275911, %v1235_v8  ;;  %v1248_v31 = vadd.f32 %v1008_v10, %v1177_v16  ;;  %v622_v33 = vmul.f32 1.442695, %v606_v7 }
  0xf6   :  { %1056 = vpow2.f32 %v626_v6  ;;  %v638_v37 = vmul.f32 1.442695, %v614_v13  ;;  %v607_v38 = vmul.f32 %v591_v14, %v367_v56  ;;  %v628_v42 = vmul.f32 1.442695, %v609_v18 }
  0xf7   :  { %v407_v34 = vadd.f32 1.0, %v391_v21  ;;  %1058 = vpow2.f32 %v642_v12  ;;  %v644_v48 = vmul.f32 1.442695, %v617_v27  ;;  %v1258_v49 = vmul.f32 0.70710677, %v1245_v28 }
  0xf8   :  { %v1261_v50 = vmul.f32 0.70710677, %v1248_v31  ;;  %v1265_v56 = vmul.f32 0.5, %v1180_v19  ;;  %v624_v58 = vmul.f32 1.442695, %v607_v38  ;;  %v1281_v9 = vmul.f32 0.5, %v1183_v20 }
  0xf9   :  { %1060 = vrcp.f32 %v407_v34  ;;  %v1273_v1 = vand.u32 2147483647, %v1258_v49  ;;  %v599_v10 = vsub.f32 0.0, %v1235_v8  ;;  %vm686_vm2 = vcmp.ge.f32.partialorder %v1200_v29, 0.0 }
  0xfa   :  { %v1237_v11 = vpop.eup %1042  ;;  %1062 = vpow2.f32 %v622_v33  ;;  %v1276_v19 = vand.u32 2147483647, %v1261_v50  ;;  %vm689_vm3 = vcmp.ge.f32.partialorder %v1211_v45, 0.0  ;;  %vm694_vm4 = vcmp.ge.f32.partialorder %v1203_v30, 0.0 }
  0xfb   :  { %v1239_v15 = vpop.eup %1044  ;;  %v448_v17 = vmul.f32 1.0614054, %v1237_v11  ;;  %1064 = vpow2.f32 %v638_v37  ;;  %v388_v20 = vmul.f32 0.3275911, %v1273_v1  ;;  %vm697_vm5 = vcmp.ge.f32.partialorder %v1221_v51, 0.0 }
  0xfc   :  { %v456_v22 = vmul.f32 1.0614054, %v1239_v15  ;;  %v1250_v35 = vpop.eup %1046  ;;  %1066 = vpow2.f32 %v628_v42  ;;  %vm687_vm6 = vcmp.ge.f32.partialorder %v1224_v52, 0.0  ;;  %vm695_vm7 = vcmp.ge.f32.partialorder %v1232_v2, 0.0 }
  0xfd   :  { %v464_v32 = vadd.f32 -1.4531521, %v448_v17  ;;  %v446_v41 = vmul.f32 1.0614054, %v1250_v35  ;;  %v1254_v43 = vpop.eup %1048  ;;  %1068 = vpow2.f32 %v644_v48  ;;  %vm692_vm8 = vcmp.ge.f32.partialorder %v1258_v49, 0.0 }
  0xfe   :  { %v472_v36 = vadd.f32 -1.4531521, %v456_v22  ;;  %v454_v55 = vmul.f32 1.0614054, %v1254_v43  ;;  %1070 = vpow2.f32 %v624_v58  ;;  %vm700_vm9 = vcmp.ge.f32.partialorder %v1261_v50, 0.0 }
  0xff   :  { %v480_v39 = vmul.f32 %v1237_v11, %v464_v32  ;;  %v462_v54 = vadd.f32 -1.4531521, %v446_v41  ;;  %v1269_v63 = vpop.eup %1050  ;;  %v396_v32 = vmul.f32 0.3275911, %v1276_v19  ;;  %v748_v50 = vmul.f32 0.5, %v1248_v31 }
 0x100   :  { %v488_v44 = vmul.f32 %v1239_v15, %v472_v36  ;;  %v470_v62 = vadd.f32 -1.4531521, %v454_v55  ;;  %v449_v6 = vmul.f32 1.0614054, %v1269_v63 }
 0x101   :  { %v496_v53 = vadd.f32 1.4214138, %v480_v39  ;;  %v478_v61 = vmul.f32 %v1250_v35, %v462_v54  ;;  %v1284_v12 = vpop.eup %1052 }
 0x102   :  { %v504_v57 = vadd.f32 1.4214138, %v488_v44  ;;  %v486_v5 = vmul.f32 %v1254_v43, %v470_v62  ;;  %v465_v18 = vadd.f32 -1.4531521, %v449_v6  ;;  %v1288_v21 = vpop.eup %1054  ;;  %v457_v27 = vmul.f32 1.0614054, %v1284_v12 }
 0x103   :  { %v512_v59 = vmul.f32 %v1237_v11, %v496_v53  ;;  %v494_v4 = vadd.f32 1.4214138, %v478_v61  ;;  %v1057_v38 = vpop.eup %1056  ;;  %v447_v42 = vmul.f32 1.0614054, %v1288_v21  ;;  %v615_v44 = vmul.f32 %v599_v10, %v1235_v8 }
 0x104   :  { %v520_v0 = vmul.f32 %v1239_v15, %v504_v57  ;;  %v502_v17 = vadd.f32 1.4214138, %v486_v5  ;;  %v481_v37 = vmul.f32 %v1269_v63, %v465_v18  ;;  %v473_v41 = vadd.f32 -1.4531521, %v457_v27  ;;  %v1059_v48 = vpop.eup %1058 }
 0x105   :  { %v528_v3 = vadd.f32 -0.28449672, %v512_v59  ;;  %v510_v14 = vmul.f32 %v1250_v35, %v494_v4  ;;  %v463_v62 = vadd.f32 -1.4531521, %v447_v42 }
 0x106   :  { %v536_v7 = vadd.f32 -0.28449672, %v520_v0  ;;  %v518_v36 = vmul.f32 %v1254_v43, %v502_v17  ;;  %v497_v57 = vadd.f32 1.4214138, %v481_v37  ;;  %v1300_v58 = vpop.eup %1060  ;;  %v489_v61 = vmul.f32 %v1284_v12, %v473_v41 }
 0x107   :  { %v544_v13 = vmul.f32 %v1237_v11, %v528_v3  ;;  %v526_v34 = vadd.f32 -0.28449672, %v510_v14  ;;  %v404_v0 = vadd.f32 1.0, %v388_v20  ;;  %v1063_v6 = vpop.eup %1062  ;;  %v479_v10 = vmul.f32 %v1288_v21, %v463_v62 }
 0x108   :  { %v552_v22 = vmul.f32 %v1239_v15, %v536_v7  ;;  %v534_v55 = vadd.f32 -0.28449672, %v518_v36  ;;  %v513_v8 = vmul.f32 %v1269_v63, %v497_v57  ;;  %v505_v7 = vadd.f32 1.4214138, %v489_v61  ;;  %v1065_v14 = vpop.eup %1064 }
 0x109   :  { %v560_v33 = vadd.f32 0.2548296, %v544_v13  ;;  %v542_v54 = vmul.f32 %v1250_v35, %v526_v34  ;;  %v455_v13 = vmul.f32 1.0614054, %v1300_v58  ;;  %v1067_v27 = vpop.eup %1066  ;;  %v495_v34 = vadd.f32 1.4214138, %v479_v10 }
 0x10a   :  { %v568_v39 = vadd.f32 0.2548296, %v552_v22  ;;  %v550_v5 = vmul.f32 %v1254_v43, %v534_v55  ;;  %v529_v18 = vadd.f32 -0.28449672, %v513_v8  ;;  %v412_v22 = vadd.f32 1.0, %v396_v32  ;;  %v1069_v37 = vpop.eup %1068 }
 0x10b   :  { %v576_v53 = vmul.f32 %v1237_v11, %v560_v33  ;;  %v558_v4 = vadd.f32 0.2548296, %v542_v54  ;;  %v521_v33 = vmul.f32 %v1284_v12, %v505_v7  ;;  %v471_v36 = vadd.f32 -1.4531521, %v455_v13  ;;  %v1071_v54 = vpop.eup %1070 }
 0x10c   :  { %v584_v59 = vmul.f32 %v1239_v15, %v568_v39  ;;  %v566_v20 = vadd.f32 0.2548296, %v550_v5  ;;  %v545_v39 = vmul.f32 %v1269_v63, %v529_v18  ;;  %v640_v41 = vmul.f32 1.442695, %v615_v44 }
 0x10d   :  { %v656_v3 = vmul.f32 %v1057_v38, %v576_v53  ;;  %v574_v15 = vmul.f32 %v1250_v35, %v558_v4  ;;  %1072 = vrcp.f32 %v404_v0  ;;  %v511_v53 = vmul.f32 %v1288_v21, %v495_v34 }
 0x10e   :  { %v664_v11 = vmul.f32 %v1059_v48, %v584_v59  ;;  %v537_v48 = vadd.f32 -0.28449672, %v521_v33  ;;  %v487_v35 = vmul.f32 %v1300_v58, %v471_v36  ;;  %v561_v55 = vadd.f32 0.2548296, %v545_v39 }
 0x10f   :  { %v672_v17 = vsub.f32 1.0, %v656_v3  ;;  %v654_v42 = vmul.f32 %v1063_v6, %v574_v15  ;;  %v582_v57 = vmul.f32 %v1254_v43, %v566_v20  ;;  %v527_v61 = vadd.f32 -0.28449672, %v511_v53  ;;  %v229_v6 = vpop.f32.mrf.mxu0 }
 0x110   :  { %v680_v38 = vsub.f32 1.0, %v664_v11  ;;  %v553_v59 = vmul.f32 %v1284_v12, %v537_v48  ;;  %1074 = vrcp.f32 %v412_v22  ;;  %v1318_v62 = vmul.f32 0.5, %v1192_v25 }
 0x111   :  { %v704_v32 = vsub.f32 0.0, %v672_v17  ;;  %v577_v0 = vmul.f32 %v1269_v63, %v561_v55  ;;  %1076 = vpow2.f32 %v640_v41  ;;  %v670_v3 = vsub.f32 1.0, %v654_v42 }
 0x112   :  { %v712_v44 = vsub.f32 0.0, %v680_v38  ;;  %v569_v4 = vadd.f32 0.2548296, %v553_v59  ;;  %v543_v5 = vmul.f32 %v1288_v21, %v527_v61  ;;  %v503_v8 = vadd.f32 1.4214138, %v487_v35  ;;  %v261_v59 = vpop.f32.mrf.mxu1 }
 0x113   :  { %v720_v43 = vsel %vm688_vm0, %v672_v17, %v704_v32  ;;  %v657_v11 = vmul.f32 %v1067_v27, %v577_v0  ;;  %v737_v7 = vmul.f32 0.5, %v1208_v40  ;;  %v662_v10 = vmul.f32 %v1065_v14, %v582_v57 }
 0x114   :  { %v585_v25 = vmul.f32 %v1284_v12, %v569_v4  ;;  %v559_v13 = vadd.f32 0.2548296, %v543_v5  ;;  %v519_v63 = vmul.f32 %v1300_v58, %v503_v8  ;;  %v745_v18 = vmul.f32 0.5, %v1214_v46 }
 0x115   :  { %v673_v15 = vsub.f32 1.0, %v657_v11  ;;  %v1331_v22 = vadd.f32 %v1177_v16, %v229_v6  ;;  %v728_v23 = vsel %vm696_vm1, %v680_v38, %v712_v44  ;;  %v702_v17 = vsub.f32 0.0, %v670_v3 }
 0x116   :  { %v665_v27 = vmul.f32 %v1069_v37, %v585_v25  ;;  %v575_v40 = vmul.f32 %v1288_v21, %v559_v13  ;;  %v752_v14 = vadd.f32 1.0, %v720_v43  ;;  %v735_v20 = vmul.f32 0.5, %v1217_v47 }
 0x117   :  { %v705_v12 = vsub.f32 0.0, %v673_v15  ;;  %v535_v33 = vadd.f32 -0.28449672, %v519_v63  ;;  %v678_v34 = vsub.f32 1.0, %v662_v10  ;;  %v760_v39 = vadd.f32 1.0, %v728_v23 }
 0x118   :  { %v681_v36 = vsub.f32 1.0, %v665_v27  ;;  %v655_v46 = vmul.f32 %v1071_v54, %v575_v40  ;;  %v1343_v21 = vmul.f32 0.70710677, %v1331_v22  ;;  %v718_v47 = vsel %vm686_vm2, %v670_v3, %v702_v17  ;;  %v1009_v40 = vpop.f32.mrf.mxu1 }
 0x119   :  { %v721_v24 = vsel %vm689_vm3, %v673_v15, %v705_v12  ;;  %v551_v37 = vmul.f32 %v1300_v58, %v535_v33  ;;  %v768_v53 = vmul.f32 %v752_v14, %v1265_v56  ;;  %v710_v54 = vsub.f32 0.0, %v678_v34  ;;  %v1001_v15 = vpop.f32.mrf.mxu0 }
 0x11a   :  { %v1345_v38 = vpop.eup %1072  ;;  %v753_v41 = vadd.f32 1.0, %v721_v24  ;;  %v713_v42 = vsub.f32 0.0, %v681_v36  ;;  %v671_v48 = vsub.f32 1.0, %v655_v46  ;;  %v1352_v45 = vand.u32 2147483647, %v1343_v21 }
 0x11b   :  { %v567_v35 = vadd.f32 0.2548296, %v551_v37  ;;  %v750_v61 = vadd.f32 1.0, %v718_v47  ;;  %v776_v4 = vmul.f32 %v760_v39, %v1281_v9  ;;  %v452_v51 = vmul.f32 1.0614054, %v1345_v38 }
 0x11c   :  { %v769_v32 = vmul.f32 %v753_v41, %v737_v7  ;;  %v729_v55 = vsel %vm697_vm5, %v681_v36, %v713_v42  ;;  %v703_v57 = vsub.f32 0.0, %v671_v48  ;;  %v386_v56 = vmul.f32 0.3275911, %v1352_v45 }
 0x11d   :  { %v1356_v29 = vpop.eup %1074  ;;  %v761_v44 = vadd.f32 1.0, %v729_v55  ;;  %v583_v0 = vmul.f32 %v1300_v58, %v567_v35  ;;  %v1365_v7 = vadd.f32 %v1177_v16, %v261_v59  ;;  %v726_v58 = vsel %vm694_vm4, %v678_v34, %v710_v54 }
 0x11e   :  { %v1077_v3 = vpop.eup %1076  ;;  %v923_v5 = vpack.c.bf16 %v769_v32, %v768_v53  ;;  %v719_v8 = vsel %vm687_vm6, %v671_v48, %v703_v57  ;;  %v460_v9 = vmul.f32 1.0614054, %v1356_v29  ;;  %v402_v10 = vadd.f32 1.0, %v386_v56 }
 0x11f   :  { %v777_v6 = vmul.f32 %v761_v44, %v745_v18  ;;  %v751_v43 = vadd.f32 1.0, %v719_v8  ;;  %v663_v11 = vmul.f32 %v1077_v3, %v583_v0  ;;  %v766_v52 = vmul.f32 %v750_v61, %v1318_v62  ;;  %v232_v0 = vpop.f32.mrf.mxu0  ;;  %v264_v3 = vpop.f32.mrf.mxu1 }
 0x120   :  { %955 = vst [vmem:[%s1503_s3 + $0x8] sm:$0xff] %v923_v5   ;;  %v468_v18 = vadd.f32 -1.4531521, %v452_v51  ;;  %1078 = vrcp.f32 %v402_v10  ;;  %v1378_v17 = vmul.f32 0.70710677, %v1365_v7  ;;  %v758_v27 = vadd.f32 1.0, %v726_v58 }
 0x121   :  { %v943_v25 = vpack.c.bf16 %v777_v6, %v776_v4  ;;  %v767_v13 = vmul.f32 %v751_v43, %v735_v20  ;;  %v679_v63 = vsub.f32 1.0, %v663_v11  ;;  %v1382_v62 = vadd.f32 %v1001_v15, %v1177_v16 }
 0x122   :  { %v742_v14 = vmul.f32 0.5, %v1195_v26  ;;  %v476_v20 = vadd.f32 -1.4531521, %v460_v9  ;;  %v1389_v33 = vand.u32 2147483647, %v1378_v17  ;;  %v743_v34 = vmul.f32 0.5, %v1229_v60 }
 0x123   :  { %959 = vst [vmem:[%s1503_s3 + $0x28] sm:$0xff] %v943_v25   ;;  %v918_v30 = vpack.c.bf16 %v767_v13, %v766_v52  ;;  %v711_v23 = vsub.f32 0.0, %v679_v63  ;;  %v484_v2 = vmul.f32 %v1345_v38, %v468_v18  ;;  %v1394_v46 = vmul.f32 0.70710677, %v1382_v62 }
 0x124   :  { %v596_v39 = vsub.f32 0.0, %v1273_v1  ;;  %v394_v26 = vmul.f32 0.3275911, %v1389_v33  ;;  %v1399_v24 = vadd.f32 %v1009_v40, %v1177_v16  ;;  %v774_v37 = vmul.f32 %v758_v27, %v742_v14 }
 0x125   :  { %919 = vst [vmem:[%s1503_s3] sm:$0xff] %v918_v30   ;;  %v727_v12 = vsel %vm695_vm7, %v679_v63, %v711_v23  ;;  %v373_v41 = vand.u32 2147483647, %v1394_v46  ;;  %v492_v42 = vmul.f32 %v1356_v29, %v476_v20  ;;  %v500_v35 = vadd.f32 1.4214138, %v484_v2 }
 0x126   :  { %v759_v36 = vadd.f32 1.0, %v727_v12  ;;  %v410_v60 = vadd.f32 1.0, %v394_v26  ;;  %v1404_v48 = vmul.f32 0.70710677, %v1399_v24  ;;  %v612_v32 = vmul.f32 %v596_v39, %v1273_v1 }
 0x127   :  { %v389_v54 = vmul.f32 0.3275911, %v373_v41  ;;  %v604_v57 = vsub.f32 0.0, %v1276_v19  ;;  %v508_v61 = vadd.f32 1.4214138, %v492_v42  ;;  %v516_v56 = vmul.f32 %v1345_v38, %v500_v35 }
 0x128   :  { %v775_v47 = vmul.f32 %v759_v36, %v743_v34  ;;  %1080 = vrcp.f32 %v410_v60  ;;  %v381_v55 = vand.u32 2147483647, %v1404_v48  ;;  %v634_v1 = vmul.f32 1.442695, %v612_v32 }
 0x129   :  { %v405_v59 = vadd.f32 1.0, %v389_v54  ;;  %v620_v8 = vmul.f32 %v604_v57, %v1276_v19  ;;  %v1418_v6 = vadd.f32 %v1177_v16, %v232_v0  ;;  %v524_v43 = vmul.f32 %v1356_v29, %v508_v61 }
 0x12a   :  { %v938_v53 = vpack.c.bf16 %v775_v47, %v774_v37  ;;  %v397_v44 = vmul.f32 0.3275911, %v381_v55  ;;  %v1422_v11 = vadd.f32 %v1177_v16, %v264_v3  ;;  %v532_v58 = vadd.f32 -0.28449672, %v516_v56 }
 0x12b   :  { %1082 = vrcp.f32 %v405_v59  ;;  %v1425_v10 = vmul.f32 0.70710677, %v1418_v6  ;;  %v650_v19 = vmul.f32 1.442695, %v620_v8  ;;  %v597_v13 = vsub.f32 0.0, %v373_v41 }
 0x12c   :  { %958 = vst [vmem:[%s1503_s3 + $0x20] sm:$0xff] %v938_v53   ;;  %v413_v5 = vadd.f32 1.0, %v397_v44  ;;  %v1428_v52 = vmul.f32 0.70710677, %v1422_v11  ;;  %v540_v15 = vadd.f32 -0.28449672, %v524_v43  ;;  %v548_v30 = vmul.f32 %v1345_v38, %v532_v58 }
 0x12d   :  { %v1413_v4 = vpop.eup %1078  ;;  %v371_v63 = vand.u32 2147483647, %v1425_v10  ;;  %v594_v18 = vsub.f32 0.0, %v1352_v45  ;;  %v602_v23 = vsub.f32 0.0, %v1389_v33  ;;  %v605_v27 = vsub.f32 0.0, %v381_v55 }
 0x12e   :  { %v450_v51 = vmul.f32 1.0614054, %v1413_v4  ;;  %1084 = vrcp.f32 %v413_v5  ;;  %v379_v16 = vand.u32 2147483647, %v1428_v52  ;;  %v613_v34 = vmul.f32 %v597_v13, %v373_v41 }
 0x12f   :  { %1086 = vpow2.f32 %v634_v1  ;;  %v387_v40 = vmul.f32 0.3275911, %v371_v63  ;;  %v556_v2 = vmul.f32 %v1356_v29, %v540_v15  ;;  %v610_v39 = vmul.f32 %v594_v18, %v1352_v45 }
 0x130   :  { %v466_v9 = vadd.f32 -1.4531521, %v450_v51  ;;  %v395_v14 = vmul.f32 0.3275911, %v379_v16  ;;  %1088 = vpow2.f32 %v650_v19  ;;  %v564_v47 = vadd.f32 0.2548296, %v548_v30 }
 0x131   :  { %v403_v36 = vadd.f32 1.0, %v387_v40  ;;  %v618_v42 = vmul.f32 %v602_v23, %v1389_v33  ;;  %v621_v60 = vmul.f32 %v605_v27, %v381_v55  ;;  %v636_v41 = vmul.f32 1.442695, %v613_v34 }
 0x132   :  { %v482_v25 = vmul.f32 %v1413_v4, %v466_v9  ;;  %v411_v37 = vadd.f32 1.0, %v395_v14  ;;  %v572_v57 = vadd.f32 0.2548296, %v556_v2  ;;  %v630_v59 = vmul.f32 1.442695, %v610_v39 }
 0x133   :  { %1090 = vrcp.f32 %v403_v36  ;;  %v580_v44 = vmul.f32 %v1345_v38, %v564_v47  ;;  %v646_v0 = vmul.f32 1.442695, %v618_v42  ;;  %v652_v33 = vmul.f32 1.442695, %v621_v60 }
 0x134   :  { %v498_v20 = vadd.f32 1.4214138, %v482_v25  ;;  %1092 = vrcp.f32 %v411_v37  ;;  %v595_v1 = vsub.f32 0.0, %v371_v63  ;;  %v603_v43 = vsub.f32 0.0, %v379_v16 }
 0x135   :  { %v1436_v12 = vpop.eup %1080  ;;  %1094 = vpow2.f32 %v636_v41  ;;  %v588_v25 = vmul.f32 %v1356_v29, %v572_v57  ;;  %vm693_vm10 = vcmp.ge.f32.partialorder %v1394_v46, 0.0  ;;  %vm701_vm11 = vcmp.ge.f32.partialorder %v1404_v48, 0.0 }
 0x136   :  { %v458_v26 = vmul.f32 1.0614054, %v1436_v12  ;;  %v514_v54 = vmul.f32 %v1413_v4, %v498_v20  ;;  %1096 = vpow2.f32 %v630_v59  ;;  %v611_v18 = vmul.f32 %v595_v1, %v371_v63 }
 0x137   :  { %1098 = vpow2.f32 %v646_v0  ;;  %v619_v27 = vmul.f32 %v603_v43, %v379_v16  ;;  %vm690_vm12 = vcmp.ge.f32.partialorder %v1343_v21, 0.0  ;;  %vm698_vm13 = vcmp.ge.f32.partialorder %v1378_v17, 0.0 }
 0x138   :  { %v1083_v53 = vpop.eup %1082  ;;  %v474_v35 = vadd.f32 -1.4531521, %v458_v26  ;;  %v530_v8 = vadd.f32 -0.28449672, %v514_v54  ;;  %1100 = vpow2.f32 %v652_v33  ;;  %v632_v26 = vmul.f32 1.442695, %v611_v18 }
 0x139   :  { %v453_v32 = vmul.f32 1.0614054, %v1083_v53  ;;  %v648_v60 = vmul.f32 1.442695, %v619_v27  ;;  %vm691_vm14 = vcmp.ge.f32.partialorder %v1425_v10, 0.0  ;;  %vm699_vm15 = vcmp.ge.f32.partialorder %v1428_v52, 0.0 }
 0x13a   :  { %v490_v61 = vmul.f32 %v1436_v12, %v474_v35  ;;  %v546_v30 = vmul.f32 %v1413_v4, %v530_v8  ;;  %1102 = vpow2.f32 %v632_v26  ;;  %v739_v17 = vmul.f32 0.5, %v1418_v6 }
 0x13b   :  { %v1444_v45 = vpop.eup %1084  ;;  %v469_v56 = vadd.f32 -1.4531521, %v453_v32  ;;  %1104 = vpow2.f32 %v648_v60 }
 0x13c   :  { %v506_v55 = vadd.f32 1.4214138, %v490_v61  ;;  %v461_v3 = vmul.f32 1.0614054, %v1444_v45  ;;  %v1087_v5 = vpop.eup %1086  ;;  %v562_v47 = vadd.f32 0.2548296, %v546_v30 }
 0x13d   :  { %v485_v51 = vmul.f32 %v1083_v53, %v469_v56  ;;  %v660_v19 = vmul.f32 %v1087_v5, %v580_v44  ;;  %v1089_v40 = vpop.eup %1088 }
 0x13e   :  { %v522_v58 = vmul.f32 %v1436_v12, %v506_v55  ;;  %v477_v9 = vadd.f32 -1.4531521, %v461_v3  ;;  %v668_v29 = vmul.f32 %v1089_v40, %v588_v25  ;;  %v578_v0 = vmul.f32 %v1413_v4, %v562_v47 }
 0x13f   :  { %v501_v38 = vadd.f32 1.4214138, %v485_v51  ;;  %v676_v2 = vsub.f32 1.0, %v660_v19 }
 0x140   :  { %v538_v13 = vadd.f32 -0.28449672, %v522_v58  ;;  %v493_v15 = vmul.f32 %v1444_v45, %v477_v9  ;;  %v1453_v36 = vpop.eup %1090  ;;  %v684_v59 = vsub.f32 1.0, %v668_v29  ;;  %v741_v29 = vmul.f32 0.5, %v1382_v62 }
 0x141   :  { %v517_v23 = vmul.f32 %v1083_v53, %v501_v38  ;;  %v1456_v37 = vpop.eup %1092  ;;  %v451_v42 = vmul.f32 1.0614054, %v1453_v36  ;;  %v708_v57 = vsub.f32 0.0, %v676_v2  ;;  %v749_v62 = vmul.f32 0.5, %v1399_v24 }
 0x142   :  { %v554_v14 = vmul.f32 %v1436_v12, %v538_v13  ;;  %v509_v20 = vadd.f32 1.4214138, %v493_v15  ;;  %v459_v54 = vmul.f32 1.0614054, %v1456_v37  ;;  %v1095_v55 = vpop.eup %1094  ;;  %v716_v9 = vsub.f32 0.0, %v684_v59 }
 0x143   :  { %v533_v34 = vadd.f32 -0.28449672, %v517_v23  ;;  %v467_v41 = vadd.f32 -1.4531521, %v451_v42  ;;  %v1097_v8 = vpop.eup %1096  ;;  %v724_v25 = vsel %vm692_vm8, %v676_v2, %v708_v57  ;;  %v740_v15 = vmul.f32 0.5, %v1245_v28 }
 0x144   :  { %v525_v39 = vmul.f32 %v1444_v45, %v509_v20  ;;  %v570_v16 = vadd.f32 0.2548296, %v554_v14  ;;  %v475_v44 = vadd.f32 -1.4531521, %v459_v54  ;;  %v1099_v58 = vpop.eup %1098  ;;  %v658_v38 = vmul.f32 %v1097_v8, %v578_v0 }
 0x145   :  { %v549_v63 = vmul.f32 %v1083_v53, %v533_v34  ;;  %v483_v33 = vmul.f32 %v1453_v36, %v467_v41  ;;  %v1101_v19 = vpop.eup %1100  ;;  %v732_v40 = vsel %vm700_vm9, %v684_v59, %v716_v9 }
 0x146   :  { %v541_v35 = vadd.f32 -0.28449672, %v525_v39  ;;  %v586_v3 = vmul.f32 %v1436_v12, %v570_v16  ;;  %v491_v5 = vmul.f32 %v1456_v37, %v475_v44  ;;  %v674_v34 = vsub.f32 1.0, %v658_v38 }
 0x147   :  { %v565_v32 = vadd.f32 0.2548296, %v549_v63  ;;  %v499_v43 = vadd.f32 1.4214138, %v483_v33  ;;  %v764_v46 = vadd.f32 1.0, %v732_v40  ;;  %v1103_v59 = vpop.eup %1102 }
 0x148   :  { %v557_v61 = vmul.f32 %v1444_v45, %v541_v35  ;;  %v666_v18 = vmul.f32 %v1099_v58, %v586_v3  ;;  %v1105_v31 = vpop.eup %1104  ;;  %v738_v58 = vmul.f32 0.5, %v1331_v22 }
 0x149   :  { %v581_v56 = vmul.f32 %v1083_v53, %v565_v32  ;;  %v507_v53 = vadd.f32 1.4214138, %v491_v5  ;;  %v515_v12 = vmul.f32 %v1453_v36, %v499_v43  ;;  %v706_v32 = vsub.f32 0.0, %v674_v34 }
 0x14a   :  { %v573_v1 = vadd.f32 0.2548296, %v557_v61  ;;  %v682_v39 = vsub.f32 1.0, %v666_v18 }
 0x14b   :  { %v661_v51 = vmul.f32 %v1095_v55, %v581_v56  ;;  %v523_v23 = vmul.f32 %v1456_v37, %v507_v53  ;;  %v531_v27 = vadd.f32 -0.28449672, %v515_v12  ;;  %v780_v56 = vmul.f32 %v764_v46, %v748_v50 }
 0x14c   :  { %v589_v4 = vmul.f32 %v1444_v45, %v573_v1  ;;  %v756_v45 = vadd.f32 1.0, %v724_v25  ;;  %v714_v61 = vsub.f32 0.0, %v682_v39  ;;  %v722_v24 = vsel %vm690_vm12, %v674_v34, %v706_v32 }
 0x14d   :  { %v677_v13 = vsub.f32 1.0, %v661_v51  ;;  %v539_v20 = vadd.f32 -0.28449672, %v523_v23  ;;  %v547_v28 = vmul.f32 %v1453_v36, %v531_v27  ;;  %v754_v8 = vadd.f32 1.0, %v722_v24 }
 0x14e   :  { %v669_v30 = vmul.f32 %v1101_v19, %v589_v4  ;;  %v772_v60 = vmul.f32 %v756_v45, %v740_v15  ;;  %v730_v1 = vsel %vm698_vm13, %v682_v39, %v714_v61  ;;  %v746_v53 = vmul.f32 0.5, %v1365_v7 }
 0x14f   :  { %v709_v49 = vsub.f32 0.0, %v677_v13  ;;  %v555_v63 = vmul.f32 %v1456_v37, %v539_v20  ;;  %v563_v42 = vadd.f32 0.2548296, %v547_v28  ;;  %v762_v51 = vadd.f32 1.0, %v730_v1 }
 0x150   :  { %v685_v14 = vsub.f32 1.0, %v669_v30  ;;  %v747_v19 = vmul.f32 0.5, %v1422_v11  ;;  %v770_v38 = vmul.f32 %v754_v8, %v738_v58 }
 0x151   :  { %v725_v2 = vsel %vm693_vm10, %v677_v13, %v709_v49  ;;  %v571_v54 = vadd.f32 0.2548296, %v555_v63  ;;  %v579_v57 = vmul.f32 %v1453_v36, %v563_v42  ;;  %v778_v12 = vmul.f32 %v762_v51, %v746_v53 }
 0x152   :  { %v757_v26 = vadd.f32 1.0, %v725_v2  ;;  %v717_v47 = vsub.f32 0.0, %v685_v14 }
 0x153   :  { %v587_v0 = vmul.f32 %v1456_v37, %v571_v54  ;;  %v659_v48 = vmul.f32 %v1103_v59, %v579_v57 }
 0x154   :  { %v773_v16 = vmul.f32 %v757_v26, %v741_v29  ;;  %v733_v35 = vsel %vm701_vm11, %v685_v14, %v717_v47 }
 0x155   :  { %v765_v41 = vadd.f32 1.0, %v733_v35  ;;  %v667_v55 = vmul.f32 %v1105_v31, %v587_v0  ;;  %v675_v3 = vsub.f32 1.0, %v659_v48 }
 0x156   :  { %v933_v44 = vpack.c.bf16 %v773_v16, %v772_v60 }
 0x157   :  { %v781_v33 = vmul.f32 %v765_v41, %v749_v62  ;;  %v683_v5 = vsub.f32 1.0, %v667_v55  ;;  %v707_v37 = vsub.f32 0.0, %v675_v3 }
 0x158   :  { %957 = vst [vmem:[%s1503_s3 + $0x18] sm:$0xff] %v933_v44  }
 0x159   :  { %v953_v36 = vpack.c.bf16 %v781_v33, %v780_v56  ;;  %v715_v21 = vsub.f32 0.0, %v683_v5  ;;  %v723_v43 = vsel %vm691_vm14, %v675_v3, %v707_v37 }
 0x15a   :  { %v755_v9 = vadd.f32 1.0, %v723_v43 }
 0x15b   :  { %961 = vst [vmem:[%s1503_s3 + $0x38] sm:$0xff] %v953_v36   ;;  %v731_v4 = vsel %vm699_vm15, %v683_v5, %v715_v21 }
 0x15c   :  { %v763_v25 = vadd.f32 1.0, %v731_v4  ;;  %v771_v13 = vmul.f32 %v755_v9, %v739_v17 }
 0x15e   :  { %v779_v10 = vmul.f32 %v763_v25, %v747_v19  ;;  %v928_v15 = vpack.c.bf16 %v771_v13, %v770_v38 }
 0x160   :  { %v948_v18 = vpack.c.bf16 %v779_v10, %v778_v12  ;;  %956 = vst [vmem:[%s1503_s3 + $0x10] sm:$0xff] %v928_v15  }
 0x162   :  { %960 = vst [vmem:[%s1503_s3 + $0x30] sm:$0xff] %v948_v18  }

// kernel: seg_tran_forward.31
= control target key start
LH: loop header
LB: loop body
LE: loop exit
PB: predicated region body
PF: predicated region fallthrough
CT: control target
= control target key end

     0   :  { %v226_v0 = vmov 0.0   ;;  %vm227_vm0 = vmmov 0   ;;  %s281_s1 = inlined_call_operand.vmem [shape: bf16[128,128], index: 1, kind: input, shape index: {}]   ;;  %s282_s0 = inlined_call_operand.vmem [shape: f32[8,128], index: 0, kind: input, shape index: {}]   ;;  %s283_s2 = inlined_call_operand.vmem [shape: f32[1,128], index: 2, kind: input, shape index: {}]   ;;  %s284_s3 = inlined_call_operand.vmem [shape: bf16[8,128], index: 3, kind: output, shape index: {}]  }
   0x1   :  { %192 = vmatprep.subr.bf16.mxu0 %v226_v0  ;;  %v214_v1 = vld [vmem:[%s281_s1 + $0x38] sm:$0xff]   ;;  %208 = vmatprep.mubr.msk.bf16.mxu0 %vm227_vm0, %v226_v0  ;;  %v215_v2 = vld [vmem:[%s281_s1 + $0x30] sm:$0xff]   ;;  %v216_v3 = vld [vmem:[%s281_s1 + $0x28] sm:$0xff]  }
   0x2   :  { %193 = vmatpush3.bf16.msra.mxu0 %v214_v1  ;;  %v20_v4 = vld [vmem:[%s282_s0] sm:$0xff]  ;;  %v218_v9 = vld [vmem:[%s281_s1 + $0x18] sm:$0xff]   ;;  %v219_v11 = vld [vmem:[%s281_s1 + $0x10] sm:$0xff]  }
   0x3   :  { %194 = vmatprep.subr.bf16.mxu0 %v226_v0  ;;  %v21_v5 = vmul.f32 0.70710677, %v20_v4  ;;  %v217_v6 = vld [vmem:[%s281_s1 + $0x20] sm:$0xff]   ;;  %v220_v13 = vld [vmem:[%s281_s1 + $0x8] sm:$0xff]   ;;  %v45_v31 = vmul.f32 0.5, %v20_v4 }
   0x4   :  { %v221_v15 = vld [vmem:[%s281_s1] sm:$0xff]  }
   0x5   :  { %v22_v7 = vand.u32 2147483647, %v21_v5  ;;  %vm42_vm1 = vcmp.ge.f32.partialorder %v21_v5, 0.0  ;;  %v182_v36 = vld [vmem:[%s283_s2] ss:$0 sm:$0xff] }
   0x6   :  { %195 = vmatpush3.bf16.msra.mxu0 %v215_v2 }
   0x7   :  { %196 = vmatprep.subr.bf16.mxu0 %v226_v0  ;;  %v23_v8 = vmul.f32 0.3275911, %v22_v7  ;;  %v36_v12 = vsub.f32 0.0, %v22_v7 }
   0x9   :  { %v24_v10 = vadd.f32 1.0, %v23_v8  ;;  %v37_v14 = vmul.f32 %v36_v12, %v22_v7 }
   0xa   :  { %197 = vmatpush3.bf16.msra.mxu0 %v216_v3 }
   0xb   :  { %198 = vmatprep.subr.bf16.mxu0 %v226_v0  ;;  %222 = vrcp.f32 %v24_v10  ;;  %v38_v16 = vmul.f32 1.442695, %v37_v14 }
   0xd   :  { %224 = vpow2.f32 %v38_v16 }
   0xe   :  { %199 = vmatpush3.bf16.msra.mxu0 %v217_v6 }
   0xf   :  { %200 = vmatprep.subr.bf16.mxu0 %v226_v0 }
  0x12   :  { %201 = vmatpush3.bf16.msra.mxu0 %v218_v9 }
  0x13   :  { %202 = vmatprep.subr.bf16.mxu0 %v226_v0 }
  0x16   :  { %203 = vmatpush3.bf16.msra.mxu0 %v219_v11 }
  0x17   :  { %204 = vmatprep.subr.bf16.mxu0 %v226_v0 }
  0x18   :  { %v223_v17 = vpop.eup %222 }
  0x19   :  { %v27_v18 = vmul.f32 1.0614054, %v223_v17 }
  0x1a   :  { %205 = vmatpush3.bf16.msra.mxu0 %v220_v13  ;;  %v225_v26 = vpop.eup %224 }
  0x1b   :  { %206 = vmatprep.subr.bf16.mxu0 %v226_v0  ;;  %v28_v19 = vadd.f32 -1.4531521, %v27_v18 }
  0x1d   :  { %v29_v20 = vmul.f32 %v223_v17, %v28_v19 }
  0x1e   :  { %207 = vmatpush3.bf16.msra.mxu0 %v221_v15 }
  0x1f   :  { %v30_v21 = vadd.f32 1.4214138, %v29_v20 }
  0x21   :  { %v31_v22 = vmul.f32 %v223_v17, %v30_v21 }
  0x23   :  { %v32_v23 = vadd.f32 -0.28449672, %v31_v22 }
  0x25   :  { %v33_v24 = vmul.f32 %v223_v17, %v32_v23 }
  0x27   :  { %v34_v25 = vadd.f32 0.2548296, %v33_v24 }
  0x29   :  { %v35_v27 = vmul.f32 %v223_v17, %v34_v25 }
  0x2b   :  { %v40_v28 = vmul.f32 %v225_v26, %v35_v27 }
  0x2d   :  { %v41_v29 = vsub.f32 1.0, %v40_v28 }
  0x2f   :  { %v43_v30 = vsub.f32 0.0, %v41_v29 }
  0x31   :  { %v44_v32 = vsel %vm42_vm1, %v41_v29, %v43_v30 }
  0x32   :  { %v46_v33 = vadd.f32 1.0, %v44_v32 }
  0x34   :  { %v47_v34 = vmul.f32 %v46_v33, %v45_v31 }
  0x36   :  { %v48_v35 = vpack.c.bf16 %v47_v34, %v47_v34 }
  0x38   :  { %209 = vmatmul.mubr.bf16.vlgmr.msra.gmra.mxu0 %v48_v35 }
  0xf8   :  { %v148_v37 = vpop.f32.mrf.mxu0 }
  0xf9   :  { %v167_v38 = vadd.f32 %v182_v36, %v148_v37 }
  0xfa   :  { %v210_v39 = vpop.f32.mrf.mxu0 }
  0xfb   :  { %v168_v40 = vpack.c.bf16 %v167_v38, %v167_v38 }
  0xfc   :  { %v151_v41 = vpop.f32.mrf.mxu0 }
  0xfd   :  { %169 = vst [vmem:[%s284_s3] sm:$0xf] %v168_v40 }
  0xfe   :  { %v211_v42 = vpop.f32.mrf.mxu0 }

// kernel: seg_tran_forward.30
= control target key start
LH: loop header
LB: loop body
LE: loop exit
PB: predicated region body
PF: predicated region fallthrough
CT: control target
= control target key end

     0   :  { %s1153_s1 = inlined_call_operand.vmem [shape: bf16[640,128], index: 1, kind: input, shape index: {}]   ;;  %s1154_s0 = inlined_call_operand.vmem [shape: bf16[32,640], index: 0, kind: input, shape index: {}]   ;;  %s1155_s2 = inlined_call_operand.vmem [shape: f32[1,128], index: 2, kind: input, shape index: {}]   ;;  %s1156_s3 = inlined_call_operand.vmem [shape: bf16[32,128], index: 3, kind: output, shape index: {}]  }
   0x1   :  { %v872_v0 = vld [vmem:[%s1153_s1 + $0x78] sm:$0xff]   ;;  %v876_v4 = vld [vmem:[%s1153_s1 + $0x70] sm:$0xff]   ;;  %v880_v8 = vld [vmem:[%s1153_s1 + $0x68] sm:$0xff]  }
   0x2   :  { %v873_v1 = vld [vmem:[%s1153_s1 + $0xf8] sm:$0xff]   ;;  %786 = vmatprep.subr.bf16.mxu0 %v872_v0  ;;  %v877_v5 = vld [vmem:[%s1153_s1 + $0xf0] sm:$0xff]   ;;  %v881_v9 = vld [vmem:[%s1153_s1 + $0xe8] sm:$0xff]  }
   0x3   :  { %v874_v2 = vld [vmem:[%s1153_s1 + $0x38] sm:$0xff]   ;;  %814 = vmatprep.subr.bf16.mxu1 %v873_v1  ;;  %v878_v6 = vld [vmem:[%s1153_s1 + $0x30] sm:$0xff]   ;;  %v882_v10 = vld [vmem:[%s1153_s1 + $0x28] sm:$0xff]  }
   0x4   :  { %v875_v3 = vld [vmem:[%s1153_s1 + $0xb8] sm:$0xff]   ;;  %787 = vmatpush3.bf16.msra.mxu0 %v874_v2  ;;  %v879_v7 = vld [vmem:[%s1153_s1 + $0xb0] sm:$0xff]   ;;  %v883_v11 = vld [vmem:[%s1153_s1 + $0xa8] sm:$0xff]  }
   0x5   :  { %815 = vmatpush3.bf16.msra.mxu1 %v875_v3  ;;  %788 = vmatprep.subr.bf16.mxu0 %v876_v4  ;;  %v884_v12 = vld [vmem:[%s1153_s1 + $0x60] sm:$0xff]   ;;  %v888_v16 = vld [vmem:[%s1153_s1 + $0x58] sm:$0xff]   ;;  %v892_v20 = vld [vmem:[%s1153_s1 + $0x50] sm:$0xff]  }
   0x6   :  { %816 = vmatprep.subr.bf16.mxu1 %v877_v5  ;;  %v885_v13 = vld [vmem:[%s1153_s1 + $0xe0] sm:$0xff]   ;;  %v889_v17 = vld [vmem:[%s1153_s1 + $0xd8] sm:$0xff]   ;;  %v893_v21 = vld [vmem:[%s1153_s1 + $0xd0] sm:$0xff]  }
   0x7   :  { %v886_v14 = vld [vmem:[%s1153_s1 + $0x20] sm:$0xff]   ;;  %v890_v18 = vld [vmem:[%s1153_s1 + $0x18] sm:$0xff]   ;;  %v894_v22 = vld [vmem:[%s1153_s1 + $0x10] sm:$0xff]  }
   0x8   :  { %789 = vmatpush3.bf16.msra.mxu0 %v878_v6  ;;  %v887_v15 = vld [vmem:[%s1153_s1 + $0xa0] sm:$0xff]   ;;  %v891_v19 = vld [vmem:[%s1153_s1 + $0x98] sm:$0xff]   ;;  %v895_v23 = vld [vmem:[%s1153_s1 + $0x90] sm:$0xff]  }
   0x9   :  { %817 = vmatpush3.bf16.msra.mxu1 %v879_v7  ;;  %790 = vmatprep.subr.bf16.mxu0 %v880_v8  ;;  %v896_v24 = vld [vmem:[%s1153_s1 + $0x48] sm:$0xff]   ;;  %v900_v28 = vld [vmem:[%s1153_s1 + $0x40] sm:$0xff]   ;;  %v910_v36 = vld [vmem:[%s1153_s1 + $0x138] sm:$0xff]  }
   0xa   :  { %818 = vmatprep.subr.bf16.mxu1 %v881_v9  ;;  %v897_v25 = vld [vmem:[%s1153_s1 + $0xc8] sm:$0xff]   ;;  %v901_v29 = vld [vmem:[%s1153_s1 + $0xc0] sm:$0xff]   ;;  %v911_v37 = vld [vmem:[%s1153_s1 + $0x130] sm:$0xff]  }
   0xb   :  { %v898_v26 = vld [vmem:[%s1153_s1 + $0x8] sm:$0xff]   ;;  %v902_v30 = vld [vmem:[%s1153_s1] sm:$0xff]   ;;  %v914_v45 = vld [vmem:[%s1153_s1 + $0x118] sm:$0xff]  }
   0xc   :  { %791 = vmatpush3.bf16.msra.mxu0 %v882_v10  ;;  %v899_v27 = vld [vmem:[%s1153_s1 + $0x88] sm:$0xff]   ;;  %v903_v31 = vld [vmem:[%s1153_s1 + $0x80] sm:$0xff]   ;;  %v921_v46 = vld [vmem:[%s1153_s1 + $0x110] sm:$0xff]  }
   0xd   :  { %819 = vmatpush3.bf16.msra.mxu1 %v883_v11  ;;  %792 = vmatprep.subr.bf16.mxu0 %v884_v12  ;;  %v904_v32 = vld [vmem:[%s1154_s0] ss:$20 sps:$4 sm:$0xff]   ;;  %v906_v33 = vld [vmem:[%s1154_s0 + $0x4] ss:$20 sps:$4 sm:$0xff]   ;;  %v907_v34 = vld [vmem:[%s1154_s0 + $0x8] ss:$20 sps:$4 sm:$0xff]  }
   0xe   :  { %820 = vmatprep.subr.bf16.mxu1 %v885_v13  ;;  %v909_v35 = vld [vmem:[%s1154_s0 + $0xc] ss:$20 sps:$4 sm:$0xff]   ;;  %443 = vmatprep.mubr.bf16.mxu0 %v906_v33  ;;  %v917_v40 = vld [vmem:[%s1154_s0 + $0x34] ss:$20 sps:$4 sm:$0xff]   ;;  %v920_v42 = vld [vmem:[%s1154_s0 + $0x30] ss:$20 sps:$4 sm:$0xff]  }
   0xf   :  { %492 = vmatprep.mubr.bf16.mxu1 %v909_v35  ;;  %v912_v38 = vld [vmem:[%s1153_s1 + $0x128] sm:$0xff]   ;;  %v913_v43 = vld [vmem:[%s1153_s1 + $0x120] sm:$0xff]  }
  0x10   :  { %793 = vmatpush3.bf16.msra.mxu0 %v886_v14  ;;  %v915_v39 = vld [vmem:[%s1154_s0 + $0x2c] ss:$20 sps:$4 sm:$0xff]   ;;  %v919_v41 = vld [vmem:[%s1154_s0 + $0x28] ss:$20 sps:$4 sm:$0xff]   ;;  %v924_v44 = vld [vmem:[%s1154_s0 + $0x10] ss:$20 sps:$4 sm:$0xff]  }
  0x11   :  { %821 = vmatpush3.bf16.msra.mxu1 %v887_v15  ;;  %794 = vmatprep.subr.bf16.mxu0 %v888_v16  ;;  %v922_v47 = vld [vmem:[%s1153_s1 + $0x108] sm:$0xff]   ;;  %v923_v48 = vld [vmem:[%s1153_s1 + $0x100] sm:$0xff]  }
  0x12   :  { %822 = vmatprep.subr.bf16.mxu1 %v889_v17  ;;  %v925_v49 = vld [vmem:[%s1154_s0 + $0x38] ss:$20 sps:$4 sm:$0xff]   ;;  %v766_v10 = vld [vmem:[%s1155_s2] ss:$0 sm:$0xff] }
  0x14   :  { %795 = vmatpush3.bf16.msra.mxu0 %v890_v18 }
  0x15   :  { %823 = vmatpush3.bf16.msra.mxu1 %v891_v19  ;;  %796 = vmatprep.subr.bf16.mxu0 %v892_v20 }
  0x16   :  { %824 = vmatprep.subr.bf16.mxu1 %v893_v21 }
  0x18   :  { %797 = vmatpush3.bf16.msra.mxu0 %v894_v22 }
  0x19   :  { %825 = vmatpush3.bf16.msra.mxu1 %v895_v23  ;;  %798 = vmatprep.subr.bf16.mxu0 %v896_v24 }
  0x1a   :  { %826 = vmatprep.subr.bf16.mxu1 %v897_v25 }
  0x1c   :  { %799 = vmatpush3.bf16.msra.mxu0 %v898_v26 }
  0x1d   :  { %827 = vmatpush3.bf16.msra.mxu1 %v899_v27  ;;  %800 = vmatprep.subr.bf16.mxu0 %v900_v28 }
  0x1e   :  { %828 = vmatprep.subr.bf16.mxu1 %v901_v29 }
  0x20   :  { %801 = vmatpush3.bf16.msra.mxu0 %v902_v30 }
  0x21   :  { %829 = vmatpush3.bf16.msra.mxu1 %v903_v31  ;;  %852 = vmatprep.subr.bf16.mxu0 %v910_v36 }
  0x23   :  { %444 = vmatmul.mubr.bf16.vlgmr.msra.gmra.mxu0 %v904_v32 }
  0x24   :  { %493 = vmatmul.mubr.bf16.vlgmr.msra.gmra.mxu1 %v907_v34  ;;  %853 = vmatpush3.bf16.msra.mxu0 %v910_v36 }
  0x25   :  { %854 = vmatprep.subr.bf16.mxu0 %v911_v37  ;;  %451 = vmatprep.mubr.bf16.mxu0 %v915_v39 }
  0x26   :  { %500 = vmatprep.mubr.bf16.mxu1 %v917_v40 }
  0x28   :  { %855 = vmatpush3.bf16.msra.mxu0 %v911_v37 }
  0x29   :  { %856 = vmatprep.subr.bf16.mxu0 %v912_v38 }
  0x2b   :  { %452 = vmatmul.mubr.bf16.gmra.mxu0 %v919_v41 }
  0x2c   :  { %501 = vmatmul.mubr.bf16.gmra.mxu1 %v920_v42  ;;  %857 = vmatpush3.bf16.msra.mxu0 %v912_v38 }
  0x2d   :  { %858 = vmatprep.subr.bf16.mxu0 %v913_v43  ;;  %868 = vmatprep.mubr.bf16.mxu0 %v924_v44 }
  0x30   :  { %859 = vmatpush3.bf16.msra.mxu0 %v913_v43 }
  0x31   :  { %860 = vmatprep.subr.bf16.mxu0 %v914_v45 }
  0x34   :  { %861 = vmatpush3.bf16.msra.mxu0 %v914_v45 }
  0x35   :  { %862 = vmatprep.subr.bf16.mxu0 %v921_v46 }
  0x38   :  { %863 = vmatpush3.bf16.msra.mxu0 %v921_v46 }
  0x39   :  { %864 = vmatprep.subr.bf16.mxu0 %v922_v47 }
  0x3c   :  { %865 = vmatpush3.bf16.msra.mxu0 %v922_v47 }
  0x3d   :  { %866 = vmatprep.subr.bf16.mxu0 %v923_v48 }
  0x40   :  { %867 = vmatpush3.bf16.msra.mxu0 %v923_v48 }
  0x43   :  { %869 = vmatmul.mubr.bf16.vlgmr.msra.gmra.mxu0 %v925_v49 }
  0xe3   :  { %v802_v50 = vpop.f32.mrf.mxu0 }
  0xe4   :  { %v830_v51 = vpop.f32.mrf.mxu1 }
  0xe5   :  { %v803_v52 = vpop.f32.mrf.mxu0 }
  0xe6   :  { %v831_v53 = vpop.f32.mrf.mxu1  ;;  %v804_v4 = vadd.f32 %v803_v52, %v802_v50 }
  0xe7   :  { %v805_v54 = vpop.f32.mrf.mxu0  ;;  %v832_v5 = vadd.f32 %v831_v53, %v830_v51 }
  0xe8   :  { %v833_v55 = vpop.f32.mrf.mxu1 }
  0xe9   :  { %v806_v56 = vpop.f32.mrf.mxu0  ;;  %v495_v12 = vadd.f32 %v832_v5, %v804_v4 }
  0xea   :  { %v834_v57 = vpop.f32.mrf.mxu1  ;;  %v807_v13 = vadd.f32 %v806_v56, %v805_v54 }
  0xeb   :  { %v808_v58 = vpop.f32.mrf.mxu0  ;;  %v835_v14 = vadd.f32 %v834_v57, %v833_v55 }
  0xec   :  { %v836_v59 = vpop.f32.mrf.mxu1 }
  0xed   :  { %v809_v60 = vpop.f32.mrf.mxu0  ;;  %v498_v23 = vadd.f32 %v835_v14, %v807_v13 }
  0xee   :  { %v837_v61 = vpop.f32.mrf.mxu1  ;;  %v810_v0 = vadd.f32 %v809_v60, %v808_v58 }
  0xef   :  { %v811_v62 = vpop.f32.mrf.mxu0  ;;  %v838_v1 = vadd.f32 %v837_v61, %v836_v59 }
  0xf0   :  { %v839_v63 = vpop.f32.mrf.mxu1 }
  0xf1   :  { %v812_v2 = vpop.f32.mrf.mxu0  ;;  %v503_v8 = vadd.f32 %v838_v1, %v810_v0 }
  0xf2   :  { %v840_v3 = vpop.f32.mrf.mxu1  ;;  %v813_v6 = vadd.f32 %v812_v2, %v811_v62 }
  0xf3   :  { %v841_v7 = vadd.f32 %v840_v3, %v839_v63 }
  0xf5   :  { %v506_v18 = vadd.f32 %v841_v7, %v813_v6 }
 0x103   :  { %v870_v9 = vpop.f32.mrf.mxu0 }
 0x104   :  { %v552_v11 = vadd.f32 %v870_v9, %v503_v8 }
 0x105   :  { %v543_v15 = vpop.f32.mrf.mxu0 }
 0x106   :  { %v1115_v16 = vadd.f32 %v766_v10, %v552_v11  ;;  %v544_v17 = vadd.f32 %v543_v15, %v495_v12 }
 0x107   :  { %v871_v19 = vpop.f32.mrf.mxu0 }
 0x108   :  { %v1118_v20 = vmul.f32 0.70710677, %v1115_v16  ;;  %v1120_v21 = vadd.f32 %v766_v10, %v544_v17  ;;  %v555_v22 = vadd.f32 %v871_v19, %v506_v18 }
 0x109   :  { %v546_v24 = vpop.f32.mrf.mxu0 }
 0x10a   :  { %v590_v25 = vand.u32 2147483647, %v1118_v20  ;;  %v1124_v26 = vmul.f32 0.70710677, %v1120_v21  ;;  %v1126_v27 = vadd.f32 %v766_v10, %v555_v22  ;;  %v547_v28 = vadd.f32 %v546_v24, %v498_v23 }
 0x10b   :  { %vm670_vm0 = vcmp.ge.f32.partialorder %v1118_v20, 0.0 }
 0x10c   :  { %v594_v29 = vmul.f32 0.3275911, %v590_v25  ;;  %v588_v30 = vand.u32 2147483647, %v1124_v26  ;;  %v1130_v31 = vmul.f32 0.70710677, %v1126_v27  ;;  %v1132_v32 = vadd.f32 %v766_v10, %v547_v28 }
 0x10d   :  { %v646_v43 = vsub.f32 0.0, %v590_v25  ;;  %vm668_vm1 = vcmp.ge.f32.partialorder %v1124_v26, 0.0  ;;  %v680_v26 = vmul.f32 0.5, %v1120_v21 }
 0x10e   :  { %v598_v33 = vadd.f32 1.0, %v594_v29  ;;  %v592_v34 = vmul.f32 0.3275911, %v588_v30  ;;  %v591_v35 = vand.u32 2147483647, %v1130_v31  ;;  %v644_v44 = vsub.f32 0.0, %v588_v30 }
 0x10f   :  { %v1136_v36 = vmul.f32 0.70710677, %v1132_v32  ;;  %v650_v45 = vmul.f32 %v646_v43, %v590_v25  ;;  %vm671_vm2 = vcmp.ge.f32.partialorder %v1130_v31, 0.0 }
 0x110   :  { %926 = vrcp.f32 %v598_v33  ;;  %v596_v37 = vadd.f32 1.0, %v592_v34  ;;  %v595_v38 = vmul.f32 0.3275911, %v591_v35  ;;  %v647_v46 = vsub.f32 0.0, %v591_v35 }
 0x111   :  { %v589_v39 = vand.u32 2147483647, %v1136_v36  ;;  %v648_v48 = vmul.f32 %v644_v44, %v588_v30  ;;  %v656_v50 = vmul.f32 1.442695, %v650_v45  ;;  %vm669_vm3 = vcmp.ge.f32.partialorder %v1136_v36, 0.0 }
 0x112   :  { %928 = vrcp.f32 %v596_v37  ;;  %v599_v40 = vadd.f32 1.0, %v595_v38  ;;  %v651_v52 = vmul.f32 %v647_v46, %v591_v35 }
 0x113   :  { %v593_v41 = vmul.f32 0.3275911, %v589_v39  ;;  %v645_v51 = vsub.f32 0.0, %v589_v39  ;;  %v652_v56 = vmul.f32 1.442695, %v648_v48 }
 0x114   :  { %930 = vrcp.f32 %v599_v40  ;;  %v658_v62 = vmul.f32 1.442695, %v651_v52 }
 0x115   :  { %v597_v42 = vadd.f32 1.0, %v593_v41  ;;  %v649_v59 = vmul.f32 %v645_v51, %v589_v39 }
 0x117   :  { %932 = vrcp.f32 %v597_v42  ;;  %v654_v5 = vmul.f32 1.442695, %v649_v59  ;;  %v683_v59 = vmul.f32 0.5, %v1126_v27 }
 0x118   :  { %934 = vpow2.f32 %v656_v50 }
 0x119   :  { %936 = vpow2.f32 %v652_v56 }
 0x11a   :  { %938 = vpow2.f32 %v658_v62 }
 0x11b   :  { %940 = vpow2.f32 %v654_v5 }
 0x11d   :  { %v927_v47 = vpop.eup %926 }
 0x11e   :  { %v610_v49 = vmul.f32 1.0614054, %v927_v47 }
 0x11f   :  { %v929_v53 = vpop.eup %928 }
 0x120   :  { %v614_v54 = vadd.f32 -1.4531521, %v610_v49  ;;  %v608_v55 = vmul.f32 1.0614054, %v929_v53 }
 0x121   :  { %v931_v57 = vpop.eup %930 }
 0x122   :  { %v618_v58 = vmul.f32 %v927_v47, %v614_v54  ;;  %v612_v60 = vadd.f32 -1.4531521, %v608_v55  ;;  %v611_v61 = vmul.f32 1.0614054, %v931_v57 }
 0x124   :  { %v622_v63 = vadd.f32 1.4214138, %v618_v58  ;;  %v933_v0 = vpop.eup %932  ;;  %v616_v1 = vmul.f32 %v929_v53, %v612_v60  ;;  %v615_v2 = vadd.f32 -1.4531521, %v611_v61  ;;  %v682_v58 = vmul.f32 0.5, %v1115_v16 }
 0x125   :  { %v609_v4 = vmul.f32 1.0614054, %v933_v0  ;;  %v935_v25 = vpop.eup %934 }
 0x126   :  { %v626_v3 = vmul.f32 %v927_v47, %v622_v63  ;;  %v620_v6 = vadd.f32 1.4214138, %v616_v1  ;;  %v619_v7 = vmul.f32 %v931_v57, %v615_v2  ;;  %v937_v37 = vpop.eup %936  ;;  %v681_v1 = vmul.f32 0.5, %v1132_v32 }
 0x127   :  { %v613_v9 = vadd.f32 -1.4531521, %v609_v4  ;;  %v939_v42 = vpop.eup %938 }
 0x128   :  { %v630_v8 = vadd.f32 -0.28449672, %v626_v3  ;;  %v624_v10 = vmul.f32 %v929_v53, %v620_v6  ;;  %v623_v11 = vadd.f32 1.4214138, %v619_v7  ;;  %v941_v48 = vpop.eup %940 }
 0x129   :  { %v617_v13 = vmul.f32 %v933_v0, %v613_v9 }
 0x12a   :  { %v634_v12 = vmul.f32 %v927_v47, %v630_v8  ;;  %v628_v14 = vadd.f32 -0.28449672, %v624_v10  ;;  %v627_v15 = vmul.f32 %v931_v57, %v623_v11 }
 0x12b   :  { %v621_v18 = vadd.f32 1.4214138, %v617_v13 }
 0x12c   :  { %v638_v17 = vadd.f32 0.2548296, %v634_v12  ;;  %v632_v19 = vmul.f32 %v929_v53, %v628_v14  ;;  %v631_v22 = vadd.f32 -0.28449672, %v627_v15 }
 0x12d   :  { %v625_v24 = vmul.f32 %v933_v0, %v621_v18 }
 0x12e   :  { %v642_v23 = vmul.f32 %v927_v47, %v638_v17  ;;  %v636_v28 = vadd.f32 0.2548296, %v632_v19  ;;  %v635_v29 = vmul.f32 %v931_v57, %v631_v22 }
 0x12f   :  { %v629_v33 = vadd.f32 -0.28449672, %v625_v24 }
 0x130   :  { %v662_v30 = vmul.f32 %v935_v25, %v642_v23  ;;  %v640_v34 = vmul.f32 %v929_v53, %v636_v28  ;;  %v639_v35 = vadd.f32 0.2548296, %v635_v29 }
 0x131   :  { %v633_v39 = vmul.f32 %v933_v0, %v629_v33 }
 0x132   :  { %v666_v38 = vsub.f32 1.0, %v662_v30  ;;  %v660_v40 = vmul.f32 %v937_v37, %v640_v34  ;;  %v643_v41 = vmul.f32 %v931_v57, %v639_v35 }
 0x133   :  { %v637_v44 = vadd.f32 0.2548296, %v633_v39 }
 0x134   :  { %v674_v43 = vsub.f32 0.0, %v666_v38  ;;  %v664_v45 = vsub.f32 1.0, %v660_v40  ;;  %v663_v46 = vmul.f32 %v939_v42, %v643_v41 }
 0x135   :  { %v641_v47 = vmul.f32 %v933_v0, %v637_v44 }
 0x136   :  { %v678_v49 = vsel %vm670_vm0, %v666_v38, %v674_v43  ;;  %v672_v50 = vsub.f32 0.0, %v664_v45  ;;  %v667_v51 = vsub.f32 1.0, %v663_v46 }
 0x137   :  { %v661_v52 = vmul.f32 %v941_v48, %v641_v47  ;;  %v686_v54 = vadd.f32 1.0, %v678_v49 }
 0x138   :  { %v675_v53 = vsub.f32 0.0, %v667_v51  ;;  %v676_v55 = vsel %vm668_vm1, %v664_v45, %v672_v50 }
 0x139   :  { %v665_v56 = vsub.f32 1.0, %v661_v52  ;;  %v684_v61 = vadd.f32 1.0, %v676_v55  ;;  %v690_v62 = vmul.f32 %v686_v54, %v682_v58 }
 0x13a   :  { %v679_v57 = vsel %vm671_vm2, %v667_v51, %v675_v53 }
 0x13b   :  { %v687_v20 = vadd.f32 1.0, %v679_v57  ;;  %v673_v60 = vsub.f32 0.0, %v665_v56  ;;  %v688_v3 = vmul.f32 %v684_v61, %v680_v26 }
 0x13d   :  { %v691_v63 = vmul.f32 %v687_v20, %v683_v59  ;;  %v677_v0 = vsel %vm669_vm3, %v665_v56, %v673_v60 }
 0x13e   :  { %v685_v2 = vadd.f32 1.0, %v677_v0 }
 0x13f   :  { %v783_v31 = vpack.c.bf16 %v691_v63, %v690_v62 }
 0x140   :  { %v689_v4 = vmul.f32 %v685_v2, %v681_v1 }
 0x141   :  { %785 = vst [vmem:[%s1156_s3 + $0x8] sm:$0xff] %v783_v31  }
 0x142   :  { %v778_v16 = vpack.c.bf16 %v689_v4, %v688_v3 }
 0x144   :  { %779 = vst [vmem:[%s1156_s3] sm:$0xff] %v778_v16  }

// kernel: seg_tran_forward.32
= control target key start
LH: loop header
LB: loop body
LE: loop exit
PB: predicated region body
PF: predicated region fallthrough
CT: control target
= control target key end

     0   :  { %v433_v13 = vmov 0.0   ;;  %vm434_vm0 = vmmov 0   ;;  %s568_s0 = inlined_call_operand.vmem [shape: bf16[40,128], index: 0, kind: input, shape index: {}]   ;;  %s569_s1 = inlined_call_operand.vmem [shape: bf16[128,128], index: 1, kind: input, shape index: {}]   ;;  %s570_s3 = inlined_call_operand.vmem [shape: f32[1,128], index: 3, kind: input, shape index: {}]   ;;  %s571_s4 = inlined_call_operand.vmem [shape: f32[1,128], index: 4, kind: input, shape index: {}]   ;;  %s572_s2 = inlined_call_operand.vmem [shape: f32[1,128], index: 2, kind: input, shape index: {}]   ;;  %s573_s5 = inlined_call_operand.vmem [shape: bf16[40,128], index: 5, kind: output, shape index: {}]  }
   0x1   :  { %v356_v0 = vld [vmem:[%s568_s0 + $0x8] sm:$0xff]   ;;  %v339_v4 = vld [vmem:[%s568_s0] sm:$0xff]   ;;  %v34_v8 = vld [vmem:[%s568_s0 + $0x10] sm:$0xf]  ;;  %397 = vmatprep.subr.bf16.mxu1 %v433_v13  ;;  %369 = vmatprep.subr.bf16.mxu0 %v433_v13 }
   0x2   :  { %v468_v1 = vunpack.c.l.bf16 %v356_v0  ;;  %v470_v2 = vunpack.c.h.bf16 %v356_v0  ;;  %v481_v6 = vunpack.c.l.bf16 %v339_v4  ;;  %v483_v7 = vunpack.c.h.bf16 %v339_v4  ;;  %v415_v12 = vld [vmem:[%s569_s1 + $0x38] sm:$0xff]   ;;  %v416_v15 = vld [vmem:[%s569_s1 + $0x30] sm:$0xff]   ;;  %v417_v16 = vld [vmem:[%s569_s1 + $0x28] sm:$0xff]   ;;  %389 = vmatprep.mubr.msk.bf16.mxu1 %vm434_vm0, %v433_v13  ;;  %385 = vmatprep.mubr.msk.bf16.mxu0 %vm434_vm0, %v433_v13 }
   0x3   :  { %v494_v11 = vunpack.c.l.bf16 %v34_v8  ;;  %405 = vmatpush3.bf16.msra.mxu1 %v415_v12  ;;  %370 = vmatpush3.bf16.msra.mxu0 %v415_v12  ;;  %v418_v17 = vld [vmem:[%s569_s1 + $0x20] sm:$0xff]   ;;  %v419_v18 = vld [vmem:[%s569_s1 + $0x18] sm:$0xff]   ;;  %v420_v19 = vld [vmem:[%s569_s1 + $0x10] sm:$0xff]  }
   0x4   :  { %44 = vadd.xlane.f32.xlu0 %v468_v1  ;;  %v57_v3 = vmul.f32 %v468_v1, %v468_v1  ;;  %v58_v5 = vmul.f32 %v470_v2, %v470_v2  ;;  %v55_v9 = vmul.f32 %v481_v6, %v481_v6  ;;  %v56_v10 = vmul.f32 %v483_v7, %v483_v7  ;;  %v421_v20 = vld [vmem:[%s569_s1 + $0x8] sm:$0xff]   ;;  %v422_v21 = vld [vmem:[%s569_s1] sm:$0xff]  }
   0x5   :  { %v59_v14 = vmul.f32 %v494_v11, %v494_v11  ;;  %398 = vmatprep.subr.bf16.mxu1 %v433_v13  ;;  %371 = vmatprep.subr.bf16.mxu0 %v433_v13  ;;  %v317_v60 = vld [vmem:[%s570_s3] ss:$0 sm:$0xff] }
   0x6   :  { %64 = vadd.xlane.f32.xlu1 %v57_v3  ;;  %v318_v3 = vld [vmem:[%s571_s4] ss:$0 sm:$0xff] }
   0x7   :  { %406 = vmatpush3.bf16.msra.mxu1 %v416_v15  ;;  %372 = vmatpush3.bf16.msra.mxu0 %v416_v15 }
   0x8   :  { %46 = vadd.xlane.f32.xlu0 %v470_v2  ;;  %399 = vmatprep.subr.bf16.mxu1 %v433_v13 }
   0x9   :  { %373 = vmatprep.subr.bf16.mxu0 %v433_v13 }
   0xa   :  { %66 = vadd.xlane.f32.xlu1 %v58_v5 }
   0xb   :  { %407 = vmatpush3.bf16.msra.mxu1 %v417_v16  ;;  %374 = vmatpush3.bf16.msra.mxu0 %v417_v16 }
   0xc   :  { %40 = vadd.xlane.f32.xlu0 %v481_v6  ;;  %400 = vmatprep.subr.bf16.mxu1 %v433_v13 }
   0xd   :  { %375 = vmatprep.subr.bf16.mxu0 %v433_v13 }
   0xe   :  { %42 = vadd.xlane.f32.xlu1 %v483_v7 }
   0xf   :  { %408 = vmatpush3.bf16.msra.mxu1 %v418_v17  ;;  %376 = vmatpush3.bf16.msra.mxu0 %v418_v17 }
  0x10   :  { %60 = vadd.xlane.f32.xlu0 %v55_v9  ;;  %401 = vmatprep.subr.bf16.mxu1 %v433_v13 }
  0x11   :  { %377 = vmatprep.subr.bf16.mxu0 %v433_v13 }
  0x12   :  { %62 = vadd.xlane.f32.xlu1 %v56_v10 }
  0x13   :  { %409 = vmatpush3.bf16.msra.mxu1 %v419_v18  ;;  %378 = vmatpush3.bf16.msra.mxu0 %v419_v18 }
  0x14   :  { %48 = vadd.xlane.f32.xlu0 %v494_v11  ;;  %402 = vmatprep.subr.bf16.mxu1 %v433_v13 }
  0x15   :  { %379 = vmatprep.subr.bf16.mxu0 %v433_v13 }
  0x16   :  { %68 = vadd.xlane.f32.xlu1 %v59_v14 }
  0x17   :  { %410 = vmatpush3.bf16.msra.mxu1 %v420_v19  ;;  %380 = vmatpush3.bf16.msra.mxu0 %v420_v19 }
  0x18   :  { %403 = vmatprep.subr.bf16.mxu1 %v433_v13  ;;  %381 = vmatprep.subr.bf16.mxu0 %v433_v13 }
  0x1b   :  { %411 = vmatpush3.bf16.msra.mxu1 %v421_v20  ;;  %382 = vmatpush3.bf16.msra.mxu0 %v421_v20 }
  0x1c   :  { %404 = vmatprep.subr.bf16.mxu1 %v433_v13  ;;  %383 = vmatprep.subr.bf16.mxu0 %v433_v13 }
  0x1f   :  { %412 = vmatpush3.bf16.msra.mxu1 %v422_v21  ;;  %384 = vmatpush3.bf16.msra.mxu0 %v422_v21 }
  0x8d   :  { %v45_v22 = vpop.xlane.xlu0 %44 }
  0x8e   :  { %v52_v23 = vmul.f32 0.03125, %v45_v22 }
  0x8f   :  { %v65_v24 = vpop.xlane.xlu1 %64 }
  0x90   :  { %v77_v25 = vmul.f32 %v52_v23, %v52_v23  ;;  %v72_v26 = vmul.f32 0.03125, %v65_v24  ;;  %v87_v55 = vsub.f32 %v468_v1, %v52_v23 }
  0x91   :  { %v47_v27 = vpop.xlane.xlu0 %46 }
  0x92   :  { %v82_v28 = vsub.f32 %v72_v26, %v77_v25  ;;  %v53_v29 = vmul.f32 0.03125, %v47_v27  ;;  %v327_v26 = vld [vmem:[%s572_s2] ss:$0 sm:$0xff] }
  0x93   :  { %v67_v30 = vpop.xlane.xlu1 %66 }
  0x94   :  { %v92_v31 = vadd.f32 1e-05, %v82_v28  ;;  %v78_v32 = vmul.f32 %v53_v29, %v53_v29  ;;  %v73_v33 = vmul.f32 0.03125, %v67_v30  ;;  %v88_v61 = vsub.f32 %v470_v2, %v53_v29 }
  0x95   :  { %v41_v34 = vpop.xlane.xlu0 %40 }
  0x96   :  { %423 = vrsqrt.f32 %v92_v31  ;;  %v83_v35 = vsub.f32 %v73_v33, %v78_v32  ;;  %v50_v36 = vmul.f32 0.03125, %v41_v34 }
  0x97   :  { %v43_v37 = vpop.xlane.xlu1 %42 }
  0x98   :  { %v93_v38 = vadd.f32 1e-05, %v83_v35  ;;  %v51_v39 = vmul.f32 0.03125, %v43_v37  ;;  %v75_v41 = vmul.f32 %v50_v36, %v50_v36  ;;  %v85_v4 = vsub.f32 %v481_v6, %v50_v36 }
  0x99   :  { %v61_v40 = vpop.xlane.xlu0 %60 }
  0x9a   :  { %425 = vrsqrt.f32 %v93_v38  ;;  %v70_v42 = vmul.f32 0.03125, %v61_v40  ;;  %v76_v44 = vmul.f32 %v51_v39, %v51_v39  ;;  %v86_v10 = vsub.f32 %v483_v7, %v51_v39 }
  0x9b   :  { %v63_v43 = vpop.xlane.xlu1 %62 }
  0x9c   :  { %v80_v45 = vsub.f32 %v70_v42, %v75_v41  ;;  %v71_v46 = vmul.f32 0.03125, %v63_v43 }
  0x9d   :  { %v49_v47 = vpop.xlane.xlu0 %48 }
  0x9e   :  { %v90_v48 = vadd.f32 1e-05, %v80_v45  ;;  %v81_v49 = vsub.f32 %v71_v46, %v76_v44  ;;  %v54_v50 = vmul.f32 0.03125, %v49_v47 }
  0x9f   :  { %v69_v51 = vpop.xlane.xlu1 %68 }
  0xa0   :  { %427 = vrsqrt.f32 %v90_v48  ;;  %v91_v52 = vadd.f32 1e-05, %v81_v49  ;;  %v79_v53 = vmul.f32 %v54_v50, %v54_v50  ;;  %v74_v54 = vmul.f32 0.03125, %v69_v51 }
  0xa1   :  { %v89_v18 = vsub.f32 %v494_v11, %v54_v50 }
  0xa2   :  { %429 = vrsqrt.f32 %v91_v52  ;;  %v84_v57 = vsub.f32 %v74_v54, %v79_v53 }
  0xa3   :  { %v424_v56 = vpop.eup %423 }
  0xa4   :  { %v102_v58 = vmul.f32 %v424_v56, %v87_v55  ;;  %v94_v59 = vadd.f32 1e-05, %v84_v57 }
  0xa6   :  { %431 = vrsqrt.f32 %v94_v59  ;;  %v114_v0 = vmul.f32 %v317_v60, %v102_v58 }
  0xa7   :  { %v426_v62 = vpop.eup %425 }
  0xa8   :  { %v103_v63 = vmul.f32 %v426_v62, %v88_v61  ;;  %v126_v5 = vadd.f32 %v318_v3, %v114_v0 }
  0xaa   :  { %v115_v1 = vmul.f32 %v317_v60, %v103_v63 }
  0xac   :  { %v127_v8 = vadd.f32 %v318_v3, %v115_v1 }
  0xad   :  { %v428_v9 = vpop.eup %427 }
  0xae   :  { %v130_v12 = vpack.c.bf16 %v127_v8, %v126_v5  ;;  %v100_v14 = vmul.f32 %v428_v9, %v85_v4 }
  0xaf   :  { %v430_v15 = vpop.eup %429 }
  0xb0   :  { %390 = vmatmul.mubr.bf16.vlgmr.msra.gmra.mxu1 %v130_v12  ;;  %v101_v2 = vmul.f32 %v430_v15, %v86_v10  ;;  %v112_v16 = vmul.f32 %v317_v60, %v100_v14 }
  0xb1   :  { %393 = vmatprep.mubr.msk.bf16.mxu1 %vm434_vm0, %v433_v13 }
  0xb2   :  { %v113_v17 = vmul.f32 %v317_v60, %v101_v2  ;;  %v124_v20 = vadd.f32 %v318_v3, %v112_v16 }
  0xb3   :  { %v432_v19 = vpop.eup %431 }
  0xb4   :  { %v125_v6 = vadd.f32 %v318_v3, %v113_v17  ;;  %v104_v21 = vmul.f32 %v432_v19, %v89_v18 }
  0xb6   :  { %v129_v22 = vpack.c.bf16 %v125_v6, %v124_v20  ;;  %v116_v23 = vmul.f32 %v317_v60, %v104_v21 }
  0xb8   :  { %386 = vmatmul.mubr.bf16.vlgmr.msra.gmra.mxu0 %v129_v22  ;;  %v128_v7 = vadd.f32 %v318_v3, %v116_v23 }
  0xba   :  { %v131_v24 = vpack.c.bf16 %v128_v7, %v128_v7 }
  0xbc   :  { %394 = vmatmul.mubr.bf16.gmra.mxu1 %v131_v24 }
 0x170   :  { %v243_v25 = vpop.f32.mrf.mxu1 }
 0x171   :  { %v284_v28 = vadd.f32 %v327_v26, %v243_v25 }
 0x172   :  { %v391_v27 = vpop.f32.mrf.mxu1 }
 0x174   :  { %v246_v13 = vpop.f32.mrf.mxu1 }
 0x175   :  { %v285_v29 = vadd.f32 %v327_v26, %v246_v13 }
 0x176   :  { %v392_v11 = vpop.f32.mrf.mxu1 }
 0x177   :  { %v354_v30 = vpack.c.bf16 %v285_v29, %v284_v28 }
 0x178   :  { %v235_v31 = vpop.f32.mrf.mxu0 }
 0x179   :  { %357 = vst [vmem:[%s573_s5 + $0x8] sm:$0xff] %v354_v30   ;;  %v282_v34 = vadd.f32 %v327_v26, %v235_v31 }
 0x17a   :  { %v387_v32 = vpop.f32.mrf.mxu0 }
 0x17c   :  { %v238_v33 = vpop.f32.mrf.mxu0  ;;  %v251_v36 = vpop.f32.mrf.mxu1 }
 0x17d   :  { %v283_v35 = vadd.f32 %v327_v26, %v238_v33  ;;  %v286_v37 = vadd.f32 %v327_v26, %v251_v36 }
 0x17e   :  { %v388_v38 = vpop.f32.mrf.mxu0  ;;  %v395_v40 = vpop.f32.mrf.mxu1 }
 0x17f   :  { %v349_v39 = vpack.c.bf16 %v283_v35, %v282_v34  ;;  %v337_v41 = vpack.c.bf16 %v286_v37, %v286_v37 }
 0x180   :  { %v254_v42 = vpop.f32.mrf.mxu1 }
 0x181   :  { %350 = vst [vmem:[%s573_s5] sm:$0xff] %v349_v39   ;;  %312 = vst [vmem:[%s573_s5 + $0x10] sm:$0xf] %v337_v41 }
 0x182   :  { %v396_v43 = vpop.f32.mrf.mxu1 }

// kernel: seg_tran_forward.34
= control target key start
LH: loop header
LB: loop body
LE: loop exit
PB: predicated region body
PF: predicated region fallthrough
CT: control target
= control target key end

     0   :  { %v316_v0 = vmov 0.0   ;;  %vm317_vm0 = vmmov 0   ;;  %s406_s1 = inlined_call_operand.vmem [shape: bf16[128,128], index: 1, kind: input, shape index: {}]   ;;  %s407_s0 = inlined_call_operand.vmem [shape: bf16[40,128], index: 0, kind: input, shape index: {}]   ;;  %s408_s3 = inlined_call_operand.vmem [shape: bf16[40,128], index: 3, kind: input, shape index: {}]   ;;  %s409_s2 = inlined_call_operand.vmem [shape: f32[1,128], index: 2, kind: input, shape index: {}]   ;;  %s410_s4 = inlined_call_operand.vmem [shape: f32[40,128], index: 4, kind: output, shape index: {}]  }
   0x1   :  { %259 = vmatprep.subr.bf16.mxu0 %v316_v0  ;;  %287 = vmatprep.subr.bf16.mxu1 %v316_v0  ;;  %v305_v1 = vld [vmem:[%s406_s1 + $0x38] sm:$0xff]   ;;  %v306_v2 = vld [vmem:[%s406_s1 + $0x30] sm:$0xff]   ;;  %v307_v3 = vld [vmem:[%s406_s1 + $0x28] sm:$0xff]  }
   0x2   :  { %275 = vmatprep.mubr.msk.bf16.mxu0 %vm317_vm0, %v316_v0  ;;  %279 = vmatprep.mubr.msk.bf16.mxu1 %vm317_vm0, %v316_v0  ;;  %v308_v4 = vld [vmem:[%s406_s1 + $0x20] sm:$0xff]   ;;  %v309_v5 = vld [vmem:[%s406_s1 + $0x18] sm:$0xff]   ;;  %v310_v6 = vld [vmem:[%s406_s1 + $0x10] sm:$0xff]  }
   0x3   :  { %260 = vmatpush3.bf16.msra.mxu0 %v305_v1  ;;  %295 = vmatpush3.bf16.msra.mxu1 %v305_v1  ;;  %v311_v7 = vld [vmem:[%s406_s1 + $0x8] sm:$0xff]   ;;  %v312_v8 = vld [vmem:[%s406_s1] sm:$0xff]   ;;  %v315_v11 = vld [vmem:[%s407_s0 + $0x10] ss:$0 sps:$4 sm:$0xff]  }
   0x4   :  { %261 = vmatprep.subr.bf16.mxu0 %v316_v0  ;;  %288 = vmatprep.subr.bf16.mxu1 %v316_v0  ;;  %v313_v9 = vld [vmem:[%s407_s0] sm:$0xff]   ;;  %v314_v10 = vld [vmem:[%s407_s0 + $0x8] sm:$0xff]   ;;  %v207_v29 = vld [vmem:[%s408_s3 + $0x10] sm:$0xf] }
   0x5   :  { %v240_v12 = vld [vmem:[%s408_s3] sm:$0xff]   ;;  %v247_v13 = vld [vmem:[%s408_s3 + $0x8] sm:$0xff]   ;;  %v212_v36 = vunpack.c.l.bf16 %v207_v29 }
   0x6   :  { %v238_v14 = vld [vmem:[%s409_s2] ss:$0 sm:$0xff]  ;;  %v241_v15 = vunpack.c.l.bf16 %v240_v12  ;;  %v245_v16 = vunpack.c.l.bf16 %v247_v13  ;;  %v242_v25 = vunpack.c.h.bf16 %v240_v12  ;;  %v246_v26 = vunpack.c.h.bf16 %v247_v13 }
   0x7   :  { %262 = vmatpush3.bf16.msra.mxu0 %v306_v2  ;;  %296 = vmatpush3.bf16.msra.mxu1 %v306_v2 }
   0x8   :  { %263 = vmatprep.subr.bf16.mxu0 %v316_v0  ;;  %289 = vmatprep.subr.bf16.mxu1 %v316_v0 }
   0xb   :  { %264 = vmatpush3.bf16.msra.mxu0 %v307_v3  ;;  %297 = vmatpush3.bf16.msra.mxu1 %v307_v3 }
   0xc   :  { %265 = vmatprep.subr.bf16.mxu0 %v316_v0  ;;  %290 = vmatprep.subr.bf16.mxu1 %v316_v0 }
   0xf   :  { %266 = vmatpush3.bf16.msra.mxu0 %v308_v4  ;;  %298 = vmatpush3.bf16.msra.mxu1 %v308_v4 }
  0x10   :  { %267 = vmatprep.subr.bf16.mxu0 %v316_v0  ;;  %291 = vmatprep.subr.bf16.mxu1 %v316_v0 }
  0x13   :  { %268 = vmatpush3.bf16.msra.mxu0 %v309_v5  ;;  %299 = vmatpush3.bf16.msra.mxu1 %v309_v5 }
  0x14   :  { %269 = vmatprep.subr.bf16.mxu0 %v316_v0  ;;  %292 = vmatprep.subr.bf16.mxu1 %v316_v0 }
  0x17   :  { %270 = vmatpush3.bf16.msra.mxu0 %v310_v6  ;;  %300 = vmatpush3.bf16.msra.mxu1 %v310_v6 }
  0x18   :  { %271 = vmatprep.subr.bf16.mxu0 %v316_v0  ;;  %293 = vmatprep.subr.bf16.mxu1 %v316_v0 }
  0x1b   :  { %272 = vmatpush3.bf16.msra.mxu0 %v311_v7  ;;  %301 = vmatpush3.bf16.msra.mxu1 %v311_v7 }
  0x1c   :  { %273 = vmatprep.subr.bf16.mxu0 %v316_v0  ;;  %294 = vmatprep.subr.bf16.mxu1 %v316_v0 }
  0x1f   :  { %274 = vmatpush3.bf16.msra.mxu0 %v312_v8  ;;  %302 = vmatpush3.bf16.msra.mxu1 %v312_v8 }
  0x22   :  { %276 = vmatmul.mubr.bf16.vlgmr.msra.gmra.mxu0 %v313_v9  ;;  %280 = vmatmul.mubr.bf16.vlgmr.msra.gmra.mxu1 %v314_v10 }
  0x23   :  { %283 = vmatprep.mubr.msk.bf16.mxu1 %vm317_vm0, %v316_v0 }
  0x2a   :  { %284 = vmatmul.mubr.bf16.gmra.mxu1 %v315_v11 }
  0xe2   :  { %v151_v17 = vpop.f32.mrf.mxu0  ;;  %v159_v18 = vpop.f32.mrf.mxu1 }
  0xe3   :  { %v198_v19 = vadd.f32 %v238_v14, %v151_v17  ;;  %v200_v20 = vadd.f32 %v238_v14, %v159_v18 }
  0xe4   :  { %v277_v21 = vpop.f32.mrf.mxu0  ;;  %v281_v22 = vpop.f32.mrf.mxu1 }
  0xe5   :  { %v213_v23 = vadd.f32 %v241_v15, %v198_v19  ;;  %v215_v24 = vadd.f32 %v245_v16, %v200_v20 }
  0xe6   :  { %v154_v27 = vpop.f32.mrf.mxu0  ;;  %v162_v28 = vpop.f32.mrf.mxu1 }
  0xe7   :  { %218 = vst [vmem:[%s410_s4] sm:$0xff] %v213_v23  ;;  %220 = vst [vmem:[%s410_s4 + $0x10] sm:$0xff] %v215_v24  ;;  %v199_v30 = vadd.f32 %v238_v14, %v154_v27  ;;  %v201_v31 = vadd.f32 %v238_v14, %v162_v28 }
  0xe8   :  { %v278_v32 = vpop.f32.mrf.mxu0  ;;  %v282_v33 = vpop.f32.mrf.mxu1 }
  0xe9   :  { %v214_v34 = vadd.f32 %v242_v25, %v199_v30  ;;  %v216_v35 = vadd.f32 %v246_v26, %v201_v31 }
  0xea   :  { %v167_v37 = vpop.f32.mrf.mxu1 }
  0xeb   :  { %219 = vst [vmem:[%s410_s4 + $0x8] sm:$0xff] %v214_v34  ;;  %221 = vst [vmem:[%s410_s4 + $0x18] sm:$0xff] %v216_v35  ;;  %v202_v38 = vadd.f32 %v238_v14, %v167_v37 }
  0xec   :  { %v285_v39 = vpop.f32.mrf.mxu1 }
  0xed   :  { %v217_v40 = vadd.f32 %v212_v36, %v202_v38 }
  0xee   :  { %v170_v41 = vpop.f32.mrf.mxu1 }
  0xef   :  { %222 = vst [vmem:[%s410_s4 + $0x20] sm:$0xff] %v217_v40 }
  0xf0   :  { %v286_v42 = vpop.f32.mrf.mxu1 }

// kernel: seg_tran_forward.33
= control target key start
LH: loop header
LB: loop body
LE: loop exit
PB: predicated region body
PF: predicated region fallthrough
CT: control target
= control target key end

     0   :  { %s1454_s12 = smov 0   ;;  %s1671_s0 = inlined_call_operand.vmem [shape: bf16[32,5,8], index: 0, kind: input, shape index: {}]   ;;  %s1672_s1 = inlined_call_operand.vmem [shape: bf16[32,5,8], index: 1, kind: input, shape index: {}]   ;;  %s1673_s2 = inlined_call_operand.vmem [shape: bf16[32,5,8], index: 2, kind: input, shape index: {}]   ;;  %s1674_s3 = inlined_call_operand.vmem [shape: bf16[32,5,8], index: 3, kind: output, shape index: {}]  }
   0x1 LB: > { %s1221_s13 = sadd.s32 4294967295, %s1429_s12   ;;  %p1225_p0 = scmp.ge.s32.totalorder %s1429_s12, 1  ;;  %s1429_s12 = sphi %s1454_s12, %s13_s12  }
   0x2   : > { %p160_p1 = scmp.lt.s32.totalorder %s1429_s12, 5 }
   0x4   : > { %p161_p2 = pnand %p1225_p0, %p160_p1 }
   0x5   : > { %s1226_s14 = sshll.u32 (!%p161_p2), %s1221_s13, 3 }
   0x6   : > { %164 = sbr.rel (%p161_p2) target bundleno = 757 (0x2f5), region = 32  ;;  %p195_p3 = scmp.lt.s32.totalorder (!%p161_p2), %s1226_s14, 31 }
   0xb   : > { %v1431_v0 = vmov 0.0   ;;  %vm1432_vm0 = vmmov 0   ;;  %s1678_s14 = smov (!%p195_p3, %s1226_s14), 31  ;;  %vm259_vm1 = vcmask 64512   ;;  %vm628_vm2 = vcmask 36864  }
   0xc   : > { %1284 = vmatprep.subr.bf16.mxu0 %v1431_v0  ;;  %1290 = vmatprep.subr.bf16.mxu1 %v1431_v0  ;;  %s1468_s15 = sshll.u32 %s1678_s14, 2  ;;  %vm737_vm3 = vcmask 1041408   ;;  %vm738_vm4 = vcmask 1042432   ;;  %vm733_vm5 = vcmask 39936   ;;  %vm1114_vm6 = vcmask 59392  }
   0xd   : > { %1286 = vmatprep.mubr.msk.bf16.mxu0 %vm1432_vm0, %v1431_v0  ;;  %1292 = vmatprep.mubr.msk.bf16.mxu1 %vm1432_vm0, %v1431_v0  ;;  %s1474_s18 = scalar_lea.vmem %s1672_s1, %s1468_s15  ;;  %s1482_s21 = scalar_lea.vmem %s1671_s0, %s1468_s15  ;;  %vm1115_vm7 = vsmask.f32 2304 }
   0xe   : > { %v251_v1 = vld [vmem:[%s1474_s18] sm:$0x7]  ;;  %v252_v2 = vld [vmem:[%s1474_s18 + $0x4] sm:$0x7]  ;;  %v221_v9 = vld [vmem:[%s1482_s21 + $0x8] sm:$0x7]  ;;  %s210_s24 = scalar_lea.vmem %s1673_s2, %s1468_s15  ;;  %s1630_s27 = scalar_lea.vmem %s1674_s3, %s1468_s15 }
   0xf   : > { %v264_v3 = vsel %vm259_vm1, %v251_v1, 0  ;;  %v310_v4 = vsel %vm259_vm1, %v252_v2, 0  ;;  %v219_v5 = vld [vmem:[%s1482_s21] sm:$0x7]  ;;  %v220_v6 = vld [vmem:[%s1482_s21 + $0x4] sm:$0x7]  ;;  %v229_v15 = vunpack.c.l.bf16 %v221_v9  ;;  %vm1632_vm8 = vmand %vm1114_vm6, %vm1115_vm7 }
  0x10   : > { %1285 = vmatpush3.bf16.xpose.msra.mxu0 %v264_v3  ;;  %1291 = vmatpush3.bf16.xpose.msra.mxu1 %v310_v4  ;;  %v227_v7 = vunpack.c.l.bf16 %v219_v5  ;;  %v228_v8 = vunpack.c.l.bf16 %v220_v6  ;;  %v253_v10 = vld [vmem:[%s1474_s18 + $0x8] sm:$0x7]  ;;  %v222_v11 = vld [vmem:[%s1482_s21 + $0xc] sm:$0x7]  ;;  %v223_v23 = vld [vmem:[%s1482_s21 + $0x10] sm:$0x7] }
  0x11   : > { %1296 = vmatprep.subr.bf16.mxu0 %v1431_v0  ;;  %1302 = vmatprep.subr.bf16.mxu1 %v1431_v0  ;;  %v254_v14 = vld [vmem:[%s1474_s18 + $0xc] sm:$0x7]  ;;  %v230_v16 = vunpack.c.l.bf16 %v222_v11  ;;  %v356_v19 = vsel %vm259_vm1, %v253_v10, 0  ;;  %v237_v21 = vmul.f32 0.35355338, %v229_v15  ;;  %v231_v29 = vunpack.c.l.bf16 %v223_v23 }
  0x12   : > { %v235_v12 = vmul.f32 0.35355338, %v227_v7  ;;  %v236_v13 = vmul.f32 0.35355338, %v228_v8  ;;  %v402_v20 = vsel %vm259_vm1, %v254_v14, 0 }
  0x13   : > { %v238_v22 = vmul.f32 0.35355338, %v230_v16  ;;  %v224_v24 = vld [vmem:[%s1482_s21 + $0x14] sm:$0x7]  ;;  %v255_v25 = vld [vmem:[%s1474_s18 + $0x10] sm:$0x7]  ;;  %v245_v27 = vpack.c.bf16 %v237_v21, %v237_v21 }
  0x14   : > { %v243_v17 = vpack.c.bf16 %v235_v12, %v235_v12  ;;  %v244_v18 = vpack.c.bf16 %v236_v13, %v236_v13  ;;  %v256_v26 = vld [vmem:[%s1474_s18 + $0x14] sm:$0x7]  ;;  %v232_v30 = vunpack.c.l.bf16 %v224_v24  ;;  %v448_v31 = vsel %vm259_vm1, %v255_v25, 0  ;;  %v225_v35 = vld [vmem:[%s1482_s21 + $0x18] sm:$0x7] }
  0x15   : > { %v246_v28 = vpack.c.bf16 %v238_v22, %v238_v22  ;;  %v494_v32 = vsel %vm259_vm1, %v256_v26, 0  ;;  %v239_v33 = vmul.f32 0.35355338, %v231_v29  ;;  %v226_v36 = vld [vmem:[%s1482_s21 + $0x1c] sm:$0x7]  ;;  %v233_v41 = vunpack.c.l.bf16 %v225_v35 }
  0x16   : > { %v240_v34 = vmul.f32 0.35355338, %v232_v30  ;;  %v257_v37 = vld [vmem:[%s1474_s18 + $0x18] sm:$0x7]  ;;  %v258_v38 = vld [vmem:[%s1474_s18 + $0x1c] sm:$0x7]  ;;  %v234_v42 = vunpack.c.l.bf16 %v226_v36 }
  0x17   : > { %1287 = vmatmul.mubr.msk.bf16.vlgmr.msra.gmra.mxu0 %vm259_vm1, %v243_v17  ;;  %1293 = vmatmul.mubr.msk.bf16.vlgmr.msra.gmra.mxu1 %vm259_vm1, %v244_v18  ;;  %v247_v39 = vpack.c.bf16 %v239_v33, %v239_v33  ;;  %v540_v43 = vsel %vm259_vm1, %v257_v37, 0  ;;  %v586_v44 = vsel %vm259_vm1, %v258_v38, 0  ;;  %v241_v45 = vmul.f32 0.35355338, %v233_v41 }
  0x18   : > { %1297 = vmatpush3.bf16.xpose.msra.mxu0 %v356_v19  ;;  %1303 = vmatpush3.bf16.xpose.msra.mxu1 %v402_v20  ;;  %v248_v40 = vpack.c.bf16 %v240_v34, %v240_v34  ;;  %v242_v46 = vmul.f32 0.35355338, %v234_v42 }
  0x19   : > { %1298 = vmatprep.mubr.msk.bf16.mxu0 %vm1432_vm0, %v1431_v0  ;;  %1304 = vmatprep.mubr.msk.bf16.mxu1 %vm1432_vm0, %v1431_v0  ;;  %v249_v47 = vpack.c.bf16 %v241_v45, %v241_v45 }
  0x1a   : > { %1308 = vmatprep.subr.bf16.mxu0 %v1431_v0  ;;  %1314 = vmatprep.subr.bf16.mxu1 %v1431_v0  ;;  %v250_v48 = vpack.c.bf16 %v242_v46, %v242_v46 }
  0x1f   : > { %1299 = vmatmul.mubr.msk.bf16.vlgmr.msra.gmra.mxu0 %vm259_vm1, %v245_v27  ;;  %1305 = vmatmul.mubr.msk.bf16.vlgmr.msra.gmra.mxu1 %vm259_vm1, %v246_v28 }
  0x20   : > { %1309 = vmatpush3.bf16.xpose.msra.mxu0 %v448_v31  ;;  %1315 = vmatpush3.bf16.xpose.msra.mxu1 %v494_v32 }
  0x21   : > { %1310 = vmatprep.mubr.msk.bf16.mxu0 %vm1432_vm0, %v1431_v0  ;;  %1316 = vmatprep.mubr.msk.bf16.mxu1 %vm1432_vm0, %v1431_v0 }
  0x22   : > { %1320 = vmatprep.subr.bf16.mxu0 %v1431_v0  ;;  %1326 = vmatprep.subr.bf16.mxu1 %v1431_v0 }
  0x27   : > { %1311 = vmatmul.mubr.msk.bf16.vlgmr.msra.gmra.mxu0 %vm259_vm1, %v247_v39  ;;  %1317 = vmatmul.mubr.msk.bf16.vlgmr.msra.gmra.mxu1 %vm259_vm1, %v248_v40 }
  0x28   : > { %1321 = vmatpush3.bf16.xpose.msra.mxu0 %v540_v43  ;;  %1327 = vmatpush3.bf16.xpose.msra.mxu1 %v586_v44 }
  0x29   : > { %1322 = vmatprep.mubr.msk.bf16.mxu0 %vm1432_vm0, %v1431_v0  ;;  %1328 = vmatprep.mubr.msk.bf16.mxu1 %vm1432_vm0, %v1431_v0 }
  0x2a   : > { %1332 = vmatprep.subr.bf16.mxu0 %v1431_v0  ;;  %1338 = vmatprep.subr.bf16.mxu1 %v1431_v0 }
  0x2f   : > { %1323 = vmatmul.mubr.msk.bf16.vlgmr.msra.gmra.mxu0 %vm259_vm1, %v249_v47  ;;  %1329 = vmatmul.mubr.msk.bf16.vlgmr.msra.gmra.mxu1 %vm259_vm1, %v250_v48 }
  0x30   : > { %1334 = vmatprep.mubr.msk.bf16.mxu0 %vm1432_vm0, %v1431_v0  ;;  %1340 = vmatprep.mubr.msk.bf16.mxu1 %vm1432_vm0, %v1431_v0 }
  0xd7   : > { %v300_v49 = vpop.f32.mrf.mxu0  ;;  %v346_v50 = vpop.f32.mrf.mxu1 }
  0xd8   : > { %v629_v51 = vsel %vm628_vm2, %v300_v49, -inf  ;;  %v632_v54 = vsel %vm628_vm2, %v346_v50, -inf }
  0xd9   : > { %v1294_v52 = vpop.f32.mrf.mxu1  ;;  %630 = vmax.xlane.f32.xlu0 %v629_v51  ;;  %v1288_v53 = vpop.f32.mrf.mxu0 }
  0xdb   : > { %v303_v55 = vpop.f32.mrf.mxu0  ;;  %v349_v56 = vpop.f32.mrf.mxu1 }
  0xdd   : > { %v1295_v57 = vpop.f32.mrf.mxu1  ;;  %633 = vmax.xlane.f32.xlu0 %v632_v54  ;;  %v1289_v58 = vpop.f32.mrf.mxu0 }
  0xdf   : > { %v392_v59 = vpop.f32.mrf.mxu0  ;;  %v438_v60 = vpop.f32.mrf.mxu1 }
  0xe0   : > { %v635_v61 = vsel %vm628_vm2, %v392_v59, -inf  ;;  %v638_v1 = vsel %vm628_vm2, %v438_v60, -inf }
  0xe1   : > { %v1306_v62 = vpop.f32.mrf.mxu1  ;;  %636 = vmax.xlane.f32.xlu1 %v635_v61  ;;  %v1300_v63 = vpop.f32.mrf.mxu0 }
  0xe2   : > { %v1433_v63 = vmov 65535  }
  0xe3   : > { %v395_v2 = vpop.f32.mrf.mxu0  ;;  %v441_v3 = vpop.f32.mrf.mxu1 }
  0xe5   : > { %v1307_v4 = vpop.f32.mrf.mxu1  ;;  %639 = vmax.xlane.f32.xlu1 %v638_v1  ;;  %v1301_v5 = vpop.f32.mrf.mxu0  ;;  %v739_v1 = vsel %vm737_vm3, 4294967295, %v1433_v63 }
  0xe6   : > { %v725_v4 = vld [vmem:[%s210_s24] sm:$0x7]  ;;  %v1580_v5 = vsel %vm738_vm4, %v739_v1, 0 }
  0xe7   : > { %v484_v6 = vpop.f32.mrf.mxu0  ;;  %v530_v7 = vpop.f32.mrf.mxu1 }
  0xe8   : > { %v644_v8 = vsel %vm628_vm2, %v530_v7, -inf  ;;  %v641_v9 = vsel %vm628_vm2, %v484_v6, -inf }
  0xe9   : > { %v1318_v10 = vpop.f32.mrf.mxu1  ;;  %645 = vmax.xlane.f32.xlu1 %v644_v8  ;;  %642 = vmax.xlane.f32.xlu0 %v641_v9  ;;  %v1312_v11 = vpop.f32.mrf.mxu0  ;;  %v742_v8 = vand.u32 %v1580_v5, %v725_v4 }
  0xea   : > { %v727_v10 = vld [vmem:[%s210_s24 + $0x8] sm:$0x7]  ;;  %v728_v11 = vld [vmem:[%s210_s24 + $0xc] sm:$0x7] }
  0xeb   : > { %v487_v12 = vpop.f32.mrf.mxu0  ;;  %v533_v13 = vpop.f32.mrf.mxu1  ;;  %1333 = vmatpush3.bf16.msra.mxu0 %v742_v8 }
  0xec   : > { %1344 = vmatprep.subr.bf16.mxu0 %v1431_v0  ;;  %v834_v12 = vand.u32 %v1580_v5, %v727_v10  ;;  %v880_v13 = vand.u32 %v1580_v5, %v728_v11 }
  0xed   : > { %v1313_v14 = vpop.f32.mrf.mxu0  ;;  %v1319_v15 = vpop.f32.mrf.mxu1 }
  0xee   : > { %v729_v14 = vld [vmem:[%s210_s24 + $0x10] sm:$0x7] }
  0xef   : > { %v576_v16 = vpop.f32.mrf.mxu0  ;;  %v622_v17 = vpop.f32.mrf.mxu1  ;;  %v926_v15 = vand.u32 %v1580_v5, %v729_v14 }
  0xf0   : > { %v650_v18 = vsel %vm628_vm2, %v622_v17, -inf  ;;  %v647_v19 = vsel %vm628_vm2, %v576_v16, -inf }
  0xf1   : > { %v1330_v20 = vpop.f32.mrf.mxu1  ;;  %651 = vmax.xlane.f32.xlu1 %v650_v18  ;;  %648 = vmax.xlane.f32.xlu0 %v647_v19  ;;  %v1324_v21 = vpop.f32.mrf.mxu0  ;;  %v731_v18 = vld [vmem:[%s210_s24 + $0x18] sm:$0x7] }
  0xf2   : > { %v1018_v19 = vand.u32 %v1580_v5, %v731_v18  ;;  %v732_v20 = vld [vmem:[%s210_s24 + $0x1c] sm:$0x7] }
  0xf3   : > { %v579_v22 = vpop.f32.mrf.mxu0  ;;  %v625_v23 = vpop.f32.mrf.mxu1  ;;  %v1064_v21 = vand.u32 %v1580_v5, %v732_v20 }
  0xf5   : > { %v1325_v24 = vpop.f32.mrf.mxu0  ;;  %v1331_v25 = vpop.f32.mrf.mxu1 }
 0x162   : > { %v631_v26 = vpop.xlane.xlu0 %630 }
 0x163   : > { %v653_v27 = vsub.f32 %v300_v49, %v631_v26 }
 0x165   : > { %v661_v28 = vmul.f32 1.442695, %v653_v27 }
 0x166   : > { %v634_v29 = vpop.xlane.xlu0 %633 }
 0x167   : > { %1391 = vpow2.f32 %v661_v28  ;;  %v654_v30 = vsub.f32 %v346_v50, %v634_v29 }
 0x169   : > { %v663_v31 = vmul.f32 1.442695, %v654_v30 }
 0x16a   : > { %v637_v32 = vpop.xlane.xlu1 %636 }
 0x16b   : > { %1393 = vpow2.f32 %v663_v31  ;;  %v655_v33 = vsub.f32 %v392_v59, %v637_v32 }
 0x16d   : > { %v665_v34 = vmul.f32 1.442695, %v655_v33 }
 0x16e   : > { %v640_v35 = vpop.xlane.xlu1 %639 }
 0x16f   : > { %1395 = vpow2.f32 %v665_v34  ;;  %v656_v36 = vsub.f32 %v438_v60, %v640_v35 }
 0x171   : > { %v667_v37 = vmul.f32 1.442695, %v656_v36 }
 0x172   : > { %v646_v38 = vpop.xlane.xlu1 %645  ;;  %v643_v39 = vpop.xlane.xlu0 %642 }
 0x173   : > { %1397 = vpow2.f32 %v667_v37  ;;  %v658_v40 = vsub.f32 %v530_v7, %v646_v38  ;;  %v657_v41 = vsub.f32 %v484_v6, %v643_v39  ;;  %v726_v6 = vld [vmem:[%s210_s24 + $0x4] sm:$0x7] }
 0x174   : > { %v1546_v42 = vpop.eup %1391  ;;  %v788_v9 = vand.u32 %v1580_v5, %v726_v6 }
 0x175   : > { %v671_v43 = vmul.f32 1.442695, %v658_v40  ;;  %v669_v44 = vmul.f32 1.442695, %v657_v41  ;;  %v677_v45 = vsel %vm628_vm2, %v1546_v42, 0.0 }
 0x176   : > { %678 = vadd.xlane.f32.xlu0 %v677_v45  ;;  %1339 = vmatpush3.bf16.msra.mxu1 %v788_v9 }
 0x177   : > { %1399 = vpow2.f32 %v671_v43  ;;  %1350 = vmatprep.subr.bf16.mxu1 %v1431_v0 }
 0x178   : > { %v1550_v46 = vpop.eup %1393  ;;  %1401 = vpow2.f32 %v669_v44 }
 0x179   : > { %v680_v47 = vsel %vm628_vm2, %v1550_v46, 0.0 }
 0x17a   : > { %681 = vadd.xlane.f32.xlu1 %v680_v47  ;;  %v652_v48 = vpop.xlane.xlu1 %651  ;;  %v649_v49 = vpop.xlane.xlu0 %648 }
 0x17b   : > { %v660_v50 = vsub.f32 %v622_v17, %v652_v48  ;;  %v659_v51 = vsub.f32 %v576_v16, %v649_v49  ;;  %v730_v16 = vld [vmem:[%s210_s24 + $0x14] sm:$0x7] }
 0x17c   : > { %v1554_v52 = vpop.eup %1395  ;;  %v972_v17 = vand.u32 %v1580_v5, %v730_v16  ;;  %v1123_v5 = vld [vmem:[%s1630_s27 + $0x8] sm:$0x7] }
 0x17d   : > { %v675_v53 = vmul.f32 1.442695, %v660_v50  ;;  %v673_v54 = vmul.f32 1.442695, %v659_v51  ;;  %v683_v55 = vsel %vm628_vm2, %v1554_v52, 0.0 }
 0x17e   : > { %684 = vadd.xlane.f32.xlu0 %v683_v55  ;;  %v1117_v55 = vld [vmem:[%s1630_s27] sm:$0x7] }
 0x17f   : > { %1403 = vpow2.f32 %v675_v53 }
 0x180   : > { %v1558_v56 = vpop.eup %1397  ;;  %1405 = vpow2.f32 %v673_v54 }
 0x181   : > { %v686_v57 = vsel %vm628_vm2, %v1558_v56, 0.0 }
 0x182   : > { %687 = vadd.xlane.f32.xlu1 %v686_v57 }
 0x184   : > { %v1562_v58 = vpop.eup %1399 }
 0x185   : > { %v1564_v59 = vpop.eup %1401  ;;  %v692_v60 = vsel %vm628_vm2, %v1562_v58, 0.0 }
 0x186   : > { %693 = vadd.xlane.f32.xlu1 %v692_v60  ;;  %v689_v61 = vsel %vm628_vm2, %v1564_v59, 0.0 }
 0x187   : > { %690 = vadd.xlane.f32.xlu0 %v689_v61  ;;  %v1120_v61 = vld [vmem:[%s1630_s27 + $0x4] sm:$0x7] }
 0x18c   : > { %v1570_v62 = vpop.eup %1403 }
 0x18d   : > { %v1576_v2 = vpop.eup %1405  ;;  %v698_v3 = vsel %vm628_vm2, %v1570_v62, 0.0 }
 0x18e   : > { %699 = vadd.xlane.f32.xlu1 %v698_v3  ;;  %v695_v7 = vsel %vm628_vm2, %v1576_v2, 0.0 }
 0x18f   : > { %696 = vadd.xlane.f32.xlu0 %v695_v7 }
 0x1ff   : > { %v679_v22 = vpop.xlane.xlu0 %678 }
 0x200   : > { %1407 = vrcp.f32 %v679_v22 }
 0x203   : > { %v682_v23 = vpop.xlane.xlu1 %681 }
 0x204   : > { %1409 = vrcp.f32 %v682_v23 }
 0x207   : > { %v685_v24 = vpop.xlane.xlu0 %684 }
 0x208   : > { %1411 = vrcp.f32 %v685_v24 }
 0x20b   : > { %v688_v25 = vpop.xlane.xlu1 %687 }
 0x20c   : > { %1413 = vrcp.f32 %v688_v25  ;;  %v1132_v25 = vld [vmem:[%s1630_s27 + $0x14] sm:$0x7] }
 0x20d   : > { %v1408_v26 = vpop.eup %1407 }
 0x20e   : > { %v709_v27 = vmul.f32 %v1408_v26, %v1546_v42 }
 0x20f   : > { %v694_v28 = vpop.xlane.xlu1 %693 }
 0x210   : > { %1415 = vrcp.f32 %v694_v28  ;;  %v691_v29 = vpop.xlane.xlu0 %690  ;;  %v717_v30 = vpack.c.bf16 %v709_v27, %v709_v27 }
 0x211   : > { %v1410_v31 = vpop.eup %1409  ;;  %1417 = vrcp.f32 %v691_v29 }
 0x212   : > { %1335 = vmatmul.mubr.msk.bf16.vlgmr.msra.gmra.mxu0 %vm733_vm5, %v717_v30  ;;  %v710_v32 = vmul.f32 %v1410_v31, %v1550_v46 }
 0x213   : > { %1345 = vmatpush3.bf16.msra.mxu0 %v834_v12  ;;  %1346 = vmatprep.mubr.msk.bf16.mxu0 %vm1432_vm0, %v1431_v0  ;;  %v1126_v12 = vld [vmem:[%s1630_s27 + $0xc] sm:$0x7] }
 0x214   : > { %v718_v33 = vpack.c.bf16 %v710_v32, %v710_v32  ;;  %1356 = vmatprep.subr.bf16.mxu0 %v1431_v0 }
 0x215   : > { %v1412_v34 = vpop.eup %1411 }
 0x216   : > { %1341 = vmatmul.mubr.msk.bf16.vlgmr.msra.gmra.mxu1 %vm733_vm5, %v718_v33  ;;  %v711_v35 = vmul.f32 %v1412_v34, %v1554_v52  ;;  %v1135_v33 = vld [vmem:[%s1630_s27 + $0x18] sm:$0x7] }
 0x217   : > { %1351 = vmatpush3.bf16.msra.mxu1 %v880_v13  ;;  %v700_v36 = vpop.xlane.xlu1 %699  ;;  %1352 = vmatprep.mubr.msk.bf16.mxu1 %vm1432_vm0, %v1431_v0 }
 0x218   : > { %1419 = vrcp.f32 %v700_v36  ;;  %v697_v37 = vpop.xlane.xlu0 %696  ;;  %v719_v38 = vpack.c.bf16 %v711_v35, %v711_v35  ;;  %1362 = vmatprep.subr.bf16.mxu1 %v1431_v0 }
 0x219   : > { %v1414_v39 = vpop.eup %1413  ;;  %1421 = vrcp.f32 %v697_v37 }
 0x21a   : > { %1347 = vmatmul.mubr.msk.bf16.vlgmr.msra.gmra.mxu0 %vm733_vm5, %v719_v38  ;;  %v712_v40 = vmul.f32 %v1414_v39, %v1558_v56  ;;  %v1138_v39 = vld [vmem:[%s1630_s27 + $0x1c] sm:$0x7] }
 0x21b   : > { %1357 = vmatpush3.bf16.msra.mxu0 %v926_v15  ;;  %1358 = vmatprep.mubr.msk.bf16.mxu0 %vm1432_vm0, %v1431_v0 }
 0x21c   : > { %v720_v41 = vpack.c.bf16 %v712_v40, %v712_v40  ;;  %1368 = vmatprep.subr.bf16.mxu0 %v1431_v0 }
 0x21d   : > { %v1416_v42 = vpop.eup %1415 }
 0x21e   : > { %v1418_v43 = vpop.eup %1417  ;;  %1353 = vmatmul.mubr.msk.bf16.vlgmr.msra.gmra.mxu1 %vm733_vm5, %v720_v41  ;;  %v714_v45 = vmul.f32 %v1416_v42, %v1562_v58 }
 0x21f   : > { %1363 = vmatpush3.bf16.msra.mxu1 %v972_v17  ;;  %v713_v44 = vmul.f32 %v1418_v43, %v1564_v59  ;;  %1364 = vmatprep.mubr.msk.bf16.mxu1 %vm1432_vm0, %v1431_v0 }
 0x220   : > { %1374 = vmatprep.subr.bf16.mxu1 %v1431_v0  ;;  %v722_v47 = vpack.c.bf16 %v714_v45, %v714_v45 }
 0x221   : > { %v721_v46 = vpack.c.bf16 %v713_v44, %v713_v44 }
 0x223   : > { %1359 = vmatmul.mubr.msk.bf16.vlgmr.msra.gmra.mxu0 %vm733_vm5, %v721_v46 }
 0x224   : > { %1369 = vmatpush3.bf16.msra.mxu0 %v1018_v19  ;;  %1370 = vmatprep.mubr.msk.bf16.mxu0 %vm1432_vm0, %v1431_v0  ;;  %v1129_v19 = vld [vmem:[%s1630_s27 + $0x10] sm:$0x7] }
 0x225   : > { %v1420_v48 = vpop.eup %1419 }
 0x226   : > { %v1422_v49 = vpop.eup %1421  ;;  %1365 = vmatmul.mubr.msk.bf16.vlgmr.msra.gmra.mxu1 %vm733_vm5, %v722_v47  ;;  %v716_v51 = vmul.f32 %v1420_v48, %v1570_v62 }
 0x227   : > { %1375 = vmatpush3.bf16.msra.mxu1 %v1064_v21  ;;  %v715_v50 = vmul.f32 %v1422_v49, %v1576_v2  ;;  %1376 = vmatprep.mubr.msk.bf16.mxu1 %vm1432_vm0, %v1431_v0 }
 0x228   : > { %v724_v53 = vpack.c.bf16 %v716_v51, %v716_v51 }
 0x229   : > { %v723_v52 = vpack.c.bf16 %v715_v50, %v715_v50 }
 0x22b   : > { %1371 = vmatmul.mubr.msk.bf16.vlgmr.msra.gmra.mxu0 %vm733_vm5, %v723_v52 }
 0x22e   : > { %1377 = vmatmul.mubr.msk.bf16.vlgmr.msra.gmra.mxu1 %vm733_vm5, %v724_v53 }
 0x2d2   : > { %v778_v0 = vpop.f32.mrf.mxu0 }
 0x2d3   : > { %v1106_v56 = vpack.c.bf16 %v778_v0, %v778_v0 }
 0x2d4   : > { %v1336_v57 = vpop.f32.mrf.mxu0 }
 0x2d5   : > { %v1118_v58 = vsel %vm1632_vm8, %v1106_v56, %v1117_v55 }
 0x2d6   : > { %1119 = vst [vmem:[%s1630_s27] sm:$0x7] %v1118_v58  ;;  %v781_v59 = vpop.f32.mrf.mxu0  ;;  %v824_v60 = vpop.f32.mrf.mxu1 }
 0x2d7   : > { %v1107_v62 = vpack.c.bf16 %v824_v60, %v824_v60 }
 0x2d8   : > { %v1337_v63 = vpop.f32.mrf.mxu0  ;;  %v1342_v1 = vpop.f32.mrf.mxu1 }
 0x2d9   : > { %v1121_v2 = vsel %vm1632_vm8, %v1107_v62, %v1120_v61 }
 0x2da   : > { %1122 = vst [vmem:[%s1630_s27 + $0x4] sm:$0x7] %v1121_v2  ;;  %v827_v3 = vpop.f32.mrf.mxu1  ;;  %v870_v4 = vpop.f32.mrf.mxu0 }
 0x2db   : > { %v1108_v6 = vpack.c.bf16 %v870_v4, %v870_v4 }
 0x2dc   : > { %v1343_v7 = vpop.f32.mrf.mxu1  ;;  %v1348_v8 = vpop.f32.mrf.mxu0 }
 0x2dd   : > { %v1124_v9 = vsel %vm1632_vm8, %v1108_v6, %v1123_v5 }
 0x2de   : > { %1125 = vst [vmem:[%s1630_s27 + $0x8] sm:$0x7] %v1124_v9  ;;  %v873_v10 = vpop.f32.mrf.mxu0  ;;  %v916_v11 = vpop.f32.mrf.mxu1 }
 0x2df   : > { %v1109_v13 = vpack.c.bf16 %v916_v11, %v916_v11 }
 0x2e0   : > { %v1349_v14 = vpop.f32.mrf.mxu0  ;;  %v1354_v15 = vpop.f32.mrf.mxu1 }
 0x2e1   : > { %v1127_v16 = vsel %vm1632_vm8, %v1109_v13, %v1126_v12 }
 0x2e2   : > { %1128 = vst [vmem:[%s1630_s27 + $0xc] sm:$0x7] %v1127_v16  ;;  %v919_v17 = vpop.f32.mrf.mxu1 }
 0x2e3   : > { %v962_v18 = vpop.f32.mrf.mxu0 }
 0x2e4   : > { %v1110_v20 = vpack.c.bf16 %v962_v18, %v962_v18  ;;  %v1355_v21 = vpop.f32.mrf.mxu1 }
 0x2e5   : > { %v1360_v22 = vpop.f32.mrf.mxu0 }
 0x2e6   : > { %v1130_v23 = vsel %vm1632_vm8, %v1110_v20, %v1129_v19  ;;  %v1008_v24 = vpop.f32.mrf.mxu1 }
 0x2e7   : > { %1131 = vst [vmem:[%s1630_s27 + $0x10] sm:$0x7] %v1130_v23  ;;  %v965_v26 = vpop.f32.mrf.mxu0  ;;  %v1111_v27 = vpack.c.bf16 %v1008_v24, %v1008_v24 }
 0x2e8   : > { %v1366_v28 = vpop.f32.mrf.mxu1 }
 0x2e9   : > { %v1133_v29 = vsel %vm1632_vm8, %v1111_v27, %v1132_v25  ;;  %v1361_v30 = vpop.f32.mrf.mxu0 }
 0x2ea   : > { %1134 = vst [vmem:[%s1630_s27 + $0x14] sm:$0x7] %v1133_v29  ;;  %v1011_v31 = vpop.f32.mrf.mxu1 }
 0x2eb   : > { %v1054_v32 = vpop.f32.mrf.mxu0 }
 0x2ec   : > { %v1112_v34 = vpack.c.bf16 %v1054_v32, %v1054_v32  ;;  %v1367_v35 = vpop.f32.mrf.mxu1 }
 0x2ed   : > { %v1372_v36 = vpop.f32.mrf.mxu0 }
 0x2ee   : > { %v1136_v37 = vsel %vm1632_vm8, %v1112_v34, %v1135_v33  ;;  %v1100_v38 = vpop.f32.mrf.mxu1 }
 0x2ef   : > { %1137 = vst [vmem:[%s1630_s27 + $0x18] sm:$0x7] %v1136_v37  ;;  %v1057_v40 = vpop.f32.mrf.mxu0  ;;  %v1113_v41 = vpack.c.bf16 %v1100_v38, %v1100_v38 }
 0x2f0   : > { %v1378_v42 = vpop.f32.mrf.mxu1 }
 0x2f1   : > { %v1139_v43 = vsel %vm1632_vm8, %v1113_v41, %v1138_v39  ;;  %v1373_v44 = vpop.f32.mrf.mxu0 }
 0x2f2   : > { %1140 = vst [vmem:[%s1630_s27 + $0x1c] sm:$0x7] %v1139_v43  ;;  %v1103_v45 = vpop.f32.mrf.mxu1 }
 0x2f4   : > { %v1379_v46 = vpop.f32.mrf.mxu1 }
 0x2f5 PF: > { %s13_s12 = sadd.s32 1, %s1429_s12  }
 0x2f6   : > { %p10_p4 = scmp.ge.s32.totalorder %s13_s12, 6  }
 0x2f8   :  { %12 = sbr.rel (!%p10_p4) target bundleno = 1 (0x1), region = 68 }

// kernel: seg_tran_forward.36
= control target key start
LH: loop header
LB: loop body
LE: loop exit
PB: predicated region body
PF: predicated region fallthrough
CT: control target
= control target key end

     0   :  { %v344_v0 = vmov 0.0   ;;  %vm345_vm0 = vmmov 0   ;;  %s434_s1 = inlined_call_operand.vmem [shape: bf16[128,128], index: 1, kind: input, shape index: {}]   ;;  %s435_s0 = inlined_call_operand.vmem [shape: bf16[40,128], index: 0, kind: input, shape index: {}]   ;;  %s436_s2 = inlined_call_operand.vmem [shape: f32[1,128], index: 2, kind: input, shape index: {}]   ;;  %s437_s3 = inlined_call_operand.vmem [shape: f32[40,128], index: 3, kind: input, shape index: {}]   ;;  %s438_s4 = inlined_call_operand.vmem [shape: bf16[40,128], index: 4, kind: output, shape index: {}]  }
   0x1   :  { %287 = vmatprep.subr.bf16.mxu0 %v344_v0  ;;  %315 = vmatprep.subr.bf16.mxu1 %v344_v0  ;;  %v333_v1 = vld [vmem:[%s434_s1 + $0x38] sm:$0xff]   ;;  %v334_v2 = vld [vmem:[%s434_s1 + $0x30] sm:$0xff]   ;;  %v335_v3 = vld [vmem:[%s434_s1 + $0x28] sm:$0xff]  }
   0x2   :  { %303 = vmatprep.mubr.msk.bf16.mxu0 %vm345_vm0, %v344_v0  ;;  %307 = vmatprep.mubr.msk.bf16.mxu1 %vm345_vm0, %v344_v0  ;;  %v336_v4 = vld [vmem:[%s434_s1 + $0x20] sm:$0xff]   ;;  %v337_v5 = vld [vmem:[%s434_s1 + $0x18] sm:$0xff]   ;;  %v338_v6 = vld [vmem:[%s434_s1 + $0x10] sm:$0xff]  }
   0x3   :  { %288 = vmatpush3.bf16.msra.mxu0 %v333_v1  ;;  %323 = vmatpush3.bf16.msra.mxu1 %v333_v1  ;;  %v339_v7 = vld [vmem:[%s434_s1 + $0x8] sm:$0xff]   ;;  %v340_v8 = vld [vmem:[%s434_s1] sm:$0xff]   ;;  %v343_v11 = vld [vmem:[%s435_s0 + $0x10] ss:$0 sps:$4 sm:$0xff]  }
   0x4   :  { %289 = vmatprep.subr.bf16.mxu0 %v344_v0  ;;  %316 = vmatprep.subr.bf16.mxu1 %v344_v0  ;;  %v341_v9 = vld [vmem:[%s435_s0] sm:$0xff]   ;;  %v342_v10 = vld [vmem:[%s435_s0 + $0x8] sm:$0xff]   ;;  %v205_v20 = vld [vmem:[%s437_s3 + $0x10] sm:$0xff] }
   0x5   :  { %v254_v13 = vld [vmem:[%s436_s2] ss:$0 sm:$0xff]  ;;  %v204_v22 = vld [vmem:[%s437_s3 + $0x8] sm:$0xff]  ;;  %v206_v24 = vld [vmem:[%s437_s3 + $0x18] sm:$0xff] }
   0x6   :  { %v203_v16 = vld [vmem:[%s437_s3] sm:$0xff] }
   0x7   :  { %290 = vmatpush3.bf16.msra.mxu0 %v334_v2  ;;  %324 = vmatpush3.bf16.msra.mxu1 %v334_v2  ;;  %v207_v34 = vld [vmem:[%s437_s3 + $0x20] sm:$0xff] }
   0x8   :  { %291 = vmatprep.subr.bf16.mxu0 %v344_v0  ;;  %317 = vmatprep.subr.bf16.mxu1 %v344_v0 }
   0xb   :  { %292 = vmatpush3.bf16.msra.mxu0 %v335_v3  ;;  %325 = vmatpush3.bf16.msra.mxu1 %v335_v3 }
   0xc   :  { %293 = vmatprep.subr.bf16.mxu0 %v344_v0  ;;  %318 = vmatprep.subr.bf16.mxu1 %v344_v0 }
   0xf   :  { %294 = vmatpush3.bf16.msra.mxu0 %v336_v4  ;;  %326 = vmatpush3.bf16.msra.mxu1 %v336_v4 }
  0x10   :  { %295 = vmatprep.subr.bf16.mxu0 %v344_v0  ;;  %319 = vmatprep.subr.bf16.mxu1 %v344_v0 }
  0x13   :  { %296 = vmatpush3.bf16.msra.mxu0 %v337_v5  ;;  %327 = vmatpush3.bf16.msra.mxu1 %v337_v5 }
  0x14   :  { %297 = vmatprep.subr.bf16.mxu0 %v344_v0  ;;  %320 = vmatprep.subr.bf16.mxu1 %v344_v0 }
  0x17   :  { %298 = vmatpush3.bf16.msra.mxu0 %v338_v6  ;;  %328 = vmatpush3.bf16.msra.mxu1 %v338_v6 }
  0x18   :  { %299 = vmatprep.subr.bf16.mxu0 %v344_v0  ;;  %321 = vmatprep.subr.bf16.mxu1 %v344_v0 }
  0x1b   :  { %300 = vmatpush3.bf16.msra.mxu0 %v339_v7  ;;  %329 = vmatpush3.bf16.msra.mxu1 %v339_v7 }
  0x1c   :  { %301 = vmatprep.subr.bf16.mxu0 %v344_v0  ;;  %322 = vmatprep.subr.bf16.mxu1 %v344_v0 }
  0x1f   :  { %302 = vmatpush3.bf16.msra.mxu0 %v340_v8  ;;  %330 = vmatpush3.bf16.msra.mxu1 %v340_v8 }
  0x22   :  { %304 = vmatmul.mubr.bf16.vlgmr.msra.gmra.mxu0 %v341_v9  ;;  %308 = vmatmul.mubr.bf16.vlgmr.msra.gmra.mxu1 %v342_v10 }
  0x23   :  { %311 = vmatprep.mubr.msk.bf16.mxu1 %vm345_vm0, %v344_v0 }
  0x2a   :  { %312 = vmatmul.mubr.bf16.gmra.mxu1 %v343_v11 }
  0xe2   :  { %v151_v12 = vpop.f32.mrf.mxu0  ;;  %v159_v14 = vpop.f32.mrf.mxu1 }
  0xe3   :  { %v198_v15 = vadd.f32 %v254_v13, %v151_v12  ;;  %v200_v19 = vadd.f32 %v254_v13, %v159_v14 }
  0xe4   :  { %v305_v17 = vpop.f32.mrf.mxu0  ;;  %v309_v18 = vpop.f32.mrf.mxu1 }
  0xe5   :  { %v208_v25 = vadd.f32 %v203_v16, %v198_v15  ;;  %v210_v30 = vadd.f32 %v205_v20, %v200_v19 }
  0xe6   :  { %v154_v21 = vpop.f32.mrf.mxu0  ;;  %v162_v23 = vpop.f32.mrf.mxu1 }
  0xe7   :  { %v199_v26 = vadd.f32 %v254_v13, %v154_v21  ;;  %v201_v27 = vadd.f32 %v254_v13, %v162_v23 }
  0xe8   :  { %v306_v28 = vpop.f32.mrf.mxu0  ;;  %v310_v29 = vpop.f32.mrf.mxu1 }
  0xe9   :  { %v209_v31 = vadd.f32 %v204_v22, %v199_v26  ;;  %v211_v32 = vadd.f32 %v206_v24, %v201_v27 }
  0xea   :  { %v167_v33 = vpop.f32.mrf.mxu1 }
  0xeb   :  { %v268_v35 = vpack.c.bf16 %v209_v31, %v208_v25  ;;  %v273_v36 = vpack.c.bf16 %v211_v32, %v210_v30  ;;  %v202_v37 = vadd.f32 %v254_v13, %v167_v33 }
  0xec   :  { %v313_v38 = vpop.f32.mrf.mxu1 }
  0xed   :  { %269 = vst [vmem:[%s438_s4] sm:$0xff] %v268_v35   ;;  %275 = vst [vmem:[%s438_s4 + $0x8] sm:$0xff] %v273_v36   ;;  %v212_v39 = vadd.f32 %v207_v34, %v202_v37 }
  0xee   :  { %v170_v40 = vpop.f32.mrf.mxu1 }
  0xef   :  { %v264_v41 = vpack.c.bf16 %v212_v39, %v212_v39 }
  0xf0   :  { %v314_v42 = vpop.f32.mrf.mxu1 }
  0xf1   :  { %238 = vst [vmem:[%s438_s4 + $0x10] sm:$0xf] %v264_v41 }

// kernel: seg_tran_forward.35
= control target key start
LH: loop header
LB: loop body
LE: loop exit
PB: predicated region body
PF: predicated region fallthrough
CT: control target
= control target key end

     0   :  { %v574_v10 = vmov 0.0   ;;  %vm575_vm0 = vmmov 0   ;;  %s755_s0 = inlined_call_operand.vmem [shape: f32[40,128], index: 0, kind: input, shape index: {}]   ;;  %s756_s1 = inlined_call_operand.vmem [shape: bf16[128,128], index: 1, kind: input, shape index: {}]   ;;  %s757_s3 = inlined_call_operand.vmem [shape: f32[1,128], index: 3, kind: input, shape index: {}]   ;;  %s758_s4 = inlined_call_operand.vmem [shape: f32[1,128], index: 4, kind: input, shape index: {}]   ;;  %s759_s2 = inlined_call_operand.vmem [shape: f32[1,128], index: 2, kind: input, shape index: {}]   ;;  %s760_s5 = inlined_call_operand.vmem [shape: bf16[40,128], index: 5, kind: output, shape index: {}]  }
   0x1   :  { %v609_v0 = vld [vmem:[%s755_s0 + $0x10] sm:$0xff]  ;;  %v614_v1 = vld [vmem:[%s755_s0 + $0x18] sm:$0xff]  ;;  %v625_v4 = vld [vmem:[%s755_s0] sm:$0xff]  ;;  %518 = vmatprep.subr.bf16.mxu1 %v574_v10  ;;  %490 = vmatprep.subr.bf16.mxu0 %v574_v10 }
   0x2   :  { %39 = vadd.xlane.f32.xlu0 %v609_v0  ;;  %v52_v2 = vmul.f32 %v609_v0, %v609_v0  ;;  %v53_v3 = vmul.f32 %v614_v1, %v614_v1  ;;  %v630_v5 = vld [vmem:[%s755_s0 + $0x8] sm:$0xff]  ;;  %v50_v6 = vmul.f32 %v625_v4, %v625_v4  ;;  %v641_v8 = vld [vmem:[%s755_s0 + $0x20] sm:$0xff]  ;;  %v536_v9 = vld [vmem:[%s756_s1 + $0x38] sm:$0xff]   ;;  %510 = vmatprep.mubr.msk.bf16.mxu1 %vm575_vm0, %v574_v10 }
   0x3   :  { %v51_v7 = vmul.f32 %v630_v5, %v630_v5  ;;  %526 = vmatpush3.bf16.msra.mxu1 %v536_v9  ;;  %v54_v11 = vmul.f32 %v641_v8, %v641_v8  ;;  %v537_v12 = vld [vmem:[%s756_s1 + $0x30] sm:$0xff]   ;;  %491 = vmatpush3.bf16.msra.mxu0 %v536_v9  ;;  %v538_v13 = vld [vmem:[%s756_s1 + $0x28] sm:$0xff]   ;;  %v539_v14 = vld [vmem:[%s756_s1 + $0x20] sm:$0xff]  }
   0x4   :  { %59 = vadd.xlane.f32.xlu1 %v52_v2  ;;  %519 = vmatprep.subr.bf16.mxu1 %v574_v10  ;;  %v540_v15 = vld [vmem:[%s756_s1 + $0x18] sm:$0xff]   ;;  %v541_v16 = vld [vmem:[%s756_s1 + $0x10] sm:$0xff]   ;;  %v542_v17 = vld [vmem:[%s756_s1 + $0x8] sm:$0xff]  }
   0x5   :  { %492 = vmatprep.subr.bf16.mxu0 %v574_v10  ;;  %506 = vmatprep.mubr.msk.bf16.mxu0 %vm575_vm0, %v574_v10  ;;  %v543_v18 = vld [vmem:[%s756_s1] sm:$0xff]  }
   0x6   :  { %41 = vadd.xlane.f32.xlu0 %v614_v1  ;;  %v447_v57 = vld [vmem:[%s757_s3] ss:$0 sm:$0xff] }
   0x7   :  { %527 = vmatpush3.bf16.msra.mxu1 %v537_v12  ;;  %493 = vmatpush3.bf16.msra.mxu0 %v537_v12  ;;  %v448_v62 = vld [vmem:[%s758_s4] ss:$0 sm:$0xff] }
   0x8   :  { %61 = vadd.xlane.f32.xlu1 %v53_v3  ;;  %520 = vmatprep.subr.bf16.mxu1 %v574_v10 }
   0x9   :  { %494 = vmatprep.subr.bf16.mxu0 %v574_v10 }
   0xa   :  { %35 = vadd.xlane.f32.xlu0 %v625_v4 }
   0xb   :  { %528 = vmatpush3.bf16.msra.mxu1 %v538_v13  ;;  %495 = vmatpush3.bf16.msra.mxu0 %v538_v13 }
   0xc   :  { %37 = vadd.xlane.f32.xlu1 %v630_v5  ;;  %521 = vmatprep.subr.bf16.mxu1 %v574_v10 }
   0xd   :  { %496 = vmatprep.subr.bf16.mxu0 %v574_v10 }
   0xe   :  { %55 = vadd.xlane.f32.xlu0 %v50_v6 }
   0xf   :  { %529 = vmatpush3.bf16.msra.mxu1 %v539_v14  ;;  %497 = vmatpush3.bf16.msra.mxu0 %v539_v14 }
  0x10   :  { %57 = vadd.xlane.f32.xlu1 %v51_v7  ;;  %522 = vmatprep.subr.bf16.mxu1 %v574_v10 }
  0x11   :  { %498 = vmatprep.subr.bf16.mxu0 %v574_v10 }
  0x12   :  { %43 = vadd.xlane.f32.xlu0 %v641_v8 }
  0x13   :  { %530 = vmatpush3.bf16.msra.mxu1 %v540_v15  ;;  %499 = vmatpush3.bf16.msra.mxu0 %v540_v15 }
  0x14   :  { %63 = vadd.xlane.f32.xlu1 %v54_v11  ;;  %523 = vmatprep.subr.bf16.mxu1 %v574_v10 }
  0x15   :  { %500 = vmatprep.subr.bf16.mxu0 %v574_v10 }
  0x17   :  { %531 = vmatpush3.bf16.msra.mxu1 %v541_v16  ;;  %501 = vmatpush3.bf16.msra.mxu0 %v541_v16 }
  0x18   :  { %524 = vmatprep.subr.bf16.mxu1 %v574_v10  ;;  %502 = vmatprep.subr.bf16.mxu0 %v574_v10 }
  0x1b   :  { %532 = vmatpush3.bf16.msra.mxu1 %v542_v17  ;;  %503 = vmatpush3.bf16.msra.mxu0 %v542_v17 }
  0x1c   :  { %525 = vmatprep.subr.bf16.mxu1 %v574_v10  ;;  %504 = vmatprep.subr.bf16.mxu0 %v574_v10 }
  0x1f   :  { %533 = vmatpush3.bf16.msra.mxu1 %v543_v18  ;;  %505 = vmatpush3.bf16.msra.mxu0 %v543_v18 }
  0x8b   :  { %v40_v19 = vpop.xlane.xlu0 %39 }
  0x8c   :  { %v47_v20 = vmul.f32 0.03125, %v40_v19 }
  0x8d   :  { %v60_v21 = vpop.xlane.xlu1 %59 }
  0x8e   :  { %v72_v22 = vmul.f32 %v47_v20, %v47_v20  ;;  %v67_v23 = vmul.f32 0.03125, %v60_v21  ;;  %v82_v52 = vsub.f32 %v609_v0, %v47_v20 }
  0x8f   :  { %v42_v24 = vpop.xlane.xlu0 %41 }
  0x90   :  { %v77_v25 = vsub.f32 %v67_v23, %v72_v22  ;;  %v48_v26 = vmul.f32 0.03125, %v42_v24  ;;  %v457_v22 = vld [vmem:[%s759_s2] ss:$0 sm:$0xff] }
  0x91   :  { %v62_v27 = vpop.xlane.xlu1 %61 }
  0x92   :  { %v87_v28 = vadd.f32 1e-05, %v77_v25  ;;  %v73_v29 = vmul.f32 %v48_v26, %v48_v26  ;;  %v68_v30 = vmul.f32 0.03125, %v62_v27  ;;  %v83_v58 = vsub.f32 %v614_v1, %v48_v26 }
  0x93   :  { %v36_v31 = vpop.xlane.xlu0 %35 }
  0x94   :  { %544 = vrsqrt.f32 %v87_v28  ;;  %v78_v32 = vsub.f32 %v68_v30, %v73_v29  ;;  %v45_v33 = vmul.f32 0.03125, %v36_v31 }
  0x95   :  { %v38_v34 = vpop.xlane.xlu1 %37 }
  0x96   :  { %v88_v35 = vadd.f32 1e-05, %v78_v32  ;;  %v46_v36 = vmul.f32 0.03125, %v38_v34  ;;  %v70_v38 = vmul.f32 %v45_v33, %v45_v33  ;;  %v80_v0 = vsub.f32 %v625_v4, %v45_v33 }
  0x97   :  { %v56_v37 = vpop.xlane.xlu0 %55 }
  0x98   :  { %546 = vrsqrt.f32 %v88_v35  ;;  %v65_v39 = vmul.f32 0.03125, %v56_v37  ;;  %v71_v41 = vmul.f32 %v46_v36, %v46_v36  ;;  %v81_v7 = vsub.f32 %v630_v5, %v46_v36 }
  0x99   :  { %v58_v40 = vpop.xlane.xlu1 %57 }
  0x9a   :  { %v75_v42 = vsub.f32 %v65_v39, %v70_v38  ;;  %v66_v43 = vmul.f32 0.03125, %v58_v40 }
  0x9b   :  { %v44_v44 = vpop.xlane.xlu0 %43 }
  0x9c   :  { %v85_v45 = vadd.f32 1e-05, %v75_v42  ;;  %v76_v46 = vsub.f32 %v66_v43, %v71_v41  ;;  %v49_v47 = vmul.f32 0.03125, %v44_v44 }
  0x9d   :  { %v64_v48 = vpop.xlane.xlu1 %63 }
  0x9e   :  { %548 = vrsqrt.f32 %v85_v45  ;;  %v86_v49 = vadd.f32 1e-05, %v76_v46  ;;  %v74_v50 = vmul.f32 %v49_v47, %v49_v47  ;;  %v69_v51 = vmul.f32 0.03125, %v64_v48 }
  0x9f   :  { %v84_v15 = vsub.f32 %v641_v8, %v49_v47 }
  0xa0   :  { %550 = vrsqrt.f32 %v86_v49  ;;  %v79_v54 = vsub.f32 %v69_v51, %v74_v50 }
  0xa1   :  { %v545_v53 = vpop.eup %544 }
  0xa2   :  { %v97_v55 = vmul.f32 %v545_v53, %v82_v52  ;;  %v89_v56 = vadd.f32 1e-05, %v79_v54 }
  0xa4   :  { %552 = vrsqrt.f32 %v89_v56  ;;  %v109_v61 = vmul.f32 %v447_v57, %v97_v55 }
  0xa5   :  { %v547_v59 = vpop.eup %546 }
  0xa6   :  { %v98_v60 = vmul.f32 %v547_v59, %v83_v58  ;;  %v121_v2 = vadd.f32 %v448_v62, %v109_v61 }
  0xa8   :  { %v110_v63 = vmul.f32 %v447_v57, %v98_v60 }
  0xaa   :  { %v122_v3 = vadd.f32 %v448_v62, %v110_v63 }
  0xab   :  { %v549_v6 = vpop.eup %548 }
  0xac   :  { %v125_v9 = vpack.c.bf16 %v122_v3, %v121_v2  ;;  %v95_v11 = vmul.f32 %v549_v6, %v80_v0 }
  0xad   :  { %v551_v12 = vpop.eup %550 }
  0xae   :  { %511 = vmatmul.mubr.bf16.vlgmr.msra.gmra.mxu1 %v125_v9  ;;  %v96_v1 = vmul.f32 %v551_v12, %v81_v7  ;;  %v107_v13 = vmul.f32 %v447_v57, %v95_v11 }
  0xaf   :  { %514 = vmatprep.mubr.msk.bf16.mxu1 %vm575_vm0, %v574_v10 }
  0xb0   :  { %v108_v14 = vmul.f32 %v447_v57, %v96_v1  ;;  %v119_v17 = vadd.f32 %v448_v62, %v107_v13 }
  0xb1   :  { %v553_v16 = vpop.eup %552 }
  0xb2   :  { %v120_v4 = vadd.f32 %v448_v62, %v108_v14  ;;  %v99_v18 = vmul.f32 %v553_v16, %v84_v15 }
  0xb4   :  { %v124_v19 = vpack.c.bf16 %v120_v4, %v119_v17  ;;  %v111_v20 = vmul.f32 %v447_v57, %v99_v18 }
  0xb6   :  { %507 = vmatmul.mubr.bf16.vlgmr.msra.gmra.mxu0 %v124_v19  ;;  %v123_v5 = vadd.f32 %v448_v62, %v111_v20 }
  0xb8   :  { %v126_v21 = vpack.c.bf16 %v123_v5, %v123_v5 }
  0xba   :  { %515 = vmatmul.mubr.bf16.gmra.mxu1 %v126_v21 }
 0x16e   :  { %v238_v23 = vpop.f32.mrf.mxu1 }
 0x16f   :  { %v706_v24 = vadd.f32 %v457_v22, %v238_v23 }
 0x170   :  { %v512_v10 = vpop.f32.mrf.mxu1 }
 0x171   :  { %v709_v8 = vmul.f32 0.70710677, %v706_v24 }
 0x172   :  { %v241_v25 = vpop.f32.mrf.mxu1 }
 0x173   :  { %v289_v26 = vand.u32 2147483647, %v709_v8  ;;  %v712_v27 = vadd.f32 %v457_v22, %v241_v25  ;;  %vm389_vm1 = vcmp.ge.f32.partialorder %v709_v8, 0.0 }
 0x174   :  { %v513_v28 = vpop.f32.mrf.mxu1 }
 0x175   :  { %v294_v29 = vmul.f32 0.3275911, %v289_v26  ;;  %v715_v30 = vmul.f32 0.70710677, %v712_v27  ;;  %v359_v47 = vsub.f32 0.0, %v289_v26 }
 0x176   :  { %v230_v31 = vpop.f32.mrf.mxu0 }
 0x177   :  { %v299_v32 = vadd.f32 1.0, %v294_v29  ;;  %v290_v33 = vand.u32 2147483647, %v715_v30  ;;  %v718_v34 = vadd.f32 %v457_v22, %v230_v31  ;;  %v364_v56 = vmul.f32 %v359_v47, %v289_v26 }
 0x178   :  { %v508_v35 = vpop.f32.mrf.mxu0  ;;  %vm390_vm2 = vcmp.ge.f32.partialorder %v715_v30, 0.0 }
 0x179   :  { %554 = vrcp.f32 %v299_v32  ;;  %v295_v36 = vmul.f32 0.3275911, %v290_v33  ;;  %v721_v37 = vmul.f32 0.70710677, %v718_v34  ;;  %v360_v58 = vsub.f32 0.0, %v290_v33 }
 0x17a   :  { %v233_v38 = vpop.f32.mrf.mxu0  ;;  %v246_v41 = vpop.f32.mrf.mxu1  ;;  %v371_v62 = vmul.f32 1.442695, %v364_v56 }
 0x17b   :  { %v300_v39 = vadd.f32 1.0, %v295_v36  ;;  %v723_v40 = vadd.f32 %v457_v22, %v233_v38  ;;  %v287_v42 = vand.u32 2147483647, %v721_v37  ;;  %v726_v43 = vadd.f32 %v457_v22, %v246_v41 }
 0x17c   :  { %v509_v44 = vpop.f32.mrf.mxu0  ;;  %v516_v46 = vpop.f32.mrf.mxu1  ;;  %v365_v0 = vmul.f32 %v360_v58, %v290_v33  ;;  %vm387_vm3 = vcmp.ge.f32.partialorder %v721_v37, 0.0 }
 0x17d   :  { %556 = vrcp.f32 %v300_v39  ;;  %v729_v45 = vmul.f32 0.70710677, %v723_v40  ;;  %v292_v48 = vmul.f32 0.3275911, %v287_v42  ;;  %v732_v49 = vmul.f32 0.70710677, %v726_v43 }
 0x17e   :  { %v249_v51 = vpop.f32.mrf.mxu1  ;;  %v357_v2 = vsub.f32 0.0, %v287_v42  ;;  %v373_v11 = vmul.f32 1.442695, %v365_v0  ;;  %v403_v37 = vmul.f32 0.5, %v723_v40 }
 0x17f   :  { %v288_v50 = vand.u32 2147483647, %v729_v45  ;;  %v297_v52 = vadd.f32 1.0, %v292_v48  ;;  %v291_v53 = vand.u32 2147483647, %v732_v49  ;;  %vm388_vm4 = vcmp.ge.f32.partialorder %v729_v45, 0.0 }
 0x180   :  { %v517_v55 = vpop.f32.mrf.mxu1  ;;  %v362_v1 = vmul.f32 %v357_v2, %v287_v42  ;;  %vm391_vm5 = vcmp.ge.f32.partialorder %v732_v49, 0.0 }
 0x181   :  { %v293_v54 = vmul.f32 0.3275911, %v288_v50  ;;  %558 = vrcp.f32 %v297_v52  ;;  %v296_v57 = vmul.f32 0.3275911, %v291_v53  ;;  %v358_v12 = vsub.f32 0.0, %v288_v50 }
 0x182   :  { %v361_v13 = vsub.f32 0.0, %v291_v53  ;;  %v367_v20 = vmul.f32 1.442695, %v362_v1 }
 0x183   :  { %v298_v59 = vadd.f32 1.0, %v293_v54  ;;  %v301_v60 = vadd.f32 1.0, %v296_v57  ;;  %v363_v18 = vmul.f32 %v358_v12, %v288_v50 }
 0x184   :  { %v366_v5 = vmul.f32 %v361_v13, %v291_v53 }
 0x185   :  { %560 = vrcp.f32 %v298_v59  ;;  %v369_v31 = vmul.f32 1.442695, %v363_v18 }
 0x186   :  { %v555_v61 = vpop.eup %554  ;;  %562 = vrcp.f32 %v301_v60  ;;  %v375_v35 = vmul.f32 1.442695, %v366_v5 }
 0x187   :  { %v314_v63 = vmul.f32 1.0614054, %v555_v61  ;;  %564 = vpow2.f32 %v371_v62 }
 0x188   :  { %566 = vpow2.f32 %v373_v11 }
 0x189   :  { %v319_v3 = vadd.f32 -1.4531521, %v314_v63  ;;  %568 = vpow2.f32 %v367_v20 }
 0x18a   :  { %v557_v6 = vpop.eup %556  ;;  %570 = vpow2.f32 %v369_v31 }
 0x18b   :  { %v324_v7 = vmul.f32 %v555_v61, %v319_v3  ;;  %v315_v9 = vmul.f32 1.0614054, %v557_v6  ;;  %572 = vpow2.f32 %v375_v35 }
 0x18d   :  { %v329_v14 = vadd.f32 1.4214138, %v324_v7  ;;  %v320_v15 = vadd.f32 -1.4531521, %v315_v9 }
 0x18e   :  { %v559_v16 = vpop.eup %558 }
 0x18f   :  { %v334_v17 = vmul.f32 %v555_v61, %v329_v14  ;;  %v325_v4 = vmul.f32 %v557_v6, %v320_v15  ;;  %v312_v19 = vmul.f32 1.0614054, %v559_v16 }
 0x191   :  { %v339_v21 = vadd.f32 -0.28449672, %v334_v17  ;;  %v330_v22 = vadd.f32 1.4214138, %v325_v4  ;;  %v317_v10 = vadd.f32 -1.4531521, %v312_v19 }
 0x192   :  { %v561_v23 = vpop.eup %560  ;;  %v404_v19 = vmul.f32 0.5, %v706_v24 }
 0x193   :  { %v563_v25 = vpop.eup %562  ;;  %v344_v26 = vmul.f32 %v555_v61, %v339_v21  ;;  %v335_v28 = vmul.f32 %v557_v6, %v330_v22  ;;  %v313_v29 = vmul.f32 1.0614054, %v561_v23  ;;  %v322_v32 = vmul.f32 %v559_v16, %v317_v10 }
 0x194   :  { %v316_v33 = vmul.f32 1.0614054, %v563_v25  ;;  %v565_v44 = vpop.eup %564  ;;  %v405_v21 = vmul.f32 0.5, %v712_v27 }
 0x195   :  { %v349_v36 = vadd.f32 0.2548296, %v344_v26  ;;  %v340_v38 = vadd.f32 -0.28449672, %v335_v28  ;;  %v318_v39 = vadd.f32 -1.4531521, %v313_v29  ;;  %v567_v60 = vpop.eup %566 }
 0x196   :  { %v327_v41 = vadd.f32 1.4214138, %v322_v32  ;;  %v321_v42 = vadd.f32 -1.4531521, %v316_v33  ;;  %v569_v14 = vpop.eup %568 }
 0x197   :  { %v354_v46 = vmul.f32 %v555_v61, %v349_v36  ;;  %v345_v47 = vmul.f32 %v557_v6, %v340_v38  ;;  %v323_v48 = vmul.f32 %v561_v23, %v318_v39  ;;  %v571_v8 = vpop.eup %570  ;;  %v402_v39 = vmul.f32 0.5, %v718_v34 }
 0x198   :  { %v332_v50 = vmul.f32 %v559_v16, %v327_v41  ;;  %v326_v51 = vmul.f32 %v563_v25, %v321_v42 }
 0x199   :  { %v379_v52 = vmul.f32 %v565_v44, %v354_v46  ;;  %v350_v53 = vadd.f32 0.2548296, %v345_v47  ;;  %v328_v54 = vadd.f32 1.4214138, %v323_v48  ;;  %v406_v44 = vmul.f32 0.5, %v726_v43 }
 0x19a   :  { %v337_v55 = vadd.f32 -0.28449672, %v332_v50  ;;  %v331_v56 = vadd.f32 1.4214138, %v326_v51 }
 0x19b   :  { %v384_v57 = vsub.f32 1.0, %v379_v52  ;;  %v355_v58 = vmul.f32 %v557_v6, %v350_v53  ;;  %v333_v59 = vmul.f32 %v561_v23, %v328_v54 }
 0x19c   :  { %v342_v62 = vmul.f32 %v559_v16, %v337_v55  ;;  %v336_v63 = vmul.f32 %v563_v25, %v331_v56 }
 0x19d   :  { %v394_v0 = vsub.f32 0.0, %v384_v57  ;;  %v380_v2 = vmul.f32 %v567_v60, %v355_v58  ;;  %v338_v61 = vadd.f32 -0.28449672, %v333_v59 }
 0x19e   :  { %v347_v3 = vadd.f32 0.2548296, %v342_v62  ;;  %v341_v7 = vadd.f32 -0.28449672, %v336_v63 }
 0x19f   :  { %v399_v9 = vsel %vm389_vm1, %v384_v57, %v394_v0  ;;  %v385_v11 = vsub.f32 1.0, %v380_v2  ;;  %v343_v12 = vmul.f32 %v561_v23, %v338_v61 }
 0x1a0   :  { %v352_v1 = vmul.f32 %v559_v16, %v347_v3  ;;  %v346_v13 = vmul.f32 %v563_v25, %v341_v7  ;;  %v409_v6 = vadd.f32 1.0, %v399_v9  ;;  %v573_v16 = vpop.eup %572 }
 0x1a1   :  { %v395_v15 = vsub.f32 0.0, %v385_v11  ;;  %v348_v17 = vadd.f32 0.2548296, %v343_v12 }
 0x1a2   :  { %v377_v4 = vmul.f32 %v569_v14, %v352_v1  ;;  %v351_v18 = vadd.f32 0.2548296, %v346_v13  ;;  %v414_v29 = vmul.f32 %v409_v6, %v404_v19 }
 0x1a3   :  { %v400_v20 = vsel %vm390_vm2, %v385_v11, %v395_v15  ;;  %v353_v5 = vmul.f32 %v561_v23, %v348_v17 }
 0x1a4   :  { %v410_v22 = vadd.f32 1.0, %v400_v20  ;;  %v382_v10 = vsub.f32 1.0, %v377_v4  ;;  %v356_v26 = vmul.f32 %v563_v25, %v351_v18 }
 0x1a5   :  { %v378_v28 = vmul.f32 %v571_v8, %v353_v5 }
 0x1a6   :  { %v415_v31 = vmul.f32 %v410_v22, %v405_v21  ;;  %v392_v32 = vsub.f32 0.0, %v382_v10  ;;  %v381_v33 = vmul.f32 %v573_v16, %v356_v26 }
 0x1a7   :  { %v383_v30 = vsub.f32 1.0, %v378_v28 }
 0x1a8   :  { %v476_v35 = vpack.c.bf16 %v415_v31, %v414_v29  ;;  %v397_v36 = vsel %vm387_vm3, %v382_v10, %v392_v32  ;;  %v386_v24 = vsub.f32 1.0, %v381_v33 }
 0x1a9   :  { %v393_v38 = vsub.f32 0.0, %v383_v30  ;;  %v407_v27 = vadd.f32 1.0, %v397_v36 }
 0x1aa   :  { %478 = vst [vmem:[%s760_s5 + $0x8] sm:$0xff] %v476_v35   ;;  %v396_v23 = vsub.f32 0.0, %v386_v24 }
 0x1ab   :  { %v398_v25 = vsel %vm388_vm4, %v383_v30, %v393_v38  ;;  %v412_v47 = vmul.f32 %v407_v27, %v402_v39 }
 0x1ac   :  { %v408_v41 = vadd.f32 1.0, %v398_v25  ;;  %v401_v42 = vsel %vm391_vm5, %v386_v24, %v396_v23 }
 0x1ad   :  { %v411_v46 = vadd.f32 1.0, %v401_v42 }
 0x1ae   :  { %v413_v48 = vmul.f32 %v408_v41, %v403_v37 }
 0x1af   :  { %v416_v50 = vmul.f32 %v411_v46, %v406_v44 }
 0x1b0   :  { %v471_v51 = vpack.c.bf16 %v413_v48, %v412_v47 }
 0x1b1   :  { %v467_v52 = vpack.c.bf16 %v416_v50, %v416_v50 }
 0x1b2   :  { %472 = vst [vmem:[%s760_s5] sm:$0xff] %v471_v51  }
 0x1b3   :  { %442 = vst [vmem:[%s760_s5 + $0x10] sm:$0xf] %v467_v52 }

// kernel: seg_tran_forward.38
= control target key start
LH: loop header
LB: loop body
LE: loop exit
PB: predicated region body
PF: predicated region fallthrough
CT: control target
= control target key end

     0   :  { %v227_v0 = vmov 0.0   ;;  %vm228_vm0 = vmmov 0   ;;  %s282_s1 = inlined_call_operand.vmem [shape: bf16[128,128], index: 1, kind: input, shape index: {}]   ;;  %s283_s0 = inlined_call_operand.vmem [shape: bf16[8,128], index: 0, kind: input, shape index: {}]   ;;  %s284_s2 = inlined_call_operand.vmem [shape: f32[1,128], index: 2, kind: input, shape index: {}]   ;;  %s285_s3 = inlined_call_operand.vmem [shape: bf16[8,128], index: 3, kind: output, shape index: {}]  }
   0x1   :  { %193 = vmatprep.subr.bf16.mxu0 %v227_v0  ;;  %v215_v1 = vld [vmem:[%s282_s1 + $0x38] sm:$0xff]   ;;  %209 = vmatprep.mubr.msk.bf16.mxu0 %vm228_vm0, %v227_v0  ;;  %v216_v2 = vld [vmem:[%s282_s1 + $0x30] sm:$0xff]   ;;  %v217_v3 = vld [vmem:[%s282_s1 + $0x28] sm:$0xff]  }
   0x2   :  { %194 = vmatpush3.bf16.msra.mxu0 %v215_v1  ;;  %v20_v4 = vld [vmem:[%s283_s0] sm:$0xf]  ;;  %v219_v9 = vld [vmem:[%s282_s1 + $0x18] sm:$0xff]   ;;  %v220_v12 = vld [vmem:[%s282_s1 + $0x10] sm:$0xff]  }
   0x3   :  { %195 = vmatprep.subr.bf16.mxu0 %v227_v0  ;;  %v21_v5 = vunpack.c.l.bf16 %v20_v4  ;;  %v218_v6 = vld [vmem:[%s282_s1 + $0x20] sm:$0xff]   ;;  %v221_v13 = vld [vmem:[%s282_s1 + $0x8] sm:$0xff]  }
   0x4   :  { %v222_v15 = vld [vmem:[%s282_s1] sm:$0xff]  }
   0x5   :  { %v22_v7 = vmul.f32 0.70710677, %v21_v5  ;;  %v46_v32 = vmul.f32 0.5, %v21_v5  ;;  %v183_v37 = vld [vmem:[%s284_s2] ss:$0 sm:$0xff] }
   0x6   :  { %196 = vmatpush3.bf16.msra.mxu0 %v216_v2 }
   0x7   :  { %197 = vmatprep.subr.bf16.mxu0 %v227_v0  ;;  %v23_v8 = vand.u32 2147483647, %v22_v7  ;;  %vm43_vm1 = vcmp.ge.f32.partialorder %v22_v7, 0.0 }
   0x9   :  { %v24_v10 = vmul.f32 0.3275911, %v23_v8  ;;  %v37_v14 = vsub.f32 0.0, %v23_v8 }
   0xa   :  { %198 = vmatpush3.bf16.msra.mxu0 %v217_v3 }
   0xb   :  { %199 = vmatprep.subr.bf16.mxu0 %v227_v0  ;;  %v25_v11 = vadd.f32 1.0, %v24_v10  ;;  %v38_v16 = vmul.f32 %v37_v14, %v23_v8 }
   0xd   :  { %223 = vrcp.f32 %v25_v11  ;;  %v39_v17 = vmul.f32 1.442695, %v38_v16 }
   0xe   :  { %200 = vmatpush3.bf16.msra.mxu0 %v218_v6 }
   0xf   :  { %201 = vmatprep.subr.bf16.mxu0 %v227_v0  ;;  %225 = vpow2.f32 %v39_v17 }
  0x12   :  { %202 = vmatpush3.bf16.msra.mxu0 %v219_v9 }
  0x13   :  { %203 = vmatprep.subr.bf16.mxu0 %v227_v0 }
  0x16   :  { %204 = vmatpush3.bf16.msra.mxu0 %v220_v12 }
  0x17   :  { %205 = vmatprep.subr.bf16.mxu0 %v227_v0 }
  0x1a   :  { %206 = vmatpush3.bf16.msra.mxu0 %v221_v13  ;;  %v224_v18 = vpop.eup %223 }
  0x1b   :  { %207 = vmatprep.subr.bf16.mxu0 %v227_v0  ;;  %v28_v19 = vmul.f32 1.0614054, %v224_v18 }
  0x1c   :  { %v226_v27 = vpop.eup %225 }
  0x1d   :  { %v29_v20 = vadd.f32 -1.4531521, %v28_v19 }
  0x1e   :  { %208 = vmatpush3.bf16.msra.mxu0 %v222_v15 }
  0x1f   :  { %v30_v21 = vmul.f32 %v224_v18, %v29_v20 }
  0x21   :  { %v31_v22 = vadd.f32 1.4214138, %v30_v21 }
  0x23   :  { %v32_v23 = vmul.f32 %v224_v18, %v31_v22 }
  0x25   :  { %v33_v24 = vadd.f32 -0.28449672, %v32_v23 }
  0x27   :  { %v34_v25 = vmul.f32 %v224_v18, %v33_v24 }
  0x29   :  { %v35_v26 = vadd.f32 0.2548296, %v34_v25 }
  0x2b   :  { %v36_v28 = vmul.f32 %v224_v18, %v35_v26 }
  0x2d   :  { %v41_v29 = vmul.f32 %v226_v27, %v36_v28 }
  0x2f   :  { %v42_v30 = vsub.f32 1.0, %v41_v29 }
  0x31   :  { %v44_v31 = vsub.f32 0.0, %v42_v30 }
  0x33   :  { %v45_v33 = vsel %vm43_vm1, %v42_v30, %v44_v31 }
  0x34   :  { %v47_v34 = vadd.f32 1.0, %v45_v33 }
  0x36   :  { %v48_v35 = vmul.f32 %v47_v34, %v46_v32 }
  0x38   :  { %v49_v36 = vpack.c.bf16 %v48_v35, %v48_v35 }
  0x3a   :  { %210 = vmatmul.mubr.bf16.vlgmr.msra.gmra.mxu0 %v49_v36 }
  0xfa   :  { %v149_v38 = vpop.f32.mrf.mxu0 }
  0xfb   :  { %v168_v39 = vadd.f32 %v183_v37, %v149_v38 }
  0xfc   :  { %v211_v40 = vpop.f32.mrf.mxu0 }
  0xfd   :  { %v169_v41 = vpack.c.bf16 %v168_v39, %v168_v39 }
  0xfe   :  { %v152_v42 = vpop.f32.mrf.mxu0 }
  0xff   :  { %170 = vst [vmem:[%s285_s3] sm:$0xf] %v169_v41 }
 0x100   :  { %v212_v43 = vpop.f32.mrf.mxu0 }

// kernel: seg_tran_forward.39
= control target key start
LH: loop header
LB: loop body
LE: loop exit
PB: predicated region body
PF: predicated region fallthrough
CT: control target
= control target key end

     0   :  { %v235_v4 = vmov 0.0   ;;  %vm236_vm0 = vmmov 0   ;;  %s306_s0 = inlined_call_operand.vmem [shape: bf16[8,128], index: 0, kind: input, shape index: {}]   ;;  %s307_s1 = inlined_call_operand.vmem [shape: bf16[128,128], index: 1, kind: input, shape index: {}]   ;;  %s308_s3 = inlined_call_operand.vmem [shape: f32[1,128], index: 3, kind: input, shape index: {}]   ;;  %s309_s4 = inlined_call_operand.vmem [shape: f32[1,128], index: 4, kind: input, shape index: {}]   ;;  %s310_s2 = inlined_call_operand.vmem [shape: f32[1,128], index: 2, kind: input, shape index: {}]   ;;  %s311_s5 = inlined_call_operand.vmem [shape: bf16[8,128], index: 5, kind: output, shape index: {}]  }
   0x1   :  { %v26_v0 = vld [vmem:[%s306_s0] sm:$0xf]  ;;  %v225_v3 = vld [vmem:[%s307_s1 + $0x38] sm:$0xff]   ;;  %203 = vmatprep.subr.bf16.mxu0 %v235_v4  ;;  %v226_v5 = vld [vmem:[%s307_s1 + $0x30] sm:$0xff]   ;;  %219 = vmatprep.mubr.msk.bf16.mxu0 %vm236_vm0, %v235_v4 }
   0x2   :  { %v27_v1 = vunpack.c.l.bf16 %v26_v0  ;;  %204 = vmatpush3.bf16.msra.mxu0 %v225_v3  ;;  %v227_v6 = vld [vmem:[%s307_s1 + $0x28] sm:$0xff]   ;;  %v228_v7 = vld [vmem:[%s307_s1 + $0x20] sm:$0xff]   ;;  %v229_v8 = vld [vmem:[%s307_s1 + $0x18] sm:$0xff]  }
   0x3   :  { %205 = vmatprep.subr.bf16.mxu0 %v235_v4  ;;  %v230_v9 = vld [vmem:[%s307_s1 + $0x10] sm:$0xff]   ;;  %v231_v10 = vld [vmem:[%s307_s1 + $0x8] sm:$0xff]   ;;  %v232_v11 = vld [vmem:[%s307_s1] sm:$0xff]  }
   0x4   :  { %28 = vadd.xlane.f32.xlu0 %v27_v1  ;;  %v31_v2 = vmul.f32 %v27_v1, %v27_v1  ;;  %v183_v21 = vld [vmem:[%s308_s3] ss:$0 sm:$0xff] }
   0x5   :  { %v184_v23 = vld [vmem:[%s309_s4] ss:$0 sm:$0xff] }
   0x6   :  { %206 = vmatpush3.bf16.msra.mxu0 %v226_v5  ;;  %v193_v27 = vld [vmem:[%s310_s2] ss:$0 sm:$0xff] }
   0x7   :  { %207 = vmatprep.subr.bf16.mxu0 %v235_v4 }
   0x8   :  { %32 = vadd.xlane.f32.xlu0 %v31_v2 }
   0xa   :  { %208 = vmatpush3.bf16.msra.mxu0 %v227_v6 }
   0xb   :  { %209 = vmatprep.subr.bf16.mxu0 %v235_v4 }
   0xe   :  { %210 = vmatpush3.bf16.msra.mxu0 %v228_v7 }
   0xf   :  { %211 = vmatprep.subr.bf16.mxu0 %v235_v4 }
  0x12   :  { %212 = vmatpush3.bf16.msra.mxu0 %v229_v8 }
  0x13   :  { %213 = vmatprep.subr.bf16.mxu0 %v235_v4 }
  0x16   :  { %214 = vmatpush3.bf16.msra.mxu0 %v230_v9 }
  0x17   :  { %215 = vmatprep.subr.bf16.mxu0 %v235_v4 }
  0x1a   :  { %216 = vmatpush3.bf16.msra.mxu0 %v231_v10 }
  0x1b   :  { %217 = vmatprep.subr.bf16.mxu0 %v235_v4 }
  0x1e   :  { %218 = vmatpush3.bf16.msra.mxu0 %v232_v11 }
  0x8d   :  { %v29_v12 = vpop.xlane.xlu0 %28 }
  0x8e   :  { %v30_v13 = vmul.f32 0.0625, %v29_v12 }
  0x90   :  { %v35_v15 = vmul.f32 %v30_v13, %v30_v13  ;;  %v37_v19 = vsub.f32 %v27_v1, %v30_v13 }
  0x91   :  { %v33_v14 = vpop.xlane.xlu0 %32 }
  0x92   :  { %v34_v16 = vmul.f32 0.0625, %v33_v14 }
  0x94   :  { %v36_v17 = vsub.f32 %v34_v16, %v35_v15 }
  0x96   :  { %v38_v18 = vadd.f32 1e-05, %v36_v17 }
  0x98   :  { %233 = vrsqrt.f32 %v38_v18 }
  0xa5   :  { %v234_v20 = vpop.eup %233 }
  0xa6   :  { %v40_v22 = vmul.f32 %v234_v20, %v37_v19 }
  0xa8   :  { %v48_v24 = vmul.f32 %v183_v21, %v40_v22 }
  0xaa   :  { %v56_v25 = vadd.f32 %v184_v23, %v48_v24 }
  0xac   :  { %v57_v26 = vpack.c.bf16 %v56_v25, %v56_v25 }
  0xae   :  { %220 = vmatmul.mubr.bf16.vlgmr.msra.gmra.mxu0 %v57_v26 }
 0x16e   :  { %v157_v28 = vpop.f32.mrf.mxu0 }
 0x16f   :  { %v176_v29 = vadd.f32 %v193_v27, %v157_v28 }
 0x170   :  { %v221_v30 = vpop.f32.mrf.mxu0 }
 0x171   :  { %v177_v31 = vpack.c.bf16 %v176_v29, %v176_v29 }
 0x172   :  { %v160_v32 = vpop.f32.mrf.mxu0 }
 0x173   :  { %178 = vst [vmem:[%s311_s5] sm:$0xf] %v177_v31 }
 0x174   :  { %v222_v33 = vpop.f32.mrf.mxu0 }

// kernel: seg_tran_forward.40
= control target key start
LH: loop header
LB: loop body
LE: loop exit
PB: predicated region body
PF: predicated region fallthrough
CT: control target
= control target key end

     0   :  { %s468_s12 = smov 0   ;;  %s497_s0 = inlined_call_operand.vmem [shape: bf16[4,4,8], index: 0, kind: input, shape index: {}]   ;;  %s498_s1 = inlined_call_operand.vmem [shape: bf16[4,4,8], index: 1, kind: input, shape index: {}]   ;;  %s499_s2 = inlined_call_operand.vmem [shape: bf16[4,4,8], index: 2, kind: input, shape index: {}]   ;;  %s500_s3 = inlined_call_operand.vmem [shape: bf16[4,4,8], index: 3, kind: output, shape index: {}]  }
   0x1 LB: > { %s395_s13 = sadd.s32 4294967295, %s444_s12   ;;  %p399_p0 = scmp.ge.s32.totalorder %s444_s12, 1  ;;  %s444_s12 = sphi %s468_s12, %s13_s12  }
   0x2   : > { %p154_p1 = scmp.lt.s32.totalorder %s444_s12, 5 }
   0x4   : > { %p155_p2 = pnand %p399_p0, %p154_p1 }
   0x5   : > { %p184_p3 = scmp.lt.s32.totalorder (!%p155_p2), %s395_s13, 3 }
   0x6   : > { %158 = sbr.rel (%p155_p2) target bundleno = 729 (0x2d9), region = 32 }
   0xb   : > { %v446_v0 = vmov 0.0   ;;  %vm447_vm0 = vmmov 0   ;;  %s502_s13 = smov (!%p184_p3, %s395_s13), 3  ;;  %vm206_vm1 = vcmask 64512   ;;  %vm253_vm2 = vcmask 27648  }
   0xc   : > { %412 = vmatprep.subr.bf16.mxu0 %v446_v0  ;;  %414 = vmatprep.mubr.msk.bf16.mxu0 %vm447_vm0, %v446_v0  ;;  %s476_s14 = sshll.u32 %s502_s13, 1  ;;  %vm271_vm3 = vcmask 1041408   ;;  %vm267_vm4 = vcmask 31744   ;;  %vm316_vm5 = vcmask 58368  }
   0xd   : > { %418 = vmatprep.subr.bf16.mxu1 %v446_v0  ;;  %420 = vmatprep.mubr.msk.bf16.mxu1 %vm447_vm0, %v446_v0  ;;  %s191_s17 = scalar_lea.vmem %s498_s1, %s476_s14  ;;  %s187_s20 = scalar_lea.vmem %s497_s0, %s476_s14 }
   0xe   : > { %v205_v1 = vld [vmem:[%s191_s17] sm:$0x3]  ;;  %s195_s23 = scalar_lea.vmem %s499_s2, %s476_s14  ;;  %s199_s26 = scalar_lea.vmem %s500_s3, %s476_s14 }
   0xf   : > { %v201_v2 = vld [vmem:[%s187_s20] sm:$0x3]  ;;  %v211_v3 = vsel %vm206_vm1, %v205_v1, 0 }
  0x10   : > { %v202_v4 = vunpack.c.l.bf16 %v201_v2  ;;  %413 = vmatpush3.bf16.xpose.msra.mxu0 %v211_v3  ;;  %v266_v17 = vld [vmem:[%s195_s23] sm:$0x3] }
  0x11   : > { %v273_v18 = vsel %vm271_vm3, %v266_v17, 0 }
  0x12   : > { %v203_v5 = vmul.f32 0.35355338, %v202_v4  ;;  %419 = vmatpush3.bf16.msra.mxu1 %v273_v18 }
  0x14   : > { %v204_v6 = vpack.c.bf16 %v203_v5, %v203_v5 }
  0x17   : > { %415 = vmatmul.mubr.msk.bf16.vlgmr.msra.gmra.mxu0 %vm206_vm1, %v204_v6 }
  0xd7   : > { %v247_v7 = vpop.f32.mrf.mxu0 }
  0xd8   : > { %v254_v8 = vsel %vm253_vm2, %v247_v7, -inf }
  0xd9   : > { %255 = vmax.xlane.f32.xlu0 %v254_v8  ;;  %v416_v9 = vpop.f32.mrf.mxu0 }
  0xdb   : > { %v250_v10 = vpop.f32.mrf.mxu0 }
  0xdd   : > { %v417_v11 = vpop.f32.mrf.mxu0 }
 0x162   : > { %v256_v12 = vpop.xlane.xlu0 %255 }
 0x163   : > { %v257_v13 = vsub.f32 %v247_v7, %v256_v12 }
 0x165   : > { %v258_v14 = vmul.f32 1.442695, %v257_v13 }
 0x167   : > { %434 = vpow2.f32 %v258_v14 }
 0x174   : > { %v435_v15 = vpop.eup %434 }
 0x175   : > { %v260_v16 = vsel %vm253_vm2, %v435_v15, 0.0 }
 0x176   : > { %261 = vadd.xlane.f32.xlu0 %v260_v16 }
 0x1ff   : > { %v262_v19 = vpop.xlane.xlu0 %261 }
 0x200   : > { %436 = vrcp.f32 %v262_v19 }
 0x20d   : > { %v437_v20 = vpop.eup %436 }
 0x20e   : > { %v264_v21 = vmul.f32 %v437_v20, %v435_v15 }
 0x210   : > { %v265_v22 = vpack.c.bf16 %v264_v21, %v264_v21 }
 0x212   : > { %421 = vmatmul.mubr.msk.bf16.vlgmr.msra.gmra.mxu1 %vm267_vm4, %v265_v22 }
 0x2d2   : > { %v309_v23 = vpop.f32.mrf.mxu1 }
 0x2d3   : > { %v315_v24 = vpack.c.bf16 %v309_v23, %v309_v23 }
 0x2d4   : > { %v422_v25 = vpop.f32.mrf.mxu1 }
 0x2d5   : > { %317 = vst.msk [vmem:[%s199_s26] sm:$0x3] %vm316_vm5, %v315_v24 }
 0x2d6   : > { %v312_v26 = vpop.f32.mrf.mxu1 }
 0x2d8   : > { %v423_v27 = vpop.f32.mrf.mxu1 }
 0x2d9 PF: > { %s13_s12 = sadd.s32 1, %s444_s12  }
 0x2da   : > { %p10_p4 = scmp.ge.s32.totalorder %s13_s12, 6  }
 0x2dc   :  { %12 = sbr.rel (!%p10_p4) target bundleno = 1 (0x1), region = 68 }

// kernel: seg_tran_forward.41
= control target key start
LH: loop header
LB: loop body
LE: loop exit
PB: predicated region body
PF: predicated region fallthrough
CT: control target
= control target key end

     0   :  { %v199_v0 = vmov 0.0   ;;  %vm200_vm0 = vmmov 0   ;;  %s262_s1 = inlined_call_operand.vmem [shape: bf16[128,128], index: 1, kind: input, shape index: {}]   ;;  %s263_s0 = inlined_call_operand.vmem [shape: bf16[8,128], index: 0, kind: input, shape index: {}]   ;;  %s264_s3 = inlined_call_operand.vmem [shape: bf16[8,128], index: 3, kind: input, shape index: {}]   ;;  %s265_s2 = inlined_call_operand.vmem [shape: f32[1,128], index: 2, kind: input, shape index: {}]   ;;  %s266_s4 = inlined_call_operand.vmem [shape: f32[8,128], index: 4, kind: output, shape index: {}]  }
   0x1   :  { %169 = vmatprep.subr.bf16.mxu0 %v199_v0  ;;  %v191_v1 = vld [vmem:[%s262_s1 + $0x38] sm:$0xff]   ;;  %185 = vmatprep.mubr.msk.bf16.mxu0 %vm200_vm0, %v199_v0  ;;  %v192_v2 = vld [vmem:[%s262_s1 + $0x30] sm:$0xff]   ;;  %v193_v3 = vld [vmem:[%s262_s1 + $0x28] sm:$0xff]  }
   0x2   :  { %170 = vmatpush3.bf16.msra.mxu0 %v191_v1  ;;  %v194_v4 = vld [vmem:[%s262_s1 + $0x20] sm:$0xff]   ;;  %v195_v5 = vld [vmem:[%s262_s1 + $0x18] sm:$0xff]   ;;  %v196_v6 = vld [vmem:[%s262_s1 + $0x10] sm:$0xff]  }
   0x3   :  { %171 = vmatprep.subr.bf16.mxu0 %v199_v0  ;;  %v197_v7 = vld [vmem:[%s262_s1 + $0x8] sm:$0xff]   ;;  %v198_v8 = vld [vmem:[%s262_s1] sm:$0xff]  }
   0x4   :  { %v23_v9 = vld [vmem:[%s263_s0] sm:$0xf] }
   0x5   :  { %v143_v10 = vld [vmem:[%s264_s3] sm:$0xf] }
   0x6   :  { %172 = vmatpush3.bf16.msra.mxu0 %v192_v2  ;;  %v159_v11 = vld [vmem:[%s265_s2] ss:$0 sm:$0xff]  ;;  %v144_v12 = vunpack.c.l.bf16 %v143_v10 }
   0x7   :  { %173 = vmatprep.subr.bf16.mxu0 %v199_v0 }
   0xa   :  { %174 = vmatpush3.bf16.msra.mxu0 %v193_v3 }
   0xb   :  { %175 = vmatprep.subr.bf16.mxu0 %v199_v0 }
   0xe   :  { %176 = vmatpush3.bf16.msra.mxu0 %v194_v4 }
   0xf   :  { %177 = vmatprep.subr.bf16.mxu0 %v199_v0 }
  0x12   :  { %178 = vmatpush3.bf16.msra.mxu0 %v195_v5 }
  0x13   :  { %179 = vmatprep.subr.bf16.mxu0 %v199_v0 }
  0x16   :  { %180 = vmatpush3.bf16.msra.mxu0 %v196_v6 }
  0x17   :  { %181 = vmatprep.subr.bf16.mxu0 %v199_v0 }
  0x1a   :  { %182 = vmatpush3.bf16.msra.mxu0 %v197_v7 }
  0x1b   :  { %183 = vmatprep.subr.bf16.mxu0 %v199_v0 }
  0x1e   :  { %184 = vmatpush3.bf16.msra.mxu0 %v198_v8 }
  0x21   :  { %186 = vmatmul.mubr.bf16.vlgmr.msra.gmra.mxu0 %v23_v9 }
  0xe1   :  { %v123_v13 = vpop.f32.mrf.mxu0 }
  0xe2   :  { %v142_v14 = vadd.f32 %v159_v11, %v123_v13 }
  0xe3   :  { %v187_v15 = vpop.f32.mrf.mxu0 }
  0xe4   :  { %v145_v16 = vadd.f32 %v144_v12, %v142_v14 }
  0xe5   :  { %v126_v17 = vpop.f32.mrf.mxu0 }
  0xe6   :  { %146 = vst [vmem:[%s266_s4] sm:$0xff] %v145_v16 }
  0xe7   :  { %v188_v18 = vpop.f32.mrf.mxu0 }

// kernel: seg_tran_forward.42
= control target key start
LH: loop header
LB: loop body
LE: loop exit
PB: predicated region body
PF: predicated region fallthrough
CT: control target
= control target key end

     0   :  { %v265_v3 = vmov 0.0   ;;  %vm266_vm0 = vmmov 0   ;;  %s336_s0 = inlined_call_operand.vmem [shape: f32[8,128], index: 0, kind: input, shape index: {}]   ;;  %s337_s1 = inlined_call_operand.vmem [shape: bf16[128,128], index: 1, kind: input, shape index: {}]   ;;  %s338_s3 = inlined_call_operand.vmem [shape: f32[1,128], index: 3, kind: input, shape index: {}]   ;;  %s339_s4 = inlined_call_operand.vmem [shape: f32[1,128], index: 4, kind: input, shape index: {}]   ;;  %s340_s2 = inlined_call_operand.vmem [shape: f32[1,128], index: 2, kind: input, shape index: {}]   ;;  %s341_s5 = inlined_call_operand.vmem [shape: bf16[8,128], index: 5, kind: output, shape index: {}]  }
   0x1   :  { %v26_v0 = vld [vmem:[%s336_s0] sm:$0xff]  ;;  %v251_v2 = vld [vmem:[%s337_s1 + $0x38] sm:$0xff]   ;;  %229 = vmatprep.subr.bf16.mxu0 %v265_v3  ;;  %v252_v4 = vld [vmem:[%s337_s1 + $0x30] sm:$0xff]   ;;  %245 = vmatprep.mubr.msk.bf16.mxu0 %vm266_vm0, %v265_v3 }
   0x2   :  { %27 = vadd.xlane.f32.xlu0 %v26_v0  ;;  %v30_v1 = vmul.f32 %v26_v0, %v26_v0  ;;  %230 = vmatpush3.bf16.msra.mxu0 %v251_v2  ;;  %v253_v5 = vld [vmem:[%s337_s1 + $0x28] sm:$0xff]   ;;  %v254_v6 = vld [vmem:[%s337_s1 + $0x20] sm:$0xff]   ;;  %v255_v7 = vld [vmem:[%s337_s1 + $0x18] sm:$0xff]  }
   0x3   :  { %231 = vmatprep.subr.bf16.mxu0 %v265_v3  ;;  %v256_v8 = vld [vmem:[%s337_s1 + $0x10] sm:$0xff]   ;;  %v257_v9 = vld [vmem:[%s337_s1 + $0x8] sm:$0xff]   ;;  %v258_v10 = vld [vmem:[%s337_s1] sm:$0xff]  }
   0x4   :  { %v209_v20 = vld [vmem:[%s338_s3] ss:$0 sm:$0xff] }
   0x5   :  { %v210_v22 = vld [vmem:[%s339_s4] ss:$0 sm:$0xff] }
   0x6   :  { %31 = vadd.xlane.f32.xlu0 %v30_v1  ;;  %232 = vmatpush3.bf16.msra.mxu0 %v252_v4  ;;  %v219_v26 = vld [vmem:[%s340_s2] ss:$0 sm:$0xff] }
   0x7   :  { %233 = vmatprep.subr.bf16.mxu0 %v265_v3 }
   0xa   :  { %234 = vmatpush3.bf16.msra.mxu0 %v253_v5 }
   0xb   :  { %235 = vmatprep.subr.bf16.mxu0 %v265_v3 }
   0xe   :  { %236 = vmatpush3.bf16.msra.mxu0 %v254_v6 }
   0xf   :  { %237 = vmatprep.subr.bf16.mxu0 %v265_v3 }
  0x12   :  { %238 = vmatpush3.bf16.msra.mxu0 %v255_v7 }
  0x13   :  { %239 = vmatprep.subr.bf16.mxu0 %v265_v3 }
  0x16   :  { %240 = vmatpush3.bf16.msra.mxu0 %v256_v8 }
  0x17   :  { %241 = vmatprep.subr.bf16.mxu0 %v265_v3 }
  0x1a   :  { %242 = vmatpush3.bf16.msra.mxu0 %v257_v9 }
  0x1b   :  { %243 = vmatprep.subr.bf16.mxu0 %v265_v3 }
  0x1e   :  { %244 = vmatpush3.bf16.msra.mxu0 %v258_v10 }
  0x8b   :  { %v28_v11 = vpop.xlane.xlu0 %27 }
  0x8c   :  { %v29_v12 = vmul.f32 0.0625, %v28_v11 }
  0x8e   :  { %v34_v14 = vmul.f32 %v29_v12, %v29_v12  ;;  %v36_v18 = vsub.f32 %v26_v0, %v29_v12 }
  0x8f   :  { %v32_v13 = vpop.xlane.xlu0 %31 }
  0x90   :  { %v33_v15 = vmul.f32 0.0625, %v32_v13 }
  0x92   :  { %v35_v16 = vsub.f32 %v33_v15, %v34_v14 }
  0x94   :  { %v37_v17 = vadd.f32 1e-05, %v35_v16 }
  0x96   :  { %259 = vrsqrt.f32 %v37_v17 }
  0xa3   :  { %v260_v19 = vpop.eup %259 }
  0xa4   :  { %v39_v21 = vmul.f32 %v260_v19, %v36_v18 }
  0xa6   :  { %v47_v23 = vmul.f32 %v209_v20, %v39_v21 }
  0xa8   :  { %v55_v24 = vadd.f32 %v210_v22, %v47_v23 }
  0xaa   :  { %v56_v25 = vpack.c.bf16 %v55_v24, %v55_v24 }
  0xac   :  { %246 = vmatmul.mubr.bf16.vlgmr.msra.gmra.mxu0 %v56_v25 }
 0x16c   :  { %v156_v27 = vpop.f32.mrf.mxu0 }
 0x16d   :  { %v175_v28 = vadd.f32 %v219_v26, %v156_v27 }
 0x16e   :  { %v247_v29 = vpop.f32.mrf.mxu0 }
 0x16f   :  { %v176_v30 = vmul.f32 0.70710677, %v175_v28  ;;  %v200_v54 = vmul.f32 0.5, %v175_v28 }
 0x170   :  { %v159_v31 = vpop.f32.mrf.mxu0 }
 0x171   :  { %v177_v32 = vand.u32 2147483647, %v176_v30  ;;  %vm197_vm1 = vcmp.ge.f32.partialorder %v176_v30, 0.0 }
 0x172   :  { %v248_v33 = vpop.f32.mrf.mxu0 }
 0x173   :  { %v178_v34 = vmul.f32 0.3275911, %v177_v32  ;;  %v191_v36 = vsub.f32 0.0, %v177_v32 }
 0x175   :  { %v179_v35 = vadd.f32 1.0, %v178_v34  ;;  %v192_v37 = vmul.f32 %v191_v36, %v177_v32 }
 0x177   :  { %261 = vrcp.f32 %v179_v35  ;;  %v193_v40 = vmul.f32 1.442695, %v192_v37 }
 0x179   :  { %263 = vpow2.f32 %v193_v40 }
 0x184   :  { %v262_v38 = vpop.eup %261 }
 0x185   :  { %v182_v39 = vmul.f32 1.0614054, %v262_v38 }
 0x186   :  { %v264_v49 = vpop.eup %263 }
 0x187   :  { %v183_v41 = vadd.f32 -1.4531521, %v182_v39 }
 0x189   :  { %v184_v42 = vmul.f32 %v262_v38, %v183_v41 }
 0x18b   :  { %v185_v43 = vadd.f32 1.4214138, %v184_v42 }
 0x18d   :  { %v186_v44 = vmul.f32 %v262_v38, %v185_v43 }
 0x18f   :  { %v187_v45 = vadd.f32 -0.28449672, %v186_v44 }
 0x191   :  { %v188_v46 = vmul.f32 %v262_v38, %v187_v45 }
 0x193   :  { %v189_v47 = vadd.f32 0.2548296, %v188_v46 }
 0x195   :  { %v190_v48 = vmul.f32 %v262_v38, %v189_v47 }
 0x197   :  { %v195_v50 = vmul.f32 %v264_v49, %v190_v48 }
 0x199   :  { %v196_v51 = vsub.f32 1.0, %v195_v50 }
 0x19b   :  { %v198_v52 = vsub.f32 0.0, %v196_v51 }
 0x19d   :  { %v199_v53 = vsel %vm197_vm1, %v196_v51, %v198_v52 }
 0x19e   :  { %v201_v55 = vadd.f32 1.0, %v199_v53 }
 0x1a0   :  { %v202_v56 = vmul.f32 %v201_v55, %v200_v54 }
 0x1a2   :  { %v203_v57 = vpack.c.bf16 %v202_v56, %v202_v56 }
 0x1a4   :  { %204 = vst [vmem:[%s341_s5] sm:$0xf] %v203_v57 }

// kernel: seg_tran_forward.43
= control target key start
LH: loop header
LB: loop body
LE: loop exit
PB: predicated region body
PF: predicated region fallthrough
CT: control target
= control target key end

     0   :  { %v199_v0 = vmov 0.0   ;;  %vm200_vm0 = vmmov 0   ;;  %s262_s1 = inlined_call_operand.vmem [shape: bf16[128,128], index: 1, kind: input, shape index: {}]   ;;  %s263_s0 = inlined_call_operand.vmem [shape: bf16[8,128], index: 0, kind: input, shape index: {}]   ;;  %s264_s2 = inlined_call_operand.vmem [shape: f32[1,128], index: 2, kind: input, shape index: {}]   ;;  %s265_s3 = inlined_call_operand.vmem [shape: f32[8,128], index: 3, kind: input, shape index: {}]   ;;  %s266_s4 = inlined_call_operand.vmem [shape: bf16[8,128], index: 4, kind: output, shape index: {}]  }
   0x1   :  { %169 = vmatprep.subr.bf16.mxu0 %v199_v0  ;;  %v191_v1 = vld [vmem:[%s262_s1 + $0x38] sm:$0xff]   ;;  %185 = vmatprep.mubr.msk.bf16.mxu0 %vm200_vm0, %v199_v0  ;;  %v192_v2 = vld [vmem:[%s262_s1 + $0x30] sm:$0xff]   ;;  %v193_v3 = vld [vmem:[%s262_s1 + $0x28] sm:$0xff]  }
   0x2   :  { %170 = vmatpush3.bf16.msra.mxu0 %v191_v1  ;;  %v194_v4 = vld [vmem:[%s262_s1 + $0x20] sm:$0xff]   ;;  %v195_v5 = vld [vmem:[%s262_s1 + $0x18] sm:$0xff]   ;;  %v196_v6 = vld [vmem:[%s262_s1 + $0x10] sm:$0xff]  }
   0x3   :  { %171 = vmatprep.subr.bf16.mxu0 %v199_v0  ;;  %v197_v7 = vld [vmem:[%s262_s1 + $0x8] sm:$0xff]   ;;  %v198_v8 = vld [vmem:[%s262_s1] sm:$0xff]  }
   0x4   :  { %v23_v9 = vld [vmem:[%s263_s0] sm:$0xf] }
   0x5   :  { %v159_v10 = vld [vmem:[%s264_s2] ss:$0 sm:$0xff] }
   0x6   :  { %172 = vmatpush3.bf16.msra.mxu0 %v192_v2  ;;  %v143_v12 = vld [vmem:[%s265_s3] sm:$0xff] }
   0x7   :  { %173 = vmatprep.subr.bf16.mxu0 %v199_v0 }
   0xa   :  { %174 = vmatpush3.bf16.msra.mxu0 %v193_v3 }
   0xb   :  { %175 = vmatprep.subr.bf16.mxu0 %v199_v0 }
   0xe   :  { %176 = vmatpush3.bf16.msra.mxu0 %v194_v4 }
   0xf   :  { %177 = vmatprep.subr.bf16.mxu0 %v199_v0 }
  0x12   :  { %178 = vmatpush3.bf16.msra.mxu0 %v195_v5 }
  0x13   :  { %179 = vmatprep.subr.bf16.mxu0 %v199_v0 }
  0x16   :  { %180 = vmatpush3.bf16.msra.mxu0 %v196_v6 }
  0x17   :  { %181 = vmatprep.subr.bf16.mxu0 %v199_v0 }
  0x1a   :  { %182 = vmatpush3.bf16.msra.mxu0 %v197_v7 }
  0x1b   :  { %183 = vmatprep.subr.bf16.mxu0 %v199_v0 }
  0x1e   :  { %184 = vmatpush3.bf16.msra.mxu0 %v198_v8 }
  0x21   :  { %186 = vmatmul.mubr.bf16.vlgmr.msra.gmra.mxu0 %v23_v9 }
  0xe1   :  { %v123_v11 = vpop.f32.mrf.mxu0 }
  0xe2   :  { %v142_v13 = vadd.f32 %v159_v10, %v123_v11 }
  0xe3   :  { %v187_v14 = vpop.f32.mrf.mxu0 }
  0xe4   :  { %v144_v15 = vadd.f32 %v143_v12, %v142_v13 }
  0xe5   :  { %v126_v16 = vpop.f32.mrf.mxu0 }
  0xe6   :  { %v145_v17 = vpack.c.bf16 %v144_v15, %v144_v15 }
  0xe7   :  { %v188_v18 = vpop.f32.mrf.mxu0 }
  0xe8   :  { %146 = vst [vmem:[%s266_s4] sm:$0xf] %v145_v17 }

// kernel: seg_tran_forward.37
= control target key start
LH: loop header
LB: loop body
LE: loop exit
PB: predicated region body
PF: predicated region fallthrough
CT: control target
= control target key end

     0   :  { %s657_s12 = smov 0   ;;  %s659_s13 = smov 0   ;;  %s795_s0 = inlined_call_operand.vmem [shape: bf16[2,6,6,32], index: 0, kind: input, shape index: {}]   ;;  %s796_s1 = inlined_call_operand.vmem [shape: f32[9,32], index: 1, kind: input, shape index: {}]   ;;  %s797_s2 = inlined_call_operand.vmem [shape: f32[1,1,1,32], index: 2, kind: input, shape index: {}]   ;;  %s798_s3 = inlined_call_operand.vmem [shape: bf16[2,4,4,32], index: 3, kind: output, shape index: {}]  }
   0x1   :  { %s661_s14 = smov 0  }
   0x2 LB: > { %s25_s15 = sadd.s32 1, %s631_s13  ;;  %p571_p0 = scmp.ge.s32.totalorder %s635_s14, 1  ;;  %s635_s14 = sphi %s661_s14, %s13_s14   ;;  %s631_s13 = sphi %s659_s13, %s800_s13   ;;  %s627_s12 = sphi %s657_s12, %s799_s12  }
   0x3   : > { %p27_p1 = scmp.ge.s32.totalorder %s25_s15, 2  ;;  %p173_p2 = scmp.lt.s32.totalorder %s635_s14, 3 }
   0x5   : > { %s802_s15 = smov (%p27_p1, %s25_s15), 0  ;;  %p174_p3 = pnand %p571_p0, %p173_p2 }
   0x6   : > { %p210_p4 = scmp.lt.s32.totalorder (!%p174_p3), %s627_s12, 1 }
   0x7   : > { %177 = sbr.rel (%p174_p3) target bundleno = 56 (0x38), region = 32 }
   0xc   : > { %s804_s12 = smov (!%p210_p4, %s627_s12), 1  ;;  %v684_v0 = vld [vmem:[%s796_s1] ss:$0 sm:$0xff]  ;;  %v689_v1 = vld [vmem:[%s796_s1 + $0x1] ss:$0 sm:$0xff]  ;;  %vm449_vm0 = vcmask 254976  }
   0xd   : > { %s588_s16 = smul.u32 24, %s804_s12  ;;  %v694_v2 = vld [vmem:[%s796_s1 + $0x2] ss:$0 sm:$0xff]  ;;  %v699_v8 = vld [vmem:[%s796_s1 + $0x4] ss:$0 sm:$0xff]  ;;  %s587_s17 = sshll.u32 %s804_s12, 3 }
   0xe   : > { %v704_v10 = vld [vmem:[%s796_s1 + $0x5] ss:$0 sm:$0xff]  ;;  %v709_v11 = vld [vmem:[%s796_s1 + $0x7] ss:$0 sm:$0xff]  ;;  %v717_v19 = vld [vmem:[%s796_s1 + $0x3] ss:$0 sm:$0xff]  ;;  %s232_s20 = scalar_lea.vmem %s798_s3, %s587_s17 }
   0xf   : > { %s217_s19 = scalar_lea.vmem %s795_s0, %s588_s16  ;;  %v723_v21 = vld [vmem:[%s796_s1 + $0x8] ss:$0 sm:$0xff]  ;;  %v729_v25 = vld [vmem:[%s796_s1 + $0x6] ss:$0 sm:$0xff] }
  0x10   : > { %v233_v3 = vld [vmem:[%s217_s19] sm:$0x7]  ;;  %v234_v4 = vld [vmem:[%s217_s19 + $0x4] sm:$0x7]  ;;  %v235_v5 = vld [vmem:[%s217_s19 + $0x8] sm:$0x7] }
  0x11   : > { %v236_v6 = vld [vmem:[%s217_s19 + $0xc] sm:$0x7]  ;;  %v239_v7 = vunpack.c.l.bf16 %v233_v3  ;;  %v240_v9 = vunpack.c.l.bf16 %v234_v4  ;;  %v237_v12 = vld [vmem:[%s217_s19 + $0x10] sm:$0x7]  ;;  %v241_v13 = vunpack.c.l.bf16 %v235_v5  ;;  %v238_v17 = vld [vmem:[%s217_s19 + $0x14] sm:$0x7] }
  0x12   : > { %v242_v18 = vunpack.c.l.bf16 %v236_v6  ;;  %v732_v27 = vunpack.c.l.bf16 %v237_v12  ;;  %v736_v30 = vunpack.c.l.bf16 %v238_v17 }
  0x13   : > { %v250_v14 = vmul.f32 %v684_v0, %v239_v7  ;;  %v263_v15 = vmul.f32 %v689_v1, %v239_v7  ;;  %v288_v16 = vmul.f32 %v694_v2, %v239_v7  ;;  %v326_v20 = vmul.f32 %v699_v8, %v240_v9 }
  0x14   : > { %v351_v24 = vmul.f32 %v704_v10, %v240_v9  ;;  %v389_v26 = vmul.f32 %v709_v11, %v241_v13  ;;  %v251_v28 = vmul.f32 %v684_v0, %v240_v9  ;;  %v264_v29 = vmul.f32 %v689_v1, %v240_v9 }
  0x15   : > { %v271_v22 = vrot.slane %v263_v15, 1  ;;  %v296_v23 = vrot.slane %v288_v16, 2  ;;  %v313_v32 = vmul.f32 %v717_v19, %v240_v9  ;;  %v414_v33 = vmul.f32 %v723_v21, %v241_v13 }
  0x16   : > { %v289_v34 = vmul.f32 %v694_v2, %v240_v9  ;;  %v334_v35 = vrot.slane %v326_v20, 1  ;;  %v376_v36 = vmul.f32 %v729_v25, %v241_v13  ;;  %v272_v37 = vrot.slane %v264_v29, 1 }
  0x17   : > { %v279_v31 = vadd.f32 %v271_v22, %v250_v14  ;;  %v327_v38 = vmul.f32 %v699_v8, %v241_v13  ;;  %v359_v40 = vrot.slane %v351_v24, 2  ;;  %v397_v41 = vrot.slane %v389_v26, 1 }
  0x18   : > { %v297_v42 = vrot.slane %v289_v34, 2  ;;  %v280_v43 = vadd.f32 %v272_v37, %v251_v28  ;;  %v314_v44 = vmul.f32 %v717_v19, %v241_v13  ;;  %v352_v45 = vmul.f32 %v704_v10, %v241_v13 }
  0x19   : > { %v304_v39 = vadd.f32 %v296_v23, %v279_v31  ;;  %v390_v46 = vmul.f32 %v709_v11, %v242_v18  ;;  %v422_v48 = vrot.slane %v414_v33, 2  ;;  %v252_v49 = vmul.f32 %v684_v0, %v241_v13 }
  0x1a   : > { %v265_v50 = vmul.f32 %v689_v1, %v241_v13  ;;  %v305_v51 = vadd.f32 %v297_v42, %v280_v43  ;;  %v335_v52 = vrot.slane %v327_v38, 1  ;;  %v415_v53 = vmul.f32 %v723_v21, %v242_v18 }
  0x1b   : > { %v317_v47 = vadd.f32 %v313_v32, %v304_v39  ;;  %v290_v54 = vmul.f32 %v694_v2, %v241_v13  ;;  %v377_v56 = vmul.f32 %v729_v25, %v242_v18  ;;  %v328_v58 = vmul.f32 %v699_v8, %v242_v18 }
  0x1c   : > { %v273_v57 = vrot.slane %v265_v50, 1  ;;  %v318_v59 = vadd.f32 %v314_v44, %v305_v51  ;;  %v360_v60 = vrot.slane %v352_v45, 2  ;;  %v398_v61 = vrot.slane %v390_v46, 1 }
  0x1d   : > { %v342_v55 = vadd.f32 %v334_v35, %v317_v47  ;;  %v298_v62 = vrot.slane %v290_v54, 2  ;;  %v315_v4 = vmul.f32 %v717_v19, %v242_v18  ;;  %v353_v5 = vmul.f32 %v704_v10, %v242_v18 }
  0x1e   : > { %v281_v3 = vadd.f32 %v273_v57, %v252_v49  ;;  %v343_v6 = vadd.f32 %v335_v52, %v318_v59  ;;  %v423_v7 = vrot.slane %v415_v53, 2  ;;  %v253_v9 = vmul.f32 %v684_v0, %v242_v18 }
  0x1f   : > { %v367_v63 = vadd.f32 %v359_v40, %v342_v55  ;;  %v266_v12 = vmul.f32 %v689_v1, %v242_v18  ;;  %v336_v15 = vrot.slane %v328_v58, 1  ;;  %v291_v16 = vmul.f32 %v694_v2, %v242_v18  ;;  %v584_v1 = vld [vmem:[%s797_s2] ss:$0 sm:$0xff] }
  0x20   : > { %v306_v14 = vadd.f32 %v298_v62, %v281_v3  ;;  %v368_v17 = vadd.f32 %v360_v60, %v343_v6  ;;  %v391_v20 = vmul.f32 %v709_v11, %v732_v27  ;;  %v329_v23 = vmul.f32 %v699_v8, %v732_v27 }
  0x21   : > { %v380_v13 = vadd.f32 %v376_v36, %v367_v63  ;;  %v274_v22 = vrot.slane %v266_v12, 1  ;;  %v361_v28 = vrot.slane %v353_v5, 2  ;;  %v299_v0 = vrot.slane %v291_v16, 2 }
  0x22   : > { %v319_v26 = vadd.f32 %v315_v4, %v306_v14  ;;  %v381_v29 = vadd.f32 %v377_v56, %v368_v17  ;;  %v316_v2 = vmul.f32 %v717_v19, %v732_v27  ;;  %v354_v18 = vmul.f32 %v704_v10, %v732_v27 }
  0x23   : > { %v405_v24 = vadd.f32 %v397_v41, %v380_v13  ;;  %v282_v31 = vadd.f32 %v274_v22, %v253_v9  ;;  %v378_v8 = vmul.f32 %v729_v25, %v732_v27  ;;  %v416_v34 = vmul.f32 %v723_v21, %v732_v27 }
  0x24   : > { %v344_v33 = vadd.f32 %v336_v15, %v319_v26  ;;  %v406_v35 = vadd.f32 %v398_v61, %v381_v29  ;;  %v337_v37 = vrot.slane %v329_v23, 1  ;;  %v399_v40 = vrot.slane %v391_v20, 1 }
  0x25   : > { %v430_v32 = vadd.f32 %v422_v48, %v405_v24  ;;  %v307_v36 = vadd.f32 %v299_v0, %v282_v31  ;;  %v362_v41 = vrot.slane %v354_v18, 2  ;;  %v392_v42 = vmul.f32 %v709_v11, %v736_v30 }
  0x26   : > { %v369_v39 = vadd.f32 %v361_v28, %v344_v33  ;;  %v431_v10 = vadd.f32 %v423_v7, %v406_v35  ;;  %v424_v27 = vrot.slane %v416_v34, 2  ;;  %v379_v47 = vmul.f32 %v729_v25, %v736_v30 }
  0x27   : > { %v441_v38 = vadd.f32 %v584_v1, %v430_v32  ;;  %v320_v19 = vadd.f32 %v316_v2, %v307_v36  ;;  %v417_v48 = vmul.f32 %v723_v21, %v736_v30  ;;  %v400_v52 = vrot.slane %v392_v42, 1 }
  0x28   : > { %v382_v44 = vadd.f32 %v378_v8, %v369_v39  ;;  %v442_v45 = vadd.f32 %v584_v1, %v431_v10 }
  0x29   : > { %v445_v43 = vpack.c.bf16 %v441_v38, %v441_v38  ;;  %v345_v46 = vadd.f32 %v337_v37, %v320_v19  ;;  %v425_v54 = vrot.slane %v417_v48, 2 }
  0x2a   : > { %v407_v49 = vadd.f32 %v399_v40, %v382_v44  ;;  %v446_v50 = vpack.c.bf16 %v442_v45, %v442_v45 }
  0x2b   : > { %450 = vst.msk [vmem:[%s232_s20] sm:$0x3] %vm449_vm0, %v445_v43  ;;  %v370_v51 = vadd.f32 %v362_v41, %v345_v46 }
  0x2c   : > { %v432_v53 = vadd.f32 %v424_v27, %v407_v49  ;;  %451 = vst.msk [vmem:[%s232_s20 + $0x2] sm:$0x3] %vm449_vm0, %v446_v50 }
  0x2d   : > { %v383_v11 = vadd.f32 %v379_v47, %v370_v51 }
  0x2e   : > { %v443_v55 = vadd.f32 %v584_v1, %v432_v53 }
  0x2f   : > { %v408_v56 = vadd.f32 %v400_v52, %v383_v11 }
  0x30   : > { %v447_v57 = vpack.c.bf16 %v443_v55, %v443_v55 }
  0x31   : > { %v433_v58 = vadd.f32 %v425_v54, %v408_v56 }
  0x32   : > { %452 = vst.msk [vmem:[%s232_s20 + $0x4] sm:$0x3] %vm449_vm0, %v447_v57 }
  0x33   : > { %v444_v25 = vadd.f32 %v584_v1, %v433_v58 }
  0x35   : > { %v448_v59 = vpack.c.bf16 %v444_v25, %v444_v25 }
  0x37   : > { %453 = vst.msk [vmem:[%s232_s20 + $0x6] sm:$0x3] %vm449_vm0, %v448_v59 }
  0x38 PF: > { %s13_s14 = sadd.s32 1, %s635_s14   ;;  %s799_s12 = smov %s631_s13 }
  0x39   : > { %p10_p5 = scmp.ge.s32.totalorder %s13_s14, 4   ;;  %s800_s13 = smov %s802_s15 }
  0x3b   :  { %12 = sbr.rel (!%p10_p5) target bundleno = 2 (0x2), region = 68 }

// kernel: seg_tran_forward.44
= control target key start
LH: loop header
LB: loop body
LE: loop exit
PB: predicated region body
PF: predicated region fallthrough
CT: control target
= control target key end

     0   :  { %s473_s1 = inlined_call_operand.vmem [shape: bf16[256,128], index: 1, kind: input, shape index: {}]   ;;  %s474_s0 = inlined_call_operand.vmem [shape: bf16[32,256], index: 0, kind: input, shape index: {}]   ;;  %s475_s2 = inlined_call_operand.vmem [shape: f32[1,128], index: 2, kind: input, shape index: {}]   ;;  %s476_s3 = inlined_call_operand.vmem [shape: bf16[32,128], index: 3, kind: output, shape index: {}]  }
   0x1   :  { %v362_v0 = vld [vmem:[%s473_s1 + $0x78] sm:$0xff]   ;;  %v364_v2 = vld [vmem:[%s473_s1 + $0x70] sm:$0xff]   ;;  %v366_v4 = vld [vmem:[%s473_s1 + $0x68] sm:$0xff]  }
   0x2   :  { %v363_v1 = vld [vmem:[%s473_s1 + $0x38] sm:$0xff]   ;;  %318 = vmatprep.subr.bf16.mxu0 %v362_v0  ;;  %346 = vmatprep.subr.bf16.mxu1 %v362_v0  ;;  %v365_v3 = vld [vmem:[%s473_s1 + $0x30] sm:$0xff]   ;;  %v367_v5 = vld [vmem:[%s473_s1 + $0x28] sm:$0xff]  }
   0x3   :  { %319 = vmatpush3.bf16.msra.mxu0 %v363_v1  ;;  %354 = vmatpush3.bf16.msra.mxu1 %v363_v1  ;;  %v368_v6 = vld [vmem:[%s473_s1 + $0x60] sm:$0xff]   ;;  %v370_v8 = vld [vmem:[%s473_s1 + $0x58] sm:$0xff]   ;;  %v372_v10 = vld [vmem:[%s473_s1 + $0x50] sm:$0xff]  }
   0x4   :  { %320 = vmatprep.subr.bf16.mxu0 %v364_v2  ;;  %347 = vmatprep.subr.bf16.mxu1 %v364_v2  ;;  %v369_v7 = vld [vmem:[%s473_s1 + $0x20] sm:$0xff]   ;;  %v371_v9 = vld [vmem:[%s473_s1 + $0x18] sm:$0xff]   ;;  %v373_v13 = vld [vmem:[%s473_s1 + $0x10] sm:$0xff]  }
   0x5   :  { %v380_v11 = vld [vmem:[%s474_s0 + $0x4] ss:$8 sps:$4 sm:$0xff]   ;;  %v383_v12 = vld [vmem:[%s474_s0 + $0x14] ss:$8 sps:$4 sm:$0xff]   ;;  %v378_v18 = vld [vmem:[%s474_s0] ss:$8 sps:$4 sm:$0xff]  }
   0x6   :  { %v374_v14 = vld [vmem:[%s473_s1 + $0x48] sm:$0xff]   ;;  %211 = vmatprep.mubr.bf16.mxu0 %v380_v11  ;;  %219 = vmatprep.mubr.bf16.mxu1 %v383_v12  ;;  %v376_v16 = vld [vmem:[%s473_s1 + $0x40] sm:$0xff]   ;;  %v381_v19 = vld [vmem:[%s474_s0 + $0x10] ss:$8 sps:$4 sm:$0xff]  }
   0x7   :  { %321 = vmatpush3.bf16.msra.mxu0 %v365_v3  ;;  %355 = vmatpush3.bf16.msra.mxu1 %v365_v3  ;;  %v375_v15 = vld [vmem:[%s473_s1 + $0x8] sm:$0xff]   ;;  %v377_v17 = vld [vmem:[%s473_s1] sm:$0xff]  }
   0x8   :  { %322 = vmatprep.subr.bf16.mxu0 %v366_v4  ;;  %348 = vmatprep.subr.bf16.mxu1 %v366_v4  ;;  %v298_v28 = vld [vmem:[%s475_s2] ss:$0 sm:$0xff] }
   0xb   :  { %323 = vmatpush3.bf16.msra.mxu0 %v367_v5  ;;  %356 = vmatpush3.bf16.msra.mxu1 %v367_v5 }
   0xc   :  { %324 = vmatprep.subr.bf16.mxu0 %v368_v6  ;;  %349 = vmatprep.subr.bf16.mxu1 %v368_v6 }
   0xf   :  { %325 = vmatpush3.bf16.msra.mxu0 %v369_v7  ;;  %357 = vmatpush3.bf16.msra.mxu1 %v369_v7 }
  0x10   :  { %326 = vmatprep.subr.bf16.mxu0 %v370_v8  ;;  %350 = vmatprep.subr.bf16.mxu1 %v370_v8 }
  0x13   :  { %327 = vmatpush3.bf16.msra.mxu0 %v371_v9  ;;  %358 = vmatpush3.bf16.msra.mxu1 %v371_v9 }
  0x14   :  { %328 = vmatprep.subr.bf16.mxu0 %v372_v10  ;;  %351 = vmatprep.subr.bf16.mxu1 %v372_v10 }
  0x17   :  { %329 = vmatpush3.bf16.msra.mxu0 %v373_v13  ;;  %359 = vmatpush3.bf16.msra.mxu1 %v373_v13 }
  0x18   :  { %330 = vmatprep.subr.bf16.mxu0 %v374_v14  ;;  %352 = vmatprep.subr.bf16.mxu1 %v374_v14 }
  0x1b   :  { %331 = vmatpush3.bf16.msra.mxu0 %v375_v15  ;;  %360 = vmatpush3.bf16.msra.mxu1 %v375_v15 }
  0x1c   :  { %332 = vmatprep.subr.bf16.mxu0 %v376_v16  ;;  %353 = vmatprep.subr.bf16.mxu1 %v376_v16 }
  0x1f   :  { %333 = vmatpush3.bf16.msra.mxu0 %v377_v17  ;;  %361 = vmatpush3.bf16.msra.mxu1 %v377_v17 }
  0x22   :  { %212 = vmatmul.mubr.bf16.vlgmr.msra.gmra.mxu0 %v378_v18  ;;  %220 = vmatmul.mubr.bf16.vlgmr.msra.gmra.mxu1 %v381_v19 }
  0xe2   :  { %v334_v20 = vpop.f32.mrf.mxu0  ;;  %v340_v21 = vpop.f32.mrf.mxu1 }
  0xe4   :  { %v335_v22 = vpop.f32.mrf.mxu0  ;;  %v341_v23 = vpop.f32.mrf.mxu1 }
  0xe5   :  { %v336_v26 = vadd.f32 %v335_v22, %v334_v20  ;;  %v342_v27 = vadd.f32 %v341_v23, %v340_v21 }
  0xe6   :  { %v337_v24 = vpop.f32.mrf.mxu0  ;;  %v343_v25 = vpop.f32.mrf.mxu1 }
  0xe7   :  { %v250_v33 = vadd.f32 %v336_v26, %v298_v28  ;;  %v252_v34 = vadd.f32 %v342_v27, %v298_v28 }
  0xe8   :  { %v338_v29 = vpop.f32.mrf.mxu0  ;;  %v344_v30 = vpop.f32.mrf.mxu1 }
  0xe9   :  { %v339_v31 = vadd.f32 %v338_v29, %v337_v24  ;;  %v345_v32 = vadd.f32 %v344_v30, %v343_v25 }
  0xeb   :  { %v251_v35 = vadd.f32 %v339_v31, %v298_v28  ;;  %v253_v36 = vadd.f32 %v345_v32, %v298_v28 }
  0xed   :  { %v310_v37 = vpack.c.bf16 %v251_v35, %v250_v33  ;;  %v315_v38 = vpack.c.bf16 %v253_v36, %v252_v34 }
  0xef   :  { %311 = vst [vmem:[%s476_s3] sm:$0xff] %v310_v37   ;;  %317 = vst [vmem:[%s476_s3 + $0x8] sm:$0xff] %v315_v38  }

// kernel: seg_tran_forward.48
= control target key start
LH: loop header
LB: loop body
LE: loop exit
PB: predicated region body
PF: predicated region fallthrough
CT: control target
= control target key end

     0   :  { %vm14_vm0 = vcmask 385024   ;;  %v195_v0 = vmov 0.0   ;;  %vm50_vm1 = vcmask 392192   ;;  %s289_s0 = inlined_call_operand.vmem [shape: bf16[128,48], index: 0, kind: input, shape index: {}]   ;;  %s290_s1 = inlined_call_operand.vmem [shape: f32[1,48], index: 1, kind: output, shape index: {0}]   ;;  %s291_s2 = inlined_call_operand.vmem [shape: f32[1,48], index: 2, kind: output, shape index: {1}]  }
   0x1   :  { %15 = vst.msk [vmem:[%s290_s1] sm:$0x1] %vm14_vm0, %v195_v0  ;;  %v156_v1 = vld [vmem:[%s289_s0] sm:$0xff]   ;;  %v187_v2 = vld [vmem:[%s289_s0 + $0x8] sm:$0xff]   ;;  %16 = vst.msk [vmem:[%s291_s2] sm:$0x1] %vm14_vm0, %v195_v0 }
   0x2   :  { %v157_v3 = vunpack.c.l.bf16 %v156_v1  ;;  %v158_v4 = vunpack.c.h.bf16 %v156_v1  ;;  %v161_v5 = vunpack.c.l.bf16 %v187_v2  ;;  %v188_v6 = vld [vmem:[%s289_s0 + $0x10] sm:$0xff]   ;;  %v162_v7 = vunpack.c.h.bf16 %v187_v2  ;;  %v189_v14 = vld [vmem:[%s289_s0 + $0x18] sm:$0xff]   ;;  %v190_v24 = vld [vmem:[%s289_s0 + $0x20] sm:$0xff]  }
   0x3   :  { %v165_v12 = vunpack.c.l.bf16 %v188_v6  ;;  %v166_v16 = vunpack.c.h.bf16 %v188_v6  ;;  %v169_v22 = vunpack.c.l.bf16 %v189_v14  ;;  %v170_v27 = vunpack.c.h.bf16 %v189_v14  ;;  %v191_v37 = vld [vmem:[%s289_s0 + $0x28] sm:$0xff]   ;;  %v192_v50 = vld [vmem:[%s289_s0 + $0x30] sm:$0xff]   ;;  %v193_v63 = vld [vmem:[%s289_s0 + $0x38] sm:$0xff]  }
   0x4   :  { %v51_v8 = vsel %vm50_vm1, %v157_v3, 0.0  ;;  %v52_v9 = vsel %vm50_vm1, %v158_v4, 0.0  ;;  %v54_v10 = vsel %vm50_vm1, %v161_v5, 0.0  ;;  %v56_v13 = vsel %vm50_vm1, %v162_v7, 0.0 }
   0x5   :  { %v53_v11 = vadd.f32 %v52_v9, %v51_v8  ;;  %v58_v17 = vsel %vm50_vm1, %v165_v12, 0.0  ;;  %v92_v19 = vmul.f32 %v157_v3, %v157_v3  ;;  %v93_v20 = vmul.f32 %v158_v4, %v158_v4 }
   0x6   :  { %v94_v21 = vmul.f32 %v161_v5, %v161_v5  ;;  %v60_v23 = vsel %vm50_vm1, %v166_v16, 0.0  ;;  %v95_v26 = vmul.f32 %v162_v7, %v162_v7  ;;  %v62_v28 = vsel %vm50_vm1, %v169_v22, 0.0 }
   0x7   :  { %v55_v15 = vadd.f32 %v54_v10, %v53_v11  ;;  %v96_v29 = vmul.f32 %v165_v12, %v165_v12  ;;  %v108_v31 = vsel %vm50_vm1, %v92_v19, 0.0  ;;  %v109_v32 = vsel %vm50_vm1, %v93_v20, 0.0 }
   0x8   :  { %v111_v33 = vsel %vm50_vm1, %v94_v21, 0.0  ;;  %v173_v34 = vunpack.c.l.bf16 %v190_v24  ;;  %v64_v35 = vsel %vm50_vm1, %v170_v27, 0.0  ;;  %v110_v36 = vadd.f32 %v109_v32, %v108_v31 }
   0x9   :  { %v57_v18 = vadd.f32 %v56_v13, %v55_v15  ;;  %v97_v39 = vmul.f32 %v166_v16, %v166_v16  ;;  %v113_v40 = vsel %vm50_vm1, %v95_v26, 0.0  ;;  %v174_v41 = vunpack.c.h.bf16 %v190_v24 }
   0xa   :  { %v66_v42 = vsel %vm50_vm1, %v173_v34, 0.0  ;;  %v112_v43 = vadd.f32 %v111_v33, %v110_v36  ;;  %v98_v45 = vmul.f32 %v169_v22, %v169_v22  ;;  %v115_v46 = vsel %vm50_vm1, %v96_v29, 0.0 }
   0xb   :  { %v59_v25 = vadd.f32 %v58_v17, %v57_v18  ;;  %v177_v47 = vunpack.c.l.bf16 %v191_v37  ;;  %v68_v48 = vsel %vm50_vm1, %v174_v41, 0.0  ;;  %v99_v52 = vmul.f32 %v170_v27, %v170_v27 }
   0xc   :  { %v114_v49 = vadd.f32 %v113_v40, %v112_v43  ;;  %v117_v53 = vsel %vm50_vm1, %v97_v39, 0.0  ;;  %v178_v54 = vunpack.c.h.bf16 %v191_v37  ;;  %v100_v58 = vmul.f32 %v173_v34, %v173_v34 }
   0xd   :  { %v61_v30 = vadd.f32 %v60_v23, %v59_v25  ;;  %v70_v55 = vsel %vm50_vm1, %v177_v47, 0.0  ;;  %v119_v59 = vsel %vm50_vm1, %v98_v45, 0.0  ;;  %v181_v60 = vunpack.c.l.bf16 %v192_v50 }
   0xe   :  { %v116_v56 = vadd.f32 %v115_v46, %v114_v49  ;;  %v72_v61 = vsel %vm50_vm1, %v178_v54, 0.0  ;;  %v101_v1 = vmul.f32 %v174_v41, %v174_v41  ;;  %v121_v2 = vsel %vm50_vm1, %v99_v52, 0.0  ;;  %v91_v52 = vld [vmem:[%s291_s2] sm:$0x1] }
   0xf   :  { %v63_v38 = vadd.f32 %v62_v28, %v61_v30  ;;  %v182_v3 = vunpack.c.h.bf16 %v192_v50  ;;  %v74_v4 = vsel %vm50_vm1, %v181_v60, 0.0  ;;  %v102_v7 = vmul.f32 %v177_v47, %v177_v47 }
  0x10   :  { %v118_v62 = vadd.f32 %v117_v53, %v116_v56  ;;  %v123_v8 = vsel %vm50_vm1, %v100_v58, 0.0  ;;  %v185_v9 = vunpack.c.l.bf16 %v193_v63  ;;  %v103_v13 = vmul.f32 %v178_v54, %v178_v54 }
  0x11   :  { %v65_v44 = vadd.f32 %v64_v35, %v63_v38  ;;  %v76_v10 = vsel %vm50_vm1, %v182_v3, 0.0  ;;  %v125_v14 = vsel %vm50_vm1, %v101_v1, 0.0  ;;  %v186_v15 = vunpack.c.h.bf16 %v193_v63 }
  0x12   :  { %v120_v5 = vadd.f32 %v119_v59, %v118_v62  ;;  %v78_v16 = vsel %vm50_vm1, %v185_v9, 0.0  ;;  %v104_v19 = vmul.f32 %v181_v60, %v181_v60  ;;  %v127_v20 = vsel %vm50_vm1, %v102_v7, 0.0 }
  0x13   :  { %v67_v51 = vadd.f32 %v66_v42, %v65_v44  ;;  %v80_v21 = vsel %vm50_vm1, %v186_v15, 0.0  ;;  %v105_v24 = vmul.f32 %v182_v3, %v182_v3  ;;  %v129_v25 = vsel %vm50_vm1, %v103_v13, 0.0  ;;  %v49_v44 = vld [vmem:[%s290_s1] sm:$0x1] }
  0x14   :  { %v122_v11 = vadd.f32 %v121_v2, %v120_v5  ;;  %v106_v28 = vmul.f32 %v185_v9, %v185_v9  ;;  %v131_v29 = vsel %vm50_vm1, %v104_v19, 0.0  ;;  %v107_v32 = vmul.f32 %v186_v15, %v186_v15 }
  0x15   :  { %v69_v57 = vadd.f32 %v68_v48, %v67_v51  ;;  %v133_v33 = vsel %vm50_vm1, %v105_v24, 0.0 }
  0x16   :  { %v124_v17 = vadd.f32 %v123_v8, %v122_v11  ;;  %v135_v36 = vsel %vm50_vm1, %v106_v28, 0.0  ;;  %v137_v39 = vsel %vm50_vm1, %v107_v32, 0.0 }
  0x17   :  { %v71_v0 = vadd.f32 %v70_v55, %v69_v57 }
  0x18   :  { %v126_v22 = vadd.f32 %v125_v14, %v124_v17 }
  0x19   :  { %v73_v6 = vadd.f32 %v72_v61, %v71_v0 }
  0x1a   :  { %v128_v26 = vadd.f32 %v127_v20, %v126_v22 }
  0x1b   :  { %v75_v12 = vadd.f32 %v74_v4, %v73_v6 }
  0x1c   :  { %v130_v30 = vadd.f32 %v129_v25, %v128_v26 }
  0x1d   :  { %v77_v18 = vadd.f32 %v76_v10, %v75_v12 }
  0x1e   :  { %v132_v34 = vadd.f32 %v131_v29, %v130_v30 }
  0x1f   :  { %v79_v23 = vadd.f32 %v78_v16, %v77_v18 }
  0x20   :  { %v134_v37 = vadd.f32 %v133_v33, %v132_v34 }
  0x21   :  { %v81_v27 = vadd.f32 %v80_v21, %v79_v23 }
  0x22   :  { %v136_v40 = vadd.f32 %v135_v36, %v134_v37 }
  0x23   :  { %v82_v31 = vrot.slane %v81_v27, 4 }
  0x24   :  { %v138_v42 = vadd.f32 %v137_v39, %v136_v40 }
  0x25   :  { %v83_v35 = vadd.f32 %v82_v31, %v81_v27 }
  0x26   :  { %v139_v45 = vrot.slane %v138_v42, 4 }
  0x27   :  { %v84_v38 = vrot.slane %v83_v35, 2 }
  0x28   :  { %v140_v47 = vadd.f32 %v139_v45, %v138_v42 }
  0x29   :  { %v85_v41 = vadd.f32 %v84_v38, %v83_v35 }
  0x2a   :  { %v141_v49 = vrot.slane %v140_v47, 2 }
  0x2b   :  { %v86_v43 = vrot.slane %v85_v41, 1 }
  0x2c   :  { %v142_v50 = vadd.f32 %v141_v49, %v140_v47 }
  0x2d   :  { %v87_v46 = vadd.f32 %v86_v43, %v85_v41 }
  0x2e   :  { %v143_v51 = vrot.slane %v142_v50, 1 }
  0x2f   :  { %v88_v48 = vadd.f32 %v87_v46, %v49_v44 }
  0x30   :  { %v144_v53 = vadd.f32 %v143_v51, %v142_v50 }
  0x31   :  { %90 = vst.msk [vmem:[%s290_s1] sm:$0x1] %vm14_vm0, %v88_v48 }
  0x32   :  { %v145_v54 = vadd.f32 %v144_v53, %v91_v52 }
  0x34   :  { %146 = vst.msk [vmem:[%s291_s2] sm:$0x1] %vm14_vm0, %v145_v54 }

// kernel: seg_tran_forward.49
= control target key start
LH: loop header
LB: loop body
LE: loop exit
PB: predicated region body
PF: predicated region fallthrough
CT: control target
= control target key end

     0   :  { %vm588_vm4 = vcmask 388096   ;;  %s1180_s0 = inlined_call_operand.vmem [shape: bf16[128,48], index: 0, kind: input, shape index: {}]   ;;  %s1181_s1 = inlined_call_operand.vmem [shape: f32[1,48], index: 1, kind: input, shape index: {}]   ;;  %s1182_s2 = inlined_call_operand.vmem [shape: f32[1,48], index: 2, kind: input, shape index: {}]   ;;  %s1183_s3 = inlined_call_operand.vmem [shape: bf16[128,48], index: 3, kind: output, shape index: {}]  }
   0x1   :  { %v644_v0 = vld [vmem:[%s1180_s0] sm:$0xff]   ;;  %v675_v4 = vld [vmem:[%s1180_s0 + $0x8] sm:$0xff]   ;;  %v676_v5 = vld [vmem:[%s1180_s0 + $0x10] sm:$0xff]  }
   0x2   :  { %v772_v1 = vld [vmem:[%s1181_s1] ss:$0 sm:$0xff]  ;;  %v645_v2 = vunpack.c.l.bf16 %v644_v0  ;;  %v646_v3 = vunpack.c.h.bf16 %v644_v0  ;;  %v649_v7 = vunpack.c.l.bf16 %v675_v4  ;;  %v650_v8 = vunpack.c.h.bf16 %v675_v4  ;;  %v677_v21 = vld [vmem:[%s1180_s0 + $0x18] sm:$0xff]  }
   0x3   :  { %v783_v6 = vld [vmem:[%s1182_s2] ss:$0 sm:$0xff]  ;;  %v653_v9 = vunpack.c.l.bf16 %v676_v5  ;;  %v654_v10 = vunpack.c.h.bf16 %v676_v5  ;;  %v657_v28 = vunpack.c.l.bf16 %v677_v21  ;;  %v658_v29 = vunpack.c.h.bf16 %v677_v21 }
   0x4   :  { %v53_v11 = vmul.f32 %v645_v2, %v772_v1  ;;  %v54_v12 = vmul.f32 %v646_v3, %v772_v1  ;;  %v55_v13 = vmul.f32 %v649_v7, %v772_v1  ;;  %v56_v14 = vmul.f32 %v650_v8, %v772_v1 }
   0x5   :  { %v57_v19 = vmul.f32 %v653_v9, %v772_v1  ;;  %v58_v20 = vmul.f32 %v654_v10, %v772_v1  ;;  %v59_v47 = vmul.f32 %v657_v28, %v772_v1  ;;  %v60_v48 = vmul.f32 %v658_v29, %v772_v1  ;;  %v678_v9 = vld [vmem:[%s1180_s0 + $0x20] sm:$0xff]  }
   0x6   :  { %v76_v15 = vadd.f32 %v783_v6, %v53_v11  ;;  %v77_v16 = vadd.f32 %v783_v6, %v54_v12  ;;  %v792_v17 = vadd.f32 %v783_v6, %v55_v13  ;;  %v795_v18 = vadd.f32 %v783_v6, %v56_v14 }
   0x7   :  { %v817_v32 = vadd.f32 %v783_v6, %v57_v19  ;;  %v820_v33 = vadd.f32 %v783_v6, %v58_v20  ;;  %v832_v58 = vadd.f32 %v783_v6, %v59_v47  ;;  %v835_v59 = vadd.f32 %v783_v6, %v60_v48 }
   0x8   :  { %v802_v22 = vmul.f32 0.70710677, %v76_v15  ;;  %v804_v23 = vmul.f32 0.70710677, %v77_v16  ;;  %v807_v24 = vmul.f32 0.70710677, %v792_v17 }
   0x9   :  { %v810_v25 = vmul.f32 0.70710677, %v795_v18  ;;  %v825_v51 = vmul.f32 0.70710677, %v817_v32  ;;  %v829_v56 = vmul.f32 0.70710677, %v820_v33 }
   0xa   :  { %v108_v26 = vand.u32 2147483647, %v802_v22  ;;  %v109_v27 = vand.u32 2147483647, %v804_v23  ;;  %v110_v30 = vand.u32 2147483647, %v807_v24 }
   0xb   :  { %v111_v31 = vand.u32 2147483647, %v810_v25  ;;  %v112_v55 = vand.u32 2147483647, %v825_v51  ;;  %v113_v62 = vand.u32 2147483647, %v829_v56 }
   0xc   :  { %v124_v34 = vmul.f32 0.3275911, %v108_v26  ;;  %v332_v35 = vsub.f32 0.0, %v108_v26  ;;  %v125_v36 = vmul.f32 0.3275911, %v109_v27  ;;  %v333_v37 = vsub.f32 0.0, %v109_v27 }
   0xd   :  { %v126_v38 = vmul.f32 0.3275911, %v110_v30  ;;  %v334_v39 = vsub.f32 0.0, %v110_v30  ;;  %v127_v40 = vmul.f32 0.3275911, %v111_v31  ;;  %v335_v41 = vsub.f32 0.0, %v111_v31 }
   0xe   :  { %v140_v42 = vadd.f32 1.0, %v124_v34  ;;  %v348_v43 = vmul.f32 %v332_v35, %v108_v26  ;;  %v141_v44 = vadd.f32 1.0, %v125_v36  ;;  %v349_v45 = vmul.f32 %v333_v37, %v109_v27 }
   0xf   :  { %v350_v46 = vmul.f32 %v334_v39, %v110_v30  ;;  %v142_v50 = vadd.f32 1.0, %v126_v38  ;;  %v351_v53 = vmul.f32 %v335_v41, %v111_v31  ;;  %v143_v54 = vadd.f32 1.0, %v127_v40 }
  0x10   :  { %682 = vrcp.f32 %v140_v42  ;;  %v364_v49 = vmul.f32 1.442695, %v348_v43  ;;  %v366_v52 = vmul.f32 1.442695, %v349_v45  ;;  %v128_v60 = vmul.f32 0.3275911, %v112_v55 }
  0x11   :  { %684 = vrcp.f32 %v141_v44  ;;  %v368_v57 = vmul.f32 1.442695, %v350_v46  ;;  %v336_v61 = vsub.f32 0.0, %v112_v55  ;;  %v370_v63 = vmul.f32 1.442695, %v351_v53 }
  0x12   :  { %686 = vpow2.f32 %v364_v49  ;;  %v839_v0 = vmul.f32 0.70710677, %v832_v58  ;;  %v144_v2 = vadd.f32 1.0, %v128_v60  ;;  %v129_v4 = vmul.f32 0.3275911, %v113_v62 }
  0x13   :  { %688 = vrcp.f32 %v142_v50  ;;  %v352_v3 = vmul.f32 %v336_v61, %v112_v55  ;;  %v841_v5 = vmul.f32 0.5, %v76_v15  ;;  %v337_v7 = vsub.f32 0.0, %v113_v62 }
  0x14   :  { %690 = vpow2.f32 %v366_v52  ;;  %v114_v8 = vand.u32 2147483647, %v839_v0  ;;  %v847_v10 = vmul.f32 0.5, %v77_v16  ;;  %v145_v11 = vadd.f32 1.0, %v129_v4  ;;  %v859_v16 = vld [vmem:[%s1180_s0 + $0x28] sm:$0xff]  }
  0x15   :  { %692 = vrcp.f32 %v143_v54  ;;  %v850_v12 = vmul.f32 0.70710677, %v835_v59  ;;  %v372_v13 = vmul.f32 1.442695, %v352_v3  ;;  %v353_v14 = vmul.f32 %v337_v7, %v113_v62 }
  0x16   :  { %694 = vpow2.f32 %v368_v57  ;;  %v130_v19 = vmul.f32 0.3275911, %v114_v8  ;;  %v338_v15 = vsub.f32 0.0, %v114_v8  ;;  %v853_v20 = vmul.f32 0.5, %v792_v17 }
  0x17   :  { %696 = vrcp.f32 %v144_v2  ;;  %v115_v21 = vand.u32 2147483647, %v850_v12  ;;  %v661_v26 = vunpack.c.l.bf16 %v678_v9  ;;  %v862_v27 = vmul.f32 0.5, %v795_v18 }
  0x18   :  { %698 = vpow2.f32 %v370_v63  ;;  %v146_v28 = vadd.f32 1.0, %v130_v19  ;;  %v354_v29 = vmul.f32 %v338_v15, %v114_v8  ;;  %v662_v34 = vunpack.c.h.bf16 %v678_v9 }
  0x19   :  { %700 = vrcp.f32 %v145_v11  ;;  %v131_v30 = vmul.f32 0.3275911, %v115_v21  ;;  %v339_v31 = vsub.f32 0.0, %v115_v21  ;;  %v61_v17 = vmul.f32 %v661_v26, %v772_v1 }
  0x1a   :  { %702 = vpow2.f32 %v372_v13  ;;  %v868_v36 = vmul.f32 0.5, %v817_v32  ;;  %v374_v37 = vmul.f32 1.442695, %v353_v14  ;;  %v665_v38 = vunpack.c.l.bf16 %v859_v16 }
  0x1b   :  { %704 = vrcp.f32 %v146_v28  ;;  %v147_v40 = vadd.f32 1.0, %v131_v30  ;;  %v355_v41 = vmul.f32 %v339_v31, %v115_v21  ;;  %v376_v43 = vmul.f32 1.442695, %v354_v29 }
  0x1c   :  { %v876_v44 = vadd.f32 %v783_v6, %v61_v17  ;;  %v62_v45 = vmul.f32 %v662_v34, %v772_v1  ;;  %v882_v47 = vmul.f32 0.5, %v820_v33  ;;  %v63_v54 = vmul.f32 %v665_v38, %v772_v1 }
  0x1d   :  { %v865_v35 = vpop.eup %682  ;;  %706 = vrcp.f32 %v147_v40  ;;  %v378_v48 = vmul.f32 1.442695, %v355_v41  ;;  %v666_v60 = vunpack.c.h.bf16 %v859_v16  ;;  %vm428_vm0 = vcmp.ge.f32.partialorder %v802_v22, 0.0 }
  0x1e   :  { %v871_v39 = vpop.eup %684  ;;  %v188_v18 = vmul.f32 1.0614054, %v865_v35  ;;  %v887_v52 = vmul.f32 0.70710677, %v876_v44  ;;  %v890_v53 = vadd.f32 %v783_v6, %v62_v45  ;;  %708 = vpow2.f32 %v374_v37 }
  0x1f   :  { %v189_v42 = vmul.f32 1.0614054, %v871_v39  ;;  %v879_v32 = vpop.eup %686  ;;  %710 = vpow2.f32 %v376_v43  ;;  %v911_v19 = vadd.f32 %v783_v6, %v63_v54  ;;  %v927_v43 = vmul.f32 %v666_v60, %v772_v1 }
  0x20   :  { %v204_v46 = vadd.f32 -1.4531521, %v188_v18  ;;  %v884_v49 = vpop.eup %688  ;;  %v116_v63 = vand.u32 2147483647, %v887_v52  ;;  %v903_v2 = vmul.f32 0.70710677, %v890_v53  ;;  %712 = vpow2.f32 %v378_v48 }
  0x21   :  { %v205_v50 = vadd.f32 -1.4531521, %v189_v42  ;;  %v893_v55 = vpop.eup %690  ;;  %v190_v33 = vmul.f32 1.0614054, %v884_v49  ;;  %vm429_vm1 = vcmp.ge.f32.partialorder %v804_v23, 0.0  ;;  %vm430_vm2 = vcmp.ge.f32.partialorder %v807_v24, 0.0 }
  0x22   :  { %v220_v57 = vmul.f32 %v865_v35, %v204_v46  ;;  %v898_v61 = vpop.eup %692  ;;  %v132_v13 = vmul.f32 0.3275911, %v116_v63  ;;  %v340_v14 = vsub.f32 0.0, %v116_v63  ;;  %v920_v17 = vand.u32 2147483647, %v903_v2 }
  0x23   :  { %v221_v62 = vmul.f32 %v871_v39, %v205_v50  ;;  %v905_v3 = vpop.eup %694  ;;  %v206_v7 = vadd.f32 -1.4531521, %v190_v33  ;;  %v191_v8 = vmul.f32 1.0614054, %v898_v61  ;;  %vm431_vm3 = vcmp.ge.f32.partialorder %v810_v25, 0.0 }
  0x24   :  { %v236_v4 = vadd.f32 1.4214138, %v220_v57  ;;  %v908_v9 = vpop.eup %696  ;;  %v148_v30 = vadd.f32 1.0, %v132_v13  ;;  %v356_v31 = vmul.f32 %v340_v14, %v116_v63  ;;  %v133_v60 = vmul.f32 0.3275911, %v920_v17 }
  0x25   :  { %v237_v11 = vadd.f32 1.4214138, %v221_v62  ;;  %v222_v21 = vmul.f32 %v884_v49, %v206_v7  ;;  %v207_v26 = vadd.f32 -1.4531521, %v191_v8  ;;  %v192_v16 = vmul.f32 1.0614054, %v908_v9  ;;  %v916_v28 = vpop.eup %698 }
  0x26   :  { %v252_v15 = vmul.f32 %v865_v35, %v236_v4  ;;  %v922_v34 = vpop.eup %700  ;;  %714 = vrcp.f32 %v148_v30  ;;  %v938_v63 = vmul.f32 1.442695, %v356_v31  ;;  %vm432_vm5 = vcmp.ge.f32.partialorder %v825_v51, 0.0 }
  0x27   :  { %v253_v29 = vmul.f32 %v871_v39, %v237_v11  ;;  %v238_v38 = vadd.f32 1.4214138, %v222_v21  ;;  %v223_v18 = vmul.f32 %v898_v61, %v207_v26  ;;  %v208_v40 = vadd.f32 -1.4531521, %v192_v16  ;;  %v929_v45 = vpop.eup %702 }
  0x28   :  { %v268_v37 = vadd.f32 -0.28449672, %v252_v15  ;;  %v193_v42 = vmul.f32 1.0614054, %v922_v34  ;;  %v934_v57 = vpop.eup %704  ;;  %v947_v26 = vadd.f32 1.0, %v133_v60  ;;  %vm433_vm6 = vcmp.ge.f32.partialorder %v829_v56, 0.0 }
  0x29   :  { %v269_v41 = vadd.f32 -0.28449672, %v253_v29  ;;  %v254_v48 = vmul.f32 %v884_v49, %v238_v38  ;;  %v239_v50 = vadd.f32 1.4214138, %v223_v18  ;;  %v224_v54 = vmul.f32 %v908_v9, %v208_v40 }
  0x2a   :  { %v284_v46 = vmul.f32 %v865_v35, %v268_v37  ;;  %v209_v62 = vadd.f32 -1.4531521, %v193_v42  ;;  %v943_v13 = vpop.eup %706  ;;  %v194_v21 = vmul.f32 1.0614054, %v934_v57  ;;  %716 = vrcp.f32 %v947_v26 }
  0x2b   :  { %v285_v33 = vmul.f32 %v871_v39, %v269_v41  ;;  %v270_v7 = vadd.f32 -0.28449672, %v254_v48  ;;  %v255_v8 = vmul.f32 %v898_v61, %v239_v50  ;;  %v240_v11 = vadd.f32 1.4214138, %v224_v54  ;;  %v709_v37 = vpop.eup %708 }
  0x2c   :  { %v300_v4 = vadd.f32 0.2548296, %v284_v46  ;;  %v225_v15 = vmul.f32 %v922_v34, %v209_v62  ;;  %v210_v40 = vadd.f32 -1.4531521, %v194_v21  ;;  %v195_v41 = vmul.f32 1.0614054, %v943_v13  ;;  %v955_v42 = vpop.eup %710 }
  0x2d   :  { %v301_v14 = vadd.f32 0.2548296, %v285_v33  ;;  %v286_v29 = vmul.f32 %v884_v49, %v270_v7  ;;  %v271_v30 = vadd.f32 -0.28449672, %v255_v8  ;;  %v256_v31 = vmul.f32 %v908_v9, %v240_v11  ;;  %v959_v54 = vpop.eup %712 }
  0x2e   :  { %v316_v16 = vmul.f32 %v865_v35, %v300_v4  ;;  %v241_v18 = vadd.f32 1.4214138, %v225_v15  ;;  %v226_v62 = vmul.f32 %v934_v57, %v210_v40  ;;  %v211_v60 = vadd.f32 -1.4531521, %v195_v41 }
  0x2f   :  { %v317_v38 = vmul.f32 %v871_v39, %v301_v14  ;;  %v302_v48 = vadd.f32 0.2548296, %v286_v29  ;;  %v287_v35 = vmul.f32 %v898_v61, %v271_v30  ;;  %v272_v50 = vadd.f32 -0.28449672, %v256_v31 }
  0x30   :  { %v396_v46 = vmul.f32 %v879_v32, %v316_v16  ;;  %v257_v39 = vmul.f32 %v922_v34, %v241_v18  ;;  %v242_v15 = vadd.f32 1.4214138, %v226_v62  ;;  %718 = vpow2.f32 %v938_v63 }
  0x31   :  { %v397_v33 = vmul.f32 %v893_v55, %v317_v38  ;;  %v318_v7 = vmul.f32 %v884_v49, %v302_v48  ;;  %v303_v32 = vadd.f32 0.2548296, %v287_v35  ;;  %v288_v8 = vmul.f32 %v908_v9, %v272_v50 }
  0x32   :  { %v412_v4 = vsub.f32 1.0, %v396_v46  ;;  %v273_v14 = vadd.f32 -0.28449672, %v257_v39  ;;  %v227_v55 = vmul.f32 %v943_v13, %v211_v60  ;;  %v258_v49 = vmul.f32 %v934_v57, %v242_v15 }
  0x33   :  { %v413_v11 = vsub.f32 1.0, %v397_v33  ;;  %v398_v16 = vmul.f32 %v905_v3, %v318_v7  ;;  %v319_v29 = vmul.f32 %v898_v61, %v303_v32  ;;  %v304_v30 = vadd.f32 0.2548296, %v288_v8  ;;  %v973_v40 = vpop.eup %714 }
  0x34   :  { %v444_v21 = vsub.f32 0.0, %v412_v4  ;;  %v289_v38 = vmul.f32 %v922_v34, %v273_v14  ;;  %v243_v18 = vadd.f32 1.4214138, %v227_v55  ;;  %v274_v33 = vadd.f32 -0.28449672, %v258_v49 }
  0x35   :  { %v445_v31 = vsub.f32 0.0, %v413_v11  ;;  %v414_v46 = vsub.f32 1.0, %v398_v16  ;;  %v399_v48 = vmul.f32 %v916_v28, %v319_v29  ;;  %v320_v35 = vmul.f32 %v908_v9, %v304_v30 }
  0x36   :  { %v460_v41 = vsel %vm428_vm0, %v412_v4, %v444_v21  ;;  %v305_v50 = vadd.f32 0.2548296, %v289_v38  ;;  %v290_v28 = vmul.f32 %v934_v57, %v274_v33  ;;  %v259_v9 = vmul.f32 %v943_v13, %v243_v18 }
  0x37   :  { %v492_v61 = vadd.f32 1.0, %v460_v41  ;;  %v461_v3 = vsel %vm429_vm1, %v413_v11, %v445_v31  ;;  %v446_v62 = vsub.f32 0.0, %v414_v46  ;;  %v415_v60 = vsub.f32 1.0, %v399_v48 }
  0x38   :  { %v493_v39 = vadd.f32 1.0, %v461_v3  ;;  %v400_v7 = vmul.f32 %v929_v45, %v320_v35  ;;  %v321_v4 = vmul.f32 %v922_v34, %v305_v50  ;;  %v306_v21 = vadd.f32 0.2548296, %v290_v28 }
  0x39   :  { %v508_v22 = vmul.f32 %v492_v61, %v841_v5  ;;  %v462_v23 = vsel %vm430_vm2, %v414_v46, %v446_v62  ;;  %v447_v8 = vsub.f32 0.0, %v415_v60  ;;  %v275_v16 = vadd.f32 -0.28449672, %v259_v9 }
  0x3a   :  { %v509_v32 = vmul.f32 %v493_v39, %v847_v10  ;;  %v416_v11 = vsub.f32 1.0, %v400_v7  ;;  %v494_v15 = vadd.f32 1.0, %v462_v23  ;;  %v401_v55 = vmul.f32 %v709_v37, %v321_v4  ;;  %v680_v4 = vld [vmem:[%s1180_s0 + $0x30] sm:$0xff]  }
  0x3b   :  { %v627_v14 = vpack.c.bf16 %v508_v22, %v508_v22  ;;  %v463_v5 = vsel %vm431_vm3, %v415_v60, %v447_v8  ;;  %v322_v30 = vmul.f32 %v934_v57, %v306_v21  ;;  %v291_v37 = vmul.f32 %v943_v13, %v275_v16  ;;  %v1056_v21 = vpop.eup %716 }
  0x3c   :  { %v628_v45 = vpack.c.bf16 %v509_v32, %v509_v32  ;;  %v448_v34 = vsub.f32 0.0, %v416_v11  ;;  %v510_v24 = vmul.f32 %v494_v15, %v853_v20  ;;  %v495_v10 = vadd.f32 1.0, %v463_v5 }
  0x3d   :  { %589 = vst.msk [vmem:[%s1183_s3] sm:$0xf] %vm588_vm4, %v627_v14  ;;  %v417_v29 = vsub.f32 1.0, %v401_v55  ;;  %v196_v31 = vmul.f32 1.0614054, %v973_v40  ;;  %v402_v57 = vmul.f32 %v955_v42, %v322_v30  ;;  %vm434_vm7 = vcmp.ge.f32.partialorder %v839_v0, 0.0 }
  0x3e   :  { %590 = vst.msk [vmem:[%s1183_s3 + $0x4] sm:$0xf] %vm588_vm4, %v628_v45  ;;  %v464_v25 = vsel %vm432_vm5, %v416_v11, %v448_v34  ;;  %v629_v38 = vpack.c.bf16 %v510_v24, %v510_v24  ;;  %v511_v20 = vmul.f32 %v495_v10, %v862_v27  ;;  %v307_v41 = vadd.f32 0.2548296, %v291_v37 }
  0x3f   :  { %v496_v49 = vadd.f32 1.0, %v464_v25  ;;  %v449_v18 = vsub.f32 0.0, %v417_v29  ;;  %v212_v46 = vadd.f32 -1.4531521, %v196_v31  ;;  %v341_v27 = vsub.f32 0.0, %v920_v17 }
  0x40   :  { %591 = vst.msk [vmem:[%s1183_s3 + $0x8] sm:$0xf] %vm588_vm4, %v629_v38  ;;  %v630_v51 = vpack.c.bf16 %v511_v20, %v511_v20  ;;  %v418_v61 = vsub.f32 1.0, %v402_v57  ;;  %v323_v42 = vmul.f32 %v943_v13, %v307_v41  ;;  %v482_v13 = vmul.f32 0.5, %v832_v58 }
  0x41   :  { %v512_v48 = vmul.f32 %v496_v49, %v868_v36  ;;  %v465_v26 = vsel %vm433_vm6, %v417_v29, %v449_v18  ;;  %v228_v3 = vmul.f32 %v973_v40, %v212_v46  ;;  %v1026_v36 = vmul.f32 0.70710677, %v911_v19  ;;  %v719_v29 = vpop.eup %718 }
  0x42   :  { %v497_v35 = vadd.f32 1.0, %v465_v26  ;;  %592 = vst.msk [vmem:[%s1183_s3 + $0xc] sm:$0xf] %vm588_vm4, %v630_v51  ;;  %v450_v50 = vsub.f32 0.0, %v418_v61  ;;  %v403_v33 = vmul.f32 %v959_v54, %v323_v42  ;;  %v357_v62 = vmul.f32 %v341_v27, %v920_v17 }
  0x43   :  { %v631_v63 = vpack.c.bf16 %v512_v48, %v512_v48  ;;  %v244_v39 = vadd.f32 1.4214138, %v228_v3  ;;  %v118_v0 = vand.u32 2147483647, %v1026_v36  ;;  %v1039_v60 = vadd.f32 %v783_v6, %v927_v43 }
  0x44   :  { %v513_v56 = vmul.f32 %v497_v35, %v882_v47  ;;  %v466_v7 = vsel %vm434_vm7, %v418_v61, %v450_v50  ;;  %v419_v22 = vsub.f32 1.0, %v403_v33  ;;  %vm435_vm8 = vcmp.ge.f32.partialorder %v850_v12, 0.0 }
  0x45   :  { %593 = vst.msk [vmem:[%s1183_s3 + $0x10] sm:$0xf] %vm588_vm4, %v631_v63  ;;  %v260_v54 = vmul.f32 %v973_v40, %v244_v39  ;;  %v498_v28 = vadd.f32 1.0, %v466_v7  ;;  %v134_v58 = vmul.f32 0.3275911, %v118_v0  ;;  %v483_v43 = vmul.f32 0.5, %v835_v59 }
  0x46   :  { %v632_v47 = vpack.c.bf16 %v513_v56, %v513_v56  ;;  %v451_v17 = vsub.f32 0.0, %v419_v22  ;;  %v1052_v32 = vmul.f32 0.70710677, %v1039_v60  ;;  %v382_v8 = vmul.f32 1.442695, %v357_v62  ;;  %v1061_v59 = vld [vmem:[%s1180_s0 + $0x38] sm:$0xff]  }
  0x47   :  { %v276_v9 = vadd.f32 -0.28449672, %v260_v54  ;;  %v514_v23 = vmul.f32 %v498_v28, %v482_v13  ;;  %v150_v11 = vadd.f32 1.0, %v134_v58  ;;  %v669_v14 = vunpack.c.l.bf16 %v680_v4 }
  0x48   :  { %594 = vst.msk [vmem:[%s1183_s3 + $0x14] sm:$0xf] %vm588_vm4, %v632_v47  ;;  %v467_v15 = vsel %vm435_vm8, %v419_v22, %v451_v17  ;;  %v119_v55 = vand.u32 2147483647, %v1052_v32  ;;  %v197_v16 = vmul.f32 1.0614054, %v1056_v21  ;;  %v670_v37 = vunpack.c.h.bf16 %v680_v4 }
  0x49   :  { %v292_v12 = vmul.f32 %v973_v40, %v276_v9  ;;  %v633_v45 = vpack.c.bf16 %v514_v23, %v514_v23  ;;  %v499_v5 = vadd.f32 1.0, %v467_v15  ;;  %720 = vrcp.f32 %v150_v11 }
  0x4a   :  { %v135_v24 = vmul.f32 0.3275911, %v119_v55  ;;  %v65_v10 = vmul.f32 %v669_v14, %v772_v1  ;;  %722 = vpow2.f32 %v382_v8  ;;  %v342_v25 = vsub.f32 0.0, %v118_v0 }
  0x4b   :  { %v308_v34 = vadd.f32 0.2548296, %v292_v12  ;;  %595 = vst.msk [vmem:[%s1183_s3 + $0x18] sm:$0xf] %vm588_vm4, %v633_v45  ;;  %v515_v30 = vmul.f32 %v499_v5, %v483_v43  ;;  %v213_v38 = vadd.f32 -1.4531521, %v197_v16  ;;  %v66_v57 = vmul.f32 %v670_v37, %v772_v1 }
  0x4c   :  { %v151_v20 = vadd.f32 1.0, %v135_v24  ;;  %v1071_v49 = vadd.f32 %v783_v6, %v65_v10  ;;  %v673_v41 = vunpack.c.l.bf16 %v1061_v59  ;;  %v358_v61 = vmul.f32 %v342_v25, %v118_v0 }
  0x4d   :  { %v324_v31 = vmul.f32 %v973_v40, %v308_v34  ;;  %v634_v18 = vpack.c.bf16 %v515_v30, %v515_v30  ;;  %v229_v51 = vmul.f32 %v1056_v21, %v213_v38  ;;  %v1084_v40 = vadd.f32 %v783_v6, %v66_v57 }
  0x4e   :  { %724 = vrcp.f32 %v151_v20  ;;  %v1077_v48 = vmul.f32 0.70710677, %v1071_v49  ;;  %v67_v26 = vmul.f32 %v673_v41, %v772_v1  ;;  %vm436_vm9 = vcmp.ge.f32.partialorder %v887_v52, 0.0 }
  0x4f   :  { %v404_v46 = vmul.f32 %v719_v29, %v324_v31  ;;  %596 = vst.msk [vmem:[%s1183_s3 + $0x1c] sm:$0xf] %vm588_vm4, %v634_v18  ;;  %v245_v35 = vadd.f32 1.4214138, %v229_v51  ;;  %v343_v3 = vsub.f32 0.0, %v119_v55  ;;  %v484_v13 = vmul.f32 0.5, %v876_v44 }
  0x50   :  { %v120_v42 = vand.u32 2147483647, %v1077_v48  ;;  %v1090_v63 = vmul.f32 0.70710677, %v1084_v40  ;;  %v1093_v56 = vadd.f32 %v783_v6, %v67_v26  ;;  %v384_v7 = vmul.f32 1.442695, %v358_v61 }
  0x51   :  { %v420_v27 = vsub.f32 1.0, %v404_v46  ;;  %v261_v33 = vmul.f32 %v1056_v21, %v245_v35  ;;  %v359_v4 = vmul.f32 %v343_v3, %v119_v55  ;;  %v674_v16 = vunpack.c.h.bf16 %v1061_v59 }
  0x52   :  { %v136_v39 = vmul.f32 0.3275911, %v120_v42  ;;  %v121_v62 = vand.u32 2147483647, %v1090_v63  ;;  %v1099_v0 = vmul.f32 0.70710677, %v1093_v56 }
  0x53   :  { %v452_v50 = vsub.f32 0.0, %v420_v27  ;;  %v277_v52 = vadd.f32 -0.28449672, %v261_v33  ;;  %v386_v45 = vmul.f32 1.442695, %v359_v4  ;;  %v344_v5 = vsub.f32 0.0, %v120_v42 }
  0x54   :  { %v152_v22 = vadd.f32 1.0, %v136_v39  ;;  %v137_v28 = vmul.f32 0.3275911, %v121_v62  ;;  %v122_v58 = vand.u32 2147483647, %v1099_v0  ;;  %v345_v25 = vsub.f32 0.0, %v121_v62 }
  0x55   :  { %v468_v47 = vsel %vm436_vm9, %v420_v27, %v452_v50  ;;  %v293_v43 = vmul.f32 %v1056_v21, %v277_v52  ;;  %v68_v31 = vmul.f32 %v674_v16, %v772_v1  ;;  %v360_v20 = vmul.f32 %v344_v5, %v120_v42 }
  0x56   :  { %v500_v54 = vadd.f32 1.0, %v468_v47  ;;  %v721_v17 = vpop.eup %720  ;;  %726 = vrcp.f32 %v152_v22  ;;  %v153_v23 = vadd.f32 1.0, %v137_v28  ;;  %v138_v14 = vmul.f32 0.3275911, %v122_v58 }
  0x57   :  { %v198_v44 = vmul.f32 1.0614054, %v721_v17  ;;  %v723_v8 = vpop.eup %722  ;;  %v309_v11 = vadd.f32 0.2548296, %v293_v43  ;;  %728 = vpow2.f32 %v384_v7  ;;  %vm437_vm10 = vcmp.ge.f32.partialorder %v903_v2, 0.0 }
  0x58   :  { %v516_v9 = vmul.f32 %v500_v54, %v484_v13  ;;  %730 = vrcp.f32 %v153_v23  ;;  %v154_v34 = vadd.f32 1.0, %v138_v14  ;;  %v1112_v18 = vadd.f32 %v783_v6, %v68_v31 }
  0x59   :  { %v214_v12 = vadd.f32 -1.4531521, %v198_v44  ;;  %v325_v55 = vmul.f32 %v1056_v21, %v309_v11  ;;  %v361_v46 = vmul.f32 %v345_v25, %v121_v62  ;;  %v346_v51 = vsub.f32 0.0, %v122_v58 }
  0x5a   :  { %v635_v15 = vpack.c.bf16 %v516_v9, %v516_v9  ;;  %732 = vrcp.f32 %v154_v34  ;;  %v485_v26 = vmul.f32 0.5, %v890_v53  ;;  %v1116_v35 = vmul.f32 0.70710677, %v1112_v18 }
  0x5b   :  { %v725_v24 = vpop.eup %724  ;;  %v230_v10 = vmul.f32 %v721_v17, %v214_v12  ;;  %v405_v29 = vmul.f32 %v723_v8, %v325_v55  ;;  %734 = vpow2.f32 %v386_v45  ;;  %v388_v3 = vmul.f32 1.442695, %v360_v20 }
  0x5c   :  { %597 = vst.msk [vmem:[%s1183_s3 + $0x20] sm:$0xf] %vm588_vm4, %v635_v15  ;;  %v199_v30 = vmul.f32 1.0614054, %v725_v24  ;;  %v123_v6 = vand.u32 2147483647, %v1116_v35  ;;  %v362_v62 = vmul.f32 %v346_v51, %v122_v58 }
  0x5d   :  { %v246_v37 = vadd.f32 1.4214138, %v230_v10  ;;  %v421_v38 = vsub.f32 1.0, %v405_v29  ;;  %v390_v13 = vmul.f32 1.442695, %v361_v46  ;;  %736 = vpow2.f32 %v388_v3 }
  0x5e   :  { %v215_v21 = vadd.f32 -1.4531521, %v199_v30  ;;  %v139_v7 = vmul.f32 0.3275911, %v123_v6  ;;  %v392_v11 = vmul.f32 1.442695, %v362_v62 }
  0x5f   :  { %v262_v59 = vmul.f32 %v721_v17, %v246_v37  ;;  %v453_v57 = vsub.f32 0.0, %v421_v38  ;;  %738 = vpow2.f32 %v390_v13  ;;  %vm438_vm11 = vcmp.ge.f32.partialorder %v1026_v36, 0.0 }
  0x60   :  { %v231_v41 = vmul.f32 %v725_v24, %v215_v21  ;;  %v155_v44 = vadd.f32 1.0, %v139_v7  ;;  %v347_v37 = vsub.f32 0.0, %v123_v6  ;;  %v486_v31 = vmul.f32 0.5, %v911_v19 }
  0x61   :  { %v278_v27 = vadd.f32 -0.28449672, %v262_v59  ;;  %v469_v1 = vsel %vm437_vm10, %v421_v38, %v453_v57  ;;  %vm439_vm12 = vcmp.ge.f32.partialorder %v1052_v32, 0.0  ;;  %vm440_vm13 = vcmp.ge.f32.partialorder %v1077_v48, 0.0 }
  0x62   :  { %v247_v61 = vadd.f32 1.4214138, %v231_v41  ;;  %v501_v2 = vadd.f32 1.0, %v469_v1  ;;  %740 = vrcp.f32 %v155_v44  ;;  %vm441_vm14 = vcmp.ge.f32.partialorder %v1090_v63, 0.0 }
  0x63   :  { %v1118_v42 = vpop.eup %726  ;;  %v294_v50 = vmul.f32 %v721_v17, %v278_v27  ;;  %742 = vpow2.f32 %v392_v11  ;;  %vm442_vm15 = vcmp.ge.f32.partialorder %v1099_v0, 0.0  ;;  %vm443_vm0 = vcmp.ge.f32.partialorder %v1116_v35, 0.0 }
  0x64   :  { %v263_v33 = vmul.f32 %v725_v24, %v247_v61  ;;  %v200_v39 = vmul.f32 1.0614054, %v1118_v42  ;;  %v729_v47 = vpop.eup %728  ;;  %v517_v53 = vmul.f32 %v501_v2, %v485_v26  ;;  %v363_v26 = vmul.f32 %v347_v37, %v123_v6 }
  0x65   :  { %v310_v52 = vadd.f32 0.2548296, %v294_v50  ;;  %v1122_v22 = vpop.eup %730  ;;  %v487_v2 = vmul.f32 0.5, %v1039_v60  ;;  %v490_v37 = vmul.f32 0.5, %v1093_v56 }
  0x66   :  { %v279_v54 = vadd.f32 -0.28449672, %v263_v33  ;;  %v216_v4 = vadd.f32 -1.4531521, %v200_v39  ;;  %v636_v28 = vpack.c.bf16 %v517_v53, %v517_v53  ;;  %v201_v9 = vmul.f32 1.0614054, %v1122_v22 }
  0x67   :  { %v326_v43 = vmul.f32 %v721_v17, %v310_v52  ;;  %v1126_v58 = vpop.eup %732  ;;  %v394_v52 = vmul.f32 1.442695, %v363_v26 }
  0x68   :  { %v295_v23 = vmul.f32 %v725_v24, %v279_v54  ;;  %v232_v8 = vmul.f32 %v1118_v42, %v216_v4  ;;  %598 = vst.msk [vmem:[%s1183_s3 + $0x24] sm:$0xf] %vm588_vm4, %v636_v28  ;;  %v217_v15 = vadd.f32 -1.4531521, %v201_v9  ;;  %v202_v45 = vmul.f32 1.0614054, %v1126_v58  ;;  %v735_v55 = vpop.eup %734 }
  0x69   :  { %v406_v14 = vmul.f32 %v729_v47, %v326_v43  ;;  %744 = vpow2.f32 %v394_v52 }
  0x6a   :  { %v311_v12 = vadd.f32 0.2548296, %v295_v23  ;;  %v248_v17 = vadd.f32 1.4214138, %v232_v8  ;;  %v233_v34 = vmul.f32 %v1122_v22, %v217_v15  ;;  %v218_v29 = vadd.f32 -1.4531521, %v202_v45  ;;  %v737_v3 = vpop.eup %736 }
  0x6b   :  { %v422_v5 = vsub.f32 1.0, %v406_v14 }
  0x6c   :  { %v327_v16 = vmul.f32 %v725_v24, %v311_v12  ;;  %v264_v10 = vmul.f32 %v1118_v42, %v248_v17  ;;  %v249_v25 = vadd.f32 1.4214138, %v233_v34  ;;  %v234_v20 = vmul.f32 %v1126_v58, %v218_v29  ;;  %v739_v47 = vpop.eup %738 }
  0x6d   :  { %v454_v30 = vsub.f32 0.0, %v422_v5  ;;  %v489_v34 = vmul.f32 0.5, %v1084_v40 }
  0x6e   :  { %v407_v38 = vmul.f32 %v735_v55, %v327_v16  ;;  %v280_v21 = vadd.f32 -0.28449672, %v264_v10  ;;  %v265_v57 = vmul.f32 %v1122_v22, %v249_v25  ;;  %v250_v46 = vadd.f32 1.4214138, %v234_v20 }
  0x6f   :  { %v470_v59 = vsel %vm438_vm11, %v422_v5, %v454_v30  ;;  %v741_v6 = vpop.eup %740 }
  0x70   :  { %v502_v36 = vadd.f32 1.0, %v470_v59  ;;  %v423_v41 = vsub.f32 1.0, %v407_v38  ;;  %v296_v24 = vmul.f32 %v1118_v42, %v280_v21  ;;  %v281_v51 = vadd.f32 -0.28449672, %v265_v57  ;;  %v743_v9 = vpop.eup %742 }
  0x71   :  { %v266_v19 = vmul.f32 %v1126_v58, %v250_v46  ;;  %v203_v28 = vmul.f32 1.0614054, %v741_v6 }
  0x72   :  { %v518_v27 = vmul.f32 %v502_v36, %v486_v31  ;;  %v455_v1 = vsub.f32 0.0, %v423_v41  ;;  %v312_v61 = vadd.f32 0.2548296, %v296_v24  ;;  %v297_v50 = vmul.f32 %v1122_v22, %v281_v51 }
  0x73   :  { %v282_v62 = vadd.f32 -0.28449672, %v266_v19  ;;  %v219_v8 = vadd.f32 -1.4531521, %v203_v28  ;;  %v491_v51 = vmul.f32 0.5, %v1112_v18 }
  0x74   :  { %v637_v33 = vpack.c.bf16 %v518_v27, %v518_v27  ;;  %v471_v39 = vsel %vm439_vm12, %v423_v41, %v455_v1  ;;  %v328_v13 = vmul.f32 %v1118_v42, %v312_v61  ;;  %v313_v32 = vadd.f32 0.2548296, %v297_v50 }
  0x75   :  { %v503_v53 = vadd.f32 1.0, %v471_v39  ;;  %v298_v60 = vmul.f32 %v1126_v58, %v282_v62  ;;  %v235_v12 = vmul.f32 %v741_v6, %v219_v8 }
  0x76   :  { %599 = vst.msk [vmem:[%s1183_s3 + $0x28] sm:$0xf] %vm588_vm4, %v637_v33  ;;  %v408_v7 = vmul.f32 %v737_v3, %v328_v13  ;;  %v329_v4 = vmul.f32 %v1122_v22, %v313_v32  ;;  %v488_v22 = vmul.f32 0.5, %v1071_v49  ;;  %v745_v0 = vpop.eup %744 }
  0x77   :  { %v519_v54 = vmul.f32 %v503_v53, %v487_v2  ;;  %v314_v42 = vadd.f32 0.2548296, %v298_v60  ;;  %v251_v5 = vadd.f32 1.4214138, %v235_v12 }
  0x78   :  { %v424_v43 = vsub.f32 1.0, %v408_v7  ;;  %v409_v23 = vmul.f32 %v739_v47, %v329_v4 }
  0x79   :  { %v638_v44 = vpack.c.bf16 %v519_v54, %v519_v54  ;;  %v330_v14 = vmul.f32 %v1126_v58, %v314_v42  ;;  %v267_v29 = vmul.f32 %v741_v6, %v251_v5 }
  0x7a   :  { %v456_v11 = vsub.f32 0.0, %v424_v43  ;;  %v425_v15 = vsub.f32 1.0, %v409_v23 }
  0x7b   :  { %600 = vst.msk [vmem:[%s1183_s3 + $0x2c] sm:$0xf] %vm588_vm4, %v638_v44  ;;  %v410_v48 = vmul.f32 %v743_v9, %v330_v14  ;;  %v283_v31 = vadd.f32 -0.28449672, %v267_v29 }
  0x7c   :  { %v472_v17 = vsel %vm440_vm13, %v424_v43, %v456_v11  ;;  %v457_v55 = vsub.f32 0.0, %v425_v15 }
  0x7d   :  { %v504_v45 = vadd.f32 1.0, %v472_v17  ;;  %v426_v16 = vsub.f32 1.0, %v410_v48  ;;  %v299_v21 = vmul.f32 %v741_v6, %v283_v31 }
  0x7e   :  { %v473_v10 = vsel %vm441_vm14, %v425_v15, %v457_v55 }
  0x7f   :  { %v520_v58 = vmul.f32 %v504_v45, %v488_v22  ;;  %v505_v30 = vadd.f32 1.0, %v473_v10  ;;  %v458_v25 = vsub.f32 0.0, %v426_v16  ;;  %v315_v57 = vadd.f32 0.2548296, %v299_v21 }
  0x81   :  { %v639_v49 = vpack.c.bf16 %v520_v58, %v520_v58  ;;  %v521_v38 = vmul.f32 %v505_v30, %v489_v34  ;;  %v474_v63 = vsel %vm442_vm15, %v426_v16, %v458_v25  ;;  %v331_v36 = vmul.f32 %v741_v6, %v315_v57 }
  0x82   :  { %v506_v40 = vadd.f32 1.0, %v474_v63 }
  0x83   :  { %601 = vst.msk [vmem:[%s1183_s3 + $0x30] sm:$0xf] %vm588_vm4, %v639_v49  ;;  %v640_v20 = vpack.c.bf16 %v521_v38, %v521_v38  ;;  %v411_v41 = vmul.f32 %v745_v0, %v331_v36 }
  0x84   :  { %v522_v59 = vmul.f32 %v506_v40, %v490_v37 }
  0x85   :  { %602 = vst.msk [vmem:[%s1183_s3 + $0x34] sm:$0xf] %vm588_vm4, %v640_v20  ;;  %v427_v24 = vsub.f32 1.0, %v411_v41 }
  0x86   :  { %v641_v56 = vpack.c.bf16 %v522_v59, %v522_v59 }
  0x87   :  { %v459_v46 = vsub.f32 0.0, %v427_v24 }
  0x88   :  { %603 = vst.msk [vmem:[%s1183_s3 + $0x38] sm:$0xf] %vm588_vm4, %v641_v56 }
  0x89   :  { %v475_v26 = vsel %vm443_vm0, %v427_v24, %v459_v46 }
  0x8a   :  { %v507_v27 = vadd.f32 1.0, %v475_v26 }
  0x8c   :  { %v523_v1 = vmul.f32 %v507_v27, %v491_v51 }
  0x8e   :  { %v642_v61 = vpack.c.bf16 %v523_v1, %v523_v1 }
  0x90   :  { %604 = vst.msk [vmem:[%s1183_s3 + $0x3c] sm:$0xf] %vm588_vm4, %v642_v61 }

// kernel: seg_tran_forward.50
= control target key start
LH: loop header
LB: loop body
LE: loop exit
PB: predicated region body
PF: predicated region fallthrough
CT: control target
= control target key end

     0   :  { %s1460_s1 = inlined_call_operand.vmem [shape: bf16[512,128], index: 1, kind: input, shape index: {}]   ;;  %s1461_s0 = inlined_call_operand.vmem [shape: bf16[128,512], index: 0, kind: input, shape index: {}]   ;;  %s1462_s2 = inlined_call_operand.vmem [shape: f32[1,128], index: 2, kind: input, shape index: {}]   ;;  %s1463_s3 = inlined_call_operand.vmem [shape: bf16[128,128], index: 3, kind: output, shape index: {}]  }
   0x1   :  { %v1123_v0 = vld [vmem:[%s1460_s1 + $0x78] sm:$0xff]   ;;  %v1127_v4 = vld [vmem:[%s1460_s1 + $0x70] sm:$0xff]   ;;  %v1131_v8 = vld [vmem:[%s1460_s1 + $0x68] sm:$0xff]  }
   0x2   :  { %v1124_v1 = vld [vmem:[%s1460_s1 + $0xf8] sm:$0xff]   ;;  %995 = vmatprep.subr.bf16.mxu0 %v1123_v0  ;;  %v1128_v5 = vld [vmem:[%s1460_s1 + $0xf0] sm:$0xff]   ;;  %v1132_v9 = vld [vmem:[%s1460_s1 + $0xe8] sm:$0xff]  }
   0x3   :  { %v1125_v2 = vld [vmem:[%s1460_s1 + $0x38] sm:$0xff]   ;;  %1059 = vmatprep.subr.bf16.mxu1 %v1124_v1  ;;  %v1129_v6 = vld [vmem:[%s1460_s1 + $0x30] sm:$0xff]   ;;  %v1133_v10 = vld [vmem:[%s1460_s1 + $0x28] sm:$0xff]  }
   0x4   :  { %v1126_v3 = vld [vmem:[%s1460_s1 + $0xb8] sm:$0xff]   ;;  %996 = vmatpush3.bf16.msra.mxu0 %v1125_v2  ;;  %v1130_v7 = vld [vmem:[%s1460_s1 + $0xb0] sm:$0xff]   ;;  %v1134_v11 = vld [vmem:[%s1460_s1 + $0xa8] sm:$0xff]  }
   0x5   :  { %1060 = vmatpush3.bf16.msra.mxu1 %v1126_v3  ;;  %997 = vmatprep.subr.bf16.mxu0 %v1127_v4  ;;  %v1135_v12 = vld [vmem:[%s1460_s1 + $0x60] sm:$0xff]   ;;  %v1139_v16 = vld [vmem:[%s1460_s1 + $0x58] sm:$0xff]   ;;  %v1143_v20 = vld [vmem:[%s1460_s1 + $0x50] sm:$0xff]  }
   0x6   :  { %1061 = vmatprep.subr.bf16.mxu1 %v1128_v5  ;;  %v1136_v13 = vld [vmem:[%s1460_s1 + $0xe0] sm:$0xff]   ;;  %v1140_v17 = vld [vmem:[%s1460_s1 + $0xd8] sm:$0xff]   ;;  %v1144_v21 = vld [vmem:[%s1460_s1 + $0xd0] sm:$0xff]  }
   0x7   :  { %v1137_v14 = vld [vmem:[%s1460_s1 + $0x20] sm:$0xff]   ;;  %v1141_v18 = vld [vmem:[%s1460_s1 + $0x18] sm:$0xff]   ;;  %v1145_v22 = vld [vmem:[%s1460_s1 + $0x10] sm:$0xff]  }
   0x8   :  { %998 = vmatpush3.bf16.msra.mxu0 %v1129_v6  ;;  %v1138_v15 = vld [vmem:[%s1460_s1 + $0xa0] sm:$0xff]   ;;  %v1142_v19 = vld [vmem:[%s1460_s1 + $0x98] sm:$0xff]   ;;  %v1146_v23 = vld [vmem:[%s1460_s1 + $0x90] sm:$0xff]  }
   0x9   :  { %1062 = vmatpush3.bf16.msra.mxu1 %v1130_v7  ;;  %999 = vmatprep.subr.bf16.mxu0 %v1131_v8  ;;  %v1147_v24 = vld [vmem:[%s1460_s1 + $0x48] sm:$0xff]   ;;  %v1151_v28 = vld [vmem:[%s1460_s1 + $0x40] sm:$0xff]  }
   0xa   :  { %1063 = vmatprep.subr.bf16.mxu1 %v1132_v9  ;;  %v1148_v25 = vld [vmem:[%s1460_s1 + $0xc8] sm:$0xff]   ;;  %v1152_v29 = vld [vmem:[%s1460_s1 + $0xc0] sm:$0xff]  }
   0xb   :  { %v1149_v26 = vld [vmem:[%s1460_s1 + $0x8] sm:$0xff]   ;;  %v1153_v30 = vld [vmem:[%s1460_s1] sm:$0xff]  }
   0xc   :  { %1000 = vmatpush3.bf16.msra.mxu0 %v1133_v10  ;;  %v1150_v27 = vld [vmem:[%s1460_s1 + $0x88] sm:$0xff]   ;;  %v1154_v31 = vld [vmem:[%s1460_s1 + $0x80] sm:$0xff]  }
   0xd   :  { %1064 = vmatpush3.bf16.msra.mxu1 %v1134_v11  ;;  %1001 = vmatprep.subr.bf16.mxu0 %v1135_v12  ;;  %v1155_v32 = vld [vmem:[%s1461_s0] ss:$16 sps:$4 sm:$0xff]   ;;  %v1157_v33 = vld [vmem:[%s1461_s0 + $0x4] ss:$16 sps:$4 sm:$0xff]   ;;  %v1158_v34 = vld [vmem:[%s1461_s0 + $0x8] ss:$16 sps:$4 sm:$0xff]  }
   0xe   :  { %1065 = vmatprep.subr.bf16.mxu1 %v1136_v13  ;;  %v1160_v35 = vld [vmem:[%s1461_s0 + $0xc] ss:$16 sps:$4 sm:$0xff]   ;;  %531 = vmatprep.mubr.bf16.mxu0 %v1157_v33  ;;  %v1161_v36 = vld [vmem:[%s1461_s0 + $0x24] ss:$16 sps:$4 sm:$0xff]   ;;  %v1165_v38 = vld [vmem:[%s1461_s0 + $0x20] ss:$16 sps:$4 sm:$0xff]  }
   0xf   :  { %628 = vmatprep.mubr.bf16.mxu1 %v1160_v35  ;;  %v1163_v37 = vld [vmem:[%s1461_s0 + $0x2c] ss:$16 sps:$4 sm:$0xff]   ;;  %v1166_v39 = vld [vmem:[%s1461_s0 + $0x28] ss:$16 sps:$4 sm:$0xff]   ;;  %v1167_v40 = vld [vmem:[%s1461_s0 + $0x44] ss:$16 sps:$4 sm:$0xff]  }
  0x10   :  { %1002 = vmatpush3.bf16.msra.mxu0 %v1137_v14  ;;  %v1169_v41 = vld [vmem:[%s1461_s0 + $0x4c] ss:$16 sps:$4 sm:$0xff]   ;;  %v1171_v42 = vld [vmem:[%s1461_s0 + $0x40] ss:$16 sps:$4 sm:$0xff]   ;;  %v1172_v43 = vld [vmem:[%s1461_s0 + $0x48] ss:$16 sps:$4 sm:$0xff]  }
  0x11   :  { %1066 = vmatpush3.bf16.msra.mxu1 %v1138_v15  ;;  %1003 = vmatprep.subr.bf16.mxu0 %v1139_v16  ;;  %v1173_v44 = vld [vmem:[%s1461_s0 + $0x64] ss:$16 sps:$4 sm:$0xff]   ;;  %v1175_v45 = vld [vmem:[%s1461_s0 + $0x6c] ss:$16 sps:$4 sm:$0xff]   ;;  %v1177_v46 = vld [vmem:[%s1461_s0 + $0x60] ss:$16 sps:$4 sm:$0xff]  }
  0x12   :  { %1067 = vmatprep.subr.bf16.mxu1 %v1140_v17  ;;  %v1178_v47 = vld [vmem:[%s1461_s0 + $0x68] ss:$16 sps:$4 sm:$0xff]   ;;  %v1179_v48 = vld [vmem:[%s1461_s0 + $0x84] ss:$16 sps:$4 sm:$0xff]   ;;  %v1181_v49 = vld [vmem:[%s1461_s0 + $0x8c] ss:$16 sps:$4 sm:$0xff]  }
  0x13   :  { %v1183_v50 = vld [vmem:[%s1461_s0 + $0x80] ss:$16 sps:$4 sm:$0xff]   ;;  %v1184_v51 = vld [vmem:[%s1461_s0 + $0x88] ss:$16 sps:$4 sm:$0xff]   ;;  %v1185_v52 = vld [vmem:[%s1461_s0 + $0xa4] ss:$16 sps:$4 sm:$0xff]  }
  0x14   :  { %1004 = vmatpush3.bf16.msra.mxu0 %v1141_v18  ;;  %v1187_v53 = vld [vmem:[%s1461_s0 + $0xac] ss:$16 sps:$4 sm:$0xff]   ;;  %v1189_v54 = vld [vmem:[%s1461_s0 + $0xa0] ss:$16 sps:$4 sm:$0xff]   ;;  %v1190_v55 = vld [vmem:[%s1461_s0 + $0xa8] ss:$16 sps:$4 sm:$0xff]  }
  0x15   :  { %1068 = vmatpush3.bf16.msra.mxu1 %v1142_v19  ;;  %1005 = vmatprep.subr.bf16.mxu0 %v1143_v20  ;;  %v1191_v56 = vld [vmem:[%s1461_s0 + $0xc4] ss:$16 sps:$4 sm:$0xff]   ;;  %v1193_v57 = vld [vmem:[%s1461_s0 + $0xcc] ss:$16 sps:$4 sm:$0xff]   ;;  %v1195_v58 = vld [vmem:[%s1461_s0 + $0xc0] ss:$16 sps:$4 sm:$0xff]  }
  0x16   :  { %1069 = vmatprep.subr.bf16.mxu1 %v1144_v21  ;;  %v1196_v59 = vld [vmem:[%s1461_s0 + $0xc8] ss:$16 sps:$4 sm:$0xff]   ;;  %v1197_v60 = vld [vmem:[%s1461_s0 + $0xe4] ss:$16 sps:$4 sm:$0xff]   ;;  %v1199_v61 = vld [vmem:[%s1461_s0 + $0xec] ss:$16 sps:$4 sm:$0xff]  }
  0x17   :  { %v1201_v62 = vld [vmem:[%s1461_s0 + $0xe0] ss:$16 sps:$4 sm:$0xff]   ;;  %v1202_v63 = vld [vmem:[%s1461_s0 + $0xe8] ss:$16 sps:$4 sm:$0xff]  }
  0x18   :  { %1006 = vmatpush3.bf16.msra.mxu0 %v1145_v22  ;;  %v1418_v14 = vld [vmem:[%s1462_s2] ss:$0 sm:$0xff] }
  0x19   :  { %1070 = vmatpush3.bf16.msra.mxu1 %v1146_v23  ;;  %1007 = vmatprep.subr.bf16.mxu0 %v1147_v24 }
  0x1a   :  { %1071 = vmatprep.subr.bf16.mxu1 %v1148_v25 }
  0x1c   :  { %1008 = vmatpush3.bf16.msra.mxu0 %v1149_v26 }
  0x1d   :  { %1072 = vmatpush3.bf16.msra.mxu1 %v1150_v27  ;;  %1009 = vmatprep.subr.bf16.mxu0 %v1151_v28 }
  0x1e   :  { %1073 = vmatprep.subr.bf16.mxu1 %v1152_v29 }
  0x20   :  { %1010 = vmatpush3.bf16.msra.mxu0 %v1153_v30 }
  0x21   :  { %1074 = vmatpush3.bf16.msra.mxu1 %v1154_v31 }
  0x23   :  { %532 = vmatmul.mubr.bf16.vlgmr.msra.gmra.mxu0 %v1155_v32 }
  0x24   :  { %629 = vmatmul.mubr.bf16.vlgmr.msra.gmra.mxu1 %v1158_v34  ;;  %539 = vmatprep.mubr.bf16.mxu0 %v1161_v36 }
  0x25   :  { %636 = vmatprep.mubr.bf16.mxu1 %v1163_v37 }
  0x2b   :  { %540 = vmatmul.mubr.bf16.gmra.mxu0 %v1165_v38 }
  0x2c   :  { %637 = vmatmul.mubr.bf16.gmra.mxu1 %v1166_v39  ;;  %547 = vmatprep.mubr.bf16.mxu0 %v1167_v40 }
  0x2d   :  { %644 = vmatprep.mubr.bf16.mxu1 %v1169_v41 }
  0x33   :  { %548 = vmatmul.mubr.bf16.gmra.mxu0 %v1171_v42 }
  0x34   :  { %645 = vmatmul.mubr.bf16.gmra.mxu1 %v1172_v43  ;;  %555 = vmatprep.mubr.bf16.mxu0 %v1173_v44 }
  0x35   :  { %652 = vmatprep.mubr.bf16.mxu1 %v1175_v45 }
  0x3b   :  { %556 = vmatmul.mubr.bf16.gmra.mxu0 %v1177_v46 }
  0x3c   :  { %653 = vmatmul.mubr.bf16.gmra.mxu1 %v1178_v47  ;;  %563 = vmatprep.mubr.bf16.mxu0 %v1179_v48 }
  0x3d   :  { %660 = vmatprep.mubr.bf16.mxu1 %v1181_v49 }
  0x43   :  { %564 = vmatmul.mubr.bf16.gmra.mxu0 %v1183_v50 }
  0x44   :  { %661 = vmatmul.mubr.bf16.gmra.mxu1 %v1184_v51  ;;  %571 = vmatprep.mubr.bf16.mxu0 %v1185_v52 }
  0x45   :  { %668 = vmatprep.mubr.bf16.mxu1 %v1187_v53 }
  0x4b   :  { %572 = vmatmul.mubr.bf16.gmra.mxu0 %v1189_v54 }
  0x4c   :  { %669 = vmatmul.mubr.bf16.gmra.mxu1 %v1190_v55  ;;  %579 = vmatprep.mubr.bf16.mxu0 %v1191_v56 }
  0x4d   :  { %676 = vmatprep.mubr.bf16.mxu1 %v1193_v57 }
  0x53   :  { %580 = vmatmul.mubr.bf16.gmra.mxu0 %v1195_v58 }
  0x54   :  { %677 = vmatmul.mubr.bf16.gmra.mxu1 %v1196_v59  ;;  %587 = vmatprep.mubr.bf16.mxu0 %v1197_v60 }
  0x55   :  { %684 = vmatprep.mubr.bf16.mxu1 %v1199_v61 }
  0x5b   :  { %588 = vmatmul.mubr.bf16.gmra.mxu0 %v1201_v62 }
  0x5c   :  { %685 = vmatmul.mubr.bf16.gmra.mxu1 %v1202_v63 }
  0xe3   :  { %v1011_v0 = vpop.f32.mrf.mxu0 }
  0xe4   :  { %v1075_v1 = vpop.f32.mrf.mxu1 }
  0xe5   :  { %v1012_v2 = vpop.f32.mrf.mxu0 }
  0xe6   :  { %v1076_v3 = vpop.f32.mrf.mxu1  ;;  %v1013_v4 = vadd.f32 %v1012_v2, %v1011_v0 }
  0xe7   :  { %v1077_v5 = vadd.f32 %v1076_v3, %v1075_v1  ;;  %v1014_v6 = vpop.f32.mrf.mxu0 }
  0xe8   :  { %v1078_v7 = vpop.f32.mrf.mxu1 }
  0xe9   :  { %v1015_v8 = vpop.f32.mrf.mxu0  ;;  %v631_v11 = vadd.f32 %v1077_v5, %v1013_v4 }
  0xea   :  { %v1016_v9 = vadd.f32 %v1015_v8, %v1014_v6  ;;  %v1079_v10 = vpop.f32.mrf.mxu1 }
  0xeb   :  { %v1080_v12 = vadd.f32 %v1079_v10, %v1078_v7  ;;  %v1017_v13 = vpop.f32.mrf.mxu0  ;;  %v751_v19 = vadd.f32 %v1418_v14, %v631_v11 }
  0xec   :  { %v1081_v15 = vpop.f32.mrf.mxu1 }
  0xed   :  { %v634_v16 = vadd.f32 %v1080_v12, %v1016_v9  ;;  %v1018_v17 = vpop.f32.mrf.mxu0 }
  0xee   :  { %v1082_v18 = vpop.f32.mrf.mxu1  ;;  %v1019_v21 = vadd.f32 %v1018_v17, %v1017_v13 }
  0xef   :  { %v752_v20 = vadd.f32 %v1418_v14, %v634_v16  ;;  %v1083_v22 = vadd.f32 %v1082_v18, %v1081_v15  ;;  %v1020_v23 = vpop.f32.mrf.mxu0 }
  0xf0   :  { %v1084_v24 = vpop.f32.mrf.mxu1 }
  0xf1   :  { %v951_v25 = vpack.c.bf16 %v752_v20, %v751_v19  ;;  %v1021_v26 = vpop.f32.mrf.mxu0  ;;  %v639_v29 = vadd.f32 %v1083_v22, %v1019_v21 }
  0xf2   :  { %v1022_v27 = vadd.f32 %v1021_v26, %v1020_v23  ;;  %v1085_v28 = vpop.f32.mrf.mxu1 }
  0xf3   :  { %952 = vst [vmem:[%s1463_s3] sm:$0xff] %v951_v25   ;;  %v1086_v30 = vadd.f32 %v1085_v28, %v1084_v24  ;;  %v1023_v31 = vpop.f32.mrf.mxu0  ;;  %v753_v36 = vadd.f32 %v1418_v14, %v639_v29 }
  0xf4   :  { %v1087_v32 = vpop.f32.mrf.mxu1 }
  0xf5   :  { %v642_v33 = vadd.f32 %v1086_v30, %v1022_v27  ;;  %v1024_v34 = vpop.f32.mrf.mxu0 }
  0xf6   :  { %v1088_v35 = vpop.f32.mrf.mxu1  ;;  %v1025_v38 = vadd.f32 %v1024_v34, %v1023_v31 }
  0xf7   :  { %v754_v37 = vadd.f32 %v1418_v14, %v642_v33  ;;  %v1089_v39 = vadd.f32 %v1088_v35, %v1087_v32  ;;  %v1026_v40 = vpop.f32.mrf.mxu0 }
  0xf8   :  { %v1090_v41 = vpop.f32.mrf.mxu1 }
  0xf9   :  { %v956_v42 = vpack.c.bf16 %v754_v37, %v753_v36  ;;  %v1027_v43 = vpop.f32.mrf.mxu0  ;;  %v647_v46 = vadd.f32 %v1089_v39, %v1025_v38 }
  0xfa   :  { %v1028_v44 = vadd.f32 %v1027_v43, %v1026_v40  ;;  %v1091_v45 = vpop.f32.mrf.mxu1 }
  0xfb   :  { %988 = vst [vmem:[%s1463_s3 + $0x8] sm:$0xff] %v956_v42   ;;  %v1092_v47 = vadd.f32 %v1091_v45, %v1090_v41  ;;  %v1029_v48 = vpop.f32.mrf.mxu0  ;;  %v755_v53 = vadd.f32 %v1418_v14, %v647_v46 }
  0xfc   :  { %v1093_v49 = vpop.f32.mrf.mxu1 }
  0xfd   :  { %v650_v50 = vadd.f32 %v1092_v47, %v1028_v44  ;;  %v1030_v51 = vpop.f32.mrf.mxu0 }
  0xfe   :  { %v1094_v52 = vpop.f32.mrf.mxu1  ;;  %v1031_v55 = vadd.f32 %v1030_v51, %v1029_v48 }
  0xff   :  { %v756_v54 = vadd.f32 %v1418_v14, %v650_v50  ;;  %v1095_v56 = vadd.f32 %v1094_v52, %v1093_v49  ;;  %v1032_v57 = vpop.f32.mrf.mxu0 }
 0x100   :  { %v1096_v58 = vpop.f32.mrf.mxu1 }
 0x101   :  { %v961_v59 = vpack.c.bf16 %v756_v54, %v755_v53  ;;  %v1033_v60 = vpop.f32.mrf.mxu0  ;;  %v655_v63 = vadd.f32 %v1095_v56, %v1031_v55 }
 0x102   :  { %v1034_v61 = vadd.f32 %v1033_v60, %v1032_v57  ;;  %v1097_v62 = vpop.f32.mrf.mxu1 }
 0x103   :  { %989 = vst [vmem:[%s1463_s3 + $0x10] sm:$0xff] %v961_v59   ;;  %v1098_v0 = vadd.f32 %v1097_v62, %v1096_v58  ;;  %v1035_v1 = vpop.f32.mrf.mxu0  ;;  %v757_v6 = vadd.f32 %v1418_v14, %v655_v63 }
 0x104   :  { %v1099_v2 = vpop.f32.mrf.mxu1 }
 0x105   :  { %v658_v3 = vadd.f32 %v1098_v0, %v1034_v61  ;;  %v1036_v4 = vpop.f32.mrf.mxu0 }
 0x106   :  { %v1100_v5 = vpop.f32.mrf.mxu1  ;;  %v1037_v8 = vadd.f32 %v1036_v4, %v1035_v1 }
 0x107   :  { %v758_v7 = vadd.f32 %v1418_v14, %v658_v3  ;;  %v1101_v9 = vadd.f32 %v1100_v5, %v1099_v2  ;;  %v1038_v10 = vpop.f32.mrf.mxu0 }
 0x108   :  { %v1102_v11 = vpop.f32.mrf.mxu1 }
 0x109   :  { %v966_v12 = vpack.c.bf16 %v758_v7, %v757_v6  ;;  %v1039_v13 = vpop.f32.mrf.mxu0  ;;  %v663_v17 = vadd.f32 %v1101_v9, %v1037_v8 }
 0x10a   :  { %v1040_v15 = vadd.f32 %v1039_v13, %v1038_v10  ;;  %v1103_v16 = vpop.f32.mrf.mxu1 }
 0x10b   :  { %990 = vst [vmem:[%s1463_s3 + $0x18] sm:$0xff] %v966_v12   ;;  %v1104_v18 = vadd.f32 %v1103_v16, %v1102_v11  ;;  %v1041_v19 = vpop.f32.mrf.mxu0  ;;  %v759_v24 = vadd.f32 %v1418_v14, %v663_v17 }
 0x10c   :  { %v1105_v20 = vpop.f32.mrf.mxu1 }
 0x10d   :  { %v666_v21 = vadd.f32 %v1104_v18, %v1040_v15  ;;  %v1042_v22 = vpop.f32.mrf.mxu0 }
 0x10e   :  { %v1106_v23 = vpop.f32.mrf.mxu1  ;;  %v1043_v26 = vadd.f32 %v1042_v22, %v1041_v19 }
 0x10f   :  { %v760_v25 = vadd.f32 %v1418_v14, %v666_v21  ;;  %v1107_v27 = vadd.f32 %v1106_v23, %v1105_v20  ;;  %v1044_v28 = vpop.f32.mrf.mxu0 }
 0x110   :  { %v1108_v29 = vpop.f32.mrf.mxu1 }
 0x111   :  { %v971_v30 = vpack.c.bf16 %v760_v25, %v759_v24  ;;  %v1045_v31 = vpop.f32.mrf.mxu0  ;;  %v671_v34 = vadd.f32 %v1107_v27, %v1043_v26 }
 0x112   :  { %v1046_v32 = vadd.f32 %v1045_v31, %v1044_v28  ;;  %v1109_v33 = vpop.f32.mrf.mxu1 }
 0x113   :  { %991 = vst [vmem:[%s1463_s3 + $0x20] sm:$0xff] %v971_v30   ;;  %v1110_v35 = vadd.f32 %v1109_v33, %v1108_v29  ;;  %v1047_v36 = vpop.f32.mrf.mxu0  ;;  %v761_v41 = vadd.f32 %v1418_v14, %v671_v34 }
 0x114   :  { %v1111_v37 = vpop.f32.mrf.mxu1 }
 0x115   :  { %v674_v38 = vadd.f32 %v1110_v35, %v1046_v32  ;;  %v1048_v39 = vpop.f32.mrf.mxu0 }
 0x116   :  { %v1112_v40 = vpop.f32.mrf.mxu1  ;;  %v1049_v43 = vadd.f32 %v1048_v39, %v1047_v36 }
 0x117   :  { %v762_v42 = vadd.f32 %v1418_v14, %v674_v38  ;;  %v1113_v44 = vadd.f32 %v1112_v40, %v1111_v37  ;;  %v1050_v45 = vpop.f32.mrf.mxu0 }
 0x118   :  { %v1114_v46 = vpop.f32.mrf.mxu1 }
 0x119   :  { %v976_v47 = vpack.c.bf16 %v762_v42, %v761_v41  ;;  %v1051_v48 = vpop.f32.mrf.mxu0  ;;  %v679_v51 = vadd.f32 %v1113_v44, %v1049_v43 }
 0x11a   :  { %v1052_v49 = vadd.f32 %v1051_v48, %v1050_v45  ;;  %v1115_v50 = vpop.f32.mrf.mxu1 }
 0x11b   :  { %992 = vst [vmem:[%s1463_s3 + $0x28] sm:$0xff] %v976_v47   ;;  %v1116_v52 = vadd.f32 %v1115_v50, %v1114_v46  ;;  %v1053_v53 = vpop.f32.mrf.mxu0  ;;  %v763_v58 = vadd.f32 %v1418_v14, %v679_v51 }
 0x11c   :  { %v1117_v54 = vpop.f32.mrf.mxu1 }
 0x11d   :  { %v682_v55 = vadd.f32 %v1116_v52, %v1052_v49  ;;  %v1054_v56 = vpop.f32.mrf.mxu0 }
 0x11e   :  { %v1118_v57 = vpop.f32.mrf.mxu1  ;;  %v1055_v60 = vadd.f32 %v1054_v56, %v1053_v53 }
 0x11f   :  { %v764_v59 = vadd.f32 %v1418_v14, %v682_v55  ;;  %v1119_v61 = vadd.f32 %v1118_v57, %v1117_v54  ;;  %v1056_v62 = vpop.f32.mrf.mxu0 }
 0x120   :  { %v1120_v63 = vpop.f32.mrf.mxu1 }
 0x121   :  { %v981_v0 = vpack.c.bf16 %v764_v59, %v763_v58  ;;  %v1057_v1 = vpop.f32.mrf.mxu0  ;;  %v687_v4 = vadd.f32 %v1119_v61, %v1055_v60 }
 0x122   :  { %v1058_v2 = vadd.f32 %v1057_v1, %v1056_v62  ;;  %v1121_v3 = vpop.f32.mrf.mxu1 }
 0x123   :  { %993 = vst [vmem:[%s1463_s3 + $0x30] sm:$0xff] %v981_v0   ;;  %v1122_v5 = vadd.f32 %v1121_v3, %v1120_v63  ;;  %v765_v7 = vadd.f32 %v1418_v14, %v687_v4 }
 0x125   :  { %v690_v6 = vadd.f32 %v1122_v5, %v1058_v2 }
 0x127   :  { %v766_v8 = vadd.f32 %v1418_v14, %v690_v6 }
 0x129   :  { %v986_v9 = vpack.c.bf16 %v766_v8, %v765_v7 }
 0x12b   :  { %994 = vst [vmem:[%s1463_s3 + $0x38] sm:$0xff] %v986_v9  }

// kernel: seg_tran_forward.53
= control target key start
LH: loop header
LB: loop body
LE: loop exit
PB: predicated region body
PF: predicated region fallthrough
CT: control target
= control target key end

     0   :  { %s586_s1 = inlined_call_operand.vmem [shape: bf16[128,128], index: 1, kind: input, shape index: {}]   ;;  %s587_s0 = inlined_call_operand.vmem [shape: bf16[128,128], index: 0, kind: input, shape index: {}]   ;;  %s588_s2 = inlined_call_operand.vmem [shape: f32[1,128], index: 2, kind: input, shape index: {}]   ;;  %s589_s3 = inlined_call_operand.vmem [shape: f32[128,128], index: 3, kind: output, shape index: {}]  }
   0x1   :  { %v451_v0 = vld [vmem:[%s586_s1 + $0x38] sm:$0xff]   ;;  %v452_v1 = vld [vmem:[%s586_s1 + $0x30] sm:$0xff]   ;;  %v453_v2 = vld [vmem:[%s586_s1 + $0x28] sm:$0xff]  }
   0x2   :  { %403 = vmatprep.subr.bf16.mxu0 %v451_v0  ;;  %435 = vmatprep.subr.bf16.mxu1 %v451_v0  ;;  %v454_v3 = vld [vmem:[%s586_s1 + $0x20] sm:$0xff]   ;;  %v455_v6 = vld [vmem:[%s586_s1 + $0x18] sm:$0xff]   ;;  %v456_v7 = vld [vmem:[%s586_s1 + $0x10] sm:$0xff]  }
   0x3   :  { %404 = vmatpush3.bf16.msra.mxu0 %v451_v0  ;;  %443 = vmatpush3.bf16.msra.mxu1 %v451_v0  ;;  %v459_v4 = vld [vmem:[%s587_s0] sm:$0xff]   ;;  %v457_v8 = vld [vmem:[%s586_s1 + $0x8] sm:$0xff]   ;;  %v463_v12 = vld [vmem:[%s587_s0 + $0x10] sm:$0xff]  }
   0x4   :  { %405 = vmatprep.subr.bf16.mxu0 %v452_v1  ;;  %436 = vmatprep.subr.bf16.mxu1 %v452_v1  ;;  %v460_v5 = vld [vmem:[%s587_s0 + $0x20] sm:$0xff]   ;;  %v461_v10 = vld [vmem:[%s587_s0 + $0x8] sm:$0xff]   ;;  %v464_v13 = vld [vmem:[%s587_s0 + $0x30] sm:$0xff]  }
   0x5   :  { %419 = vmatprep.mubr.bf16.mxu0 %v459_v4  ;;  %427 = vmatprep.mubr.bf16.mxu1 %v460_v5  ;;  %v458_v9 = vld [vmem:[%s586_s1] sm:$0xff]   ;;  %v462_v11 = vld [vmem:[%s587_s0 + $0x28] sm:$0xff]   ;;  %v465_v14 = vld [vmem:[%s587_s0 + $0x18] sm:$0xff]  }
   0x6   :  { %v466_v15 = vld [vmem:[%s587_s0 + $0x38] sm:$0xff]   ;;  %v386_v16 = vld [vmem:[%s588_s2] ss:$0 sm:$0xff] }
   0x7   :  { %406 = vmatpush3.bf16.msra.mxu0 %v452_v1  ;;  %444 = vmatpush3.bf16.msra.mxu1 %v452_v1 }
   0x8   :  { %407 = vmatprep.subr.bf16.mxu0 %v453_v2  ;;  %437 = vmatprep.subr.bf16.mxu1 %v453_v2 }
   0xb   :  { %408 = vmatpush3.bf16.msra.mxu0 %v453_v2  ;;  %445 = vmatpush3.bf16.msra.mxu1 %v453_v2 }
   0xc   :  { %409 = vmatprep.subr.bf16.mxu0 %v454_v3  ;;  %438 = vmatprep.subr.bf16.mxu1 %v454_v3 }
   0xf   :  { %410 = vmatpush3.bf16.msra.mxu0 %v454_v3  ;;  %446 = vmatpush3.bf16.msra.mxu1 %v454_v3 }
  0x10   :  { %411 = vmatprep.subr.bf16.mxu0 %v455_v6  ;;  %439 = vmatprep.subr.bf16.mxu1 %v455_v6 }
  0x13   :  { %412 = vmatpush3.bf16.msra.mxu0 %v455_v6  ;;  %447 = vmatpush3.bf16.msra.mxu1 %v455_v6 }
  0x14   :  { %413 = vmatprep.subr.bf16.mxu0 %v456_v7  ;;  %440 = vmatprep.subr.bf16.mxu1 %v456_v7 }
  0x17   :  { %414 = vmatpush3.bf16.msra.mxu0 %v456_v7  ;;  %448 = vmatpush3.bf16.msra.mxu1 %v456_v7 }
  0x18   :  { %415 = vmatprep.subr.bf16.mxu0 %v457_v8  ;;  %441 = vmatprep.subr.bf16.mxu1 %v457_v8 }
  0x1b   :  { %416 = vmatpush3.bf16.msra.mxu0 %v457_v8  ;;  %449 = vmatpush3.bf16.msra.mxu1 %v457_v8 }
  0x1c   :  { %417 = vmatprep.subr.bf16.mxu0 %v458_v9  ;;  %442 = vmatprep.subr.bf16.mxu1 %v458_v9 }
  0x1f   :  { %418 = vmatpush3.bf16.msra.mxu0 %v458_v9  ;;  %450 = vmatpush3.bf16.msra.mxu1 %v458_v9 }
  0x22   :  { %420 = vmatmul.mubr.bf16.vlgmr.msra.gmra.mxu0 %v461_v10  ;;  %428 = vmatmul.mubr.bf16.vlgmr.msra.gmra.mxu1 %v462_v11 }
  0x23   :  { %423 = vmatprep.mubr.bf16.mxu0 %v463_v12  ;;  %431 = vmatprep.mubr.bf16.mxu1 %v464_v13 }
  0x2a   :  { %424 = vmatmul.mubr.bf16.gmra.mxu0 %v465_v14  ;;  %432 = vmatmul.mubr.bf16.gmra.mxu1 %v466_v15 }
  0xe2   :  { %v421_v17 = vpop.f32.mrf.mxu0  ;;  %v429_v18 = vpop.f32.mrf.mxu1 }
  0xe3   :  { %v336_v19 = vadd.f32 %v421_v17, %v386_v16  ;;  %v344_v20 = vadd.f32 %v429_v18, %v386_v16 }
  0xe4   :  { %v213_v21 = vpop.f32.mrf.mxu0  ;;  %v245_v22 = vpop.f32.mrf.mxu1 }
  0xe5   :  { %352 = vst [vmem:[%s589_s3 + $0x10] sm:$0xff] %v336_v19  ;;  %360 = vst [vmem:[%s589_s3 + $0x50] sm:$0xff] %v344_v20  ;;  %v334_v23 = vadd.f32 %v386_v16, %v213_v21  ;;  %v342_v24 = vadd.f32 %v386_v16, %v245_v22 }
  0xe6   :  { %v422_v25 = vpop.f32.mrf.mxu0  ;;  %v430_v26 = vpop.f32.mrf.mxu1 }
  0xe7   :  { %350 = vst [vmem:[%s589_s3] sm:$0xff] %v334_v23  ;;  %358 = vst [vmem:[%s589_s3 + $0x40] sm:$0xff] %v342_v24  ;;  %v337_v27 = vadd.f32 %v422_v25, %v386_v16  ;;  %v345_v28 = vadd.f32 %v430_v26, %v386_v16 }
  0xe8   :  { %v216_v29 = vpop.f32.mrf.mxu0  ;;  %v248_v30 = vpop.f32.mrf.mxu1 }
  0xe9   :  { %353 = vst [vmem:[%s589_s3 + $0x18] sm:$0xff] %v337_v27  ;;  %361 = vst [vmem:[%s589_s3 + $0x58] sm:$0xff] %v345_v28  ;;  %v335_v31 = vadd.f32 %v386_v16, %v216_v29  ;;  %v343_v32 = vadd.f32 %v386_v16, %v248_v30 }
  0xea   :  { %v425_v33 = vpop.f32.mrf.mxu0  ;;  %v433_v34 = vpop.f32.mrf.mxu1 }
  0xeb   :  { %351 = vst [vmem:[%s589_s3 + $0x8] sm:$0xff] %v335_v31  ;;  %359 = vst [vmem:[%s589_s3 + $0x48] sm:$0xff] %v343_v32  ;;  %v340_v35 = vadd.f32 %v425_v33, %v386_v16  ;;  %v348_v36 = vadd.f32 %v433_v34, %v386_v16 }
  0xec   :  { %v229_v37 = vpop.f32.mrf.mxu0  ;;  %v261_v38 = vpop.f32.mrf.mxu1 }
  0xed   :  { %356 = vst [vmem:[%s589_s3 + $0x30] sm:$0xff] %v340_v35  ;;  %364 = vst [vmem:[%s589_s3 + $0x70] sm:$0xff] %v348_v36  ;;  %v338_v39 = vadd.f32 %v386_v16, %v229_v37  ;;  %v346_v40 = vadd.f32 %v386_v16, %v261_v38 }
  0xee   :  { %v426_v41 = vpop.f32.mrf.mxu0  ;;  %v434_v42 = vpop.f32.mrf.mxu1 }
  0xef   :  { %354 = vst [vmem:[%s589_s3 + $0x20] sm:$0xff] %v338_v39  ;;  %362 = vst [vmem:[%s589_s3 + $0x60] sm:$0xff] %v346_v40  ;;  %v341_v43 = vadd.f32 %v426_v41, %v386_v16  ;;  %v349_v44 = vadd.f32 %v434_v42, %v386_v16 }
  0xf0   :  { %v232_v45 = vpop.f32.mrf.mxu0  ;;  %v264_v46 = vpop.f32.mrf.mxu1 }
  0xf1   :  { %357 = vst [vmem:[%s589_s3 + $0x38] sm:$0xff] %v341_v43  ;;  %365 = vst [vmem:[%s589_s3 + $0x78] sm:$0xff] %v349_v44  ;;  %v339_v47 = vadd.f32 %v386_v16, %v232_v45  ;;  %v347_v48 = vadd.f32 %v386_v16, %v264_v46 }
  0xf3   :  { %355 = vst [vmem:[%s589_s3 + $0x28] sm:$0xff] %v339_v47  ;;  %363 = vst [vmem:[%s589_s3 + $0x68] sm:$0xff] %v347_v48 }

</bundles_post_ra>
